<compile_context>
chip_gen: v5e
topology: v5e:2x2
jax: 0.10.0
libtpu: 0.0.40
codegen_flags: <defaults>
</compile_context>

<pallas_src>
import functools

import jax
import jax.numpy as jnp
from jax import lax
from jax.experimental import pallas as pl
from jax.experimental.pallas import tpu as pltpu


def _round_up(a, m):
    return ((a + m - 1) // m) * m


def _largest_divisor_leq(n, cap):
    cap = max(1, min(n, cap))
    for d in range(cap, 0, -1):
        if n % d == 0:
            return d
    return 1


# ----------------------------------------------------------------------------
# Fused ResidualGroup kernel: one grid step = one RCAB of one image.
# ----------------------------------------------------------------------------
def _residual_group_kernel(
    x_ref,       # (1, H*W, C)   group input (resident across the block axis)
    w1_ref,      # (1, 9*C, C)   current block conv1 weights (im2col layout)
    b1_ref,      # (1, 1, C)
    w2_ref,      # (1, 9*C, C)   current block conv2 weights
    b2_ref,      # (1, 1, C)
    caw1_ref,    # (1, C, Cm)    channel-attention squeeze
    cab1_ref,    # (1, 1, Cm)
    caw2_ref,    # (1, Cm, C)    channel-attention excite
    cab2_ref,    # (1, 1, C)
    wf_ref,      # (9*C, C)      group tail conv (resident)
    bf_ref,      # (1, C)
    out_ref,     # (1, H*W, C)
    qa_ref,      # VMEM (NQ + 2*margin, C) storage : running activation y
    qb_ref,      # VMEM (NQ + 2*margin, C) storage : conv1 output
    t_ref,       # VMEM (NQ, C)            storage : conv2 output
    *, H, W, C, Wp, margin, hs, n_strips, num_block,
    res_scale, storage_dtype, mxu_dtype,
):
    blk = pl.program_id(1)
    NQ = H * Wp                  # extended (halo-column-padded) activation rows
    strip_rows = hs * Wp         # rows per strip in extended layout (mult of 8)
    sW = hs * W                  # rows per strip in the (H*W, C) HBM layout
    inv_hw = 1.0 / float(H * W)
    unroll = bool(n_strips <= 4)

    x_img = x_ref.at[0]          # (H*W, C) view
    out_img = out_ref.at[0]      # (H*W, C) view

    def a8(v):                   # traced offsets statically known to be 8-aligned
        return pl.multiple_of(v, 8)

    def axw(v):                  # HBM-layout strip offsets (aligned iff sW % 8 == 0)
        return pl.multiple_of(v, 8) if sW % 8 == 0 else v

    # Halo mask for one strip.  Strips are whole image rows, so the pattern
    # repeats: columns 0 and W+1..Wp-1 of every Wp-pitched row are padding.
    col = lax.broadcasted_iota(jnp.int32, (hs, Wp, C), 1)
    mask = jnp.where((col >= 1) & (col <= W), 1.0, 0.0).reshape(strip_rows, C)

    # ---------------- blk == 0 : stage x into the extended activation ---------
    @pl.when(blk == 0)
    def _init():
        zeros_m = jnp.zeros((margin, C), storage_dtype)
        qa_ref[pl.ds(0, margin), :] = zeros_m
        qa_ref[pl.ds(margin + NQ, margin), :] = zeros_m
        qb_ref[pl.ds(0, margin), :] = zeros_m
        qb_ref[pl.ds(margin + NQ, margin), :] = zeros_m

        def body(si, carry):
            xs = x_img[pl.ds(axw(si * sW), sW), :].astype(storage_dtype)
            xs3 = xs.reshape(hs, W, C)
            zl = jnp.zeros((hs, 1, C), storage_dtype)
            zr = jnp.zeros((hs, Wp - W - 1, C), storage_dtype)
            ext = jnp.concatenate([zl, xs3, zr], axis=1).reshape(strip_rows, C)
            qa_ref[pl.ds(a8(margin + si * strip_rows), strip_rows), :] = ext
            return carry

        lax.fori_loop(0, n_strips, body, 0, unroll=unroll)

    # ---------------- one RCAB per grid step -----------------------------------
    w1 = w1_ref[0]
    b1 = b1_ref[0]
    w2 = w2_ref[0]
    b2 = b2_ref[0]

    def conv_strip(src_ref, si, w_mat, b_row):
        """3x3 SAME conv of one row strip: single 9*C-deep im2col matmul."""
        base = si * strip_rows
        taps = []
        for kh in (-1, 0, 1):
            for kw in (-1, 0, 1):
                off = base + margin + kh * Wp + kw
                if kw == 0:                       # margin, Wp are multiples of 8
                    off = a8(off)
                taps.append(src_ref[pl.ds(off, strip_rows), :])
        patches = jnp.concatenate(taps, axis=1)                     # (strip, 9*C)
        acc = jnp.dot(patches.astype(mxu_dtype), w_mat,
                      preferred_element_type=jnp.float32)
        return acc + b_row                                          # f32 (strip, C)

    # conv1 + ReLU : qa -> qb (strip-tiled)
    def c1_body(si, carry):
        acc = jnp.maximum(conv_strip(qa_ref, si, w1, b1), 0.0) * mask
        qb_ref[pl.ds(a8(margin + si * strip_rows), strip_rows), :] = (
            acc.astype(storage_dtype))
        return carry

    lax.fori_loop(0, n_strips, c1_body, 0, unroll=unroll)

    # conv2 : qb -> t, with the spatial-mean accumulation fused into the epilogue
    def c2_body(si, pooled):
        acc = conv_strip(qb_ref, si, w2, b2) * mask
        t_ref[pl.ds(a8(si * strip_rows), strip_rows), :] = acc.astype(storage_dtype)
        return pooled + jnp.sum(acc, axis=0, keepdims=True)

    pooled = lax.fori_loop(0, n_strips, c2_body,
                           jnp.zeros((1, C), jnp.float32), unroll=unroll) * inv_hw

    # Channel attention (tiny squeeze/excite, f32)
    z = jnp.maximum(
        jnp.dot(pooled, caw1_ref[0], preferred_element_type=jnp.float32)
        + cab1_ref[0], 0.0)                                          # (1, Cm)
    s_vec = jax.nn.sigmoid(
        jnp.dot(z, caw2_ref[0], preferred_element_type=jnp.float32)
        + cab2_ref[0])                                               # (1, C)

    # Residual update  y <- y + res_scale * (t * s)   (qa updated in place)
    def comb_body(si, carry):
        dst = a8(margin + si * strip_rows)
        y = qa_ref[pl.ds(dst, strip_rows), :].astype(jnp.float32)
        t = t_ref[pl.ds(a8(si * strip_rows), strip_rows), :].astype(jnp.float32)
        qa_ref[pl.ds(dst, strip_rows), :] = (
            y + res_scale * (t * s_vec)).astype(storage_dtype)
        return carry

    lax.fori_loop(0, n_strips, comb_body, 0, unroll=unroll)

    # ---------------- blk == last : group tail conv + group skip ---------------
    @pl.when(blk == num_block - 1)
    def _tail():
        wf = wf_ref[...]
        bf = bf_ref[...]

        def body(si, carry):
            acc = conv_strip(qa_ref, si, wf, bf)                    # (strip, C) f32
            interior = acc.reshape(hs, Wp, C)[:, 1:W + 1, :].reshape(sW, C)
            xs = x_img[pl.ds(axw(si * sW), sW), :].astype(jnp.float32)
            out_img[pl.ds(axw(si * sW), sW), :] = (interior + xs).astype(out_ref.dtype)
            return carry

        lax.fori_loop(0, n_strips, body, 0, unroll=unroll)


# ----------------------------------------------------------------------------
# Wrapper
# ----------------------------------------------------------------------------
def residual_group_forward(x, params, res_scale=1.0,
                           storage_dtype=jnp.float32, mxu_dtype=jnp.float32):
    """x: (N, H, W, C) float32, NHWC layout."""
    N, H, W, C = x.shape
    blocks = params["blocks"]
    num_block = len(blocks)
    assert num_block >= 1
    Cm = blocks[0]["ca_w1"].shape[1]

    # Extended-row geometry: halo columns at j=0 and j>=W+1; row pitch Wp and the
    # top/bottom margin are rounded to sublane multiples (8) for aligned slices.
    Wp = _round_up(W + 2, 8)
    margin = _round_up(Wp + 1, 8)
    NQ = H * Wp

    # Row-strip tiling for the im2col matmuls: hs whole image rows per strip so
    # the halo-mask pattern repeats and strips never straddle an image row.
    hs = _largest_divisor_leq(H, max(1, 1024 // Wp))
    strip_rows = hs * Wp
    n_strips = H // hs

    # Per-block parameters stacked on a leading axis that becomes the block grid
    # axis (double-buffered per-block weight streaming).  3x3 weights go to the
    # im2col layout (9*C, C), row index = tap*C + cin; conv weights are pre-cast
    # to the MXU dtype here so no casts happen in the kernel.
    W1 = jnp.stack([b["w1"].reshape(9 * C, C) for b in blocks]).astype(mxu_dtype)
    B1 = jnp.stack([b["b1"] for b in blocks]).astype(jnp.float32)
    W2 = jnp.stack([b["w2"].reshape(9 * C, C) for b in blocks]).astype(mxu_dtype)
    B2 = jnp.stack([b["b2"] for b in blocks]).astype(jnp.float32)
    CW1 = jnp.stack([b["ca_w1"] for b in blocks]).astype(jnp.float32)
    CB1 = jnp.stack([b["ca_b1"] for b in blocks]).astype(jnp.float32)
    CW2 = jnp.stack([b["ca_w2"] for b in blocks]).astype(jnp.float32)
    CB2 = jnp.stack([b["ca_b2"] for b in blocks]).astype(jnp.float32)
    WF = params["wf"].reshape(9 * C, C).astype(mxu_dtype)
    BF = params["bf"].astype(jnp.float32)

    x_flat = x.reshape(N, H * W, C)

    kern = functools.partial(
        _residual_group_kernel, H=H, W=W, C=C, Wp=Wp, margin=margin, hs=hs,
        n_strips=n_strips, num_block=num_block, res_scale=float(res_scale),
        storage_dtype=storage_dtype, mxu_dtype=mxu_dtype)

    # VMEM budget derived from buffer sizes, clamped per TPU generation.
    bs = jnp.dtype(storage_dtype).itemsize
    bm = jnp.dtype(mxu_dtype).itemsize
    bx = jnp.dtype(x.dtype).itemsize
    scratch_bytes = (2 * (NQ + 2 * margin) + NQ) * C * bs
    io_bytes = 2 * 2 * H * W * C * bx                       # x + out blocks, 2-buffered
    per_block_w = 2 * 9 * C * C * bm + 2 * C * 4 + 2 * C * Cm * 4 + (C + Cm) * 4
    weight_bytes = 2 * per_block_w + 9 * C * C * bm + C * 4
    temp_bytes = 4 * strip_rows * 9 * C * max(bs, 4)        # im2col strip + slack
    need = scratch_bytes + io_bytes + weight_bytes + temp_bytes + (2 << 20)
    try:
        phys_vmem = pltpu.get_tpu_info().vmem_capacity_bytes
    except Exception:
        phys_vmem = 64 * 1024 * 1024
    cap = min(100 * 1024 * 1024, (phys_vmem * 3) // 4)
    vmem_limit = int(min(cap, max(32 * 1024 * 1024, 2 * need)))

    out_flat = pl.pallas_call(
        kern,
        out_shape=jax.ShapeDtypeStruct((N, H * W, C), x.dtype),
        grid=(N, num_block),
        in_specs=[
            pl.BlockSpec((1, H * W, C), lambda n, b: (n, 0, 0)),     # x (per image)
            pl.BlockSpec((1, 9 * C, C), lambda n, b: (b, 0, 0)),     # conv1 W (per block)
            pl.BlockSpec((1, 1, C), lambda n, b: (b, 0, 0)),         # conv1 b
            pl.BlockSpec((1, 9 * C, C), lambda n, b: (b, 0, 0)),     # conv2 W
            pl.BlockSpec((1, 1, C), lambda n, b: (b, 0, 0)),         # conv2 b
            pl.BlockSpec((1, C, Cm), lambda n, b: (b, 0, 0)),        # CA squeeze W
            pl.BlockSpec((1, 1, Cm), lambda n, b: (b, 0, 0)),        # CA squeeze b
            pl.BlockSpec((1, Cm, C), lambda n, b: (b, 0, 0)),        # CA excite W
            pl.BlockSpec((1, 1, C), lambda n, b: (b, 0, 0)),         # CA excite b
            pl.BlockSpec((9 * C, C), lambda n, b: (0, 0)),           # tail conv W
            pl.BlockSpec((1, C), lambda n, b: (0, 0)),               # tail conv b
        ],
        out_specs=pl.BlockSpec((1, H * W, C), lambda n, b: (n, 0, 0)),
        scratch_shapes=[
            pltpu.VMEM((NQ + 2 * margin, C), storage_dtype),   # running activation
            pltpu.VMEM((NQ + 2 * margin, C), storage_dtype),   # conv1 output
            pltpu.VMEM((NQ, C), storage_dtype),                # conv2 output
        ],
        compiler_params=pltpu.CompilerParams(
            dimension_semantics=("parallel", "arbitrary"),
            vmem_limit_bytes=vmem_limit,
        ),
    )(x_flat, W1, B1, W2, B2, CW1, CB1, CW2, CB2, WF, BF)

    return out_flat.reshape(N, H, W, C)


# ----------------------------------------------------------------------------
# Parameter construction
# ----------------------------------------------------------------------------
def init_residual_group_params(key, num_feat, num_block, squeeze_factor=16):
    cm = max(num_feat // squeeze_factor, 1)
    params = {"blocks": []}
    keys = jax.random.split(key, num_block * 8 + 2)
    k = 0

    def nrm(key_, shape, scale=0.1):
        return (scale * jax.random.normal(key_, shape)).astype(jnp.float32)

    for _ in range(num_block):
        blk = {
            "w1": nrm(keys[k + 0], (9, num_feat, num_feat)),
            "b1": nrm(keys[k + 1], (1, num_feat)),
            "w2": nrm(keys[k + 2], (9, num_feat, num_feat)),
            "b2": nrm(keys[k + 3], (1, num_feat)),
            "ca_w1": nrm(keys[k + 4], (num_feat, cm)),
            "ca_b1": nrm(keys[k + 5], (1, cm)),
            "ca_w2": nrm(keys[k + 6], (cm, num_feat)),
            "ca_b2": nrm(keys[k + 7], (1, num_feat)),
        }
        params["blocks"].append(blk)
        k += 8
    params["wf"] = nrm(keys[k + 0], (9, num_feat, num_feat))
    params["bf"] = nrm(keys[k + 1], (1, num_feat))
    return params


# ----------------------------------------------------------------------------
# Pure-JAX reference (numerical check)
# ----------------------------------------------------------------------------
def _ref_conv3x3(x, w, b, relu=False):
    w4 = w.reshape(3, 3, w.shape[1], w.shape[2])  # HWIO
    y = jax.lax.conv_general_dilated(
        x, w4, window_strides=(1, 1), padding="SAME",
        dimension_numbers=("NHWC", "HWIO", "NHWC"),
    ) + b.reshape(1, 1, 1, -1)
    return jnp.maximum(y, 0.0) if relu else y


def _ref_forward(x, params, res_scale=1.0):
    y = x
    for blk in params["blocks"]:
        t = _ref_conv3x3(y, blk["w1"], blk["b1"], relu=True)
        t = _ref_conv3x3(t, blk["w2"], blk["b2"], relu=False)
        pooled = jnp.mean(t, axis=(1, 2), keepdims=False)             # (N, C)
        z = jnp.maximum(pooled @ blk["ca_w1"] + blk["ca_b1"], 0.0)    # (N, Cm)
        s = jax.nn.sigmoid(z @ blk["ca_w2"] + blk["ca_b2"])           # (N, C)
        y = y + res_scale * (t * s[:, None, None, :])
    return _ref_conv3x3(y, params["wf"], params["bf"]) + x


# ----------------------------------------------------------------------------
if __name__ == "__main__":
    N, C, H, W = 2, 32, 16, 16     # num_feat=32 so num_feat // squeeze_factor >= 1
    num_block = 2
    squeeze_factor = 16
    res_scale = 1.0

    root = jax.random.PRNGKey(0)
    kx, kp = jax.random.split(root)
    x = jax.random.normal(kx, (N, H, W, C), dtype=jnp.float32)
    params = init_residual_group_params(kp, C, num_block, squeeze_factor)

    ref = jax.block_until_ready(_ref_forward(x, params, res_scale))

    # f32 storage + f32 MXU: strict check against the XLA reference.
    out = jax.block_until_ready(residual_group_forward(x, params, res_scale))
    assert out.shape == (N, H, W, C)
    err = float(jnp.max(jnp.abs(out - ref)))
    assert err < 5e-4, f"f32 Pallas output mismatch vs reference (max abs err {err})"

    # v6e/v7x fast path: bf16 activation storage + bf16 MXU, f32 accumulation.
    out_bf = jax.block_until_ready(residual_group_forward(
        x, params, res_scale, storage_dtype=jnp.bfloat16, mxu_dtype=jnp.bfloat16))
    rel = float(jnp.max(jnp.abs(out_bf - ref)) / (jnp.max(jnp.abs(ref)) + 1e-6))
    assert rel < 5e-2, f"bf16 Pallas output mismatch vs reference (rel err {rel})"

    # v5e path: f32 storage / elementwise (no bf16 VPU there), bf16 MXU operands.
    out_v5 = jax.block_until_ready(residual_group_forward(
        x, params, res_scale, storage_dtype=jnp.float32, mxu_dtype=jnp.bfloat16))
    rel5 = float(jnp.max(jnp.abs(out_v5 - ref)) / (jnp.max(jnp.abs(ref)) + 1e-6))
    assert rel5 < 5e-2, f"f32/bf16 Pallas output mismatch vs reference (rel err {rel5})"

    print("KERNEL_OK")
</pallas_src>

<mosaic_0001>
module attributes {stable_mosaic.version = 11 : i64} {
  func.func @_residual_group_kernel(%arg0: i32, %arg1: i32, %arg2: memref<1x256x32xf32, #tpu.memory_space<vmem>>, %arg3: memref<1x288x32xf32, #tpu.memory_space<vmem>>, %arg4: memref<1x1x32xf32, #tpu.memory_space<vmem>>, %arg5: memref<1x288x32xf32, #tpu.memory_space<vmem>>, %arg6: memref<1x1x32xf32, #tpu.memory_space<vmem>>, %arg7: memref<1x32x2xf32, #tpu.memory_space<vmem>>, %arg8: memref<1x1x2xf32, #tpu.memory_space<vmem>>, %arg9: memref<1x2x32xf32, #tpu.memory_space<vmem>>, %arg10: memref<1x1x32xf32, #tpu.memory_space<vmem>>, %arg11: memref<288x32xf32, #tpu.memory_space<vmem>>, %arg12: memref<1x32xf32, #tpu.memory_space<vmem>>, %arg13: memref<1x256x32xf32, #tpu.memory_space<vmem>>, %arg14: memref<448x32xf32, #tpu.memory_space<vmem>>, %arg15: memref<448x32xf32, #tpu.memory_space<vmem>>, %arg16: memref<384x32xf32, #tpu.memory_space<vmem>>) attributes {dimension_semantics = [#tpu.dimension_semantics<parallel>, #tpu.dimension_semantics<arbitrary>], iteration_bounds = array<i64: 2, 2>, scalar_prefetch = 0 : i64, scratch_operands = 3 : i64, tpu.core_type = #tpu.core_type<tc>, window_params = [{transform_indices = @transform_0, window_bounds = array<i64: 1, 256, 32>}, {transform_indices = @transform_1, window_bounds = array<i64: 1, 288, 32>}, {transform_indices = @transform_2, window_bounds = array<i64: 1, 1, 32>}, {transform_indices = @transform_3, window_bounds = array<i64: 1, 288, 32>}, {transform_indices = @transform_4, window_bounds = array<i64: 1, 1, 32>}, {transform_indices = @transform_5, window_bounds = array<i64: 1, 32, 2>}, {transform_indices = @transform_6, window_bounds = array<i64: 1, 1, 2>}, {transform_indices = @transform_7, window_bounds = array<i64: 1, 2, 32>}, {transform_indices = @transform_8, window_bounds = array<i64: 1, 1, 32>}, {pipeline_mode = #tpu.pipeline_mode<synchronous>, transform_indices = @transform_9, window_bounds = array<i64: 288, 32>}, {pipeline_mode = #tpu.pipeline_mode<synchronous>, transform_indices = @transform_10, window_bounds = array<i64: 1, 32>}, {transform_indices = @transform_11, window_bounds = array<i64: 1, 256, 32>}]} {
    %0 = tpu.iota {dimensions = array<i32: 1>} : vector<16x24x32xi32>
    %c1_i32 = arith.constant 1 : i32
    %1 = vector.broadcast %c1_i32 : i32 to vector<16x24x32xi32>
    %2 = arith.cmpi sge, %0, %1 : vector<16x24x32xi32>
    %c16_i32 = arith.constant 16 : i32
    %3 = vector.broadcast %c16_i32 : i32 to vector<16x24x32xi32>
    %4 = arith.cmpi sle, %0, %3 : vector<16x24x32xi32>
    %5 = arith.andi %2, %4 : vector<16x24x32xi1>
    %cst = arith.constant 1.000000e+00 : f32
    %cst_0 = arith.constant 0.000000e+00 : f32
    %6 = vector.broadcast %cst : f32 to vector<16x24x32xf32>
    %7 = vector.broadcast %cst_0 : f32 to vector<16x24x32xf32>
    %8 = arith.select %5, %6, %7 : vector<16x24x32xi1>, vector<16x24x32xf32>
    %9 = vector.shape_cast %8 : vector<16x24x32xf32> to vector<384x32xf32>
    %c0_i32 = arith.constant 0 : i32
    %10 = arith.cmpi eq, %arg1, %c0_i32 : i32
    %11 = arith.extui %10 : i1 to i32
    %c0_i32_1 = arith.constant 0 : i32
    %c0_i32_2 = arith.constant 0 : i32
    %12 = arith.cmpi ne, %11, %c0_i32_2 : i32
    scf.if %12 {
      %cst_127 = arith.constant 0.000000e+00 : f32
      %184 = vector.broadcast %cst_127 : f32 to vector<32x32xf32>
      %c0_128 = arith.constant 0 : index
      %c0_129 = arith.constant 0 : index
      %185 = vector.load %arg14[%c0_128, %c0_129] : memref<448x32xf32, #tpu.memory_space<vmem>>, vector<32x32xf32>
      tpu.vector_store %arg14[%c0_128, %c0_129], %184 {strides = array<i32>} : memref<448x32xf32, #tpu.memory_space<vmem>>, vector<32x32xf32>,
      %c416 = arith.constant 416 : index
      %c0_130 = arith.constant 0 : index
      %186 = vector.load %arg14[%c416, %c0_130] : memref<448x32xf32, #tpu.memory_space<vmem>>, vector<32x32xf32>
      tpu.vector_store %arg14[%c416, %c0_130], %184 {strides = array<i32>} : memref<448x32xf32, #tpu.memory_space<vmem>>, vector<32x32xf32>,
      %c0_131 = arith.constant 0 : index
      %c0_132 = arith.constant 0 : index
      %187 = vector.load %arg15[%c0_131, %c0_132] : memref<448x32xf32, #tpu.memory_space<vmem>>, vector<32x32xf32>
      tpu.vector_store %arg15[%c0_131, %c0_132], %184 {strides = array<i32>} : memref<448x32xf32, #tpu.memory_space<vmem>>, vector<32x32xf32>,
      %c416_133 = arith.constant 416 : index
      %c0_134 = arith.constant 0 : index
      %188 = vector.load %arg15[%c416_133, %c0_134] : memref<448x32xf32, #tpu.memory_space<vmem>>, vector<32x32xf32>
      tpu.vector_store %arg15[%c416_133, %c0_134], %184 {strides = array<i32>} : memref<448x32xf32, #tpu.memory_space<vmem>>, vector<32x32xf32>,
      %c0_i32_135 = arith.constant 0 : i32
      %c256_i32 = arith.constant 256 : i32
      %189 = arith.muli %c0_i32_135, %c256_i32 : i32
      %190 = tpu.assume_multiple %189, 8 : i32
      %c0_i32_136 = arith.constant 0 : i32
      %c0_i32_137 = arith.constant 0 : i32
      %191 = tpu.memref_slice %arg2[%c0_i32_1, %c0_i32_136, %c0_i32_137] : memref<1x256x32xf32, #tpu.memory_space<vmem>> -> memref<1x256x32xf32, #tpu.memory_space<vmem>>
      %192 = tpu.memref_squeeze %191 : memref<1x256x32xf32, #tpu.memory_space<vmem>> -> memref<256x32xf32, #tpu.memory_space<vmem>>
      %193 = arith.index_cast %190 : i32 to index
      %c0_138 = arith.constant 0 : index
      %194 = vector.load %192[%193, %c0_138] : memref<256x32xf32, #tpu.memory_space<vmem>>, vector<256x32xf32>
      %195 = vector.shape_cast %194 : vector<256x32xf32> to vector<16x16x32xf32>
      %cst_139 = arith.constant 0.000000e+00 : f32
      %196 = vector.broadcast %cst_139 : f32 to vector<16x1x32xf32>
      %cst_140 = arith.constant 0.000000e+00 : f32
      %197 = vector.broadcast %cst_140 : f32 to vector<16x7x32xf32>
      %198 = tpu.concatenate %196, %195, %197 in 1 : vector<16x1x32xf32>, vector<16x16x32xf32>, vector<16x7x32xf32> -> vector<16x24x32xf32>
      %199 = vector.shape_cast %198 : vector<16x24x32xf32> to vector<384x32xf32>
      %c384_i32_141 = arith.constant 384 : i32
      %200 = arith.muli %c0_i32_135, %c384_i32_141 : i32
      %c32_i32_142 = arith.constant 32 : i32
      %201 = arith.addi %c32_i32_142, %200 : i32
      %202 = tpu.assume_multiple %201, 8 : i32
      %203 = arith.index_cast %202 : i32 to index
      %c0_143 = arith.constant 0 : index
      %204 = vector.load %arg14[%203, %c0_143] : memref<448x32xf32, #tpu.memory_space<vmem>>, vector<384x32xf32>
      tpu.vector_store %arg14[%203, %c0_143], %199 {strides = array<i32>} : memref<448x32xf32, #tpu.memory_space<vmem>>, vector<384x32xf32>,
      %c1_i32_144 = arith.constant 1 : i32
    } else {
    }
    %c0 = arith.constant 0 : index
    %c0_3 = arith.constant 0 : index
    %c0_4 = arith.constant 0 : index
    %13 = vector.load %arg3[%c0, %c0_3, %c0_4] : memref<1x288x32xf32, #tpu.memory_space<vmem>>, vector<1x288x32xf32>
    %14 = vector.shape_cast %13 : vector<1x288x32xf32> to vector<288x32xf32>
    %c0_5 = arith.constant 0 : index
    %c0_6 = arith.constant 0 : index
    %c0_7 = arith.constant 0 : index
    %15 = vector.load %arg4[%c0_5, %c0_6, %c0_7] : memref<1x1x32xf32, #tpu.memory_space<vmem>>, vector<1x1x32xf32>
    %16 = vector.shape_cast %15 : vector<1x1x32xf32> to vector<1x32xf32>
    %c0_8 = arith.constant 0 : index
    %c0_9 = arith.constant 0 : index
    %c0_10 = arith.constant 0 : index
    %17 = vector.load %arg5[%c0_8, %c0_9, %c0_10] : memref<1x288x32xf32, #tpu.memory_space<vmem>>, vector<1x288x32xf32>
    %18 = vector.shape_cast %17 : vector<1x288x32xf32> to vector<288x32xf32>
    %c0_11 = arith.constant 0 : index
    %c0_12 = arith.constant 0 : index
    %c0_13 = arith.constant 0 : index
    %19 = vector.load %arg6[%c0_11, %c0_12, %c0_13] : memref<1x1x32xf32, #tpu.memory_space<vmem>>, vector<1x1x32xf32>
    %20 = vector.shape_cast %19 : vector<1x1x32xf32> to vector<1x32xf32>
    %c0_i32_14 = arith.constant 0 : i32
    %c384_i32 = arith.constant 384 : i32
    %21 = arith.muli %c0_i32_14, %c384_i32 : i32
    %c32_i32 = arith.constant 32 : i32
    %22 = arith.addi %21, %c32_i32 : i32
    %c-24_i32 = arith.constant -24 : i32
    %23 = arith.addi %22, %c-24_i32 : i32
    %c-1_i32 = arith.constant -1 : i32
    %24 = arith.addi %23, %c-1_i32 : i32
    %25 = arith.index_cast %24 : i32 to index
    %c0_15 = arith.constant 0 : index
    %26 = vector.load %arg14[%25, %c0_15] : memref<448x32xf32, #tpu.memory_space<vmem>>, vector<384x32xf32>
    %c32_i32_16 = arith.constant 32 : i32
    %27 = arith.addi %21, %c32_i32_16 : i32
    %c-24_i32_17 = arith.constant -24 : i32
    %28 = arith.addi %27, %c-24_i32_17 : i32
    %c0_i32_18 = arith.constant 0 : i32
    %29 = arith.addi %28, %c0_i32_18 : i32
    %30 = tpu.assume_multiple %29, 8 : i32
    %31 = arith.index_cast %30 : i32 to index
    %c0_19 = arith.constant 0 : index
    %32 = vector.load %arg14[%31, %c0_19] : memref<448x32xf32, #tpu.memory_space<vmem>>, vector<384x32xf32>
    %c32_i32_20 = arith.constant 32 : i32
    %33 = arith.addi %21, %c32_i32_20 : i32
    %c-24_i32_21 = arith.constant -24 : i32
    %34 = arith.addi %33, %c-24_i32_21 : i32
    %c1_i32_22 = arith.constant 1 : i32
    %35 = arith.addi %34, %c1_i32_22 : i32
    %36 = arith.index_cast %35 : i32 to index
    %c0_23 = arith.constant 0 : index
    %37 = vector.load %arg14[%36, %c0_23] : memref<448x32xf32, #tpu.memory_space<vmem>>, vector<384x32xf32>
    %c32_i32_24 = arith.constant 32 : i32
    %38 = arith.addi %21, %c32_i32_24 : i32
    %c0_i32_25 = arith.constant 0 : i32
    %39 = arith.addi %38, %c0_i32_25 : i32
    %c-1_i32_26 = arith.constant -1 : i32
    %40 = arith.addi %39, %c-1_i32_26 : i32
    %41 = arith.index_cast %40 : i32 to index
    %c0_27 = arith.constant 0 : index
    %42 = vector.load %arg14[%41, %c0_27] : memref<448x32xf32, #tpu.memory_space<vmem>>, vector<384x32xf32>
    %c32_i32_28 = arith.constant 32 : i32
    %43 = arith.addi %21, %c32_i32_28 : i32
    %c0_i32_29 = arith.constant 0 : i32
    %44 = arith.addi %43, %c0_i32_29 : i32
    %c0_i32_30 = arith.constant 0 : i32
    %45 = arith.addi %44, %c0_i32_30 : i32
    %46 = tpu.assume_multiple %45, 8 : i32
    %47 = arith.index_cast %46 : i32 to index
    %c0_31 = arith.constant 0 : index
    %48 = vector.load %arg14[%47, %c0_31] : memref<448x32xf32, #tpu.memory_space<vmem>>, vector<384x32xf32>
    %c32_i32_32 = arith.constant 32 : i32
    %49 = arith.addi %21, %c32_i32_32 : i32
    %c0_i32_33 = arith.constant 0 : i32
    %50 = arith.addi %49, %c0_i32_33 : i32
    %c1_i32_34 = arith.constant 1 : i32
    %51 = arith.addi %50, %c1_i32_34 : i32
    %52 = arith.index_cast %51 : i32 to index
    %c0_35 = arith.constant 0 : index
    %53 = vector.load %arg14[%52, %c0_35] : memref<448x32xf32, #tpu.memory_space<vmem>>, vector<384x32xf32>
    %c32_i32_36 = arith.constant 32 : i32
    %54 = arith.addi %21, %c32_i32_36 : i32
    %c24_i32 = arith.constant 24 : i32
    %55 = arith.addi %54, %c24_i32 : i32
    %c-1_i32_37 = arith.constant -1 : i32
    %56 = arith.addi %55, %c-1_i32_37 : i32
    %57 = arith.index_cast %56 : i32 to index
    %c0_38 = arith.constant 0 : index
    %58 = vector.load %arg14[%57, %c0_38] : memref<448x32xf32, #tpu.memory_space<vmem>>, vector<384x32xf32>
    %c32_i32_39 = arith.constant 32 : i32
    %59 = arith.addi %21, %c32_i32_39 : i32
    %c24_i32_40 = arith.constant 24 : i32
    %60 = arith.addi %59, %c24_i32_40 : i32
    %c0_i32_41 = arith.constant 0 : i32
    %61 = arith.addi %60, %c0_i32_41 : i32
    %62 = tpu.assume_multiple %61, 8 : i32
    %63 = arith.index_cast %62 : i32 to index
    %c0_42 = arith.constant 0 : index
    %64 = vector.load %arg14[%63, %c0_42] : memref<448x32xf32, #tpu.memory_space<vmem>>, vector<384x32xf32>
    %c32_i32_43 = arith.constant 32 : i32
    %65 = arith.addi %21, %c32_i32_43 : i32
    %c24_i32_44 = arith.constant 24 : i32
    %66 = arith.addi %65, %c24_i32_44 : i32
    %c1_i32_45 = arith.constant 1 : i32
    %67 = arith.addi %66, %c1_i32_45 : i32
    %68 = arith.index_cast %67 : i32 to index
    %c0_46 = arith.constant 0 : index
    %69 = vector.load %arg14[%68, %c0_46] : memref<448x32xf32, #tpu.memory_space<vmem>>, vector<384x32xf32>
    %70 = tpu.concatenate %26, %32, %37, %42, %48, %53, %58, %64, %69 in 1 : vector<384x32xf32>, vector<384x32xf32>, vector<384x32xf32>, vector<384x32xf32>, vector<384x32xf32>, vector<384x32xf32>, vector<384x32xf32>, vector<384x32xf32>, vector<384x32xf32> -> vector<384x288xf32>
    %cst_47 = arith.constant dense<0.000000e+00> : vector<384x32xf32>
    %71 = tpu.matmul %70, %14, %cst_47 {dimension_numbers = #tpu.dot_dimension_numbers<[1], [0], [0], [1], [0, 0, 1, 1], [], []>} : vector<384x288xf32>, vector<288x32xf32>, vector<384x32xf32> -> vector<384x32xf32>
    %72 = vector.broadcast %16 : vector<1x32xf32> to vector<384x32xf32>
    %73 = arith.addf %71, %72 : vector<384x32xf32>
    %cst_48 = arith.constant 0.000000e+00 : f32
    %74 = vector.broadcast %cst_48 : f32 to vector<384x32xf32>
    %75 = arith.maximumf %73, %74 : vector<384x32xf32>
    %76 = arith.mulf %75, %9 : vector<384x32xf32>
    %c384_i32_49 = arith.constant 384 : i32
    %77 = arith.muli %c0_i32_14, %c384_i32_49 : i32
    %c32_i32_50 = arith.constant 32 : i32
    %78 = arith.addi %c32_i32_50, %77 : i32
    %79 = tpu.assume_multiple %78, 8 : i32
    %80 = arith.index_cast %79 : i32 to index
    %c0_51 = arith.constant 0 : index
    %81 = vector.load %arg15[%80, %c0_51] : memref<448x32xf32, #tpu.memory_space<vmem>>, vector<384x32xf32>
    tpu.vector_store %arg15[%80, %c0_51], %76 {strides = array<i32>} : memref<448x32xf32, #tpu.memory_space<vmem>>, vector<384x32xf32>,
    %c1_i32_52 = arith.constant 1 : i32
    %cst_53 = arith.constant 0.000000e+00 : f32
    %82 = vector.broadcast %cst_53 : f32 to vector<1x32xf32>
    %c0_i32_54 = arith.constant 0 : i32
    %c384_i32_55 = arith.constant 384 : i32
    %83 = arith.muli %c0_i32_54, %c384_i32_55 : i32
    %c32_i32_56 = arith.constant 32 : i32
    %84 = arith.addi %83, %c32_i32_56 : i32
    %c-24_i32_57 = arith.constant -24 : i32
    %85 = arith.addi %84, %c-24_i32_57 : i32
    %c-1_i32_58 = arith.constant -1 : i32
    %86 = arith.addi %85, %c-1_i32_58 : i32
    %87 = arith.index_cast %86 : i32 to index
    %c0_59 = arith.constant 0 : index
    %88 = vector.load %arg15[%87, %c0_59] : memref<448x32xf32, #tpu.memory_space<vmem>>, vector<384x32xf32>
    %c32_i32_60 = arith.constant 32 : i32
    %89 = arith.addi %83, %c32_i32_60 : i32
    %c-24_i32_61 = arith.constant -24 : i32
    %90 = arith.addi %89, %c-24_i32_61 : i32
    %c0_i32_62 = arith.constant 0 : i32
    %91 = arith.addi %90, %c0_i32_62 : i32
    %92 = tpu.assume_multiple %91, 8 : i32
    %93 = arith.index_cast %92 : i32 to index
    %c0_63 = arith.constant 0 : index
    %94 = vector.load %arg15[%93, %c0_63] : memref<448x32xf32, #tpu.memory_space<vmem>>, vector<384x32xf32>
    %c32_i32_64 = arith.constant 32 : i32
    %95 = arith.addi %83, %c32_i32_64 : i32
    %c-24_i32_65 = arith.constant -24 : i32
    %96 = arith.addi %95, %c-24_i32_65 : i32
    %c1_i32_66 = arith.constant 1 : i32
    %97 = arith.addi %96, %c1_i32_66 : i32
    %98 = arith.index_cast %97 : i32 to index
    %c0_67 = arith.constant 0 : index
    %99 = vector.load %arg15[%98, %c0_67] : memref<448x32xf32, #tpu.memory_space<vmem>>, vector<384x32xf32>
    %c32_i32_68 = arith.constant 32 : i32
    %100 = arith.addi %83, %c32_i32_68 : i32
    %c0_i32_69 = arith.constant 0 : i32
    %101 = arith.addi %100, %c0_i32_69 : i32
    %c-1_i32_70 = arith.constant -1 : i32
    %102 = arith.addi %101, %c-1_i32_70 : i32
    %103 = arith.index_cast %102 : i32 to index
    %c0_71 = arith.constant 0 : index
    %104 = vector.load %arg15[%103, %c0_71] : memref<448x32xf32, #tpu.memory_space<vmem>>, vector<384x32xf32>
    %c32_i32_72 = arith.constant 32 : i32
    %105 = arith.addi %83, %c32_i32_72 : i32
    %c0_i32_73 = arith.constant 0 : i32
    %106 = arith.addi %105, %c0_i32_73 : i32
    %c0_i32_74 = arith.constant 0 : i32
    %107 = arith.addi %106, %c0_i32_74 : i32
    %108 = tpu.assume_multiple %107, 8 : i32
    %109 = arith.index_cast %108 : i32 to index
    %c0_75 = arith.constant 0 : index
    %110 = vector.load %arg15[%109, %c0_75] : memref<448x32xf32, #tpu.memory_space<vmem>>, vector<384x32xf32>
    %c32_i32_76 = arith.constant 32 : i32
    %111 = arith.addi %83, %c32_i32_76 : i32
    %c0_i32_77 = arith.constant 0 : i32
    %112 = arith.addi %111, %c0_i32_77 : i32
    %c1_i32_78 = arith.constant 1 : i32
    %113 = arith.addi %112, %c1_i32_78 : i32
    %114 = arith.index_cast %113 : i32 to index
    %c0_79 = arith.constant 0 : index
    %115 = vector.load %arg15[%114, %c0_79] : memref<448x32xf32, #tpu.memory_space<vmem>>, vector<384x32xf32>
    %c32_i32_80 = arith.constant 32 : i32
    %116 = arith.addi %83, %c32_i32_80 : i32
    %c24_i32_81 = arith.constant 24 : i32
    %117 = arith.addi %116, %c24_i32_81 : i32
    %c-1_i32_82 = arith.constant -1 : i32
    %118 = arith.addi %117, %c-1_i32_82 : i32
    %119 = arith.index_cast %118 : i32 to index
    %c0_83 = arith.constant 0 : index
    %120 = vector.load %arg15[%119, %c0_83] : memref<448x32xf32, #tpu.memory_space<vmem>>, vector<384x32xf32>
    %c32_i32_84 = arith.constant 32 : i32
    %121 = arith.addi %83, %c32_i32_84 : i32
    %c24_i32_85 = arith.constant 24 : i32
    %122 = arith.addi %121, %c24_i32_85 : i32
    %c0_i32_86 = arith.constant 0 : i32
    %123 = arith.addi %122, %c0_i32_86 : i32
    %124 = tpu.assume_multiple %123, 8 : i32
    %125 = arith.index_cast %124 : i32 to index
    %c0_87 = arith.constant 0 : index
    %126 = vector.load %arg15[%125, %c0_87] : memref<448x32xf32, #tpu.memory_space<vmem>>, vector<384x32xf32>
    %c32_i32_88 = arith.constant 32 : i32
    %127 = arith.addi %83, %c32_i32_88 : i32
    %c24_i32_89 = arith.constant 24 : i32
    %128 = arith.addi %127, %c24_i32_89 : i32
    %c1_i32_90 = arith.constant 1 : i32
    %129 = arith.addi %128, %c1_i32_90 : i32
    %130 = arith.index_cast %129 : i32 to index
    %c0_91 = arith.constant 0 : index
    %131 = vector.load %arg15[%130, %c0_91] : memref<448x32xf32, #tpu.memory_space<vmem>>, vector<384x32xf32>
    %132 = tpu.concatenate %88, %94, %99, %104, %110, %115, %120, %126, %131 in 1 : vector<384x32xf32>, vector<384x32xf32>, vector<384x32xf32>, vector<384x32xf32>, vector<384x32xf32>, vector<384x32xf32>, vector<384x32xf32>, vector<384x32xf32>, vector<384x32xf32> -> vector<384x288xf32>
    %cst_92 = arith.constant dense<0.000000e+00> : vector<384x32xf32>
    %133 = tpu.matmul %132, %18, %cst_92 {dimension_numbers = #tpu.dot_dimension_numbers<[1], [0], [0], [1], [0, 0, 1, 1], [], []>} : vector<384x288xf32>, vector<288x32xf32>, vector<384x32xf32> -> vector<384x32xf32>
    %134 = vector.broadcast %20 : vector<1x32xf32> to vector<384x32xf32>
    %135 = arith.addf %133, %134 : vector<384x32xf32>
    %136 = arith.mulf %135, %9 : vector<384x32xf32>
    %c384_i32_93 = arith.constant 384 : i32
    %137 = arith.muli %c0_i32_54, %c384_i32_93 : i32
    %138 = tpu.assume_multiple %137, 8 : i32
    %139 = arith.index_cast %138 : i32 to index
    %c0_94 = arith.constant 0 : index
    %140 = vector.load %arg16[%139, %c0_94] : memref<384x32xf32, #tpu.memory_space<vmem>>, vector<384x32xf32>
    tpu.vector_store %arg16[%139, %c0_94], %136 {strides = array<i32>} : memref<384x32xf32, #tpu.memory_space<vmem>>, vector<384x32xf32>,
    %cst_95 = arith.constant dense<0.000000e+00> : vector<32xf32>
    %141 = vector.multi_reduction <add>, %136, %cst_95 [0] : vector<384x32xf32> to vector<32xf32>
    %142 = vector.shape_cast %141 : vector<32xf32> to vector<1x32xf32>
    %143 = arith.addf %82, %142 : vector<1x32xf32>
    %c1_i32_96 = arith.constant 1 : i32
    %cst_97 = arith.constant 3.906250e-03 : f32
    %144 = vector.broadcast %cst_97 : f32 to vector<1x32xf32>
    %145 = arith.mulf %143, %144 : vector<1x32xf32>
    %c0_98 = arith.constant 0 : index
    %c0_99 = arith.constant 0 : index
    %c0_100 = arith.constant 0 : index
    %146 = vector.load %arg7[%c0_98, %c0_99, %c0_100] : memref<1x32x2xf32, #tpu.memory_space<vmem>>, vector<1x32x2xf32>
    %147 = vector.shape_cast %146 : vector<1x32x2xf32> to vector<32x2xf32>
    %cst_101 = arith.constant dense<0.000000e+00> : vector<1x2xf32>
    %148 = tpu.matmul %145, %147, %cst_101 {dimension_numbers = #tpu.dot_dimension_numbers<[1], [0], [0], [1], [0, 0, 1, 1], [], []>} : vector<1x32xf32>, vector<32x2xf32>, vector<1x2xf32> -> vector<1x2xf32>
    %c0_102 = arith.constant 0 : index
    %c0_103 = arith.constant 0 : index
    %c0_104 = arith.constant 0 : index
    %149 = vector.load %arg8[%c0_102, %c0_103, %c0_104] : memref<1x1x2xf32, #tpu.memory_space<vmem>>, vector<1x1x2xf32>
    %150 = vector.shape_cast %149 : vector<1x1x2xf32> to vector<1x2xf32>
    %151 = arith.addf %148, %150 : vector<1x2xf32>
    %cst_105 = arith.constant 0.000000e+00 : f32
    %152 = vector.broadcast %cst_105 : f32 to vector<1x2xf32>
    %153 = arith.maximumf %151, %152 : vector<1x2xf32>
    %c0_106 = arith.constant 0 : index
    %c0_107 = arith.constant 0 : index
    %c0_108 = arith.constant 0 : index
    %154 = vector.load %arg9[%c0_106, %c0_107, %c0_108] : memref<1x2x32xf32, #tpu.memory_space<vmem>>, vector<1x2x32xf32>
    %155 = vector.shape_cast %154 : vector<1x2x32xf32> to vector<2x32xf32>
    %cst_109 = arith.constant dense<0.000000e+00> : vector<1x32xf32>
    %156 = tpu.matmul %153, %155, %cst_109 {dimension_numbers = #tpu.dot_dimension_numbers<[1], [0], [0], [1], [0, 0, 1, 1], [], []>} : vector<1x2xf32>, vector<2x32xf32>, vector<1x32xf32> -> vector<1x32xf32>
    %c0_110 = arith.constant 0 : index
    %c0_111 = arith.constant 0 : index
    %c0_112 = arith.constant 0 : index
    %157 = vector.load %arg10[%c0_110, %c0_111, %c0_112] : memref<1x1x32xf32, #tpu.memory_space<vmem>>, vector<1x1x32xf32>
    %158 = vector.shape_cast %157 : vector<1x1x32xf32> to vector<1x32xf32>
    %159 = arith.addf %156, %158 : vector<1x32xf32>
    %160 = arith.negf %159 : vector<1x32xf32>
    %161 = math.exp %160 : vector<1x32xf32>
    %cst_113 = arith.constant 1.000000e+00 : f32
    %162 = vector.broadcast %cst_113 : f32 to vector<1x32xf32>
    %163 = arith.addf %162, %161 : vector<1x32xf32>
    %164 = arith.divf %162, %163 : vector<1x32xf32>
    %c0_i32_114 = arith.constant 0 : i32
    %c384_i32_115 = arith.constant 384 : i32
    %165 = arith.muli %c0_i32_114, %c384_i32_115 : i32
    %c32_i32_116 = arith.constant 32 : i32
    %166 = arith.addi %c32_i32_116, %165 : i32
    %167 = tpu.assume_multiple %166, 8 : i32
    %168 = arith.index_cast %167 : i32 to index
    %c0_117 = arith.constant 0 : index
    %169 = vector.load %arg14[%168, %c0_117] : memref<448x32xf32, #tpu.memory_space<vmem>>, vector<384x32xf32>
    %c384_i32_118 = arith.constant 384 : i32
    %170 = arith.muli %c0_i32_114, %c384_i32_118 : i32
    %171 = tpu.assume_multiple %170, 8 : i32
    %172 = arith.index_cast %171 : i32 to index
    %c0_119 = arith.constant 0 : index
    %173 = vector.load %arg16[%172, %c0_119] : memref<384x32xf32, #tpu.memory_space<vmem>>, vector<384x32xf32>
    %174 = vector.broadcast %164 : vector<1x32xf32> to vector<384x32xf32>
    %175 = arith.mulf %173, %174 : vector<384x32xf32>
    %cst_120 = arith.constant 1.000000e+00 : f32
    %176 = vector.broadcast %cst_120 : f32 to vector<384x32xf32>
    %177 = arith.mulf %176, %175 : vector<384x32xf32>
    %178 = arith.addf %169, %177 : vector<384x32xf32>
    %179 = arith.index_cast %167 : i32 to index
    %c0_121 = arith.constant 0 : index
    %180 = vector.load %arg14[%179, %c0_121] : memref<448x32xf32, #tpu.memory_space<vmem>>, vector<384x32xf32>
    tpu.vector_store %arg14[%179, %c0_121], %178 {strides = array<i32>} : memref<448x32xf32, #tpu.memory_space<vmem>>, vector<384x32xf32>,
    %c1_i32_122 = arith.constant 1 : i32
    %c1_i32_123 = arith.constant 1 : i32
    %181 = arith.cmpi eq, %arg1, %c1_i32_123 : i32
    %182 = arith.extui %181 : i1 to i32
    %c0_i32_124 = arith.constant 0 : i32
    %c0_i32_125 = arith.constant 0 : i32
    %c0_i32_126 = arith.constant 0 : i32
    %183 = arith.cmpi ne, %182, %c0_i32_126 : i32
    scf.if %183 {
      %c0_127 = arith.constant 0 : index
      %c0_128 = arith.constant 0 : index
      %184 = vector.load %arg11[%c0_127, %c0_128] : memref<288x32xf32, #tpu.memory_space<vmem>>, vector<288x32xf32>
      %c0_129 = arith.constant 0 : index
      %c0_130 = arith.constant 0 : index
      %185 = vector.load %arg12[%c0_129, %c0_130] : memref<1x32xf32, #tpu.memory_space<vmem>>, vector<1x32xf32>
      %c0_i32_131 = arith.constant 0 : i32
      %c384_i32_132 = arith.constant 384 : i32
      %186 = arith.muli %c0_i32_131, %c384_i32_132 : i32
      %c32_i32_133 = arith.constant 32 : i32
      %187 = arith.addi %186, %c32_i32_133 : i32
      %c-24_i32_134 = arith.constant -24 : i32
      %188 = arith.addi %187, %c-24_i32_134 : i32
      %c-1_i32_135 = arith.constant -1 : i32
      %189 = arith.addi %188, %c-1_i32_135 : i32
      %190 = arith.index_cast %189 : i32 to index
      %c0_136 = arith.constant 0 : index
      %191 = vector.load %arg14[%190, %c0_136] : memref<448x32xf32, #tpu.memory_space<vmem>>, vector<384x32xf32>
      %c32_i32_137 = arith.constant 32 : i32
      %192 = arith.addi %186, %c32_i32_137 : i32
      %c-24_i32_138 = arith.constant -24 : i32
      %193 = arith.addi %192, %c-24_i32_138 : i32
      %c0_i32_139 = arith.constant 0 : i32
      %194 = arith.addi %193, %c0_i32_139 : i32
      %195 = tpu.assume_multiple %194, 8 : i32
      %196 = arith.index_cast %195 : i32 to index
      %c0_140 = arith.constant 0 : index
      %197 = vector.load %arg14[%196, %c0_140] : memref<448x32xf32, #tpu.memory_space<vmem>>, vector<384x32xf32>
      %c32_i32_141 = arith.constant 32 : i32
      %198 = arith.addi %186, %c32_i32_141 : i32
      %c-24_i32_142 = arith.constant -24 : i32
      %199 = arith.addi %198, %c-24_i32_142 : i32
      %c1_i32_143 = arith.constant 1 : i32
      %200 = arith.addi %199, %c1_i32_143 : i32
      %201 = arith.index_cast %200 : i32 to index
      %c0_144 = arith.constant 0 : index
      %202 = vector.load %arg14[%201, %c0_144] : memref<448x32xf32, #tpu.memory_space<vmem>>, vector<384x32xf32>
      %c32_i32_145 = arith.constant 32 : i32
      %203 = arith.addi %186, %c32_i32_145 : i32
      %c0_i32_146 = arith.constant 0 : i32
      %204 = arith.addi %203, %c0_i32_146 : i32
      %c-1_i32_147 = arith.constant -1 : i32
      %205 = arith.addi %204, %c-1_i32_147 : i32
      %206 = arith.index_cast %205 : i32 to index
      %c0_148 = arith.constant 0 : index
      %207 = vector.load %arg14[%206, %c0_148] : memref<448x32xf32, #tpu.memory_space<vmem>>, vector<384x32xf32>
      %c32_i32_149 = arith.constant 32 : i32
      %208 = arith.addi %186, %c32_i32_149 : i32
      %c0_i32_150 = arith.constant 0 : i32
      %209 = arith.addi %208, %c0_i32_150 : i32
      %c0_i32_151 = arith.constant 0 : i32
      %210 = arith.addi %209, %c0_i32_151 : i32
      %211 = tpu.assume_multiple %210, 8 : i32
      %212 = arith.index_cast %211 : i32 to index
      %c0_152 = arith.constant 0 : index
      %213 = vector.load %arg14[%212, %c0_152] : memref<448x32xf32, #tpu.memory_space<vmem>>, vector<384x32xf32>
      %c32_i32_153 = arith.constant 32 : i32
      %214 = arith.addi %186, %c32_i32_153 : i32
      %c0_i32_154 = arith.constant 0 : i32
      %215 = arith.addi %214, %c0_i32_154 : i32
      %c1_i32_155 = arith.constant 1 : i32
      %216 = arith.addi %215, %c1_i32_155 : i32
      %217 = arith.index_cast %216 : i32 to index
      %c0_156 = arith.constant 0 : index
      %218 = vector.load %arg14[%217, %c0_156] : memref<448x32xf32, #tpu.memory_space<vmem>>, vector<384x32xf32>
      %c32_i32_157 = arith.constant 32 : i32
      %219 = arith.addi %186, %c32_i32_157 : i32
      %c24_i32_158 = arith.constant 24 : i32
      %220 = arith.addi %219, %c24_i32_158 : i32
      %c-1_i32_159 = arith.constant -1 : i32
      %221 = arith.addi %220, %c-1_i32_159 : i32
      %222 = arith.index_cast %221 : i32 to index
      %c0_160 = arith.constant 0 : index
      %223 = vector.load %arg14[%222, %c0_160] : memref<448x32xf32, #tpu.memory_space<vmem>>, vector<384x32xf32>
      %c32_i32_161 = arith.constant 32 : i32
      %224 = arith.addi %186, %c32_i32_161 : i32
      %c24_i32_162 = arith.constant 24 : i32
      %225 = arith.addi %224, %c24_i32_162 : i32
      %c0_i32_163 = arith.constant 0 : i32
      %226 = arith.addi %225, %c0_i32_163 : i32
      %227 = tpu.assume_multiple %226, 8 : i32
      %228 = arith.index_cast %227 : i32 to index
      %c0_164 = arith.constant 0 : index
      %229 = vector.load %arg14[%228, %c0_164] : memref<448x32xf32, #tpu.memory_space<vmem>>, vector<384x32xf32>
      %c32_i32_165 = arith.constant 32 : i32
      %230 = arith.addi %186, %c32_i32_165 : i32
      %c24_i32_166 = arith.constant 24 : i32
      %231 = arith.addi %230, %c24_i32_166 : i32
      %c1_i32_167 = arith.constant 1 : i32
      %232 = arith.addi %231, %c1_i32_167 : i32
      %233 = arith.index_cast %232 : i32 to index
      %c0_168 = arith.constant 0 : index
      %234 = vector.load %arg14[%233, %c0_168] : memref<448x32xf32, #tpu.memory_space<vmem>>, vector<384x32xf32>
      %235 = tpu.concatenate %191, %197, %202, %207, %213, %218, %223, %229, %234 in 1 : vector<384x32xf32>, vector<384x32xf32>, vector<384x32xf32>, vector<384x32xf32>, vector<384x32xf32>, vector<384x32xf32>, vector<384x32xf32>, vector<384x32xf32>, vector<384x32xf32> -> vector<384x288xf32>
      %cst_169 = arith.constant dense<0.000000e+00> : vector<384x32xf32>
      %236 = tpu.matmul %235, %184, %cst_169 {dimension_numbers = #tpu.dot_dimension_numbers<[1], [0], [0], [1], [0, 0, 1, 1], [], []>} : vector<384x288xf32>, vector<288x32xf32>, vector<384x32xf32> -> vector<384x32xf32>
      %237 = vector.broadcast %185 : vector<1x32xf32> to vector<384x32xf32>
      %238 = arith.addf %236, %237 : vector<384x32xf32>
      %239 = vector.shape_cast %238 : vector<384x32xf32> to vector<16x24x32xf32>
      %240 = vector.extract_strided_slice %239 {offsets = [0, 1, 0], sizes = [16, 16, 32], strides = [1, 1, 1]} : vector<16x24x32xf32> to vector<16x16x32xf32>
      %241 = vector.shape_cast %240 : vector<16x16x32xf32> to vector<256x32xf32>
      %c256_i32 = arith.constant 256 : i32
      %242 = arith.muli %c0_i32_131, %c256_i32 : i32
      %243 = tpu.assume_multiple %242, 8 : i32
      %c0_i32_170 = arith.constant 0 : i32
      %c0_i32_171 = arith.constant 0 : i32
      %244 = tpu.memref_slice %arg2[%c0_i32_124, %c0_i32_170, %c0_i32_171] : memref<1x256x32xf32, #tpu.memory_space<vmem>> -> memref<1x256x32xf32, #tpu.memory_space<vmem>>
      %245 = tpu.memref_squeeze %244 : memref<1x256x32xf32, #tpu.memory_space<vmem>> -> memref<256x32xf32, #tpu.memory_space<vmem>>
      %246 = arith.index_cast %243 : i32 to index
      %c0_172 = arith.constant 0 : index
      %247 = vector.load %245[%246, %c0_172] : memref<256x32xf32, #tpu.memory_space<vmem>>, vector<256x32xf32>
      %248 = arith.addf %241, %247 : vector<256x32xf32>
      %c256_i32_173 = arith.constant 256 : i32
      %249 = arith.muli %c0_i32_131, %c256_i32_173 : i32
      %250 = tpu.assume_multiple %249, 8 : i32
      %c0_i32_174 = arith.constant 0 : i32
      %c0_i32_175 = arith.constant 0 : i32
      %251 = tpu.memref_slice %arg13[%c0_i32_125, %c0_i32_174, %c0_i32_175] : memref<1x256x32xf32, #tpu.memory_space<vmem>> -> memref<1x256x32xf32, #tpu.memory_space<vmem>>
      %252 = tpu.memref_squeeze %251 : memref<1x256x32xf32, #tpu.memory_space<vmem>> -> memref<256x32xf32, #tpu.memory_space<vmem>>
      %253 = arith.index_cast %250 : i32 to index
      %c0_176 = arith.constant 0 : index
      %254 = vector.load %252[%253, %c0_176] : memref<256x32xf32, #tpu.memory_space<vmem>>, vector<256x32xf32>
      tpu.vector_store %252[%253, %c0_176], %248 {strides = array<i32>} : memref<256x32xf32, #tpu.memory_space<vmem>>, vector<256x32xf32>,
      %c1_i32_177 = arith.constant 1 : i32
    } else {
    }
    return
  }
  func.func @transform_0(%arg0: i32, %arg1: i32) -> (i32, i32, i32) {
    %c0_i32 = arith.constant 0 : i32
    %c0_i32_0 = arith.constant 0 : i32
    %c0_i32_1 = arith.constant 0 : i32
    return %arg0, %c0_i32, %c0_i32_0 : i32, i32, i32
  }
  func.func @transform_1(%arg0: i32, %arg1: i32) -> (i32, i32, i32) {
    %c0_i32 = arith.constant 0 : i32
    %c0_i32_0 = arith.constant 0 : i32
    %c0_i32_1 = arith.constant 0 : i32
    return %arg1, %c0_i32, %c0_i32_0 : i32, i32, i32
  }
  func.func @transform_2(%arg0: i32, %arg1: i32) -> (i32, i32, i32) {
    %c0_i32 = arith.constant 0 : i32
    %c0_i32_0 = arith.constant 0 : i32
    %c0_i32_1 = arith.constant 0 : i32
    return %arg1, %c0_i32, %c0_i32_0 : i32, i32, i32
  }
  func.func @transform_3(%arg0: i32, %arg1: i32) -> (i32, i32, i32) {
    %c0_i32 = arith.constant 0 : i32
    %c0_i32_0 = arith.constant 0 : i32
    %c0_i32_1 = arith.constant 0 : i32
    return %arg1, %c0_i32, %c0_i32_0 : i32, i32, i32
  }
  func.func @transform_4(%arg0: i32, %arg1: i32) -> (i32, i32, i32) {
    %c0_i32 = arith.constant 0 : i32
    %c0_i32_0 = arith.constant 0 : i32
    %c0_i32_1 = arith.constant 0 : i32
    return %arg1, %c0_i32, %c0_i32_0 : i32, i32, i32
  }
  func.func @transform_5(%arg0: i32, %arg1: i32) -> (i32, i32, i32) {
    %c0_i32 = arith.constant 0 : i32
    %c0_i32_0 = arith.constant 0 : i32
    %c0_i32_1 = arith.constant 0 : i32
    return %arg1, %c0_i32, %c0_i32_0 : i32, i32, i32
  }
  func.func @transform_6(%arg0: i32, %arg1: i32) -> (i32, i32, i32) {
    %c0_i32 = arith.constant 0 : i32
    %c0_i32_0 = arith.constant 0 : i32
    %c0_i32_1 = arith.constant 0 : i32
    return %arg1, %c0_i32, %c0_i32_0 : i32, i32, i32
  }
  func.func @transform_7(%arg0: i32, %arg1: i32) -> (i32, i32, i32) {
    %c0_i32 = arith.constant 0 : i32
    %c0_i32_0 = arith.constant 0 : i32
    %c0_i32_1 = arith.constant 0 : i32
    return %arg1, %c0_i32, %c0_i32_0 : i32, i32, i32
  }
  func.func @transform_8(%arg0: i32, %arg1: i32) -> (i32, i32, i32) {
    %c0_i32 = arith.constant 0 : i32
    %c0_i32_0 = arith.constant 0 : i32
    %c0_i32_1 = arith.constant 0 : i32
    return %arg1, %c0_i32, %c0_i32_0 : i32, i32, i32
  }
  func.func @transform_9(%arg0: i32, %arg1: i32) -> (i32, i32) {
    %c0_i32 = arith.constant 0 : i32
    %c0_i32_0 = arith.constant 0 : i32
    %c0_i32_1 = arith.constant 0 : i32
    return %c0_i32, %c0_i32_0 : i32, i32
  }
  func.func @transform_10(%arg0: i32, %arg1: i32) -> (i32, i32) {
    %c0_i32 = arith.constant 0 : i32
    %c0_i32_0 = arith.constant 0 : i32
    %c0_i32_1 = arith.constant 0 : i32
    return %c0_i32, %c0_i32_0 : i32, i32
  }
  func.func @transform_11(%arg0: i32, %arg1: i32) -> (i32, i32, i32) {
    %c0_i32 = arith.constant 0 : i32
    %c0_i32_0 = arith.constant 0 : i32
    %c0_i32_1 = arith.constant 0 : i32
    return %arg0, %c0_i32, %c0_i32_0 : i32, i32, i32
  }
}

</mosaic_0001>

<bundles_post_ra>
// kernel: tpu_custom_call.1
= control target key start
LH: loop header
LB: loop body
LE: loop exit
PB: predicated region body
PF: predicated region fallthrough
CT: control target
= control target key end

     0   :  { %s11531_s17 = smov 0   ;;  %s11533_s18 = smov 0   ;;  %s17357_s0 = inlined_call_operand.vmem [shape: f32[2,256,32], index: 0, kind: input, shape index: {}]   ;;  %s17358_s1 = inlined_call_operand.vmem [shape: f32[2,288,32], index: 1, kind: input, shape index: {}]   ;;  %s17359_s2 = inlined_call_operand.vmem [shape: f32[2,1,32], index: 2, kind: input, shape index: {}]   ;;  %s17360_s3 = inlined_call_operand.vmem [shape: f32[2,288,32], index: 3, kind: input, shape index: {}]   ;;  %s17361_s4 = inlined_call_operand.vmem [shape: f32[2,1,32], index: 4, kind: input, shape index: {}]   ;;  %s17362_s5 = inlined_call_operand.vmem [shape: f32[2,32,2], index: 5, kind: input, shape index: {}]   ;;  %s17363_s6 = inlined_call_operand.vmem [shape: f32[2,1,2], index: 6, kind: input, shape index: {}]   ;;  %s17364_s7 = inlined_call_operand.vmem [shape: f32[2,2,32], index: 7, kind: input, shape index: {}]   ;;  %s17365_s8 = inlined_call_operand.vmem [shape: f32[2,1,32], index: 8, kind: input, shape index: {}]   ;;  %s17366_s9 = inlined_call_operand.vmem [shape: f32[288,32], index: 9, kind: input, shape index: {}]   ;;  %s17367_s10 = inlined_call_operand.vmem [shape: f32[1,32], index: 10, kind: input, shape index: {}]   ;;  %s17368_s11 = inlined_call_operand.vmem [shape: f32[2,256,32], index: 11, kind: output, shape index: {}]  }
   0x1   :  { %17495 = sst [smem:[#allocation124_spill]] %s17357_s0  ;;  %s11535_s19 = smov 0  }
   0x2   :  { %17496 = sst [smem:[#allocation125_spill]] %s17358_s1  ;;  %s11537_s20 = smov 0  }
   0x3   :  { %17497 = sst [smem:[#allocation126_spill]] %s17359_s2  ;;  %s11539_s21 = smov 0  }
   0x4   :  { %17498 = sst [smem:[#allocation127_spill]] %s17360_s3 }
   0x5   :  { %17499 = sst [smem:[#allocation128_spill]] %s17361_s4 }
   0x6 LB: > { %17500 = sst [smem:[#allocation5_spill]] %s11453_s19  ;;  %s30_s22 = sadd.s32 1, %s11453_s19  ;;  %s11461_s21 = sphi %s11539_s21, %s21_s21   ;;  %s11457_s20 = sphi %s11537_s20, %s17914_s20   ;;  %s11453_s19 = sphi %s11535_s19, %s17913_s19   ;;  %s11449_s18 = sphi %s11533_s18, %s17912_s18   ;;  %s11445_s17 = sphi %s11531_s17, %s17911_s17  }
   0x7   : > { %17501 = sst [smem:[#allocation6_spill]] %s11457_s20  ;;  %s33_s23 = sadd.s32 1, %s11457_s20 }
   0x8   : > { %17502 = sst [smem:[#allocation7_spill]] %s11461_s21  ;;  %p31_p0 = scmp.ge.s32.totalorder %s30_s22, 2 }
   0x9   : > { %p8884_p1 = scmp.ge.s32.totalorder %s11461_s21, 1  ;;  %p420_p2 = scmp.lt.s32.totalorder %s11461_s21, 5 }
   0xa   : > { %s17916_s22 = smov (%p31_p0, %s30_s22), 0  ;;  %s17918_s23 = smov (!%p31_p0, %s33_s23), %s11457_s20 }
   0xb   : > { %17503 = sst [smem:[#allocation8_spill]] %s17916_s22  ;;  %p421_p3 = pnand %p8884_p1, %p420_p2 }
   0xc   : > { %p35_p4 = scmp.ge.s32.totalorder %s17918_s23, 2 }
   0xd   : > { %424 = sbr.rel (%p421_p3) target bundleno = 2539 (0x9eb), region = 64 }
   0xe   : > { %s17920_s23 = smov (%p35_p4, %s17918_s23), 0 }
   0xf   : > { %17504 = sst [smem:[#allocation9_spill]] %s17920_s23 }
  0x12   : > { %p491_p5 = scmp.lt.s32.totalorder %s11449_s18, 1  ;;  %p496_p6 = scmp.lt.s32.totalorder %s11445_s17, 1  ;;  %v532_v0 = vlaneseq  ;;  %v11463_v3 = vmov 0.0  }
  0x13   : > { %s17505_s0 = sld [smem:[#allocation124_spill]]  ;;  %p8894_p7 = scmp.ne.s32.totalorder %s11445_s17, 0 }
  0x14   : > { %s17922_s18 = smov (!%p491_p5, %s11449_s18), 1  ;;  %v533_v1 = vshrl.u32 %v532_v0, 7  ;;  %s17507_s2 = sld [smem:[#allocation126_spill]] }
  0x15   : > { %s11565_s24 = scalar_select %p496_p6, %s11445_s17, 1 }
  0x16   : > { %s9046_s25 = sshll.u32 %s17922_s18, 8  ;;  %v535_v2 = vadd.s32 16, %v533_v1  ;;  %vm536_vm0 = vcmp.ge.s32.totalorder %v533_v1, 1  ;;  %s17508_s4 = sld [smem:[#allocation128_spill]] }
  0x17   : > { %s9121_s29 = smul.u32 288, %s11565_s24  ;;  %v11573_v4 = vsel %vm536_vm0, 1.0, %v11463_v3  ;;  %s17509_s1 = sld [smem:[#allocation125_spill]] }
  0x18   : > { %17506 = vst [vmem:[#allocation10_spill] sm:$0xff] %v11573_v4  ;;  %vm541_vm1 = vcmp.le.s32.totalorder %v535_v2, 16  ;;  %s17510_s3 = sld [smem:[#allocation127_spill]]  ;;  %s9047_s30 = sshll.u32 %s11565_s24, 5 }
  0x19   : > { %s11570_s28 = scalar_lea.vmem %s17505_s0, %s9046_s25  ;;  %v11597_v5 = vsel %vm541_vm1, 1.0, %v11463_v3  ;;  %s519_s14 = scalar_lea.vmem %s17363_s6, %s11565_s24 }
  0x1a   : > { %s11579_s13 = scalar_lea.vmem %s17507_s2, %s11565_s24  ;;  %17511 = vst [vmem:[#allocation11_spill] sm:$0xff] %v11597_v5  ;;  %s11607_s20 = scalar_lea.vmem %s17362_s5, %s9047_s30 }
  0x1b   : > { %s8891_s18 = sshll.u32 %s11565_s24, 1  ;;  %s11622_s2 = scalar_lea.vmem %s17368_s11, %s9046_s25 }
  0x1c   : > { %s11585_s16 = scalar_lea.vmem %s17508_s4, %s11565_s24  ;;  %s11613_s19 = scalar_lea.vmem %s17364_s7, %s8891_s18 }
  0x1d   : > { %s11590_s27 = scalar_lea.vmem %s17509_s1, %s9121_s29  ;;  %551 = sbr.rel (%p8894_p7) target bundleno = 99 (0x63), region = 68 }
  0x1e   : > { %s11595_s22 = scalar_lea.vmem %s17510_s3, %s9121_s29  ;;  %s526_s29 = scalar_lea.vmem %s17365_s8, %s11565_s24 }
  0x22   : > { %vm552_vm2 = vcmask 261120   ;;  %v11464_v6 = vmov 0.0   ;;  %v569_v7 = vld [vmem:[%s11570_s28] sm:$0xff]  ;;  %v570_v8 = vld [vmem:[%s11570_s28 + $0x8] sm:$0xff]  ;;  %v571_v10 = vld [vmem:[%s11570_s28 + $0x10] sm:$0xff]  ;;  %vm633_vm3 = vcmask 1040384  }
  0x23   : > { %553 = vst.msk [vmem:[#allocation2] sm:$0xff] %vm552_vm2, %v11464_v6  ;;  %v634_v9 = vrot.slane %v569_v7, 7  ;;  %v635_v11 = vrot.slane %v570_v8, 7  ;;  %v572_v12 = vld [vmem:[%s11570_s28 + $0x18] sm:$0xff]  ;;  %v637_v13 = vrot.slane %v571_v10, 7  ;;  %v573_v14 = vld [vmem:[%s11570_s28 + $0x20] sm:$0xff] }
  0x24   : > { %554 = vst.msk [vmem:[#allocation2 + $0x8] sm:$0xff] %vm552_vm2, %v11464_v6  ;;  %v638_v16 = vrot.slane %v572_v12, 7  ;;  %v574_v17 = vld [vmem:[%s11570_s28 + $0x28] sm:$0xff]  ;;  %v640_v20 = vrot.slane %v573_v14, 7  ;;  %v575_v21 = vld [vmem:[%s11570_s28 + $0x30] sm:$0xff]  ;;  %v576_v24 = vld [vmem:[%s11570_s28 + $0x38] sm:$0xff] }
  0x25   : > { %555 = vst.msk [vmem:[#allocation2 + $0x10] sm:$0xff] %vm552_vm2, %v11464_v6  ;;  %v730_v15 = vsel %vm633_vm3, 0.0, %v634_v9  ;;  %v636_v18 = vsel %vm633_vm3, %v634_v9, %v635_v11  ;;  %v746_v19 = vsel %vm633_vm3, %v635_v11, 0.0  ;;  %v731_v22 = vsel %vm633_vm3, 0.0, %v637_v13  ;;  %v577_v28 = vld [vmem:[%s11570_s28 + $0x40] sm:$0xff]  ;;  %v578_v31 = vld [vmem:[%s11570_s28 + $0x48] sm:$0xff] }
  0x26   : > { %556 = vst.msk [vmem:[#allocation2 + $0x18] sm:$0xff] %vm552_vm2, %v11464_v6  ;;  %v641_v23 = vrot.slane %v574_v17, 7  ;;  %v639_v25 = vsel %vm633_vm3, %v637_v13, %v638_v16  ;;  %v747_v26 = vsel %vm633_vm3, %v638_v16, 0.0  ;;  %v643_v27 = vrot.slane %v575_v21, 7  ;;  %v579_v35 = vld [vmem:[%s11570_s28 + $0x50] sm:$0xff]  ;;  %v580_v38 = vld [vmem:[%s11570_s28 + $0x58] sm:$0xff] }
  0x27   : > { %557 = vst.msk [vmem:[#allocation2 + $0x1a0] sm:$0xff] %vm552_vm2, %v11464_v6  ;;  %v732_v29 = vsel %vm633_vm3, 0.0, %v640_v20  ;;  %v644_v30 = vrot.slane %v576_v24, 7  ;;  %v646_v34 = vrot.slane %v577_v28, 7  ;;  %v647_v37 = vrot.slane %v578_v31, 7  ;;  %v581_v42 = vld [vmem:[%s11570_s28 + $0x60] sm:$0xff] }
  0x28   : > { %558 = vst.msk [vmem:[#allocation2 + $0x1a8] sm:$0xff] %vm552_vm2, %v11464_v6  ;;  %v642_v32 = vsel %vm633_vm3, %v640_v20, %v641_v23  ;;  %v748_v33 = vsel %vm633_vm3, %v641_v23, 0.0  ;;  %v733_v36 = vsel %vm633_vm3, 0.0, %v643_v27  ;;  %v649_v41 = vrot.slane %v579_v35, 7  ;;  %v582_v45 = vld [vmem:[%s11570_s28 + $0x68] sm:$0xff]  ;;  %v583_v49 = vld [vmem:[%s11570_s28 + $0x70] sm:$0xff] }
  0x29   : > { %559 = vst.msk [vmem:[#allocation2 + $0x1b0] sm:$0xff] %vm552_vm2, %v11464_v6  ;;  %v645_v39 = vsel %vm633_vm3, %v643_v27, %v644_v30  ;;  %v749_v40 = vsel %vm633_vm3, %v644_v30, 0.0  ;;  %v734_v43 = vsel %vm633_vm3, 0.0, %v646_v34  ;;  %v650_v44 = vrot.slane %v580_v38, 7  ;;  %v584_v52 = vld [vmem:[%s11570_s28 + $0x78] sm:$0xff]  ;;  %v585_v56 = vld [vmem:[%s11570_s28 + $0x80] sm:$0xff] }
  0x2a   : > { %560 = vst.msk [vmem:[#allocation2 + $0x1b8] sm:$0xff] %vm552_vm2, %v11464_v6  ;;  %v648_v46 = vsel %vm633_vm3, %v646_v34, %v647_v37  ;;  %v750_v47 = vsel %vm633_vm3, %v647_v37, 0.0  ;;  %v652_v48 = vrot.slane %v581_v42, 7  ;;  %v735_v50 = vsel %vm633_vm3, 0.0, %v649_v41  ;;  %v586_v59 = vld [vmem:[%s11570_s28 + $0x88] sm:$0xff]  ;;  %v587_v63 = vld [vmem:[%s11570_s28 + $0x90] sm:$0xff] }
  0x2b   : > { %561 = vst.msk [vmem:[#allocation3] sm:$0xff] %vm552_vm2, %v11464_v6  ;;  %v653_v51 = vrot.slane %v582_v45, 7  ;;  %v651_v53 = vsel %vm633_vm3, %v649_v41, %v650_v44  ;;  %v751_v54 = vsel %vm633_vm3, %v650_v44, 0.0  ;;  %v655_v55 = vrot.slane %v583_v49, 7  ;;  %v588_v2 = vld [vmem:[%s11570_s28 + $0x98] sm:$0xff]  ;;  %v589_v8 = vld [vmem:[%s11570_s28 + $0xa0] sm:$0xff] }
  0x2c   : > { %562 = vst.msk [vmem:[#allocation3 + $0x8] sm:$0xff] %vm552_vm2, %v11464_v6  ;;  %v736_v57 = vsel %vm633_vm3, 0.0, %v652_v48  ;;  %v656_v58 = vrot.slane %v584_v52, 7  ;;  %v658_v62 = vrot.slane %v585_v56, 7  ;;  %v659_v1 = vrot.slane %v586_v59, 7  ;;  %v590_v11 = vld [vmem:[%s11570_s28 + $0xa8] sm:$0xff] }
  0x2d   : > { %563 = vst.msk [vmem:[#allocation3 + $0x10] sm:$0xff] %vm552_vm2, %v11464_v6  ;;  %v654_v60 = vsel %vm633_vm3, %v652_v48, %v653_v51  ;;  %v752_v61 = vsel %vm633_vm3, %v653_v51, 0.0  ;;  %v737_v0 = vsel %vm633_vm3, 0.0, %v655_v55  ;;  %v661_v7 = vrot.slane %v587_v63, 7 }
  0x2e   : > { %564 = vst.msk [vmem:[#allocation3 + $0x18] sm:$0xff] %vm552_vm2, %v11464_v6  ;;  %v657_v3 = vsel %vm633_vm3, %v655_v55, %v656_v58  ;;  %v738_v9 = vsel %vm633_vm3, 0.0, %v658_v62  ;;  %v662_v10 = vrot.slane %v588_v2, 7  ;;  %v660_v12 = vsel %vm633_vm3, %v658_v62, %v659_v1 }
  0x2f   : > { %565 = vst.msk [vmem:[#allocation3 + $0x1a0] sm:$0xff] %vm552_vm2, %v11464_v6  ;;  %v754_v13 = vsel %vm633_vm3, %v659_v1, 0.0  ;;  %v664_v14 = vrot.slane %v589_v8, 7  ;;  %v739_v16 = vsel %vm633_vm3, 0.0, %v661_v7  ;;  %v665_v17 = vrot.slane %v590_v11, 7 }
  0x30   : > { %566 = vst.msk [vmem:[#allocation3 + $0x1a8] sm:$0xff] %vm552_vm2, %v11464_v6  ;;  %v755_v20 = vsel %vm633_vm3, %v662_v10, 0.0 }
  0x31   : > { %567 = vst.msk [vmem:[#allocation3 + $0x1b0] sm:$0xff] %vm552_vm2, %v11464_v6  ;;  %v740_v23 = vsel %vm633_vm3, 0.0, %v664_v14  ;;  %v756_v27 = vsel %vm633_vm3, %v665_v17, 0.0 }
  0x32   : > { %568 = vst.msk [vmem:[#allocation3 + $0x1b8] sm:$0xff] %vm552_vm2, %v11464_v6  ;;  %v753_v6 = vsel %vm633_vm3, %v656_v58, 0.0 }
  0x33   : > { %763 = vst.msk [vmem:[#allocation2 + $0x20] sm:$0xff] %vm552_vm2, %v730_v15  ;;  %v591_v15 = vld [vmem:[%s11570_s28 + $0xb0] sm:$0xff] }
  0x34   : > { %764 = vst.msk [vmem:[#allocation2 + $0x28] sm:$0xff] %vm552_vm2, %v636_v18  ;;  %v592_v18 = vld [vmem:[%s11570_s28 + $0xb8] sm:$0xff]  ;;  %v667_v21 = vrot.slane %v591_v15, 7 }
  0x35   : > { %765 = vst.msk [vmem:[#allocation2 + $0x30] sm:$0xff] %vm552_vm2, %v746_v19  ;;  %v663_v19 = vsel %vm633_vm3, %v661_v7, %v662_v10  ;;  %v668_v24 = vrot.slane %v592_v18, 7 }
  0x36   : > { %766 = vst.msk [vmem:[#allocation2 + $0x38] sm:$0xff] %vm552_vm2, %v731_v22  ;;  %v593_v22 = vld [vmem:[%s11570_s28 + $0xc0] sm:$0xff]  ;;  %v741_v30 = vsel %vm633_vm3, 0.0, %v667_v21 }
  0x37   : > { %767 = vst.msk [vmem:[#allocation2 + $0x40] sm:$0xff] %vm552_vm2, %v639_v25  ;;  %v594_v25 = vld [vmem:[%s11570_s28 + $0xc8] sm:$0xff]  ;;  %v670_v28 = vrot.slane %v593_v22, 7  ;;  %v757_v34 = vsel %vm633_vm3, %v668_v24, 0.0 }
  0x38   : > { %768 = vst.msk [vmem:[#allocation2 + $0x48] sm:$0xff] %vm552_vm2, %v747_v26  ;;  %v666_v26 = vsel %vm633_vm3, %v664_v14, %v665_v17  ;;  %v671_v31 = vrot.slane %v594_v25, 7 }
  0x39   : > { %769 = vst.msk [vmem:[#allocation2 + $0x50] sm:$0xff] %vm552_vm2, %v732_v29  ;;  %v595_v29 = vld [vmem:[%s11570_s28 + $0xd0] sm:$0xff]  ;;  %v742_v37 = vsel %vm633_vm3, 0.0, %v670_v28 }
  0x3a   : > { %770 = vst.msk [vmem:[#allocation2 + $0x58] sm:$0xff] %vm552_vm2, %v642_v32  ;;  %v596_v32 = vld [vmem:[%s11570_s28 + $0xd8] sm:$0xff]  ;;  %v673_v35 = vrot.slane %v595_v29, 7  ;;  %v758_v41 = vsel %vm633_vm3, %v671_v31, 0.0 }
  0x3b   : > { %771 = vst.msk [vmem:[#allocation2 + $0x60] sm:$0xff] %vm552_vm2, %v748_v33  ;;  %v669_v33 = vsel %vm633_vm3, %v667_v21, %v668_v24  ;;  %v674_v38 = vrot.slane %v596_v32, 7 }
  0x3c   : > { %772 = vst.msk [vmem:[#allocation2 + $0x68] sm:$0xff] %vm552_vm2, %v733_v36  ;;  %v597_v36 = vld [vmem:[%s11570_s28 + $0xe0] sm:$0xff]  ;;  %v743_v44 = vsel %vm633_vm3, 0.0, %v673_v35 }
  0x3d   : > { %773 = vst.msk [vmem:[#allocation2 + $0x70] sm:$0xff] %vm552_vm2, %v645_v39  ;;  %v598_v39 = vld [vmem:[%s11570_s28 + $0xe8] sm:$0xff]  ;;  %v676_v42 = vrot.slane %v597_v36, 7  ;;  %v759_v48 = vsel %vm633_vm3, %v674_v38, 0.0 }
  0x3e   : > { %774 = vst.msk [vmem:[#allocation2 + $0x78] sm:$0xff] %vm552_vm2, %v749_v40  ;;  %v672_v40 = vsel %vm633_vm3, %v670_v28, %v671_v31  ;;  %v677_v45 = vrot.slane %v598_v39, 7 }
  0x3f   : > { %775 = vst.msk [vmem:[#allocation2 + $0x80] sm:$0xff] %vm552_vm2, %v734_v43  ;;  %v599_v43 = vld [vmem:[%s11570_s28 + $0xf0] sm:$0xff] }
  0x40   : > { %776 = vst.msk [vmem:[#allocation2 + $0x88] sm:$0xff] %vm552_vm2, %v648_v46  ;;  %v600_v46 = vld [vmem:[%s11570_s28 + $0xf8] sm:$0xff]  ;;  %v679_v49 = vrot.slane %v599_v43, 7  ;;  %v678_v52 = vsel %vm633_vm3, %v676_v42, %v677_v45 }
  0x41   : > { %777 = vst.msk [vmem:[#allocation2 + $0x90] sm:$0xff] %vm552_vm2, %v750_v47  ;;  %v675_v47 = vsel %vm633_vm3, %v673_v35, %v674_v38  ;;  %v680_v51 = vrot.slane %v600_v46, 7 }
  0x42   : > { %778 = vst.msk [vmem:[#allocation2 + $0x98] sm:$0xff] %vm552_vm2, %v735_v50  ;;  %v744_v50 = vsel %vm633_vm3, 0.0, %v676_v42 }
  0x43   : > { %779 = vst.msk [vmem:[#allocation2 + $0xa0] sm:$0xff] %vm552_vm2, %v651_v53  ;;  %v760_v53 = vsel %vm633_vm3, %v677_v45, 0.0  ;;  %v681_v55 = vsel %vm633_vm3, %v679_v49, %v680_v51  ;;  %v761_v56 = vsel %vm633_vm3, %v680_v51, 0.0 }
  0x44   : > { %780 = vst.msk [vmem:[#allocation2 + $0xa8] sm:$0xff] %vm552_vm2, %v751_v54  ;;  %v745_v54 = vsel %vm633_vm3, 0.0, %v679_v49 }
  0x45   : > { %781 = vst.msk [vmem:[#allocation2 + $0xb0] sm:$0xff] %vm552_vm2, %v736_v57 }
  0x46   : > { %782 = vst.msk [vmem:[#allocation2 + $0xb8] sm:$0xff] %vm552_vm2, %v654_v60 }
  0x47   : > { %783 = vst.msk [vmem:[#allocation2 + $0xc0] sm:$0xff] %vm552_vm2, %v752_v61 }
  0x48   : > { %784 = vst.msk [vmem:[#allocation2 + $0xc8] sm:$0xff] %vm552_vm2, %v737_v0 }
  0x49   : > { %785 = vst.msk [vmem:[#allocation2 + $0xd0] sm:$0xff] %vm552_vm2, %v657_v3 }
  0x4a   : > { %786 = vst.msk [vmem:[#allocation2 + $0xd8] sm:$0xff] %vm552_vm2, %v753_v6 }
  0x4b   : > { %787 = vst.msk [vmem:[#allocation2 + $0xe0] sm:$0xff] %vm552_vm2, %v738_v9 }
  0x4c   : > { %788 = vst.msk [vmem:[#allocation2 + $0xe8] sm:$0xff] %vm552_vm2, %v660_v12 }
  0x4d   : > { %789 = vst.msk [vmem:[#allocation2 + $0xf0] sm:$0xff] %vm552_vm2, %v754_v13 }
  0x4e   : > { %790 = vst.msk [vmem:[#allocation2 + $0xf8] sm:$0xff] %vm552_vm2, %v739_v16 }
  0x4f   : > { %791 = vst.msk [vmem:[#allocation2 + $0x100] sm:$0xff] %vm552_vm2, %v663_v19 }
  0x50   : > { %792 = vst.msk [vmem:[#allocation2 + $0x108] sm:$0xff] %vm552_vm2, %v755_v20 }
  0x51   : > { %793 = vst.msk [vmem:[#allocation2 + $0x110] sm:$0xff] %vm552_vm2, %v740_v23 }
  0x52   : > { %794 = vst.msk [vmem:[#allocation2 + $0x118] sm:$0xff] %vm552_vm2, %v666_v26 }
  0x53   : > { %795 = vst.msk [vmem:[#allocation2 + $0x120] sm:$0xff] %vm552_vm2, %v756_v27 }
  0x54   : > { %796 = vst.msk [vmem:[#allocation2 + $0x128] sm:$0xff] %vm552_vm2, %v741_v30 }
  0x55   : > { %797 = vst.msk [vmem:[#allocation2 + $0x130] sm:$0xff] %vm552_vm2, %v669_v33 }
  0x56   : > { %798 = vst.msk [vmem:[#allocation2 + $0x138] sm:$0xff] %vm552_vm2, %v757_v34 }
  0x57   : > { %799 = vst.msk [vmem:[#allocation2 + $0x140] sm:$0xff] %vm552_vm2, %v742_v37 }
  0x58   : > { %800 = vst.msk [vmem:[#allocation2 + $0x148] sm:$0xff] %vm552_vm2, %v672_v40 }
  0x59   : > { %801 = vst.msk [vmem:[#allocation2 + $0x150] sm:$0xff] %vm552_vm2, %v758_v41 }
  0x5a   : > { %802 = vst.msk [vmem:[#allocation2 + $0x158] sm:$0xff] %vm552_vm2, %v743_v44 }
  0x5b   : > { %803 = vst.msk [vmem:[#allocation2 + $0x160] sm:$0xff] %vm552_vm2, %v675_v47 }
  0x5c   : > { %804 = vst.msk [vmem:[#allocation2 + $0x168] sm:$0xff] %vm552_vm2, %v759_v48 }
  0x5d   : > { %805 = vst.msk [vmem:[#allocation2 + $0x170] sm:$0xff] %vm552_vm2, %v744_v50 }
  0x5e   : > { %806 = vst.msk [vmem:[#allocation2 + $0x178] sm:$0xff] %vm552_vm2, %v678_v52 }
  0x5f   : > { %807 = vst.msk [vmem:[#allocation2 + $0x180] sm:$0xff] %vm552_vm2, %v760_v53 }
  0x60   : > { %808 = vst.msk [vmem:[#allocation2 + $0x188] sm:$0xff] %vm552_vm2, %v745_v54 }
  0x61   : > { %809 = vst.msk [vmem:[#allocation2 + $0x190] sm:$0xff] %vm552_vm2, %v681_v55 }
  0x62   : > { %810 = vst.msk [vmem:[#allocation2 + $0x198] sm:$0xff] %vm552_vm2, %v761_v56 }
  0x63 PF: > { %v942_v57 = vld [vmem:[#allocation2 + $0x48] sm:$0xff]  ;;  %v943_v58 = vld [vmem:[#allocation2 + $0x50] sm:$0xff]  ;;  %s11465_s1 = smov 32   ;;  %v944_v2 = vld [vmem:[#allocation2 + $0x58] sm:$0xff]  ;;  %s11466_s3 = smov 64   ;;  %vm2472_vm4 = vcmask 261120  }
  0x64   : > { %v938_v59 = vld [vmem:[#allocation2 + $0x28] sm:$0xff]  ;;  %v9190_v60 = vpack.i.bf16 %v943_v58, %v942_v57  ;;  %v939_v61 = vld [vmem:[#allocation2 + $0x30] sm:$0xff]  ;;  %v945_v3 = vld [vmem:[#allocation2 + $0x60] sm:$0xff]  ;;  %s11467_s4 = smov 96   ;;  %vm2521_vm5 = vcmask 523264   ;;  %vm2570_vm6 = vcmask 785408  }
  0x65   : > { %v934_v62 = vld [vmem:[#allocation2 + $0x8] sm:$0xff]  ;;  %v935_v63 = vld [vmem:[#allocation2 + $0x10] sm:$0xff]  ;;  %v9180_v0 = vpack.i.bf16 %v939_v61, %v938_v59  ;;  %v940_v6 = vld [vmem:[#allocation2 + $0x38] sm:$0xff]  ;;  %v9195_v10 = vpack.i.bf16 %v945_v3, %v944_v2  ;;  %vm5961_vm7 = vcmask 1041408   ;;  %vm5957_vm8 = vcmask 15360   ;;  %p8995_p8 = scmp.ne.s32.totalorder %s11445_s17, 1 }
  0x66   : > { %v9170_v1 = vpack.i.bf16 %v935_v63, %v934_v62  ;;  %9191 = vrot.lane.b32.xlu2 %v9190_v60, %s11465_s1  ;;  %v941_v7 = vld [vmem:[#allocation2 + $0x40] sm:$0xff]  ;;  %v936_v8 = vld [vmem:[#allocation2 + $0x18] sm:$0xff]  ;;  %v950_v13 = vld [vmem:[#allocation2 + $0x88] sm:$0xff] }
  0x67   : > { %9181 = vrot.lane.b32.xlu1 %v9180_v0, %s11465_s1  ;;  %v937_v9 = vld [vmem:[#allocation2 + $0x20] sm:$0xff]  ;;  %v9185_v11 = vpack.i.bf16 %v941_v7, %v940_v6  ;;  %v951_v14 = vld [vmem:[#allocation2 + $0x90] sm:$0xff]  ;;  %v948_v15 = vld [vmem:[#allocation2 + $0x78] sm:$0xff] }
  0x68   : > { %9171 = vrot.lane.b32.xlu0 %v9170_v1, %s11465_s1  ;;  %v9175_v12 = vpack.i.bf16 %v937_v9, %v936_v8  ;;  %v949_v16 = vld [vmem:[#allocation2 + $0x80] sm:$0xff]  ;;  %v946_v17 = vld [vmem:[#allocation2 + $0x68] sm:$0xff]  ;;  %v947_v18 = vld [vmem:[#allocation2 + $0x70] sm:$0xff]  ;;  %v9210_v19 = vpack.i.bf16 %v951_v14, %v950_v13 }
  0x69   : > { %v9205_v20 = vpack.i.bf16 %v949_v16, %v948_v15  ;;  %v9200_v21 = vpack.i.bf16 %v947_v18, %v946_v17  ;;  %v956_v22 = vld [vmem:[#allocation2 + $0xb8] sm:$0xff]  ;;  %v957_v23 = vld [vmem:[#allocation2 + $0xc0] sm:$0xff]  ;;  %v954_v24 = vld [vmem:[#allocation2 + $0xa8] sm:$0xff] }
  0x6a   : > { %v955_v25 = vld [vmem:[#allocation2 + $0xb0] sm:$0xff]  ;;  %v952_v26 = vld [vmem:[#allocation2 + $0x98] sm:$0xff]  ;;  %v953_v27 = vld [vmem:[#allocation2 + $0xa0] sm:$0xff]  ;;  %v9225_v28 = vpack.i.bf16 %v957_v23, %v956_v22 }
  0x6b   : > { %v9220_v29 = vpack.i.bf16 %v955_v25, %v954_v24  ;;  %v9215_v30 = vpack.i.bf16 %v953_v27, %v952_v26  ;;  %v962_v31 = vld [vmem:[#allocation2 + $0xe8] sm:$0xff]  ;;  %v963_v32 = vld [vmem:[#allocation2 + $0xf0] sm:$0xff]  ;;  %v960_v33 = vld [vmem:[#allocation2 + $0xd8] sm:$0xff] }
  0x6c   : > { %v961_v34 = vld [vmem:[#allocation2 + $0xe0] sm:$0xff]  ;;  %v958_v35 = vld [vmem:[#allocation2 + $0xc8] sm:$0xff]  ;;  %v959_v36 = vld [vmem:[#allocation2 + $0xd0] sm:$0xff]  ;;  %v9240_v37 = vpack.i.bf16 %v963_v32, %v962_v31 }
  0x6d   : > { %v9235_v38 = vpack.i.bf16 %v961_v34, %v960_v33  ;;  %v9230_v39 = vpack.i.bf16 %v959_v36, %v958_v35  ;;  %v968_v40 = vld [vmem:[#allocation2 + $0x118] sm:$0xff]  ;;  %v969_v41 = vld [vmem:[#allocation2 + $0x120] sm:$0xff]  ;;  %v966_v42 = vld [vmem:[#allocation2 + $0x108] sm:$0xff] }
  0x6e   : > { %9196 = vrot.lane.b32.xlu2 %v9195_v10, %s11465_s1  ;;  %v967_v43 = vld [vmem:[#allocation2 + $0x110] sm:$0xff]  ;;  %v964_v44 = vld [vmem:[#allocation2 + $0xf8] sm:$0xff]  ;;  %v965_v45 = vld [vmem:[#allocation2 + $0x100] sm:$0xff]  ;;  %v9255_v46 = vpack.i.bf16 %v969_v41, %v968_v40 }
  0x6f   : > { %9186 = vrot.lane.b32.xlu1 %v9185_v11, %s11465_s1  ;;  %v9250_v47 = vpack.i.bf16 %v967_v43, %v966_v42  ;;  %v9245_v48 = vpack.i.bf16 %v965_v45, %v964_v44  ;;  %v974_v49 = vld [vmem:[#allocation2 + $0x148] sm:$0xff]  ;;  %v975_v50 = vld [vmem:[#allocation2 + $0x150] sm:$0xff]  ;;  %v972_v51 = vld [vmem:[#allocation2 + $0x138] sm:$0xff] }
  0x70   : > { %9176 = vrot.lane.b32.xlu0 %v9175_v12, %s11465_s1  ;;  %v973_v52 = vld [vmem:[#allocation2 + $0x140] sm:$0xff]  ;;  %v970_v53 = vld [vmem:[#allocation2 + $0x128] sm:$0xff]  ;;  %v971_v54 = vld [vmem:[#allocation2 + $0x130] sm:$0xff]  ;;  %v9270_v55 = vpack.i.bf16 %v975_v50, %v974_v49 }
  0x71   : > { %v9265_v56 = vpack.i.bf16 %v973_v52, %v972_v51  ;;  %v9260_v57 = vpack.i.bf16 %v971_v54, %v970_v53  ;;  %v980_v58 = vld [vmem:[#allocation2 + $0x178] sm:$0xff]  ;;  %v981_v59 = vld [vmem:[#allocation2 + $0x180] sm:$0xff]  ;;  %v978_v60 = vld [vmem:[#allocation2 + $0x168] sm:$0xff] }
  0x72   : > { %v979_v61 = vld [vmem:[#allocation2 + $0x170] sm:$0xff]  ;;  %v976_v62 = vld [vmem:[#allocation2 + $0x158] sm:$0xff]  ;;  %v977_v63 = vld [vmem:[#allocation2 + $0x160] sm:$0xff]  ;;  %v9285_v0 = vpack.i.bf16 %v981_v59, %v980_v58 }
  0x73   : > { %v9280_v1 = vpack.i.bf16 %v979_v61, %v978_v60  ;;  %v9275_v2 = vpack.i.bf16 %v977_v63, %v976_v62  ;;  %v11793_v3 = vld [vmem:[#allocation2 + $0x29] sm:$0xff]  ;;  %v11795_v6 = vld [vmem:[#allocation2 + $0x31] sm:$0xff]  ;;  %v984_v7 = vld [vmem:[#allocation2 + $0x19] sm:$0xff] }
  0x74   : > { %v11797_v8 = vld [vmem:[#allocation2 + $0x21] sm:$0xff]  ;;  %v982_v9 = vld [vmem:[#allocation2 + $0x9] sm:$0xff]  ;;  %v983_v10 = vld [vmem:[#allocation2 + $0x11] sm:$0xff]  ;;  %v9300_v11 = vpack.i.bf16 %v11795_v6, %v11793_v3 }
  0x75   : > { %v9295_v12 = vpack.i.bf16 %v11797_v8, %v984_v7  ;;  %v9290_v13 = vpack.i.bf16 %v983_v10, %v982_v9  ;;  %v11805_v14 = vld [vmem:[#allocation2 + $0x59] sm:$0xff]  ;;  %v11807_v15 = vld [vmem:[#allocation2 + $0x61] sm:$0xff]  ;;  %v11809_v16 = vld [vmem:[#allocation2 + $0x49] sm:$0xff] }
  0x76   : > { %9211 = vrot.lane.b32.xlu2 %v9210_v19, %s11465_s1  ;;  %v11811_v17 = vld [vmem:[#allocation2 + $0x51] sm:$0xff]  ;;  %v11813_v18 = vld [vmem:[#allocation2 + $0x39] sm:$0xff]  ;;  %v11815_v19 = vld [vmem:[#allocation2 + $0x41] sm:$0xff] }
  0x77   : > { %9206 = vrot.lane.b32.xlu1 %v9205_v20, %s11465_s1  ;;  %v9315_v20 = vpack.i.bf16 %v11807_v15, %v11805_v14  ;;  %v9305_v22 = vpack.i.bf16 %v11815_v19, %v11813_v18  ;;  %v11826_v23 = vld [vmem:[#allocation2 + $0x89] sm:$0xff]  ;;  %v11828_v24 = vld [vmem:[#allocation2 + $0x91] sm:$0xff]  ;;  %v11830_v25 = vld [vmem:[#allocation2 + $0x79] sm:$0xff] }
  0x78   : > { %9201 = vrot.lane.b32.xlu0 %v9200_v21, %s11465_s1  ;;  %v9310_v21 = vpack.i.bf16 %v11811_v17, %v11809_v16  ;;  %v11832_v26 = vld [vmem:[#allocation2 + $0x81] sm:$0xff]  ;;  %v11834_v27 = vld [vmem:[#allocation2 + $0x69] sm:$0xff]  ;;  %v11847_v32 = vld [vmem:[#allocation2 + $0xb9] sm:$0xff] }
  0x79   : > { %v11849_v33 = vld [vmem:[#allocation2 + $0xc1] sm:$0xff]  ;;  %v11851_v34 = vld [vmem:[#allocation2 + $0xa9] sm:$0xff]  ;;  %v11853_v35 = vld [vmem:[#allocation2 + $0xb1] sm:$0xff] }
  0x7a   : > { %v11855_v36 = vld [vmem:[#allocation2 + $0x99] sm:$0xff]  ;;  %v11868_v41 = vld [vmem:[#allocation2 + $0xe9] sm:$0xff]  ;;  %v11870_v42 = vld [vmem:[#allocation2 + $0xf1] sm:$0xff] }
  0x7b   : > { %v11872_v43 = vld [vmem:[#allocation2 + $0xd9] sm:$0xff]  ;;  %v11876_v45 = vld [vmem:[#allocation2 + $0xe1] sm:$0xff]  ;;  %v11895_v53 = vld [vmem:[#allocation2 + $0x109] sm:$0xff] }
  0x7c   : > { %v9355_v49 = vpack.i.bf16 %v11876_v45, %v11872_v43  ;;  %v11891_v51 = vld [vmem:[#allocation2 + $0x119] sm:$0xff]  ;;  %v11893_v52 = vld [vmem:[#allocation2 + $0x121] sm:$0xff]  ;;  %v11914_v61 = vld [vmem:[#allocation2 + $0x149] sm:$0xff] }
  0x7d   : > { %v9375_v58 = vpack.i.bf16 %v11893_v52, %v11891_v51  ;;  %v11916_v62 = vld [vmem:[#allocation2 + $0x151] sm:$0xff]  ;;  %v11918_v63 = vld [vmem:[#allocation2 + $0x139] sm:$0xff] }
  0x7e   : > { %9226 = vrot.lane.b32.xlu2 %v9225_v28, %s11465_s1  ;;  %v11836_v28 = vld [vmem:[#allocation2 + $0x71] sm:$0xff]  ;;  %v9390_v9 = vpack.i.bf16 %v11916_v62, %v11914_v61 }
  0x7f   : > { %9221 = vrot.lane.b32.xlu1 %v9220_v29, %s11465_s1  ;;  %v9330_v29 = vpack.i.bf16 %v11828_v24, %v11826_v23  ;;  %v9320_v31 = vpack.i.bf16 %v11836_v28, %v11834_v27  ;;  %v11926_v7 = vld [vmem:[#allocation2 + $0x131] sm:$0xff] }
  0x80   : > { %9216 = vrot.lane.b32.xlu0 %v9215_v30, %s11465_s1  ;;  %v9325_v30 = vpack.i.bf16 %v11832_v26, %v11830_v25  ;;  %v11988_v4 = vld [vmem:[#allocation2 + $0x6f] sm:$0xff] }
  0x81   : > { %17523 = vst [vmem:[#allocation23_spill] sm:$0xff] %v11988_v4 }
  0x86   : > { %9241 = vrot.lane.b32.xlu2 %v9240_v37, %s11465_s1  ;;  %v11857_v37 = vld [vmem:[#allocation2 + $0xa1] sm:$0xff] }
  0x87   : > { %9236 = vrot.lane.b32.xlu1 %v9235_v38, %s11465_s1  ;;  %v9345_v38 = vpack.i.bf16 %v11849_v33, %v11847_v32  ;;  %v9335_v40 = vpack.i.bf16 %v11857_v37, %v11855_v36 }
  0x88   : > { %9231 = vrot.lane.b32.xlu0 %v9230_v39, %s11465_s1  ;;  %v9340_v39 = vpack.i.bf16 %v11853_v35, %v11851_v34 }
  0x8e   : > { %9256 = vrot.lane.b32.xlu2 %v9255_v46, %s11465_s1  ;;  %v11878_v46 = vld [vmem:[#allocation2 + $0xc9] sm:$0xff] }
  0x8f   : > { %9251 = vrot.lane.b32.xlu1 %v9250_v47, %s11465_s1  ;;  %v11880_v47 = vld [vmem:[#allocation2 + $0xd1] sm:$0xff] }
  0x90   : > { %9246 = vrot.lane.b32.xlu0 %v9245_v48, %s11465_s1  ;;  %v9360_v48 = vpack.i.bf16 %v11870_v42, %v11868_v41  ;;  %v9350_v50 = vpack.i.bf16 %v11880_v47, %v11878_v46 }
  0x96   : > { %9271 = vrot.lane.b32.xlu2 %v9270_v55, %s11465_s1  ;;  %v11899_v55 = vld [vmem:[#allocation2 + $0x111] sm:$0xff] }
  0x97   : > { %9266 = vrot.lane.b32.xlu1 %v9265_v56, %s11465_s1  ;;  %v11901_v56 = vld [vmem:[#allocation2 + $0xf9] sm:$0xff]  ;;  %v9370_v59 = vpack.i.bf16 %v11899_v55, %v11895_v53 }
  0x98   : > { %9261 = vrot.lane.b32.xlu0 %v9260_v57, %s11465_s1  ;;  %v11903_v57 = vld [vmem:[#allocation2 + $0x101] sm:$0xff] }
  0x99   : > { %v9365_v60 = vpack.i.bf16 %v11903_v57, %v11901_v56 }
  0x9e   : > { %9286 = vrot.lane.b32.xlu2 %v9285_v0, %s11465_s1 }
  0x9f   : > { %9281 = vrot.lane.b32.xlu1 %v9280_v1, %s11465_s1  ;;  %v11922_v1 = vld [vmem:[#allocation2 + $0x141] sm:$0xff] }
  0xa0   : > { %9276 = vrot.lane.b32.xlu0 %v9275_v2, %s11465_s1  ;;  %v11924_v2 = vld [vmem:[#allocation2 + $0x129] sm:$0xff]  ;;  %v9385_v10 = vpack.i.bf16 %v11922_v1, %v11918_v63 }
  0xa6   : > { %9301 = vrot.lane.b32.xlu2 %v9300_v11, %s11466_s3  ;;  %v9380_v11 = vpack.i.bf16 %v11926_v7, %v11924_v2 }
  0xa7   : > { %9296 = vrot.lane.b32.xlu1 %v9295_v12, %s11466_s3  ;;  %v11937_v12 = vld [vmem:[#allocation2 + $0x179] sm:$0xff] }
  0xa8   : > { %9291 = vrot.lane.b32.xlu0 %v9290_v13, %s11466_s3  ;;  %v11939_v13 = vld [vmem:[#allocation2 + $0x181] sm:$0xff] }
  0xae   : > { %9316 = vrot.lane.b32.xlu2 %v9315_v20, %s11466_s3  ;;  %v11941_v20 = vld [vmem:[#allocation2 + $0x169] sm:$0xff] }
  0xaf   : > { %9311 = vrot.lane.b32.xlu1 %v9310_v21, %s11466_s3 }
  0xb0   : > { %9306 = vrot.lane.b32.xlu0 %v9305_v22, %s11466_s3  ;;  %v11945_v22 = vld [vmem:[#allocation2 + $0x171] sm:$0xff] }
  0xb6   : > { %9331 = vrot.lane.b32.xlu2 %v9330_v29, %s11466_s3  ;;  %v11947_v29 = vld [vmem:[#allocation2 + $0x159] sm:$0xff] }
  0xb7   : > { %9326 = vrot.lane.b32.xlu1 %v9325_v30, %s11466_s3  ;;  %v11949_v30 = vld [vmem:[#allocation2 + $0x161] sm:$0xff] }
  0xb8   : > { %9321 = vrot.lane.b32.xlu0 %v9320_v31, %s11466_s3 }
  0xbe   : > { %9346 = vrot.lane.b32.xlu2 %v9345_v38, %s11466_s3 }
  0xbf   : > { %9341 = vrot.lane.b32.xlu1 %v9340_v39, %s11466_s3  ;;  %v9405_v39 = vpack.i.bf16 %v11939_v13, %v11937_v12 }
  0xc0   : > { %9336 = vrot.lane.b32.xlu0 %v9335_v40, %s11466_s3  ;;  %v11874_v44 = vpop.permute.xlu2 %9191  ;;  %v9400_v40 = vpack.i.bf16 %v11945_v22, %v11941_v20 }
  0xc1   : > { %17512 = vst [vmem:[#allocation12_spill] sm:$0xff] %v11874_v44  ;;  %v12000_v44 = vld [vmem:[#allocation2 + $0x57] sm:$0xff] }
  0xc6   : > { %9361 = vrot.lane.b32.xlu2 %v9360_v48, %s11466_s3  ;;  %v9395_v48 = vpack.i.bf16 %v11949_v30, %v11947_v29 }
  0xc7   : > { %9356 = vrot.lane.b32.xlu1 %v9355_v49, %s11466_s3  ;;  %v11964_v49 = vld [vmem:[#allocation2 + $0x3f] sm:$0xff] }
  0xc8   : > { %9351 = vrot.lane.b32.xlu0 %v9350_v50, %s11466_s3  ;;  %v11897_v54 = vpop.permute.xlu2 %9196  ;;  %17517 = vst [vmem:[#allocation17_spill] sm:$0xff] %v11964_v49  ;;  %v11966_v50 = vld [vmem:[#allocation2 + $0x47] sm:$0xff] }
  0xc9   : > { %17513 = vst [vmem:[#allocation13_spill] sm:$0xff] %v11897_v54 }
  0xce   : > { %9376 = vrot.lane.b32.xlu2 %v9375_v58, %s11466_s3  ;;  %v11968_v58 = vld [vmem:[#allocation2 + $0x1f] sm:$0xff] }
  0xcf   : > { %9371 = vrot.lane.b32.xlu1 %v9370_v59, %s11466_s3  ;;  %17518 = vst [vmem:[#allocation18_spill] sm:$0xff] %v11968_v58 }
  0xd0   : > { %9366 = vrot.lane.b32.xlu0 %v9365_v60, %s11466_s3  ;;  %v11920_v0 = vpop.permute.xlu2 %9211  ;;  %v1032_v60 = vld [vmem:[#allocation2 + $0x2f] sm:$0xff] }
  0xd1   : > { %17514 = vst [vmem:[#allocation14_spill] sm:$0xff] %v11920_v0  ;;  %v11992_v0 = vld [vmem:[#allocation2 + $0x5f] sm:$0xff] }
  0xd6   : > { %9391 = vrot.lane.b32.xlu2 %v9390_v9, %s11466_s3  ;;  %v11972_v9 = vld [vmem:[#allocation2 + $0x37] sm:$0xff] }
  0xd7   : > { %9386 = vrot.lane.b32.xlu1 %v9385_v10, %s11466_s3  ;;  %v11974_v10 = vld [vmem:[#allocation2 + $0x27] sm:$0xff] }
  0xd8   : > { %9381 = vrot.lane.b32.xlu0 %v9380_v11, %s11466_s3  ;;  %v11943_v21 = vpop.permute.xlu2 %9226  ;;  %17520 = vst [vmem:[#allocation20_spill] sm:$0xff] %v11974_v10  ;;  %v9410_v5 = vpack.i.bf16 %v11974_v10, %v11968_v58  ;;  %v12023_v58 = vld [vmem:[#allocation2 + $0x97] sm:$0xff] }
  0xd9   : > { %17515 = vst [vmem:[#allocation15_spill] sm:$0xff] %v11943_v21  ;;  %v11951_v31 = vpop.permute.xlu1 %9181  ;;  %v11990_v21 = vld [vmem:[#allocation2 + $0x77] sm:$0xff] }
  0xda   : > { %17516 = vst [vmem:[#allocation16_spill] sm:$0xff] %v11951_v31  ;;  %v11953_v38 = vpop.permute.xlu0 %9171 }
  0xdb   : > { %17524 = vst [vmem:[#allocation24_spill] sm:$0xff] %v11990_v21 }
  0xdc   : > { %17533 = vst [vmem:[#allocation33_spill] sm:$0xff] %v12023_v58 }
  0xde   : > { %9406 = vrot.lane.b32.xlu2 %v9405_v39, %s11466_s3 }
  0xdf   : > { %9401 = vrot.lane.b32.xlu1 %v9400_v40, %s11466_s3  ;;  %v9420_v40 = vpack.i.bf16 %v11966_v50, %v11964_v49 }
  0xe0   : > { %9396 = vrot.lane.b32.xlu0 %v9395_v48, %s11466_s3  ;;  %v11970_v59 = vpop.permute.xlu2 %9241  ;;  %v9415_v48 = vpack.i.bf16 %v11972_v9, %v1032_v60  ;;  %v11998_v60 = vld [vmem:[#allocation2 + $0x4f] sm:$0xff] }
  0xe1   : > { %17519 = vst [vmem:[#allocation19_spill] sm:$0xff] %v11970_v59  ;;  %v11976_v11 = vpop.permute.xlu1 %9186  ;;  %v11996_v59 = vld [vmem:[#allocation2 + $0x67] sm:$0xff]  ;;  %v9425_v10 = vpack.i.bf16 %v12000_v44, %v11998_v60 }
  0xe2   : > { %17521 = vst [vmem:[#allocation21_spill] sm:$0xff] %v11976_v11  ;;  %v11978_v39 = vpop.permute.xlu0 %9176 }
  0xe3   : > { %17522 = vst [vmem:[#allocation22_spill] sm:$0xff] %v11978_v39 }
  0xe4   : > { %17526 = vst [vmem:[#allocation26_spill] sm:$0xff] %v11996_v59 }
  0xe6   : > { %9421 = vrot.lane.b32.xlu2 %v9420_v40, %s11467_s4 }
  0xe7   : > { %9416 = vrot.lane.b32.xlu1 %v9415_v48, %s11467_s4  ;;  %v9430_v48 = vpack.i.bf16 %v11996_v59, %v11992_v0  ;;  %v12027_v59 = vld [vmem:[#allocation2 + $0x87] sm:$0xff] }
  0xe8   : > { %9411 = vrot.lane.b32.xlu0 %v9410_v5, %s11467_s4  ;;  %v11994_v54 = vpop.permute.xlu2 %9256  ;;  %v9435_v5 = vpack.i.bf16 %v11990_v21, %v11988_v4  ;;  %v12025_v4 = vld [vmem:[#allocation2 + $0x7f] sm:$0xff]  ;;  %17535 = vst [vmem:[#allocation35_spill] sm:$0xff] %v12027_v59 }
  0xe9   : > { %17525 = vst [vmem:[#allocation25_spill] sm:$0xff] %v11994_v54  ;;  %v12002_v11 = vpop.permute.xlu1 %9206  ;;  %v12015_v54 = vld [vmem:[#allocation2 + $0x9f] sm:$0xff]  ;;  %v9440_v39 = vpack.i.bf16 %v12027_v59, %v12025_v4 }
  0xea   : > { %17527 = vst [vmem:[#allocation27_spill] sm:$0xff] %v12002_v11  ;;  %v12004_v40 = vpop.permute.xlu0 %9201  ;;  %v12017_v11 = vld [vmem:[#allocation2 + $0xa7] sm:$0xff] }
  0xeb   : > { %17528 = vst [vmem:[#allocation28_spill] sm:$0xff] %v12004_v40  ;;  %v12019_v40 = vld [vmem:[#allocation2 + $0x8f] sm:$0xff] }
  0xec   : > { %17529 = vst [vmem:[#allocation29_spill] sm:$0xff] %v12015_v54 }
  0xed   : > { %17530 = vst [vmem:[#allocation30_spill] sm:$0xff] %v12017_v11 }
  0xee   : > { %9436 = vrot.lane.b32.xlu2 %v9435_v5, %s11467_s4  ;;  %17531 = vst [vmem:[#allocation31_spill] sm:$0xff] %v12019_v40 }
  0xef   : > { %9431 = vrot.lane.b32.xlu1 %v9430_v48, %s11467_s4  ;;  %17534 = vst [vmem:[#allocation34_spill] sm:$0xff] %v12025_v4  ;;  %v9445_v48 = vpack.i.bf16 %v12023_v58, %v12019_v40  ;;  %v12052_v58 = vld [vmem:[#allocation2 + $0xaf] sm:$0xff] }
  0xf0   : > { %9426 = vrot.lane.b32.xlu0 %v9425_v10, %s11467_s4  ;;  %v12021_v31 = vpop.permute.xlu2 %9271  ;;  %v9450_v10 = vpack.i.bf16 %v12017_v11, %v12015_v54  ;;  %v12050_v54 = vld [vmem:[#allocation2 + $0xbf] sm:$0xff]  ;;  %17543 = vst [vmem:[#allocation43_spill] sm:$0xff] %v12052_v58  ;;  %v12054_v11 = vld [vmem:[#allocation2 + $0xb7] sm:$0xff] }
  0xf1   : > { %17532 = vst [vmem:[#allocation32_spill] sm:$0xff] %v12021_v31  ;;  %v12029_v21 = vpop.permute.xlu1 %9221  ;;  %v12042_v31 = vld [vmem:[#allocation2 + $0xcf] sm:$0xff]  ;;  %v9455_v40 = vpack.i.bf16 %v12054_v11, %v12052_v58 }
  0xf2   : > { %17536 = vst [vmem:[#allocation36_spill] sm:$0xff] %v12029_v21  ;;  %v12031_v5 = vpop.permute.xlu0 %9216  ;;  %v12044_v21 = vld [vmem:[#allocation2 + $0xd7] sm:$0xff] }
  0xf3   : > { %17537 = vst [vmem:[#allocation37_spill] sm:$0xff] %v12031_v5  ;;  %v12046_v5 = vld [vmem:[#allocation2 + $0xc7] sm:$0xff] }
  0xf4   : > { %17538 = vst [vmem:[#allocation38_spill] sm:$0xff] %v12042_v31 }
  0xf5   : > { %17539 = vst [vmem:[#allocation39_spill] sm:$0xff] %v12044_v21 }
  0xf6   : > { %9451 = vrot.lane.b32.xlu2 %v9450_v10, %s11467_s4  ;;  %17540 = vst [vmem:[#allocation40_spill] sm:$0xff] %v12046_v5 }
  0xf7   : > { %9446 = vrot.lane.b32.xlu1 %v9445_v48, %s11467_s4  ;;  %17542 = vst [vmem:[#allocation42_spill] sm:$0xff] %v12050_v54  ;;  %v9460_v48 = vpack.i.bf16 %v12046_v5, %v12050_v54  ;;  %v12081_v5 = vld [vmem:[#allocation2 + $0xe7] sm:$0xff] }
  0xf8   : > { %9441 = vrot.lane.b32.xlu0 %v9440_v39, %s11467_s4  ;;  %v12048_v49 = vpop.permute.xlu2 %9286  ;;  %17544 = vst [vmem:[#allocation44_spill] sm:$0xff] %v12054_v11  ;;  %v9465_v39 = vpack.i.bf16 %v12044_v21, %v12042_v31  ;;  %v12077_v31 = vld [vmem:[#allocation2 + $0xf7] sm:$0xff]  ;;  %v12079_v21 = vld [vmem:[#allocation2 + $0xdf] sm:$0xff] }
  0xf9   : > { %17541 = vst [vmem:[#allocation41_spill] sm:$0xff] %v12048_v49  ;;  %v12056_v4 = vpop.permute.xlu1 %9236  ;;  %v12069_v49 = vld [vmem:[#allocation2 + $0xff] sm:$0xff]  ;;  %v9470_v54 = vpack.i.bf16 %v12081_v5, %v12079_v21 }
  0xfa   : > { %17545 = vst [vmem:[#allocation45_spill] sm:$0xff] %v12056_v4  ;;  %v12058_v10 = vpop.permute.xlu0 %9231  ;;  %v12071_v4 = vld [vmem:[#allocation2 + $0x107] sm:$0xff] }
  0xfb   : > { %17546 = vst [vmem:[#allocation46_spill] sm:$0xff] %v12058_v10  ;;  %v12073_v10 = vld [vmem:[#allocation2 + $0xef] sm:$0xff] }
  0xfc   : > { %17547 = vst [vmem:[#allocation47_spill] sm:$0xff] %v12069_v49 }
  0xfd   : > { %17548 = vst [vmem:[#allocation48_spill] sm:$0xff] %v12071_v4 }
  0xfe   : > { %9466 = vrot.lane.b32.xlu2 %v9465_v39, %s11467_s4  ;;  %17549 = vst [vmem:[#allocation49_spill] sm:$0xff] %v12073_v10 }
  0xff   : > { %9461 = vrot.lane.b32.xlu1 %v9460_v48, %s11467_s4  ;;  %17551 = vst [vmem:[#allocation51_spill] sm:$0xff] %v12077_v31  ;;  %v9475_v48 = vpack.i.bf16 %v12077_v31, %v12073_v10  ;;  %v12106_v31 = vld [vmem:[#allocation2 + $0x10f] sm:$0xff] }
 0x100   : > { %9456 = vrot.lane.b32.xlu0 %v9455_v40, %s11467_s4  ;;  %v12075_v59 = vpop.permute.xlu2 %9301  ;;  %17552 = vst [vmem:[#allocation52_spill] sm:$0xff] %v12079_v21  ;;  %v9480_v40 = vpack.i.bf16 %v12071_v4, %v12069_v49  ;;  %v12104_v49 = vld [vmem:[#allocation2 + $0x127] sm:$0xff]  ;;  %v12108_v4 = vld [vmem:[#allocation2 + $0x117] sm:$0xff] }
 0x101   : > { %17550 = vst [vmem:[#allocation50_spill] sm:$0xff] %v12075_v59  ;;  %v12083_v58 = vpop.permute.xlu1 %9251  ;;  %v12096_v59 = vld [vmem:[#allocation2 + $0x12f] sm:$0xff]  ;;  %v9485_v10 = vpack.i.bf16 %v12108_v4, %v12106_v31 }
 0x102   : > { %17553 = vst [vmem:[#allocation53_spill] sm:$0xff] %v12081_v5  ;;  %v12085_v39 = vpop.permute.xlu0 %9246 }
 0x103   : > { %17554 = vst [vmem:[#allocation54_spill] sm:$0xff] %v12083_v58  ;;  %v12098_v58 = vld [vmem:[#allocation2 + $0x137] sm:$0xff] }
 0x104   : > { %17555 = vst [vmem:[#allocation55_spill] sm:$0xff] %v12085_v39  ;;  %v12100_v39 = vld [vmem:[#allocation2 + $0x11f] sm:$0xff] }
 0x105   : > { %17556 = vst [vmem:[#allocation56_spill] sm:$0xff] %v12096_v59 }
 0x106   : > { %9481 = vrot.lane.b32.xlu2 %v9480_v40, %s11467_s4  ;;  %17557 = vst [vmem:[#allocation57_spill] sm:$0xff] %v12098_v58 }
 0x107   : > { %9476 = vrot.lane.b32.xlu1 %v9475_v48, %s11467_s4  ;;  %17558 = vst [vmem:[#allocation58_spill] sm:$0xff] %v12100_v39  ;;  %v9490_v48 = vpack.i.bf16 %v12104_v49, %v12100_v39  ;;  %v12133_v39 = vld [vmem:[#allocation2 + $0x13f] sm:$0xff] }
 0x108   : > { %9471 = vrot.lane.b32.xlu0 %v9470_v54, %s11467_s4  ;;  %v12102_v11 = vpop.permute.xlu2 %9316  ;;  %17560 = vst [vmem:[#allocation60_spill] sm:$0xff] %v12104_v49  ;;  %v9495_v54 = vpack.i.bf16 %v12098_v58, %v12096_v59  ;;  %v12131_v58 = vld [vmem:[#allocation2 + $0x157] sm:$0xff]  ;;  %v12135_v59 = vld [vmem:[#allocation2 + $0x147] sm:$0xff]  ;;  %v1076_v49 = vld [vmem:[#allocation2 + $0x18f] sm:$0xff] }
 0x109   : > { %17559 = vst [vmem:[#allocation59_spill] sm:$0xff] %v12102_v11  ;;  %v12110_v21 = vpop.permute.xlu1 %9266  ;;  %v12123_v11 = vld [vmem:[#allocation2 + $0x15f] sm:$0xff] }
 0x10a   : > { %17561 = vst [vmem:[#allocation61_spill] sm:$0xff] %v12106_v31  ;;  %v12112_v40 = vpop.permute.xlu0 %9261  ;;  %v12150_v31 = vld [vmem:[#allocation2 + $0x17f] sm:$0xff] }
 0x10b   : > { %17562 = vst [vmem:[#allocation62_spill] sm:$0xff] %v12108_v4 }
 0x10c   : > { %17563 = vst [vmem:[#allocation63_spill] sm:$0xff] %v12110_v21  ;;  %v12125_v21 = vld [vmem:[#allocation2 + $0x167] sm:$0xff] }
 0x10d   : > { %17564 = vst [vmem:[#allocation64_spill] sm:$0xff] %v12112_v40  ;;  %v12127_v40 = vld [vmem:[#allocation2 + $0x14f] sm:$0xff] }
 0x10e   : > { %9496 = vrot.lane.b32.xlu2 %v9495_v54, %s11467_s4  ;;  %17565 = vst [vmem:[#allocation65_spill] sm:$0xff] %v12123_v11 }
 0x10f   : > { %9491 = vrot.lane.b32.xlu1 %v9490_v48, %s11467_s4  ;;  %17566 = vst [vmem:[#allocation66_spill] sm:$0xff] %v12125_v21  ;;  %v9505_v48 = vpack.i.bf16 %v12131_v58, %v12127_v40 }
 0x110   : > { %9486 = vrot.lane.b32.xlu0 %v9485_v10, %s11467_s4  ;;  %17567 = vst [vmem:[#allocation67_spill] sm:$0xff] %v12127_v40  ;;  %v12129_v5 = vpop.permute.xlu2 %9331  ;;  %v9510_v10 = vpack.i.bf16 %v12125_v21, %v12123_v11  ;;  %v1075_v11 = vld [vmem:[#allocation2 + $0x187] sm:$0xff]  ;;  %v12154_v21 = vld [vmem:[#allocation2 + $0x16f] sm:$0xff] }
 0x111   : > { %17568 = vst [vmem:[#allocation68_spill] sm:$0xff] %v12129_v5  ;;  %v12137_v4 = vpop.permute.xlu1 %9281  ;;  %v9500_v5 = vpack.i.bf16 %v12135_v59, %v12133_v39 }
 0x112   : > { %17569 = vst [vmem:[#allocation69_spill] sm:$0xff] %v12131_v58  ;;  %v12139_v54 = vpop.permute.xlu0 %9276  ;;  %v12156_v58 = vld [vmem:[#allocation2 + $0x177] sm:$0xff] }
 0x113   : > { %17570 = vst [vmem:[#allocation70_spill] sm:$0xff] %v12133_v39 }
 0x114   : > { %17571 = vst [vmem:[#allocation71_spill] sm:$0xff] %v12135_v59  ;;  %v9515_v59 = vpack.i.bf16 %v12156_v58, %v12154_v21 }
 0x115   : > { %17572 = vst [vmem:[#allocation72_spill] sm:$0xff] %v12137_v4  ;;  %v1077_v4 = vld [vmem:[#allocation2 + $0x197] sm:$0xff] }
 0x116   : > { %17573 = vst [vmem:[#allocation73_spill] sm:$0xff] %v12139_v54  ;;  %9511 = vrot.lane.b32.xlu2 %v9510_v10, %s11467_s4  ;;  %v9525_v10 = vpack.i.bf16 %v1077_v4, %v1076_v49 }
 0x117   : > { %9506 = vrot.lane.b32.xlu1 %v9505_v48, %s11467_s4  ;;  %17575 = vst [vmem:[#allocation75_spill] sm:$0xff] %v12154_v21  ;;  %v826_v48 = vld [vmem:[%s11590_s27 + $0x78] sm:$0xff] }
 0x118   : > { %9501 = vrot.lane.b32.xlu0 %v9500_v5, %s11467_s4  ;;  %v12152_v54 = vpop.permute.xlu2 %9346  ;;  %17576 = vst [vmem:[#allocation76_spill] sm:$0xff] %v12156_v58  ;;  %v9520_v5 = vpack.i.bf16 %v1075_v11, %v12150_v31  ;;  %2910 = vmatpush.msra.mxu0 %v826_v48  ;;  %v824_v58 = vld [vmem:[%s11590_s27 + $0x68] sm:$0xff]  ;;  %v822_v21 = vld [vmem:[%s11590_s27 + $0x58] sm:$0xff] }
 0x119   : > { %17574 = vst [vmem:[#allocation74_spill] sm:$0xff] %v12152_v54  ;;  %v12158_v40 = vpop.permute.xlu1 %9296  ;;  %9049 = vmatpush.msra.mxu1 %v826_v48  ;;  %9050 = vmatpush.msra.mxu3 %v826_v48  ;;  %v825_v54 = vld [vmem:[%s11590_s27 + $0x70] sm:$0xff]  ;;  %v823_v48 = vld [vmem:[%s11590_s27 + $0x60] sm:$0xff] }
 0x11a   : > { %v12160_v39 = vpop.permute.xlu0 %9291  ;;  %2911 = vmatpush.msra.mxu0 %v825_v54 }
 0x11b   : > { %9051 = vmatpush.msra.mxu1 %v825_v54  ;;  %9052 = vmatpush.msra.mxu3 %v825_v54  ;;  %v9550_v54 = vpack.i.bf16 %v11834_v27, %v11807_v15  ;;  %v816_v27 = vld [vmem:[%s11590_s27 + $0x28] sm:$0xff] }
 0x11c   : > { %2912 = vmatpush.msra.mxu0 %v824_v58 }
 0x11d   : > { %9053 = vmatpush.msra.mxu1 %v824_v58  ;;  %9054 = vmatpush.msra.mxu3 %v824_v58  ;;  %v819_v58 = vld [vmem:[%s11590_s27 + $0x40] sm:$0xff] }
 0x11e   : > { %9526 = vrot.lane.b32.xlu2 %v9525_v10, %s11467_s4  ;;  %v9540_v10 = vpack.i.bf16 %v11809_v16, %v11815_v19  ;;  %2913 = vmatpush.msra.mxu0 %v823_v48  ;;  %v821_v16 = vld [vmem:[%s11590_s27 + $0x50] sm:$0xff]  ;;  %v9555_v19 = vpack.i.bf16 %v11830_v25, %v11836_v28  ;;  %v9570_v28 = vpack.i.bf16 %v11851_v34, %v11857_v37 }
 0x11f   : > { %9521 = vrot.lane.b32.xlu1 %v9520_v5, %s11467_s4  ;;  %v9530_v5 = vpack.i.bf16 %v11793_v3, %v11797_v8  ;;  %9055 = vmatpush.msra.mxu1 %v823_v48  ;;  %v817_v25 = vld [vmem:[%s11590_s27 + $0x30] sm:$0xff] }
 0x120   : > { %9516 = vrot.lane.b32.xlu0 %v9515_v59, %s11467_s4  ;;  %v12170_v4 = vpop.permute.xlu2 %9361  ;;  %v9535_v59 = vpack.i.bf16 %v11813_v18, %v11795_v6  ;;  %9056 = vmatpush.msra.mxu3 %v823_v48  ;;  %v820_v18 = vld [vmem:[%s11590_s27 + $0x48] sm:$0xff]  ;;  %v818_v48 = vld [vmem:[%s11590_s27 + $0x38] sm:$0xff]  ;;  %v813_v34 = vld [vmem:[%s11590_s27 + $0x10] sm:$0xff] }
 0x121   : > { %v12172_v49 = vpop.permute.xlu1 %9311  ;;  %2914 = vmatpush.msra.mxu0 %v822_v21  ;;  %9057 = vmatpush.msra.mxu1 %v822_v21 }
 0x122   : > { %v12174_v11 = vpop.permute.xlu0 %9306  ;;  %9058 = vmatpush.msra.mxu3 %v822_v21  ;;  %v815_v21 = vld [vmem:[%s11590_s27 + $0x20] sm:$0xff] }
 0x123   : > { %2915 = vmatpush.msra.mxu0 %v821_v16  ;;  %9059 = vmatpush.msra.mxu1 %v821_v16 }
 0x124   : > { %9060 = vmatpush.msra.mxu3 %v821_v16  ;;  %v814_v16 = vld [vmem:[%s11590_s27 + $0x18] sm:$0xff] }
 0x125   : > { %2916 = vmatpush.msra.mxu0 %v820_v18  ;;  %9061 = vmatpush.msra.mxu1 %v820_v18 }
 0x126   : > { %9541 = vrot.lane.b32.xlu2 %v9540_v10, %s11465_s1  ;;  %v9545_v10 = vpack.i.bf16 %v11805_v14, %v11811_v17  ;;  %9062 = vmatpush.msra.mxu3 %v820_v18  ;;  %v811_v18 = vld [vmem:[%s11590_s27] sm:$0xff] }
 0x127   : > { %9536 = vrot.lane.b32.xlu1 %v9535_v59, %s11465_s1  ;;  %2917 = vmatpush.msra.mxu0 %v819_v58  ;;  %v9565_v59 = vpack.i.bf16 %v11855_v36, %v11828_v24  ;;  %v9585_v36 = vpack.i.bf16 %v11872_v43, %v11880_v47 }
 0x128   : > { %9531 = vrot.lane.b32.xlu0 %v9530_v5, %s11465_s1  ;;  %v12189_v6 = vpop.permute.xlu2 %9376  ;;  %9063 = vmatpush.msra.mxu1 %v819_v58  ;;  %v9560_v5 = vpack.i.bf16 %v11826_v23, %v11832_v26  ;;  %v812_v26 = vld [vmem:[%s11590_s27 + $0x8] sm:$0xff] }
 0x129   : > { %v12191_v3 = vpop.permute.xlu1 %9326  ;;  %2918 = vmatpush.msra.mxu0 %v818_v48  ;;  %9064 = vmatpush.msra.mxu3 %v819_v58  ;;  %v9575_v58 = vpack.i.bf16 %v11847_v32, %v11853_v35  ;;  %v9600_v32 = vpack.i.bf16 %v11895_v53, %v11903_v57  ;;  %v9595_v35 = vpack.i.bf16 %v11901_v56, %v11870_v42 }
 0x12a   : > { %v12193_v8 = vpop.permute.xlu0 %9321  ;;  %9065 = vmatpush.msra.mxu1 %v818_v48  ;;  %v9615_v57 = vpack.i.bf16 %v11918_v63, %v11926_v7  ;;  %v9610_v42 = vpack.i.bf16 %v11924_v2, %v11893_v52  ;;  %v9625_v52 = vpack.i.bf16 %v11947_v29, %v11916_v62  ;;  %v9293_v2 = vunpack.i.l.bf16 %v12160_v39  ;;  %v885_v7 = vld [vmem:[#allocation2 + $0x7] sm:$0xff] }
 0x12b   : > { %2919 = vmatpush.msra.mxu0 %v817_v25  ;;  %9066 = vmatpush.msra.mxu3 %v818_v48  ;;  %v9630_v48 = vpack.i.bf16 %v11941_v20, %v11949_v30  ;;  %v1173_v20 = vld [vmem:[#allocation2 + $0x191] sm:$0xff]  ;;  %v1174_v30 = vld [vmem:[#allocation2 + $0x199] sm:$0xff]  ;;  %v1172_v62 = vld [vmem:[#allocation2 + $0x189] sm:$0xff] }
 0x12c   : > { %9067 = vmatpush.msra.mxu1 %v817_v25 }
 0x12d   : > { %2920 = vmatpush.msra.mxu0 %v816_v27  ;;  %9068 = vmatpush.msra.mxu3 %v817_v25 }
 0x12e   : > { %9556 = vrot.lane.b32.xlu2 %v9555_v19, %s11465_s1  ;;  %9069 = vmatpush.msra.mxu1 %v816_v27  ;;  %v9580_v19 = vpack.i.bf16 %v11878_v46, %v11849_v33  ;;  %v9590_v46 = vpack.i.bf16 %v11868_v41, %v11876_v45  ;;  %v9605_v41 = vpack.i.bf16 %v11891_v51, %v11899_v55  ;;  %v9173_v55 = vunpack.i.l.bf16 %v11953_v38 }
 0x12f   : > { %9551 = vrot.lane.b32.xlu1 %v9550_v54, %s11465_s1  ;;  %2921 = vmatpush.msra.mxu0 %v815_v21  ;;  %v9620_v51 = vpack.i.bf16 %v11914_v61, %v11922_v1 }
 0x130   : > { %9546 = vrot.lane.b32.xlu0 %v9545_v10, %s11465_s1  ;;  %v12208_v15 = vpop.permute.xlu2 %9391  ;;  %9070 = vmatpush.msra.mxu3 %v816_v27  ;;  %v2473_v1 = vsel %vm2472_vm4, %v885_v7, %v9173_v55  ;;  %v9645_v27 = vpack.i.bf16 %v1174_v30, %v1173_v20  ;;  %v17581_v20 = vld [vmem:[#allocation24_spill] sm:$0xff]  ;;  %v17582_v30 = vld [vmem:[#allocation34_spill] sm:$0xff] }
 0x131   : > { %v12210_v14 = vpop.permute.xlu1 %9341  ;;  %2922 = vmatpush.msra.mxu0 %v814_v16  ;;  %9071 = vmatpush.msra.mxu1 %v815_v21 }
 0x132   : > { %v12212_v17 = vpop.permute.xlu0 %9336  ;;  %9072 = vmatpush.msra.mxu3 %v815_v21  ;;  %v9640_v21 = vpack.i.bf16 %v1172_v62, %v11939_v13  ;;  %v886_v13 = vld [vmem:[#allocation2 + $0xf] sm:$0xff]  ;;  %v9670_v62 = vpack.i.bf16 %v17582_v30, %v17581_v20 }
 0x133   : > { %2923 = vmatpush.msra.mxu0 %v813_v34  ;;  %9073 = vmatpush.msra.mxu1 %v814_v16 }
 0x134   : > { %9074 = vmatpush.msra.mxu3 %v814_v16 }
 0x135   : > { %2924 = vmatpush.msra.mxu0 %v812_v26  ;;  %9075 = vmatpush.msra.mxu1 %v813_v34 }
 0x136   : > { %9571 = vrot.lane.b32.xlu2 %v9570_v28, %s11465_s1  ;;  %9076 = vmatpush.msra.mxu3 %v813_v34  ;;  %v2522_v28 = vsel %vm2521_vm5, %v2473_v1, %v9293_v2  ;;  %v842_v34 = vld [vmem:[%s11590_s27 + $0xf8] sm:$0xff]  ;;  %v841_v2 = vld [vmem:[%s11590_s27 + $0xf0] sm:$0xff] }
 0x137   : > { %9566 = vrot.lane.b32.xlu1 %v9565_v59, %s11465_s1  ;;  %2925 = vmatpush.msra.mxu0 %v811_v18  ;;  %v9635_v59 = vpack.i.bf16 %v11937_v12, %v11945_v22 }
 0x138   : > { %9561 = vrot.lane.b32.xlu0 %v9560_v5, %s11465_s1  ;;  %v12227_v37 = vpop.permute.xlu2 %9406  ;;  %9077 = vmatpush.msra.mxu1 %v812_v26 }
 0x139   : > { %v12229_v23 = vpop.permute.xlu1 %9356  ;;  %9078 = vmatpush.msra.mxu3 %v812_v26  ;;  %v9174_v26 = vunpack.i.h.bf16 %v11953_v38  ;;  %v9660_v38 = vpack.i.bf16 %v11992_v0, %v12000_v44  ;;  %v887_v44 = vld [vmem:[#allocation2 + $0x17] sm:$0xff] }
 0x13a   : > { %v12231_v24 = vpop.permute.xlu0 %9351  ;;  %9079 = vmatpush.msra.mxu1 %v811_v18 }
 0x13b   : > { %9080 = vmatpush.msra.mxu3 %v811_v18  ;;  %v2474_v22 = vsel %vm2472_vm4, %v886_v13, %v9174_v26  ;;  %v9353_v20 = vunpack.i.l.bf16 %v12231_v24 }
 0x13c   : > { %3071 = vmatpush.msrb.mxu1 %v842_v34 }
 0x13e   : > { %9586 = vrot.lane.b32.xlu2 %v9585_v36, %s11465_s1  ;;  %v9294_v36 = vunpack.i.h.bf16 %v12160_v39  ;;  %v9655_v39 = vpack.i.bf16 %v11998_v60, %v11966_v50  ;;  %3072 = vmatpush.msrb.mxu1 %v841_v2 }
 0x13f   : > { %9581 = vrot.lane.b32.xlu1 %v9580_v19, %s11465_s1 }
 0x140   : > { %9576 = vrot.lane.b32.xlu0 %v9575_v58, %s11465_s1  ;;  %v12244_v43 = vpop.permute.xlu2 %9421  ;;  %v2523_v58 = vsel %vm2521_vm5, %v2474_v22, %v9294_v36  ;;  %v17585_v36 = vld [vmem:[#allocation18_spill] sm:$0xff] }
 0x141   : > { %v12246_v47 = vpop.permute.xlu1 %9371  ;;  %v17587_v22 = vld [vmem:[#allocation42_spill] sm:$0xff]  ;;  %v9423_v30 = vunpack.i.l.bf16 %v12244_v43 }
 0x142   : > { %v12248_v33 = vpop.permute.xlu0 %9366 }
 0x146   : > { %9601 = vrot.lane.b32.xlu2 %v9600_v32, %s11465_s1  ;;  %v17577_v32 = vld [vmem:[#allocation17_spill] sm:$0xff] }
 0x147   : > { %9596 = vrot.lane.b32.xlu1 %v9595_v35, %s11465_s1  ;;  %v9650_v35 = vpack.i.bf16 %v17577_v32, %v11972_v9  ;;  %v17589_v32 = vld [vmem:[#allocation43_spill] sm:$0xff] }
 0x148   : > { %9591 = vrot.lane.b32.xlu0 %v9590_v46, %s11465_s1  ;;  %v12259_v54 = vpop.permute.xlu2 %9436 }
 0x149   : > { %v12261_v10 = vpop.permute.xlu1 %9386 }
 0x14a   : > { %v12263_v53 = vpop.permute.xlu0 %9381 }
 0x14e   : > { %9616 = vrot.lane.b32.xlu2 %v9615_v57, %s11465_s1  ;;  %v17578_v57 = vld [vmem:[#allocation22_spill] sm:$0xff] }
 0x14f   : > { %9611 = vrot.lane.b32.xlu1 %v9610_v42, %s11465_s1  ;;  %v9178_v42 = vunpack.i.l.bf16 %v17578_v57 }
 0x150   : > { %9606 = vrot.lane.b32.xlu0 %v9605_v41, %s11465_s1  ;;  %v12274_v45 = vpop.permute.xlu2 %9451  ;;  %v9298_v41 = vunpack.i.l.bf16 %v12158_v40 }
 0x151   : > { %v12280_v63 = vpop.permute.xlu1 %9401  ;;  %v2475_v60 = vsel %vm2472_vm4, %v887_v44, %v9178_v42 }
 0x152   : > { %v12276_v56 = vpop.permute.xlu0 %9396  ;;  %v2524_v7 = vsel %vm2521_vm5, %v2475_v60, %v9298_v41  ;;  %v17592_v41 = vld [vmem:[#allocation16_spill] sm:$0xff] }
 0x153   : > { %v9183_v44 = vunpack.i.l.bf16 %v17592_v41 }
 0x156   : > { %9631 = vrot.lane.b32.xlu2 %v9630_v48, %s11465_s1 }
 0x157   : > { %9626 = vrot.lane.b32.xlu1 %v9625_v52, %s11465_s1  ;;  %v17579_v52 = vld [vmem:[#allocation35_spill] sm:$0xff] }
 0x158   : > { %9621 = vrot.lane.b32.xlu0 %v9620_v51, %s11465_s1  ;;  %v12291_v25 = vpop.permute.xlu2 %9466  ;;  %v17580_v51 = vld [vmem:[#allocation31_spill] sm:$0xff] }
 0x159   : > { %v9417_v16 = vpop.permute.xlu1 %9416  ;;  %v9675_v55 = vpack.i.bf16 %v17580_v51, %v17579_v52  ;;  %v17594_v52 = vld [vmem:[#allocation46_spill] sm:$0xff] }
 0x15a   : > { %v9412_v29 = vpop.permute.xlu0 %9411  ;;  %v9418_v0 = vunpack.i.l.bf16 %v9417_v16  ;;  %v9233_v51 = vunpack.i.l.bf16 %v17594_v52 }
 0x15b   : > { %v9413_v61 = vunpack.i.l.bf16 %v9412_v29  ;;  %v9414_v18 = vunpack.i.h.bf16 %v9412_v29  ;;  %v17583_v29 = vld [vmem:[#allocation26_spill] sm:$0xff] }
 0x15d   : > { %v2571_v5 = vsel %vm2570_vm6, %v2522_v28, %v9413_v61  ;;  %v2572_v46 = vsel %vm2570_vm6, %v2523_v58, %v9414_v18  ;;  %v17584_v61 = vld [vmem:[#allocation23_spill] sm:$0xff]  ;;  %v9179_v28 = vunpack.i.h.bf16 %v17578_v57  ;;  %v17586_v18 = vld [vmem:[#allocation44_spill] sm:$0xff] }
 0x15e   : > { %2926 = vmatmul.f32.vlgmr.msra.gmra.mxu0 %v2571_v5  ;;  %9646 = vrot.lane.b32.xlu2 %v9645_v27, %s11465_s1  ;;  %v9665_v1 = vpack.i.bf16 %v17584_v61, %v17583_v29  ;;  %v2573_v27 = vsel %vm2570_vm6, %v2524_v7, %v9418_v0  ;;  %v840_v58 = vld [vmem:[%s11590_s27 + $0xe8] sm:$0xff]  ;;  %v17593_v0 = vld [vmem:[#allocation41_spill] sm:$0xff]  ;;  %v9409_v7 = vunpack.i.h.bf16 %v12227_v37 }
 0x15f   : > { %9641 = vrot.lane.b32.xlu1 %v9640_v21, %s11465_s1  ;;  %v9299_v21 = vunpack.i.h.bf16 %v12158_v40  ;;  %v2476_v13 = vsel %vm2472_vm4, %v17585_v36, %v9179_v28  ;;  %3073 = vmatpush.msrb.mxu1 %v840_v58  ;;  %v9289_v60 = vunpack.i.h.bf16 %v17593_v0  ;;  %v17597_v28 = vld [vmem:[#allocation40_spill] sm:$0xff] }
 0x160   : > { %9636 = vrot.lane.b32.xlu0 %v9635_v59, %s11465_s1  ;;  %v12305_v19 = vpop.permute.xlu2 %9481  ;;  %v9419_v59 = vunpack.i.h.bf16 %v9417_v16  ;;  %v17591_v16 = vld [vmem:[#allocation29_spill] sm:$0xff] }
 0x161   : > { %v12321_v48 = vpop.permute.xlu1 %9431  ;;  %v2525_v40 = vsel %vm2521_vm5, %v2476_v13, %v9299_v21  ;;  %v2497_v21 = vsel %vm2472_vm4, %v17597_v28, %v9233_v51  ;;  %v9234_v51 = vunpack.i.h.bf16 %v17594_v52 }
 0x162   : > { %v12307_v12 = vpop.permute.xlu0 %9426  ;;  %v2574_v42 = vsel %vm2570_vm6, %v2525_v40, %v9419_v59  ;;  %v2520_v59 = vsel %vm2472_vm4, %v12150_v31, %v9289_v60  ;;  %v17602_v31 = vld [vmem:[#allocation38_spill] sm:$0xff]  ;;  %v9184_v60 = vunpack.i.h.bf16 %v17592_v41 }
 0x163   : > { %v2498_v52 = vsel %vm2472_vm4, %v17602_v31, %v9234_v51 }
 0x166   : > { %2929 = vmatmul.f32.gmra.mxu0 %v2572_v46  ;;  %9661 = vrot.lane.b32.xlu2 %v9660_v38, %s11466_s3  ;;  %v9690_v38 = vpack.i.bf16 %v17587_v22, %v17586_v18  ;;  %v17590_v46 = vld [vmem:[#allocation33_spill] sm:$0xff]  ;;  %v2569_v18 = vsel %vm2521_vm5, %v2520_v59, %v9409_v7  ;;  %v9354_v7 = vunpack.i.h.bf16 %v12231_v24 }
 0x167   : > { %9656 = vrot.lane.b32.xlu1 %v9655_v39, %s11466_s3  ;;  %v17588_v39 = vld [vmem:[#allocation30_spill] sm:$0xff]  ;;  %v9680_v57 = vpack.i.bf16 %v17591_v16, %v17590_v46  ;;  %v17598_v22 = vld [vmem:[#allocation53_spill] sm:$0xff]  ;;  %v17601_v46 = vld [vmem:[#allocation52_spill] sm:$0xff] }
 0x168   : > { %9651 = vrot.lane.b32.xlu0 %v9650_v35, %s11466_s3  ;;  %v12325_v50 = vpop.permute.xlu2 %9496  ;;  %v9685_v35 = vpack.i.bf16 %v17589_v32, %v17588_v39  ;;  %v2546_v39 = vsel %vm2521_vm5, %v2497_v21, %v9353_v20  ;;  %v890_v20 = vld [vmem:[#allocation2 + $0x2f] sm:$0xff]  ;;  %v17604_v21 = vld [vmem:[#allocation61_spill] sm:$0xff] }
 0x169   : > { %v12346_v34 = vpop.permute.xlu1 %9446  ;;  %v2478_v41 = vsel %vm2472_vm4, %v890_v20, %v9184_v60  ;;  %v9428_v60 = vunpack.i.l.bf16 %v12307_v12 }
 0x16a   : > { %v12327_v9 = vpop.permute.xlu0 %9441 }
 0x16e   : > { %2932 = vmatmul.f32.gmra.mxu0 %v2573_v27  ;;  %9676 = vrot.lane.b32.xlu2 %v9675_v55, %s11466_s3  ;;  %v17595_v55 = vld [vmem:[#allocation50_spill] sm:$0xff] }
 0x16f   : > { %9671 = vrot.lane.b32.xlu1 %v9670_v62, %s11466_s3  ;;  %v9303_v2 = vunpack.i.l.bf16 %v17595_v55 }
 0x170   : > { %9666 = vrot.lane.b32.xlu0 %v9665_v1, %s11466_s3  ;;  %v12344_v5 = vpop.permute.xlu2 %9511  ;;  %v17596_v1 = vld [vmem:[#allocation20_spill] sm:$0xff] }
 0x171   : > { %v2477_v27 = vsel %vm2472_vm4, %v17596_v1, %v9183_v44  ;;  %v12384_v40 = vpop.permute.xlu1 %9461 }
 0x172   : > { %v12348_v26 = vpop.permute.xlu0 %9456  ;;  %v2526_v13 = vsel %vm2521_vm5, %v2477_v27, %v9303_v2  ;;  %v9304_v2 = vunpack.i.h.bf16 %v17595_v55  ;;  %v1224_v27 = vld [vmem:[#allocation2 + $0x38] sm:$0xff]  ;;  %v17603_v55 = vld [vmem:[#allocation48_spill] sm:$0xff] }
 0x173   : > { %v9720_v24 = vpack.i.bf16 %v17604_v21, %v17603_v55  ;;  %v17611_v21 = vld [vmem:[#allocation62_spill] sm:$0xff] }
 0x174   : > { %v2527_v59 = vsel %vm2521_vm5, %v2478_v41, %v9304_v2  ;;  %v1226_v2 = vld [vmem:[#allocation2 + $0x48] sm:$0xff] }
 0x176   : > { %2935 = vmatmul.f32.gmra.mxu0 %v2574_v42  ;;  %9691 = vrot.lane.b32.xlu2 %v9690_v38, %s11466_s3  ;;  %v17599_v38 = vld [vmem:[#allocation49_spill] sm:$0xff]  ;;  %v2575_v42 = vsel %vm2570_vm6, %v2526_v13, %v9423_v30  ;;  %v839_v30 = vld [vmem:[%s11590_s27 + $0xe0] sm:$0xff] }
 0x177   : > { %9686 = vrot.lane.b32.xlu1 %v9685_v35, %s11466_s3  ;;  %v9705_v58 = vpack.i.bf16 %v17599_v38, %v17598_v22  ;;  %v17600_v35 = vld [vmem:[#allocation39_spill] sm:$0xff]  ;;  %3074 = vmatpush.msrb.mxu1 %v839_v30 }
 0x178   : > { %9681 = vrot.lane.b32.xlu0 %v9680_v57, %s11466_s3  ;;  %v12371_v62 = vpop.permute.xlu2 %9526  ;;  %v9700_v16 = vpack.i.bf16 %v17601_v46, %v17600_v35  ;;  %v9695_v57 = vpack.i.bf16 %v17602_v31, %v17597_v28  ;;  %v1225_v28 = vld [vmem:[#allocation2 + $0x40] sm:$0xff]  ;;  %v17606_v22 = vld [vmem:[#allocation47_spill] sm:$0xff] }
 0x179   : > { %v9529_v29 = vunpack.i.h.bf16 %v12371_v62  ;;  %v9715_v13 = vpack.i.bf16 %v1225_v28, %v1224_v27  ;;  %v838_v28 = vld [vmem:[%s11590_s27 + $0xd8] sm:$0xff] }
 0x17a   : > { %v9472_v61 = vpop.permute.xlu0 %9471  ;;  %3075 = vmatpush.msrb.mxu1 %v838_v28  ;;  %v9313_v28 = vunpack.i.l.bf16 %v12172_v49 }
 0x17b   : > { %v9473_v36 = vunpack.i.l.bf16 %v9472_v61  ;;  %v2618_v32 = vsel %vm2570_vm6, %v2569_v18, %v9529_v29  ;;  %v9424_v29 = vunpack.i.h.bf16 %v12244_v43  ;;  %v9474_v1 = vunpack.i.h.bf16 %v9472_v61  ;;  %v17605_v18 = vld [vmem:[#allocation51_spill] sm:$0xff] }
 0x17c   : > { %3067 = vmatmul.f32.vlgmr.msra.gmra.mxu3 %v2618_v32  ;;  %v9710_v43 = vpack.i.bf16 %v17606_v22, %v17605_v18  ;;  %v9309_v22 = vunpack.i.h.bf16 %v12174_v11 }
 0x17d   : > { %v2595_v44 = vsel %vm2570_vm6, %v2546_v39, %v9473_v36  ;;  %v2547_v36 = vsel %vm2521_vm5, %v2498_v52, %v9354_v7  ;;  %v2576_v61 = vsel %vm2570_vm6, %v2527_v59, %v9424_v29  ;;  %v17607_v39 = vld [vmem:[#allocation21_spill] sm:$0xff]  ;;  %v1227_v7 = vld [vmem:[#allocation2 + $0x50] sm:$0xff] }
 0x17e   : > { %2938 = vmatmul.f32.gmra.mxu0 %v2575_v42  ;;  %2998 = vmatmul.f32.vlgmr.msra.gmra.mxu1 %v2595_v44  ;;  %v2596_v38 = vsel %vm2570_vm6, %v2547_v36, %v9474_v1  ;;  %v9188_v32 = vunpack.i.l.bf16 %v17607_v39  ;;  %v9358_v42 = vunpack.i.l.bf16 %v12229_v23  ;;  %v891_v44 = vld [vmem:[#allocation2 + $0x37] sm:$0xff]  ;;  %v9730_v55 = vpack.i.bf16 %v1227_v7, %v1226_v2  ;;  %v17616_v2 = vld [vmem:[#allocation70_spill] sm:$0xff] }
 0x17f   : > { %9706 = vrot.lane.b32.xlu2 %v9705_v58, %s11466_s3  ;;  %9701 = vrot.lane.b32.xlu1 %v9700_v16, %s11466_s3  ;;  %v9477_v58 = vpop.permute.xlu1 %9476  ;;  %v17608_v16 = vld [vmem:[#allocation45_spill] sm:$0xff]  ;;  %v17609_v29 = vld [vmem:[#allocation60_spill] sm:$0xff] }
 0x180   : > { %9696 = vrot.lane.b32.xlu0 %v9695_v57, %s11466_s3  ;;  %v9238_v31 = vunpack.i.l.bf16 %v17608_v16  ;;  %v9308_v57 = vunpack.i.l.bf16 %v12174_v11  ;;  %v9478_v51 = vunpack.i.l.bf16 %v9477_v58  ;;  %v2479_v20 = vsel %vm2472_vm4, %v891_v44, %v9188_v32  ;;  %v17610_v1 = vld [vmem:[#allocation56_spill] sm:$0xff]  ;;  %v17614_v44 = vld [vmem:[#allocation67_spill] sm:$0xff] }
 0x181   : > { %v9735_v27 = vpack.i.bf16 %v17610_v1, %v17609_v29  ;;  %v9239_v18 = vunpack.i.h.bf16 %v17608_v16  ;;  %v9479_v32 = vunpack.i.h.bf16 %v9477_v58  ;;  %v17618_v29 = vld [vmem:[#allocation19_spill] sm:$0xff] }
 0x182   : > { %v2499_v30 = vsel %vm2472_vm4, %v17600_v35, %v9238_v31  ;;  %v2528_v41 = vsel %vm2521_vm5, %v2479_v20, %v9308_v57  ;;  %v9189_v35 = vunpack.i.h.bf16 %v17607_v39  ;;  %v1228_v31 = vld [vmem:[#allocation2 + $0x58] sm:$0xff]  ;;  %v1229_v57 = vld [vmem:[#allocation2 + $0x60] sm:$0xff]  ;;  %v9243_v1 = vunpack.i.l.bf16 %v17618_v29 }
 0x183   : > { %v2548_v52 = vsel %vm2521_vm5, %v2499_v30, %v9358_v42  ;;  %v2577_v36 = vsel %vm2570_vm6, %v2528_v41, %v9428_v60  ;;  %v2500_v16 = vsel %vm2472_vm4, %v17601_v46, %v9239_v18  ;;  %v17613_v42 = vld [vmem:[#allocation71_spill] sm:$0xff]  ;;  %v17617_v30 = vld [vmem:[#allocation12_spill] sm:$0xff] }
 0x184   : > { %v9750_v11 = vpack.i.bf16 %v17614_v44, %v17613_v42  ;;  %v9193_v46 = vunpack.i.l.bf16 %v17617_v30 }
 0x186   : > { %2941 = vmatmul.f32.gmra.mxu0 %v2576_v61  ;;  %3001 = vmatmul.f32.gmra.mxu1 %v2596_v38  ;;  %v892_v61 = vld [vmem:[#allocation2 + $0x3f] sm:$0xff]  ;;  %v9429_v38 = vunpack.i.h.bf16 %v12307_v12  ;;  %v9740_v12 = vpack.i.bf16 %v1229_v57, %v1228_v31 }
 0x187   : > { %9721 = vrot.lane.b32.xlu2 %v9720_v24, %s11466_s3  ;;  %9716 = vrot.lane.b32.xlu1 %v9715_v13, %s11467_s4  ;;  %v17612_v24 = vld [vmem:[#allocation58_spill] sm:$0xff]  ;;  %v2597_v13 = vsel %vm2570_vm6, %v2548_v52, %v9478_v51  ;;  %v2480_v39 = vsel %vm2472_vm4, %v892_v61, %v9189_v35  ;;  %v17615_v51 = vld [vmem:[#allocation57_spill] sm:$0xff]  ;;  %v12458_v41 = vpop.permute.xlu1 %9491 }
 0x188   : > { %9711 = vrot.lane.b32.xlu0 %v9710_v43, %s11466_s3  ;;  %v9725_v59 = vpack.i.bf16 %v17612_v24, %v17611_v21  ;;  %v9359_v43 = vunpack.i.h.bf16 %v12229_v23  ;;  %v2529_v23 = vsel %vm2521_vm5, %v2480_v39, %v9309_v22  ;;  %v9745_v7 = vpack.i.bf16 %v17616_v2, %v17615_v51  ;;  %v893_v52 = vld [vmem:[#allocation2 + $0x47] sm:$0xff]  ;;  %v837_v21 = vld [vmem:[%s11590_s27 + $0xd0] sm:$0xff]  ;;  %v17621_v31 = vld [vmem:[#allocation69_spill] sm:$0xff] }
 0x189   : > { %v2578_v58 = vsel %vm2570_vm6, %v2529_v23, %v9429_v38  ;;  %v9483_v24 = vunpack.i.l.bf16 %v12305_v19  ;;  %3076 = vmatpush.msrb.mxu1 %v837_v21  ;;  %v2481_v35 = vsel %vm2472_vm4, %v893_v52, %v9193_v46  ;;  %v17619_v22 = vld [vmem:[#allocation66_spill] sm:$0xff]  ;;  %v17622_v57 = vld [vmem:[#allocation65_spill] sm:$0xff]  ;;  %v9244_v23 = vunpack.i.h.bf16 %v17618_v29  ;;  %v836_v52 = vld [vmem:[%s11590_s27 + $0xc8] sm:$0xff] }
 0x18a   : > { %v2549_v60 = vsel %vm2521_vm5, %v2500_v16, %v9359_v43  ;;  %v17620_v43 = vld [vmem:[#allocation75_spill] sm:$0xff]  ;;  %v2530_v38 = vsel %vm2521_vm5, %v2481_v35, %v9313_v28  ;;  %v9760_v39 = vpack.i.bf16 %v17622_v57, %v17621_v31  ;;  %v9364_v51 = vunpack.i.h.bf16 %v12170_v4  ;;  %v1216_v46 = vld [vmem:[#allocation2 + $0x17f] sm:$0xff] }
 0x18b   : > { %v2598_v20 = vsel %vm2570_vm6, %v2549_v60, %v9479_v32  ;;  %v9765_v61 = vpack.i.bf16 %v17620_v43, %v17619_v22  ;;  %v894_v60 = vld [vmem:[#allocation2 + $0x4f] sm:$0xff]  ;;  %v9314_v2 = vunpack.i.h.bf16 %v12172_v49  ;;  %v1232_v29 = vld [vmem:[#allocation2 + $0x78] sm:$0xff]  ;;  %3077 = vmatpush.msrb.mxu1 %v836_v52  ;;  %v9368_v57 = vunpack.i.l.bf16 %v12248_v33 }
 0x18c   : > { %v17624_v35 = vld [vmem:[#allocation13_spill] sm:$0xff]  ;;  %v17625_v22 = vld [vmem:[#allocation55_spill] sm:$0xff] }
 0x18d   : > { %v9248_v43 = vunpack.i.l.bf16 %v17625_v22  ;;  %v9199_v52 = vunpack.i.h.bf16 %v17624_v35 }
 0x18e   : > { %2944 = vmatmul.f32.gmra.mxu0 %v2577_v36  ;;  %3004 = vmatmul.f32.gmra.mxu1 %v2597_v13  ;;  %v1230_v36 = vld [vmem:[#allocation2 + $0x68] sm:$0xff]  ;;  %v1231_v13 = vld [vmem:[#allocation2 + $0x70] sm:$0xff] }
 0x18f   : > { %9736 = vrot.lane.b32.xlu2 %v9735_v27, %s11466_s3  ;;  %9731 = vrot.lane.b32.xlu1 %v9730_v55, %s11467_s4  ;;  %v9363_v27 = vunpack.i.l.bf16 %v12170_v4  ;;  %v913_v55 = vld [vmem:[#allocation2 + $0xe7] sm:$0xff]  ;;  %v9755_v16 = vpack.i.bf16 %v1231_v13, %v1230_v36 }
 0x190   : > { %9726 = vrot.lane.b32.xlu0 %v9725_v59, %s11466_s3  ;;  %v9433_v59 = vunpack.i.l.bf16 %v12321_v48  ;;  %v2501_v18 = vsel %vm2472_vm4, %v913_v55, %v9243_v1  ;;  %v1233_v1 = vld [vmem:[#allocation2 + $0x80] sm:$0xff]  ;;  %v12489_v55 = vpop.permute.xlu0 %9486 }
 0x191   : > { %v2550_v32 = vsel %vm2521_vm5, %v2501_v18, %v9363_v27  ;;  %v12484_v27 = vpop.permute.xlu1 %9506  ;;  %v9198_v18 = vunpack.i.l.bf16 %v17624_v35  ;;  %v9439_v35 = vunpack.i.h.bf16 %v12259_v54 }
 0x192   : > { %v2579_v42 = vsel %vm2570_vm6, %v2530_v38, %v9433_v59  ;;  %v2599_v44 = vsel %vm2570_vm6, %v2550_v32, %v9483_v24  ;;  %v915_v38 = vld [vmem:[#allocation2 + $0xf7] sm:$0xff]  ;;  %v17626_v32 = vld [vmem:[#allocation59_spill] sm:$0xff] }
 0x193   : > { %v9318_v31 = vunpack.i.l.bf16 %v17626_v32 }
 0x196   : > { %2947 = vmatmul.f32.gmra.mxu0 %v2578_v58  ;;  %3007 = vmatmul.f32.gmra.mxu1 %v2598_v20  ;;  %v1235_v58 = vld [vmem:[#allocation2 + $0x90] sm:$0xff]  ;;  %v9484_v20 = vunpack.i.h.bf16 %v12305_v19 }
 0x197   : > { %9751 = vrot.lane.b32.xlu2 %v9750_v11, %s11466_s3  ;;  %9746 = vrot.lane.b32.xlu1 %v9745_v7, %s11466_s3  ;;  %v9194_v11 = vunpack.i.h.bf16 %v17617_v30  ;;  %v914_v7 = vld [vmem:[#allocation2 + $0xef] sm:$0xff]  ;;  %v9434_v30 = vunpack.i.h.bf16 %v12321_v48  ;;  %v9770_v48 = vpack.i.bf16 %v1233_v1, %v1232_v29 }
 0x198   : > { %9741 = vrot.lane.b32.xlu0 %v9740_v12, %s11467_s4  ;;  %v1234_v12 = vld [vmem:[#allocation2 + $0x88] sm:$0xff]  ;;  %v2502_v49 = vsel %vm2472_vm4, %v914_v7, %v9244_v23  ;;  %v17623_v19 = vld [vmem:[#allocation76_spill] sm:$0xff]  ;;  %v1220_v23 = vld [vmem:[#allocation2 + $0x19f] sm:$0xff]  ;;  %v2503_v7 = vsel %vm2472_vm4, %v915_v38, %v9248_v43 }
 0x199   : > { %v2482_v4 = vsel %vm2472_vm4, %v894_v60, %v9194_v11  ;;  %v9780_v28 = vpack.i.bf16 %v1235_v58, %v1234_v12  ;;  %v2551_v24 = vsel %vm2521_vm5, %v2502_v49, %v9364_v51  ;;  %v9775_v59 = vpack.i.bf16 %v1216_v46, %v17623_v19  ;;  %v1217_v60 = vld [vmem:[#allocation2 + $0x187] sm:$0xff]  ;;  %v1218_v51 = vld [vmem:[#allocation2 + $0x18f] sm:$0xff]  ;;  %v12507_v58 = vpop.permute.xlu1 %9521  ;;  %v12513_v49 = vpop.permute.xlu0 %9501  ;;  %v916_v19 = vld [vmem:[#allocation2 + $0xff] sm:$0xff] }
 0x19a   : > { %v2531_v21 = vsel %vm2521_vm5, %v2482_v4, %v9314_v2  ;;  %v2600_v13 = vsel %vm2570_vm6, %v2551_v24, %v9484_v20  ;;  %v9488_v11 = vunpack.i.l.bf16 %v12489_v55  ;;  %v9785_v29 = vpack.i.bf16 %v1218_v51, %v1217_v60  ;;  %v896_v24 = vld [vmem:[#allocation2 + $0x5f] sm:$0xff]  ;;  %v1239_v43 = vld [vmem:[#allocation2 + $0xb0] sm:$0xff] }
 0x19b   : > { %v2580_v36 = vsel %vm2570_vm6, %v2531_v21, %v9434_v30  ;;  %v2552_v30 = vsel %vm2521_vm5, %v2503_v7, %v9368_v57  ;;  %v9249_v21 = vunpack.i.h.bf16 %v17625_v22  ;;  %v9489_v22 = vunpack.i.h.bf16 %v12489_v55  ;;  %v1222_v38 = vld [vmem:[#allocation2 + $0x1af] sm:$0xff]  ;;  %v17628_v60 = vld [vmem:[#allocation54_spill] sm:$0xff] }
 0x19c   : > { %v2601_v4 = vsel %vm2570_vm6, %v2552_v30, %v9488_v11  ;;  %v17627_v55 = vld [vmem:[#allocation28_spill] sm:$0xff]  ;;  %v9253_v51 = vunpack.i.l.bf16 %v17628_v60  ;;  %v917_v7 = vld [vmem:[#allocation2 + $0x107] sm:$0xff] }
 0x19e   : > { %2950 = vmatmul.f32.gmra.mxu0 %v2579_v42  ;;  %3010 = vmatmul.f32.gmra.mxu1 %v2599_v44  ;;  %v1219_v42 = vld [vmem:[#allocation2 + $0x197] sm:$0xff]  ;;  %v9438_v44 = vunpack.i.l.bf16 %v12259_v54 }
 0x19f   : > { %9766 = vrot.lane.b32.xlu2 %v9765_v61, %s11466_s3  ;;  %9761 = vrot.lane.b32.xlu1 %v9760_v39, %s11466_s3  ;;  %v895_v61 = vld [vmem:[#allocation2 + $0x57] sm:$0xff]  ;;  %v9790_v46 = vpack.i.bf16 %v1220_v23, %v1219_v42  ;;  %v9203_v23 = vunpack.i.l.bf16 %v17627_v55 }
 0x1a0   : > { %9756 = vrot.lane.b32.xlu0 %v9755_v16, %s11467_s4  ;;  %v1236_v39 = vld [vmem:[#allocation2 + $0x98] sm:$0xff]  ;;  %v1237_v16 = vld [vmem:[#allocation2 + $0xa0] sm:$0xff]  ;;  %v2483_v2 = vsel %vm2472_vm4, %v895_v61, %v9198_v18 }
 0x1a1   : > { %v9795_v12 = vpack.i.bf16 %v1237_v16, %v1236_v39  ;;  %v2532_v20 = vsel %vm2521_vm5, %v2483_v2, %v9318_v31  ;;  %v1241_v18 = vld [vmem:[#allocation2 + $0xc0] sm:$0xff]  ;;  %v2484_v31 = vsel %vm2472_vm4, %v896_v24, %v9199_v52  ;;  %v12531_v11 = vpop.permute.xlu1 %9536  ;;  %v12538_v30 = vpop.permute.xlu0 %9516  ;;  %v1243_v24 = vld [vmem:[#allocation2 + $0xd0] sm:$0xff] }
 0x1a2   : > { %v2581_v1 = vsel %vm2570_vm6, %v2532_v20, %v9438_v44  ;;  %v1221_v61 = vld [vmem:[#allocation2 + $0x1a7] sm:$0xff]  ;;  %v9373_v20 = vunpack.i.l.bf16 %v12246_v47 }
 0x1a3   : > { %v9800_v42 = vpack.i.bf16 %v1222_v38, %v1221_v61  ;;  %v897_v2 = vld [vmem:[#allocation2 + $0x67] sm:$0xff]  ;;  %v9204_v38 = vunpack.i.h.bf16 %v17627_v55  ;;  %v9444_v55 = vunpack.i.h.bf16 %v12327_v9 }
 0x1a4   : > { %v1245_v52 = vld [vmem:[#allocation2 + $0xe0] sm:$0xff] }
 0x1a6   : > { %2953 = vmatmul.f32.gmra.mxu0 %v2580_v36  ;;  %3013 = vmatmul.f32.gmra.mxu1 %v2600_v13  ;;  %v1238_v36 = vld [vmem:[#allocation2 + $0xa8] sm:$0xff]  ;;  %v1240_v13 = vld [vmem:[#allocation2 + $0xb8] sm:$0xff] }
 0x1a7   : > { %9781 = vrot.lane.b32.xlu2 %v9780_v28, %s11467_s4  ;;  %9776 = vrot.lane.b32.xlu1 %v9775_v59, %s11466_s3  ;;  %v835_v28 = vld [vmem:[%s11590_s27 + $0xc0] sm:$0xff]  ;;  %v9319_v59 = vunpack.i.h.bf16 %v17626_v32  ;;  %v2504_v32 = vsel %vm2472_vm4, %v916_v19, %v9249_v21  ;;  %v9810_v57 = vpack.i.bf16 %v1241_v18, %v1240_v13  ;;  %v9805_v16 = vpack.i.bf16 %v1239_v43, %v1238_v36  ;;  %v1242_v21 = vld [vmem:[#allocation2 + $0xc8] sm:$0xff]  ;;  %v834_v36 = vld [vmem:[%s11590_s27 + $0xb8] sm:$0xff] }
 0x1a8   : > { %9771 = vrot.lane.b32.xlu0 %v9770_v48, %s11467_s4  ;;  %3078 = vmatpush.msrb.mxu1 %v835_v28  ;;  %v9369_v48 = vunpack.i.h.bf16 %v12248_v33  ;;  %v9493_v28 = vunpack.i.l.bf16 %v12458_v41  ;;  %v2485_v19 = vsel %vm2472_vm4, %v897_v2, %v9203_v23  ;;  %v9494_v23 = vunpack.i.h.bf16 %v12458_v41  ;;  %v1249_v2 = vld [vmem:[#allocation2 + $0x100] sm:$0xff] }
 0x1a9   : > { %v2533_v33 = vsel %vm2521_vm5, %v2484_v31, %v9319_v59  ;;  %v2505_v59 = vsel %vm2472_vm4, %v917_v7, %v9253_v51  ;;  %v9254_v31 = vunpack.i.h.bf16 %v17628_v60  ;;  %v1251_v60 = vld [vmem:[#allocation2 + $0x110] sm:$0xff]  ;;  %v1248_v51 = vld [vmem:[#allocation2 + $0xf8] sm:$0xff] }
 0x1aa   : > { %v2553_v39 = vsel %vm2521_vm5, %v2504_v32, %v9369_v48  ;;  %v2582_v44 = vsel %vm2570_vm6, %v2533_v33, %v9439_v35  ;;  %v2554_v18 = vsel %vm2521_vm5, %v2505_v59, %v9373_v20  ;;  %3079 = vmatpush.msrb.mxu1 %v834_v36  ;;  %v898_v32 = vld [vmem:[#allocation2 + $0x6f] sm:$0xff]  ;;  %v9324_v33 = vunpack.i.h.bf16 %v12193_v8  ;;  %v919_v59 = vld [vmem:[#allocation2 + $0x117] sm:$0xff] }
 0x1ab   : > { %v2602_v54 = vsel %vm2570_vm6, %v2553_v39, %v9489_v22  ;;  %v9815_v22 = vpack.i.bf16 %v1243_v24, %v1242_v21  ;;  %v2603_v61 = vsel %vm2570_vm6, %v2554_v18, %v9493_v28  ;;  %v9374_v39 = vunpack.i.h.bf16 %v12246_v47  ;;  %v17629_v28 = vld [vmem:[#allocation25_spill] sm:$0xff]  ;;  %v17630_v21 = vld [vmem:[#allocation27_spill] sm:$0xff] }
 0x1ac   : > { %v2486_v47 = vsel %vm2472_vm4, %v898_v32, %v9204_v38  ;;  %v9208_v24 = vunpack.i.l.bf16 %v17630_v21  ;;  %v9328_v36 = vunpack.i.l.bf16 %v12191_v3  ;;  %v1258_v18 = vld [vmem:[#allocation2 + $0x148] sm:$0xff] }
 0x1ad   : > { %v2535_v20 = vsel %vm2521_vm5, %v2486_v47, %v9324_v33  ;;  %v1254_v38 = vld [vmem:[#allocation2 + $0x128] sm:$0xff]  ;;  %v9259_v47 = vunpack.i.h.bf16 %v17629_v28 }
 0x1ae   : > { %2956 = vmatmul.f32.gmra.mxu0 %v2581_v1  ;;  %3016 = vmatmul.f32.gmra.mxu1 %v2601_v4  ;;  %v1247_v1 = vld [vmem:[#allocation2 + $0xf0] sm:$0xff]  ;;  %v9443_v4 = vunpack.i.l.bf16 %v12327_v9  ;;  %v2584_v9 = vsel %vm2570_vm6, %v2535_v20, %v9444_v55  ;;  %v920_v20 = vld [vmem:[#allocation2 + $0x11f] sm:$0xff] }
 0x1af   : > { %9796 = vrot.lane.b32.xlu2 %v9795_v12, %s11467_s4  ;;  %9791 = vrot.lane.b32.xlu1 %v9790_v46, %s11466_s3  ;;  %v9323_v12 = vunpack.i.l.bf16 %v12193_v8  ;;  %v1244_v46 = vld [vmem:[#allocation2 + $0xd8] sm:$0xff]  ;;  %v12562_v8 = vpop.permute.xlu0 %9531 }
 0x1b0   : > { %9786 = vrot.lane.b32.xlu0 %v9785_v29, %s11466_s3  ;;  %v1246_v29 = vld [vmem:[#allocation2 + $0xe8] sm:$0xff]  ;;  %v9820_v35 = vpack.i.bf16 %v1245_v52, %v1244_v46  ;;  %v9258_v52 = vunpack.i.l.bf16 %v17629_v28  ;;  %v9449_v28 = vunpack.i.h.bf16 %v12346_v34 }
 0x1b1   : > { %v9825_v48 = vpack.i.bf16 %v1247_v1, %v1246_v29  ;;  %v2534_v13 = vsel %vm2521_vm5, %v2485_v19, %v9323_v12  ;;  %v9830_v1 = vpack.i.bf16 %v1249_v2, %v1248_v51  ;;  %v899_v19 = vld [vmem:[#allocation2 + $0x77] sm:$0xff]  ;;  %v832_v2 = vld [vmem:[%s11590_s27 + $0xa8] sm:$0xff] }
 0x1b2   : > { %v2583_v43 = vsel %vm2570_vm6, %v2534_v13, %v9443_v4  ;;  %v833_v4 = vld [vmem:[%s11590_s27 + $0xb0] sm:$0xff]  ;;  %v1256_v13 = vld [vmem:[#allocation2 + $0x138] sm:$0xff]  ;;  %v2507_v33 = vsel %vm2472_vm4, %v919_v59, %v9258_v52 }
 0x1b3   : > { %3080 = vmatpush.msrb.mxu1 %v833_v4  ;;  %v9499_v4 = vunpack.i.h.bf16 %v12325_v50  ;;  %v1263_v52 = vld [vmem:[#allocation2 + $0x170] sm:$0xff] }
 0x1b5   : > { %3081 = vmatpush.msrb.mxu1 %v832_v2 }
 0x1b6   : > { %2959 = vmatmul.f32.gmra.mxu0 %v2582_v44  ;;  %3019 = vmatmul.f32.gmra.mxu1 %v2602_v54  ;;  %v1252_v44 = vld [vmem:[#allocation2 + $0x118] sm:$0xff]  ;;  %v1253_v54 = vld [vmem:[#allocation2 + $0x120] sm:$0xff] }
 0x1b7   : > { %9811 = vrot.lane.b32.xlu2 %v9810_v57, %s11467_s4  ;;  %9806 = vrot.lane.b32.xlu1 %v9805_v16, %s11467_s4  ;;  %v918_v57 = vld [vmem:[#allocation2 + $0x10f] sm:$0xff]  ;;  %v12556_v16 = vpop.permute.xlu1 %9551  ;;  %v9840_v12 = vpack.i.bf16 %v1253_v54, %v1252_v44 }
 0x1b8   : > { %9801 = vrot.lane.b32.xlu0 %v9800_v42, %s11466_s3  ;;  %v1250_v42 = vld [vmem:[#allocation2 + $0x108] sm:$0xff]  ;;  %v2506_v7 = vsel %vm2472_vm4, %v918_v57, %v9254_v31  ;;  %v1255_v31 = vld [vmem:[#allocation2 + $0x130] sm:$0xff]  ;;  %v2487_v57 = vsel %vm2472_vm4, %v899_v19, %v9208_v24  ;;  %v1261_v24 = vld [vmem:[#allocation2 + $0x160] sm:$0xff] }
 0x1b9   : > { %v2555_v46 = vsel %vm2521_vm5, %v2506_v7, %v9374_v39  ;;  %v9835_v29 = vpack.i.bf16 %v1251_v60, %v1250_v42  ;;  %v12584_v42 = vpop.permute.xlu0 %9546  ;;  %v2536_v44 = vsel %vm2521_vm5, %v2487_v57, %v9328_v36  ;;  %v9209_v7 = vunpack.i.h.bf16 %v17630_v21  ;;  %v1260_v21 = vld [vmem:[#allocation2 + $0x158] sm:$0xff] }
 0x1ba   : > { %v2604_v41 = vsel %vm2570_vm6, %v2555_v46, %v9494_v23  ;;  %v9845_v23 = vpack.i.bf16 %v1255_v31, %v1254_v38  ;;  %v9379_v46 = vunpack.i.h.bf16 %v12189_v6  ;;  %v17633_v31 = vld [vmem:[#allocation68_spill] sm:$0xff] }
 0x1bb   : > { %v9333_v57 = vunpack.i.l.bf16 %v17633_v31 }
 0x1be   : > { %2962 = vmatmul.f32.gmra.mxu0 %v2583_v43  ;;  %3022 = vmatmul.f32.gmra.mxu1 %v2603_v61  ;;  %v9448_v43 = vunpack.i.l.bf16 %v12346_v34  ;;  %v1257_v61 = vld [vmem:[#allocation2 + $0x140] sm:$0xff] }
 0x1bf   : > { %9826 = vrot.lane.b32.xlu2 %v9825_v48, %s11467_s4  ;;  %9821 = vrot.lane.b32.xlu1 %v9820_v35, %s11467_s4  ;;  %v9378_v48 = vunpack.i.l.bf16 %v12189_v6  ;;  %v1259_v35 = vld [vmem:[#allocation2 + $0x150] sm:$0xff]  ;;  %v12580_v32 = vpop.permute.xlu1 %9566  ;;  %v9850_v55 = vpack.i.bf16 %v1257_v61, %v1256_v13  ;;  %v2508_v6 = vsel %vm2472_vm4, %v920_v20, %v9259_v47  ;;  %v831_v20 = vld [vmem:[%s11590_s27 + $0xa0] sm:$0xff] }
 0x1c0   : > { %9816 = vrot.lane.b32.xlu0 %v9815_v22, %s11467_s4  ;;  %v9498_v22 = vunpack.i.l.bf16 %v12325_v50  ;;  %v9855_v39 = vpack.i.bf16 %v1259_v35, %v1258_v18  ;;  %v2585_v60 = vsel %vm2570_vm6, %v2536_v44, %v9448_v43  ;;  %v2557_v36 = vsel %vm2521_vm5, %v2508_v6, %v9379_v46  ;;  %v17632_v61 = vld [vmem:[#allocation64_spill] sm:$0xff]  ;;  %v921_v44 = vld [vmem:[#allocation2 + $0x127] sm:$0xff]  ;;  %3082 = vmatpush.msrb.mxu1 %v831_v20 }
 0x1c1   : > { %v2556_v54 = vsel %vm2521_vm5, %v2507_v33, %v9378_v48  ;;  %v9860_v18 = vpack.i.bf16 %v1261_v24, %v1260_v21  ;;  %v2606_v34 = vsel %vm2570_vm6, %v2557_v36, %v9499_v4  ;;  %v12608_v35 = vpop.permute.xlu0 %9561  ;;  %v9263_v38 = vunpack.i.l.bf16 %v17632_v61  ;;  %v902_v24 = vld [vmem:[#allocation2 + $0x8f] sm:$0xff] }
 0x1c2   : > { %v2605_v51 = vsel %vm2570_vm6, %v2556_v54, %v9498_v22  ;;  %v17631_v22 = vld [vmem:[#allocation14_spill] sm:$0xff]  ;;  %v9383_v33 = vunpack.i.l.bf16 %v12263_v53  ;;  %v9453_v54 = vunpack.i.l.bf16 %v12274_v45  ;;  %v9334_v4 = vunpack.i.h.bf16 %v17633_v31 }
 0x1c3   : > { %v9213_v43 = vunpack.i.l.bf16 %v17631_v22  ;;  %v2509_v2 = vsel %vm2472_vm4, %v921_v44, %v9263_v38  ;;  %v9454_v6 = vunpack.i.h.bf16 %v12274_v45  ;;  %v17635_v45 = vld [vmem:[#allocation63_spill] sm:$0xff]  ;;  %v9388_v38 = vunpack.i.l.bf16 %v12261_v10 }
 0x1c4   : > { %v9508_v44 = vunpack.i.l.bf16 %v12484_v27  ;;  %v9269_v20 = vunpack.i.h.bf16 %v17635_v45 }
 0x1c6   : > { %2965 = vmatmul.f32.gmra.mxu0 %v2584_v9  ;;  %3025 = vmatmul.f32.gmra.mxu1 %v2604_v41  ;;  %v1264_v9 = vld [vmem:[#allocation2 + $0x178] sm:$0xff]  ;;  %v1265_v41 = vld [vmem:[#allocation2 + $0x180] sm:$0xff] }
 0x1c7   : > { %9841 = vrot.lane.b32.xlu2 %v9840_v12, %s11467_s4  ;;  %9836 = vrot.lane.b32.xlu1 %v9835_v29, %s11467_s4  ;;  %v900_v12 = vld [vmem:[#allocation2 + $0x7f] sm:$0xff]  ;;  %v9329_v29 = vunpack.i.h.bf16 %v12191_v3  ;;  %v9870_v59 = vpack.i.bf16 %v1265_v41, %v1264_v9  ;;  %v12602_v3 = vpop.permute.xlu1 %9581  ;;  %v9214_v9 = vunpack.i.h.bf16 %v17631_v22  ;;  %v9264_v41 = vunpack.i.h.bf16 %v17632_v61 }
 0x1c8   : > { %9831 = vrot.lane.b32.xlu0 %v9830_v1, %s11467_s4  ;;  %v1262_v1 = vld [vmem:[#allocation2 + $0x168] sm:$0xff]  ;;  %v2488_v19 = vsel %vm2472_vm4, %v900_v12, %v9209_v7  ;;  %v2558_v7 = vsel %vm2521_vm5, %v2509_v2, %v9383_v33  ;;  %v17634_v22 = vld [vmem:[#allocation37_spill] sm:$0xff]  ;;  %v9268_v61 = vunpack.i.l.bf16 %v17635_v45 }
 0x1c9   : > { %v2537_v48 = vsel %vm2521_vm5, %v2488_v19, %v9329_v29  ;;  %v9865_v13 = vpack.i.bf16 %v1263_v52, %v1262_v1  ;;  %v12632_v52 = vpop.permute.xlu2 %9541  ;;  %v12634_v21 = vpop.permute.xlu0 %9576  ;;  %v922_v19 = vld [vmem:[#allocation2 + $0x12f] sm:$0xff]  ;;  %v923_v33 = vld [vmem:[#allocation2 + $0x137] sm:$0xff]  ;;  %v925_v45 = vld [vmem:[#allocation2 + $0x147] sm:$0xff] }
 0x1ca   : > { %v2586_v50 = vsel %vm2570_vm6, %v2537_v48, %v9449_v28  ;;  %v9384_v28 = vunpack.i.h.bf16 %v12263_v53  ;;  %v2490_v48 = vsel %vm2472_vm4, %v902_v24, %v9214_v9  ;;  %v2510_v36 = vsel %vm2472_vm4, %v922_v19, %v9264_v41  ;;  %v904_v9 = vld [vmem:[#allocation2 + $0x9f] sm:$0xff] }
 0x1cb   : > { %v924_v41 = vld [vmem:[#allocation2 + $0x13f] sm:$0xff] }
 0x1cc   : > { %v2559_v53 = vsel %vm2521_vm5, %v2510_v36, %v9384_v28  ;;  %v9509_v28 = vunpack.i.h.bf16 %v12484_v27  ;;  %v829_v36 = vld [vmem:[%s11590_s27 + $0x90] sm:$0xff] }
 0x1cd   : > { %v17636_v27 = vld [vmem:[#allocation32_spill] sm:$0xff] }
 0x1ce   : > { %2968 = vmatmul.f32.gmra.mxu0 %v2585_v60  ;;  %3028 = vmatmul.f32.gmra.mxu1 %v2605_v51  ;;  %v1267_v60 = vld [vmem:[#allocation2 + $0x190] sm:$0xff] }
 0x1cf   : > { %9856 = vrot.lane.b32.xlu2 %v9855_v39, %s11467_s4  ;;  %9851 = vrot.lane.b32.xlu1 %v9850_v55, %s11467_s4  ;;  %v901_v39 = vld [vmem:[#allocation2 + $0x87] sm:$0xff]  ;;  %v9503_v55 = vunpack.i.l.bf16 %v12513_v49  ;;  %v12626_v1 = vpop.permute.xlu1 %9596 }
 0x1d0   : > { %9846 = vrot.lane.b32.xlu0 %v9845_v23, %s11467_s4  ;;  %v1266_v23 = vld [vmem:[#allocation2 + $0x188] sm:$0xff]  ;;  %v2489_v51 = vsel %vm2472_vm4, %v901_v39, %v9213_v43  ;;  %v9218_v43 = vunpack.i.l.bf16 %v17634_v22  ;;  %v9458_v39 = vunpack.i.l.bf16 %v12348_v26 }
 0x1d1   : > { %v2538_v47 = vsel %vm2521_vm5, %v2489_v51, %v9333_v57  ;;  %v9875_v12 = vpack.i.bf16 %v1267_v60, %v1266_v23  ;;  %v2607_v29 = vsel %vm2570_vm6, %v2558_v7, %v9503_v55  ;;  %v903_v57 = vld [vmem:[#allocation2 + $0x97] sm:$0xff]  ;;  %v12656_v55 = vpop.permute.xlu0 %9591  ;;  %v2511_v60 = vsel %vm2472_vm4, %v923_v33, %v9268_v61 }
 0x1d2   : > { %v2587_v46 = vsel %vm2570_vm6, %v2538_v47, %v9453_v54  ;;  %v12654_v54 = vpop.permute.xlu2 %9556  ;;  %v2491_v23 = vsel %vm2472_vm4, %v903_v57, %v9218_v43  ;;  %v2560_v2 = vsel %vm2521_vm5, %v2511_v60, %v9388_v38  ;;  %v905_v43 = vld [vmem:[#allocation2 + $0xa7] sm:$0xff]  ;;  %v9513_v61 = vunpack.i.l.bf16 %v12344_v5 }
 0x1d3   : > { %v2609_v7 = vsel %vm2570_vm6, %v2560_v2, %v9508_v44 }
 0x1d6   : > { %2971 = vmatmul.f32.gmra.mxu0 %v2586_v50  ;;  %3031 = vmatmul.f32.gmra.mxu1 %v2606_v34  ;;  %v830_v34 = vld [vmem:[%s11590_s27 + $0x98] sm:$0xff] }
 0x1d7   : > { %9871 = vrot.lane.b32.xlu2 %v9870_v59, %s11467_s4  ;;  %9866 = vrot.lane.b32.xlu1 %v9865_v13, %s11467_s4  ;;  %v9504_v59 = vunpack.i.h.bf16 %v12513_v49  ;;  %v2539_v13 = vsel %vm2521_vm5, %v2490_v48, %v9334_v4  ;;  %v9338_v49 = vunpack.i.l.bf16 %v12212_v17  ;;  %v12650_v31 = vpop.permute.xlu1 %9611  ;;  %v9459_v4 = vunpack.i.h.bf16 %v12348_v26 }
 0x1d8   : > { %9861 = vrot.lane.b32.xlu0 %v9860_v18, %s11467_s4  ;;  %v2588_v18 = vsel %vm2570_vm6, %v2539_v13, %v9454_v6  ;;  %3083 = vmatpush.msrb.mxu1 %v830_v34  ;;  %v2512_v6 = vsel %vm2472_vm4, %v924_v41, %v9269_v20  ;;  %v9393_v34 = vunpack.i.l.bf16 %v12208_v15  ;;  %v926_v41 = vld [vmem:[#allocation2 + $0x14f] sm:$0xff] }
 0x1d9   : > { %v2608_v50 = vsel %vm2570_vm6, %v2559_v53, %v9504_v59  ;;  %v2540_v51 = vsel %vm2521_vm5, %v2491_v23, %v9338_v49  ;;  %v12676_v48 = vpop.permute.xlu0 %9606  ;;  %v9273_v53 = vunpack.i.l.bf16 %v17636_v27  ;;  %v9463_v49 = vunpack.i.l.bf16 %v12384_v40 }
 0x1da   : > { %v2589_v47 = vsel %vm2570_vm6, %v2540_v51, %v9458_v39  ;;  %v12674_v59 = vpop.permute.xlu2 %9571  ;;  %3084 = vmatpush.msrb.mxu1 %v829_v36 }
 0x1db   : > { %v2513_v33 = vsel %vm2472_vm4, %v925_v45, %v9273_v53  ;;  %v17641_v53 = vld [vmem:[#allocation74_spill] sm:$0xff]  ;;  %v927_v45 = vld [vmem:[#allocation2 + $0x157] sm:$0xff] }
 0x1dc   : > { %v2562_v23 = vsel %vm2521_vm5, %v2513_v33, %v9393_v34 }
 0x1dd   : > { %v2611_v51 = vsel %vm2570_vm6, %v2562_v23, %v9513_v61  ;;  %v9468_v61 = vunpack.i.l.bf16 %v12291_v25  ;;  %v846_v23 = vld [vmem:[%s11590_s27 + $0x118] sm:$0xff] }
 0x1de   : > { %2974 = vmatmul.f32.gmra.mxu0 %v2587_v46  ;;  %3034 = vmatmul.f32.gmra.mxu1 %v2607_v29  ;;  %v9339_v46 = vunpack.i.h.bf16 %v12212_v17  ;;  %v9389_v29 = vunpack.i.h.bf16 %v12261_v10 }
 0x1df   : > { %v12670_v24 = vpop.permute.xlu1 %9626  ;;  %3244 = vmatpush.msra.mxu2 %v846_v23  ;;  %9081 = vmatpush.msrb.mxu3 %v846_v23  ;;  %v1273_v23 = vld [vmem:[#allocation2 + $0x41] sm:$0xff] }
 0x1e0   : > { %9876 = vrot.lane.b32.xlu0 %v9875_v12, %s11467_s4  ;;  %v9219_v12 = vunpack.i.h.bf16 %v17634_v22  ;;  %v2561_v10 = vsel %vm2521_vm5, %v2512_v6, %v9389_v29  ;;  %v9343_v22 = vunpack.i.l.bf16 %v12210_v14  ;;  %v9344_v29 = vunpack.i.h.bf16 %v12210_v14 }
 0x1e1   : > { %v2610_v26 = vsel %vm2570_vm6, %v2561_v10, %v9509_v28  ;;  %v9464_v28 = vunpack.i.h.bf16 %v12384_v40 }
 0x1e2   : > { %v2492_v19 = vsel %vm2472_vm4, %v904_v9, %v9219_v12  ;;  %v12699_v2 = vpop.permute.xlu2 %9586  ;;  %v9274_v12 = vunpack.i.h.bf16 %v17636_v27  ;;  %v906_v9 = vld [vmem:[#allocation2 + $0xaf] sm:$0xff] }
 0x1e3   : > { %v2541_v17 = vsel %vm2521_vm5, %v2492_v19, %v9339_v46  ;;  %v9394_v46 = vunpack.i.h.bf16 %v12208_v15 }
 0x1e4   : > { %v2590_v13 = vsel %vm2570_vm6, %v2541_v17, %v9459_v4  ;;  %v9514_v4 = vunpack.i.h.bf16 %v12344_v5  ;;  %v2514_v17 = vsel %vm2472_vm4, %v926_v41, %v9274_v12  ;;  %v17639_v5 = vld [vmem:[#allocation15_spill] sm:$0xff]  ;;  %v845_v12 = vld [vmem:[%s11590_s27 + $0x110] sm:$0xff] }
 0x1e5   : > { %v2563_v36 = vsel %vm2521_vm5, %v2514_v17, %v9394_v46  ;;  %v9228_v40 = vunpack.i.l.bf16 %v17639_v5  ;;  %3245 = vmatpush.msra.mxu2 %v845_v12  ;;  %9082 = vmatpush.msrb.mxu3 %v845_v12  ;;  %v908_v17 = vld [vmem:[#allocation2 + $0xbf] sm:$0xff] }
 0x1e6   : > { %2977 = vmatmul.f32.gmra.mxu0 %v2588_v18  ;;  %3037 = vmatmul.f32.gmra.mxu1 %v2608_v50  ;;  %v17637_v18 = vld [vmem:[#allocation36_spill] sm:$0xff]  ;;  %v2612_v14 = vsel %vm2570_vm6, %v2563_v36, %v9514_v4  ;;  %v9349_v4 = vunpack.i.h.bf16 %v17641_v53  ;;  %v843_v36 = vld [vmem:[%s11590_s27 + $0x100] sm:$0xff] }
 0x1e7   : > { %v9223_v50 = vunpack.i.l.bf16 %v17637_v18  ;;  %v12693_v39 = vpop.permute.xlu1 %9641  ;;  %v9224_v20 = vunpack.i.h.bf16 %v17637_v18  ;;  %v9348_v18 = vunpack.i.l.bf16 %v17641_v53 }
 0x1e8   : > { %17638 = vst [vmem:[#allocation17_spill] sm:$0xff] %v12693_v39 }
 0x1e9   : > { %v2493_v57 = vsel %vm2472_vm4, %v905_v43, %v9223_v50  ;;  %v2494_v6 = vsel %vm2472_vm4, %v906_v9, %v9224_v20  ;;  %v9398_v50 = vunpack.i.l.bf16 %v12276_v56  ;;  %v907_v43 = vld [vmem:[#allocation2 + $0xb7] sm:$0xff]  ;;  %v9229_v9 = vunpack.i.h.bf16 %v17639_v5 }
 0x1ea   : > { %v2542_v44 = vsel %vm2521_vm5, %v2493_v57, %v9343_v22  ;;  %v2543_v10 = vsel %vm2521_vm5, %v2494_v6, %v9344_v29  ;;  %v12724_v34 = vpop.permute.xlu2 %9601  ;;  %v2495_v33 = vsel %vm2472_vm4, %v907_v43, %v9228_v40  ;;  %v844_v29 = vld [vmem:[%s11590_s27 + $0x108] sm:$0xff]  ;;  %v17642_v43 = vld [vmem:[#allocation72_spill] sm:$0xff] }
 0x1eb   : > { %v2591_v60 = vsel %vm2570_vm6, %v2542_v44, %v9463_v49  ;;  %v2592_v15 = vsel %vm2570_vm6, %v2543_v10, %v9464_v28  ;;  %v9518_v49 = vunpack.i.l.bf16 %v12538_v30  ;;  %v9399_v28 = vunpack.i.h.bf16 %v12276_v56  ;;  %v928_v10 = vld [vmem:[#allocation2 + $0x15f] sm:$0xff]  ;;  %3246 = vmatpush.msra.mxu2 %v844_v29  ;;  %9083 = vmatpush.msrb.mxu3 %v844_v29 }
 0x1ec   : > { %v2496_v56 = vsel %vm2472_vm4, %v908_v17, %v9229_v9  ;;  %v9284_v29 = vunpack.i.h.bf16 %v17642_v43  ;;  %v9404_v9 = vunpack.i.h.bf16 %v12280_v63 }
 0x1ed   : > { %3247 = vmatpush.msra.mxu2 %v843_v36  ;;  %9084 = vmatpush.msrb.mxu3 %v843_v36 }
 0x1ee   : > { %2980 = vmatmul.f32.gmra.mxu0 %v2589_v47  ;;  %3040 = vmatmul.f32.gmra.mxu1 %v2609_v7  ;;  %v12701_v47 = vpop.permute.xlu0 %9621  ;;  %v828_v7 = vld [vmem:[%s11590_s27 + $0x88] sm:$0xff] }
 0x1ef   : > { %3085 = vmatpush.msrb.mxu1 %v828_v7  ;;  %v827_v7 = vld [vmem:[%s11590_s27 + $0x80] sm:$0xff] }
 0x1f1   : > { %3086 = vmatpush.msrb.mxu1 %v827_v7 }
 0x1f2   : > { %v12751_v5 = vpop.permute.xlu2 %9616 }
 0x1f6   : > { %2983 = vmatmul.f32.gmra.mxu0 %v2590_v13  ;;  %3043 = vmatmul.f32.gmra.mxu1 %v2610_v26  ;;  %v12718_v13 = vpop.permute.xlu1 %9656  ;;  %v17640_v26 = vld [vmem:[#allocation73_spill] sm:$0xff]  ;;  %v12726_v22 = vpop.permute.xlu0 %9636 }
 0x1f7   : > { %v9278_v27 = vunpack.i.l.bf16 %v17640_v26  ;;  %v9279_v41 = vunpack.i.h.bf16 %v17640_v26  ;;  %v1272_v26 = vld [vmem:[#allocation2 + $0x39] sm:$0xff] }
 0x1f8   : > { %8895 = vmatmul.msk.f32.vlgmr.msra.gmra.mxu2 %vm2472_vm4, %v1272_v26 }
 0x1f9   : > { %v2515_v44 = vsel %vm2472_vm4, %v927_v45, %v9278_v27  ;;  %v2516_v53 = vsel %vm2472_vm4, %v928_v10, %v9279_v41  ;;  %v9283_v45 = vunpack.i.l.bf16 %v17642_v43  ;;  %v930_v41 = vld [vmem:[#allocation2 + $0x16f] sm:$0xff] }
 0x1fa   : > { %v12772_v7 = vpop.permute.xlu2 %9631  ;;  %v2518_v10 = vsel %vm2472_vm4, %v930_v41, %v9284_v29 }
 0x1fb   : > { %v12689_v38 = vpop.f32.mrf.mxu1 }
 0x1fe   : > { %2986 = vmatmul.f32.gmra.mxu0 %v2591_v60  ;;  %3046 = vmatmul.f32.gmra.mxu1 %v2611_v51  ;;  %v2544_v60 = vsel %vm2521_vm5, %v2495_v33, %v9348_v18  ;;  %v2564_v51 = vsel %vm2521_vm5, %v2515_v44, %v9398_v50  ;;  %v12746_v6 = vpop.permute.xlu1 %9671  ;;  %v12753_v40 = vpop.permute.xlu0 %9651  ;;  %v2545_v18 = vsel %vm2521_vm5, %v2496_v56, %v9349_v4  ;;  %v9523_v33 = vunpack.i.l.bf16 %v12507_v58 }
 0x1ff   : > { %v2593_v20 = vsel %vm2570_vm6, %v2544_v60, %v9468_v61  ;;  %v2613_v46 = vsel %vm2570_vm6, %v2564_v51, %v9518_v49  ;;  %v9403_v61 = vunpack.i.l.bf16 %v12280_v63  ;;  %v929_v49 = vld [vmem:[#allocation2 + $0x167] sm:$0xff]  ;;  %v9524_v4 = vunpack.i.h.bf16 %v12507_v58 }
 0x200   : > { %v2517_v51 = vsel %vm2472_vm4, %v929_v49, %v9283_v45  ;;  %8896 = vmatmul.msk.f32.gmra.mxu2 %vm2472_vm4, %v1273_v23  ;;  %v9288_v63 = vunpack.i.l.bf16 %v17593_v0  ;;  %v9408_v58 = vunpack.i.l.bf16 %v12227_v37  ;;  %v9533_v45 = vunpack.i.l.bf16 %v12562_v8  ;;  %v1079_v0 = vld [vmem:[#allocation2 + $0x20] sm:$0xff] }
 0x202   : > { %v12790_v26 = vpop.permute.xlu2 %9646 }
 0x203   : > { %v12710_v19 = vpop.f32.mrf.mxu1  ;;  %17645 = vst [vmem:[#allocation31_spill] sm:$0xff] %v12790_v26 }
 0x206   : > { %2989 = vmatmul.f32.gmra.mxu0 %v2592_v15  ;;  %3049 = vmatmul.f32.gmra.mxu1 %v2612_v14  ;;  %v9469_v15 = vunpack.i.h.bf16 %v12291_v25  ;;  %v9519_v14 = vunpack.i.h.bf16 %v12538_v30  ;;  %v2565_v25 = vsel %vm2521_vm5, %v2516_v53, %v9399_v28  ;;  %v12767_v44 = vpop.permute.xlu1 %9686  ;;  %v12774_v12 = vpop.permute.xlu0 %9666  ;;  %v1274_v28 = vld [vmem:[#allocation2 + $0x49] sm:$0xff]  ;;  %v931_v53 = vld [vmem:[#allocation2 + $0x177] sm:$0xff] }
 0x208   : > { %v2594_v30 = vsel %vm2570_vm6, %v2545_v18, %v9469_v15  ;;  %v2614_v50 = vsel %vm2570_vm6, %v2565_v25, %v9519_v14  ;;  %v2567_v15 = vsel %vm2521_vm5, %v2518_v10, %v9404_v9  ;;  %8897 = vmatmul.msk.f32.gmra.mxu2 %vm2472_vm4, %v1274_v28  ;;  %v9528_v18 = vunpack.i.l.bf16 %v12371_v62  ;;  %v1275_v25 = vld [vmem:[#allocation2 + $0x51] sm:$0xff] }
 0x209   : > { %v2616_v14 = vsel %vm2570_vm6, %v2567_v15, %v9524_v4  ;;  %v9653_v62 = vunpack.i.l.bf16 %v12753_v40  ;;  %v9534_v9 = vunpack.i.h.bf16 %v12562_v8  ;;  %v1080_v4 = vld [vmem:[#allocation2 + $0x28] sm:$0xff]  ;;  %v9654_v28 = vunpack.i.h.bf16 %v12753_v40 }
 0x20a   : > { %v12804_v37 = vpop.permute.xlu2 %9661  ;;  %v9538_v40 = vunpack.i.l.bf16 %v12531_v11 }
 0x20b   : > { %v12730_v57 = vpop.f32.mrf.mxu1  ;;  %v2620_v15 = vsel %vm2472_vm4, %v1080_v4, %v9534_v9  ;;  %v9659_v9 = vunpack.i.h.bf16 %v12718_v13 }
 0x20e   : > { %2992 = vmatmul.f32.gmra.mxu0 %v2593_v20  ;;  %3052 = vmatmul.f32.gmra.mxu1 %v2613_v46  ;;  %v2566_v20 = vsel %vm2521_vm5, %v2517_v51, %v9403_v61  ;;  %v12785_v36 = vpop.permute.xlu1 %9701  ;;  %v12792_v56 = vpop.permute.xlu0 %9681  ;;  %v2619_v51 = vsel %vm2472_vm4, %v1079_v0, %v9533_v45 }
 0x20f   : > { %v2615_v46 = vsel %vm2570_vm6, %v2566_v20, %v9523_v33  ;;  %v1276_v20 = vld [vmem:[#allocation2 + $0x59] sm:$0xff]  ;;  %v2667_v29 = vsel %vm2521_vm5, %v2619_v51, %v9653_v62 }
 0x210   : > { %8898 = vmatmul.msk.f32.gmra.mxu2 %vm2472_vm4, %v1275_v25 }
 0x213   : > { %v12755_v27 = vpop.f32.mrf.mxu1 }
 0x216   : > { %2995 = vmatmul.f32.gmra.mxu0 %v2594_v30  ;;  %3055 = vmatmul.f32.gmra.mxu1 %v2614_v50  ;;  %v2519_v50 = vsel %vm2472_vm4, %v931_v53, %v9288_v63  ;;  %v9717_v49 = vpop.permute.xlu1 %9716  ;;  %v12807_v33 = vpop.permute.xlu0 %9696 }
 0x217   : > { %v2568_v43 = vsel %vm2521_vm5, %v2519_v50, %v9408_v58  ;;  %v9718_v23 = vunpack.i.l.bf16 %v9717_v49  ;;  %v9719_v10 = vunpack.i.h.bf16 %v9717_v49  ;;  %v12818_v63 = vpop.permute.xlu2 %9676  ;;  %v9658_v50 = vunpack.i.l.bf16 %v12718_v13  ;;  %v1083_v13 = vld [vmem:[#allocation2 + $0x40] sm:$0xff] }
 0x218   : > { %v2617_v61 = vsel %vm2570_vm6, %v2568_v43, %v9528_v18  ;;  %8899 = vmatmul.msk.f32.gmra.mxu2 %vm2472_vm4, %v1276_v20  ;;  %v2668_v18 = vsel %vm2521_vm5, %v2620_v15, %v9654_v28  ;;  %v1081_v43 = vld [vmem:[#allocation2 + $0x30] sm:$0xff] }
 0x219   : > { %v2715_v41 = vsel %vm2570_vm6, %v2667_v29, %v9718_v23  ;;  %v2716_v8 = vsel %vm2570_vm6, %v2668_v18, %v9719_v10  ;;  %v2621_v0 = vsel %vm2472_vm4, %v1081_v43, %v9538_v40  ;;  %v9539_v29 = vunpack.i.h.bf16 %v12531_v11  ;;  %v1279_v28 = vld [vmem:[#allocation2 + $0x71] sm:$0xff] }
 0x21a   : > { %v2669_v51 = vsel %vm2521_vm5, %v2621_v0, %v9658_v50  ;;  %v9543_v18 = vunpack.i.l.bf16 %v12632_v52 }
 0x21b   : > { %v12769_v60 = vpop.f32.mrf.mxu1 }
 0x21c   : > { %17643 = vst [vmem:[#allocation22_spill] sm:$0xff] %v12769_v60  ;;  %v2623_v43 = vsel %vm2472_vm4, %v1083_v13, %v9543_v18 }
 0x21e   : > { %3058 = vmatmul.f32.gmra.mxu1 %v2615_v46  ;;  %v12820_v58 = vpop.permute.xlu0 %9711  ;;  %v9732_v25 = vpop.permute.xlu1 %9731 }
 0x21f   : > { %v9733_v45 = vunpack.i.l.bf16 %v9732_v25  ;;  %v12832_v62 = vpop.permute.xlu2 %9691  ;;  %v9734_v4 = vunpack.i.h.bf16 %v9732_v25  ;;  %v9663_v25 = vunpack.i.l.bf16 %v12804_v37 }
 0x221   : > { %v2717_v20 = vsel %vm2570_vm6, %v2669_v51, %v9733_v45  ;;  %v1280_v45 = vld [vmem:[#allocation2 + $0x79] sm:$0xff]  ;;  %v2671_v0 = vsel %vm2521_vm5, %v2623_v43, %v9663_v25  ;;  %v9544_v51 = vunpack.i.h.bf16 %v12632_v52  ;;  %v9548_v52 = vunpack.i.l.bf16 %v12584_v42  ;;  %v1085_v25 = vld [vmem:[#allocation2 + $0x50] sm:$0xff] }
 0x222   : > { %v1282_v43 = vld [vmem:[#allocation2 + $0x89] sm:$0xff] }
 0x223   : > { %v12782_v17 = vpop.f32.mrf.mxu1 }
 0x224   : > { %17644 = vst [vmem:[#allocation35_spill] sm:$0xff] %v12782_v17 }
 0x226   : > { %3061 = vmatmul.f32.gmra.mxu1 %v2616_v14  ;;  %v1277_v14 = vld [vmem:[#allocation2 + $0x61] sm:$0xff]  ;;  %v12834_v23 = vpop.permute.xlu0 %9726 }
 0x227   : > { %8900 = vmatmul.msk.f32.gmra.mxu2 %vm2472_vm4, %v1277_v14  ;;  %v12848_v40 = vpop.permute.xlu2 %9706 }
 0x22b   : > { %v12797_v30 = vpop.f32.mrf.mxu1 }
 0x22c   : > { %17646 = vst [vmem:[#allocation24_spill] sm:$0xff] %v12797_v30  ;;  %v9584_v30 = vunpack.i.h.bf16 %v12602_v3 }
 0x22e   : > { %3064 = vmatmul.f32.gmra.mxu1 %v2617_v61  ;;  %v1278_v61 = vld [vmem:[#allocation2 + $0x69] sm:$0xff]  ;;  %v9742_v11 = vpop.permute.xlu0 %9741 }
 0x22f   : > { %8901 = vmatmul.msk.f32.gmra.mxu2 %vm2472_vm4, %v1278_v61  ;;  %v9743_v50 = vunpack.i.l.bf16 %v9742_v11 }
 0x233   : > { %v12810_v46 = vpop.f32.mrf.mxu1 }
 0x234   : > { %17647 = vst [vmem:[#allocation34_spill] sm:$0xff] %v12810_v46  ;;  %v878_v46 = vld [vmem:[%s11595_s22 + $0xf0] sm:$0xff] }
 0x236   : > { %3087 = vmatmul.f32.vlgmr.msrb.gmra.mxu1 %v2715_v41  ;;  %v1082_v41 = vld [vmem:[#allocation2 + $0x38] sm:$0xff]  ;;  %v9757_v13 = vpop.permute.xlu0 %9756 }
 0x237   : > { %v2622_v15 = vsel %vm2472_vm4, %v1082_v41, %v9539_v29  ;;  %8902 = vmatmul.msk.f32.gmra.mxu2 %vm2472_vm4, %v1279_v28  ;;  %v1084_v29 = vld [vmem:[#allocation2 + $0x48] sm:$0xff]  ;;  %v12859_v41 = vpop.permute.xlu2 %9721 }
 0x238   : > { %v2670_v14 = vsel %vm2521_vm5, %v2622_v15, %v9659_v9  ;;  %v9664_v9 = vunpack.i.h.bf16 %v12804_v37  ;;  %v2624_v28 = vsel %vm2472_vm4, %v1084_v29, %v9544_v51  ;;  %v1281_v15 = vld [vmem:[#allocation2 + $0x81] sm:$0xff]  ;;  %v9668_v37 = vunpack.i.l.bf16 %v12774_v12 }
 0x23a   : > { %v2672_v18 = vsel %vm2521_vm5, %v2624_v28, %v9664_v9  ;;  %v1086_v9 = vld [vmem:[#allocation2 + $0x58] sm:$0xff]  ;;  %v9759_v28 = vunpack.i.h.bf16 %v9757_v13 }
 0x23b   : > { %v12822_v53 = vpop.f32.mrf.mxu1 }
 0x23c   : > { %17648 = vst [vmem:[#allocation26_spill] sm:$0xff] %v12822_v53 }
 0x23e   : > { %3090 = vmatmul.f32.gmra.mxu1 %v2716_v8  ;;  %v2718_v8 = vsel %vm2570_vm6, %v2670_v14, %v9734_v4  ;;  %v9744_v4 = vunpack.i.h.bf16 %v9742_v11  ;;  %v2625_v11 = vsel %vm2472_vm4, %v1085_v25, %v9548_v52 }
 0x23f   : > { %8903 = vmatmul.msk.f32.gmra.mxu2 %vm2472_vm4, %v1280_v45  ;;  %v12870_v45 = vpop.permute.xlu2 %9736  ;;  %v2673_v51 = vsel %vm2521_vm5, %v2625_v11, %v9668_v37  ;;  %v9772_v37 = vpop.permute.xlu0 %9771 }
 0x240   : > { %v9773_v11 = vunpack.i.l.bf16 %v9772_v37 }
 0x243   : > { %v12829_v49 = vpop.f32.mrf.mxu1 }
 0x244   : > { %17649 = vst [vmem:[#allocation23_spill] sm:$0xff] %v12829_v49 }
 0x246   : > { %3093 = vmatmul.f32.gmra.mxu1 %v2717_v20  ;;  %v2719_v20 = vsel %vm2570_vm6, %v2671_v0, %v9743_v50  ;;  %v9758_v50 = vunpack.i.l.bf16 %v9757_v13  ;;  %v1087_v13 = vld [vmem:[#allocation2 + $0x60] sm:$0xff] }
 0x247   : > { %8904 = vmatmul.msk.f32.gmra.mxu2 %vm2472_vm4, %v1281_v15 }
 0x248   : > { %v2721_v29 = vsel %vm2570_vm6, %v2673_v51, %v9758_v50  ;;  %v9553_v50 = vunpack.i.l.bf16 %v12556_v16 }
 0x24b   : > { %v12841_v10 = vpop.f32.mrf.mxu1 }
 0x24c   : > { %17650 = vst [vmem:[#allocation18_spill] sm:$0xff] %v12841_v10 }
 0x24e   : > { %3096 = vmatmul.f32.gmra.mxu1 %v2718_v8  ;;  %v2720_v8 = vsel %vm2570_vm6, %v2672_v18, %v9744_v4  ;;  %v9669_v4 = vunpack.i.h.bf16 %v12774_v12  ;;  %v1283_v18 = vld [vmem:[#allocation2 + $0x91] sm:$0xff]  ;;  %v9673_v12 = vunpack.i.l.bf16 %v12746_v6 }
 0x24f   : > { %8905 = vmatmul.msk.f32.gmra.mxu2 %vm2472_vm4, %v1282_v43  ;;  %v1284_v43 = vld [vmem:[#allocation2 + $0x99] sm:$0xff] }
 0x253   : > { %v12852_v61 = vpop.f32.mrf.mxu1 }
 0x254   : > { %17651 = vst [vmem:[#allocation44_spill] sm:$0xff] %v12852_v61 }
 0x256   : > { %3099 = vmatmul.f32.gmra.mxu1 %v2719_v20  ;;  %v9549_v20 = vunpack.i.h.bf16 %v12584_v42 }
 0x257   : > { %8906 = vmatmul.msk.f32.gmra.mxu2 %vm2472_vm4, %v1283_v18  ;;  %v9674_v18 = vunpack.i.h.bf16 %v12746_v6  ;;  %v12909_v6 = vpop.f32.mrf.mxu0 }
 0x258   : > { %v2626_v15 = vsel %vm2472_vm4, %v1086_v9, %v9549_v20  ;;  %v2627_v20 = vsel %vm2472_vm4, %v1087_v13, %v9553_v50  ;;  %v9558_v50 = vunpack.i.l.bf16 %v12654_v54 }
 0x259   : > { %v2674_v25 = vsel %vm2521_vm5, %v2626_v15, %v9669_v4  ;;  %v9554_v15 = vunpack.i.h.bf16 %v12556_v16  ;;  %v9678_v16 = vunpack.i.l.bf16 %v12818_v63 }
 0x25a   : > { %v2722_v42 = vsel %vm2570_vm6, %v2674_v25, %v9759_v28  ;;  %v12897_v28 = vpop.permute.xlu1 %9746  ;;  %v1088_v25 = vld [vmem:[#allocation2 + $0x68] sm:$0xff] }
 0x25b   : > { %v12862_v14 = vpop.f32.mrf.mxu1 }
 0x25c   : > { %17652 = vst [vmem:[#allocation42_spill] sm:$0xff] %v12862_v14  ;;  %v9693_v14 = vunpack.i.l.bf16 %v12832_v62 }
 0x25e   : > { %3102 = vmatmul.f32.gmra.mxu1 %v2720_v8  ;;  %v12882_v8 = vpop.permute.xlu2 %9751 }
 0x25f   : > { %8907 = vmatmul.msk.f32.gmra.mxu2 %vm2472_vm4, %v1284_v43  ;;  %v1089_v43 = vld [vmem:[#allocation2 + $0x70] sm:$0xff] }
 0x263   : > { %v12872_v0 = vpop.f32.mrf.mxu1 }
 0x264   : > { %17653 = vst [vmem:[#allocation30_spill] sm:$0xff] %v12872_v0  ;;  %v1289_v0 = vld [vmem:[#allocation2 + $0xc1] sm:$0xff] }
 0x266   : > { %3105 = vmatmul.f32.gmra.mxu1 %v2721_v29  ;;  %v2675_v29 = vsel %vm2521_vm5, %v2627_v20, %v9673_v12  ;;  %v12895_v4 = vpop.permute.xlu2 %9766  ;;  %v2628_v12 = vsel %vm2472_vm4, %v1088_v25, %v9554_v15 }
 0x267   : > { %v2723_v9 = vsel %vm2570_vm6, %v2675_v29, %v9773_v11  ;;  %v2676_v11 = vsel %vm2521_vm5, %v2628_v12, %v9674_v18  ;;  %v9559_v18 = vunpack.i.h.bf16 %v12654_v54 }
 0x26b   : > { %v12880_v52 = vpop.f32.mrf.mxu1 }
 0x26c   : > { %17654 = vst [vmem:[#allocation43_spill] sm:$0xff] %v12880_v52  ;;  %v1286_v52 = vld [vmem:[#allocation2 + $0xa9] sm:$0xff] }
 0x26e   : > { %3108 = vmatmul.f32.gmra.mxu1 %v2722_v42  ;;  %v9774_v42 = vunpack.i.h.bf16 %v9772_v37  ;;  %v2629_v37 = vsel %vm2472_vm4, %v1089_v43, %v9558_v50  ;;  %v9782_v29 = vpop.permute.xlu2 %9781  ;;  %v9679_v50 = vunpack.i.h.bf16 %v12818_v63 }
 0x26f   : > { %v2677_v15 = vsel %vm2521_vm5, %v2629_v37, %v9678_v16  ;;  %v9784_v43 = vunpack.i.h.bf16 %v9782_v29  ;;  %v12923_v16 = vpop.f32.mrf.mxu0 }
 0x270   : > { %v2724_v20 = vsel %vm2570_vm6, %v2676_v11, %v9774_v42  ;;  %v1298_v42 = vld [vmem:[#allocation2 + $0x109] sm:$0xff] }
 0x271   : > { %8921 = vmatmul.msk.f32.vlgmr.msrb.gmra.mxu3 %vm2472_vm4, %v1298_v42 }
 0x273   : > { %v12889_v51 = vpop.f32.mrf.mxu1 }
 0x274   : > { %17655 = vst [vmem:[#allocation33_spill] sm:$0xff] %v12889_v51  ;;  %v1285_v51 = vld [vmem:[#allocation2 + $0xa1] sm:$0xff] }
 0x275   : > { %8908 = vmatmul.msk.f32.gmra.mxu2 %vm2472_vm4, %v1285_v51  ;;  %v1090_v51 = vld [vmem:[#allocation2 + $0x78] sm:$0xff] }
 0x276   : > { %3111 = vmatmul.f32.gmra.mxu1 %v2723_v9  ;;  %v12912_v9 = vpop.permute.xlu1 %9761  ;;  %v2630_v11 = vsel %vm2472_vm4, %v1090_v51, %v9559_v18  ;;  %v9683_v18 = vunpack.i.l.bf16 %v12792_v56 }
 0x277   : > { %v2678_v37 = vsel %vm2521_vm5, %v2630_v11, %v9679_v50  ;;  %v12938_v11 = vpop.f32.mrf.mxu0 }
 0x278   : > { %v2726_v63 = vsel %vm2570_vm6, %v2678_v37, %v9784_v43  ;;  %v9564_v43 = vunpack.i.h.bf16 %v12608_v35 }
 0x27b   : > { %v12902_v13 = vpop.f32.mrf.mxu1 }
 0x27c   : > { %17656 = vst [vmem:[#allocation29_spill] sm:$0xff] %v12902_v13  ;;  %v9783_v13 = vunpack.i.l.bf16 %v9782_v29  ;;  %v1091_v29 = vld [vmem:[#allocation2 + $0x80] sm:$0xff] }
 0x27d   : > { %8909 = vmatmul.msk.f32.gmra.mxu2 %vm2472_vm4, %v1286_v52  ;;  %v1299_v52 = vld [vmem:[#allocation2 + $0x111] sm:$0xff] }
 0x27e   : > { %3114 = vmatmul.f32.gmra.mxu1 %v2724_v20  ;;  %v2725_v12 = vsel %vm2570_vm6, %v2677_v15, %v9783_v13  ;;  %v1287_v20 = vld [vmem:[#allocation2 + $0xb1] sm:$0xff]  ;;  %v12925_v54 = vpop.permute.xlu1 %9776  ;;  %v9563_v13 = vunpack.i.l.bf16 %v12608_v35  ;;  %8922 = vmatmul.msk.f32.gmra.mxu3 %vm2472_vm4, %v1299_v52  ;;  %v9797_v15 = vpop.permute.xlu2 %9796  ;;  %v1300_v52 = vld [vmem:[#allocation2 + $0x119] sm:$0xff] }
 0x27f   : > { %v9798_v51 = vunpack.i.l.bf16 %v9797_v15 }
 0x280   : > { %v2631_v42 = vsel %vm2472_vm4, %v1091_v29, %v9563_v13  ;;  %v12947_v13 = vpop.f32.mrf.mxu2  ;;  %v9684_v29 = vunpack.i.h.bf16 %v12792_v56  ;;  %v9568_v56 = vunpack.i.l.bf16 %v12580_v32 }
 0x283   : > { %v12916_v25 = vpop.f32.mrf.mxu1 }
 0x284   : > { %17657 = vst [vmem:[#allocation16_spill] sm:$0xff] %v12916_v25 }
 0x285   : > { %8910 = vmatmul.msk.f32.gmra.mxu2 %vm2472_vm4, %v1287_v20 }
 0x286   : > { %3117 = vmatmul.f32.gmra.mxu1 %v2725_v12  ;;  %v1288_v12 = vld [vmem:[#allocation2 + $0xb9] sm:$0xff]  ;;  %v12940_v20 = vpop.permute.xlu1 %9791  ;;  %8923 = vmatmul.msk.f32.gmra.mxu3 %vm2472_vm4, %v1300_v52  ;;  %v9812_v61 = vpop.permute.xlu2 %9811 }
 0x287   : > { %17660 = vst [vmem:[#allocation50_spill] sm:$0xff] %v12940_v20  ;;  %v9709_v20 = vunpack.i.h.bf16 %v12848_v40 }
 0x28b   : > { %v12928_v25 = vpop.f32.mrf.mxu1 }
 0x28c   : > { %17658 = vst [vmem:[#allocation41_spill] sm:$0xff] %v12928_v25  ;;  %v2679_v25 = vsel %vm2521_vm5, %v2631_v42, %v9683_v18 }
 0x28d   : > { %8911 = vmatmul.msk.f32.gmra.mxu2 %vm2472_vm4, %v1288_v12  ;;  %v2727_v37 = vsel %vm2570_vm6, %v2679_v25, %v9798_v51  ;;  %v1301_v25 = vld [vmem:[#allocation2 + $0x121] sm:$0xff]  ;;  %v12956_v51 = vpop.f32.mrf.mxu0 }
 0x28e   : > { %3120 = vmatmul.f32.gmra.mxu1 %v2726_v63  ;;  %v1092_v63 = vld [vmem:[#allocation2 + $0x88] sm:$0xff]  ;;  %v9807_v12 = vpop.permute.xlu1 %9806  ;;  %8924 = vmatmul.msk.f32.gmra.mxu3 %vm2472_vm4, %v1301_v25  ;;  %v13107_v17 = vpop.permute.xlu2 %9826 }
 0x28f   : > { %v2632_v26 = vsel %vm2472_vm4, %v1092_v63, %v9564_v43  ;;  %v9688_v43 = vunpack.i.l.bf16 %v12767_v44  ;;  %v9808_v52 = vunpack.i.l.bf16 %v9807_v12 }
 0x290   : > { %v2680_v42 = vsel %vm2521_vm5, %v2632_v26, %v9684_v29  ;;  %v1290_v26 = vld [vmem:[#allocation2 + $0xc9] sm:$0xff] }
 0x293   : > { %v12936_v50 = vpop.f32.mrf.mxu1 }
 0x294   : > { %17659 = vst [vmem:[#allocation46_spill] sm:$0xff] %v12936_v50  ;;  %v9799_v50 = vunpack.i.h.bf16 %v9797_v15  ;;  %v12960_v15 = vpop.f32.mrf.mxu2 }
 0x295   : > { %8912 = vmatmul.msk.f32.gmra.mxu2 %vm2472_vm4, %v1289_v0 }
 0x296   : > { %3123 = vmatmul.f32.gmra.mxu1 %v2727_v37  ;;  %v2728_v35 = vsel %vm2570_vm6, %v2680_v42, %v9799_v50  ;;  %v1093_v37 = vld [vmem:[#allocation2 + $0x90] sm:$0xff] }
 0x297   : > { %v2633_v0 = vsel %vm2472_vm4, %v1093_v37, %v9568_v56  ;;  %v1302_v42 = vld [vmem:[#allocation2 + $0x129] sm:$0xff]  ;;  %v1094_v56 = vld [vmem:[#allocation2 + $0x98] sm:$0xff]  ;;  %v9809_v37 = vunpack.i.h.bf16 %v9807_v12  ;;  %v12987_v12 = vld [vmem:[%s11579_s13] ss:$0 sm:$0xff] }
 0x298   : > { %v2681_v50 = vsel %vm2521_vm5, %v2633_v0, %v9688_v43  ;;  %8925 = vmatmul.msk.f32.gmra.mxu3 %vm2472_vm4, %v1302_v42  ;;  %v12976_v43 = vpop.permute.xlu0 %9786  ;;  %v1303_v42 = vld [vmem:[#allocation2 + $0x131] sm:$0xff] }
 0x299   : > { %v2729_v29 = vsel %vm2570_vm6, %v2681_v50, %v9808_v52  ;;  %v9573_v52 = vunpack.i.l.bf16 %v12674_v59 }
 0x29b   : > { %v12951_v18 = vpop.f32.mrf.mxu1 }
 0x29c   : > { %17661 = vst [vmem:[#allocation20_spill] sm:$0xff] %v12951_v18  ;;  %v12971_v25 = vpop.f32.mrf.mxu2  ;;  %v9689_v18 = vunpack.i.h.bf16 %v12767_v44 }
 0x29d   : > { %8913 = vmatmul.msk.f32.gmra.mxu2 %vm2472_vm4, %v1290_v26  ;;  %v1291_v26 = vld [vmem:[#allocation2 + $0xd1] sm:$0xff] }
 0x29e   : > { %3126 = vmatmul.f32.gmra.mxu1 %v2728_v35  ;;  %v9569_v35 = vunpack.i.h.bf16 %v12580_v32 }
 0x2a0   : > { %v2634_v50 = vsel %vm2472_vm4, %v1094_v56, %v9569_v35  ;;  %8926 = vmatmul.msk.f32.gmra.mxu3 %vm2472_vm4, %v1303_v42  ;;  %v9813_v35 = vunpack.i.l.bf16 %v9812_v61  ;;  %v12999_v49 = vpop.permute.xlu0 %9801  ;;  %v1096_v42 = vld [vmem:[#allocation2 + $0xa8] sm:$0xff] }
 0x2a1   : > { %v2682_v32 = vsel %vm2521_vm5, %v2634_v50, %v9689_v18  ;;  %v2928_v18 = vadd.f32 %v12987_v12, %v12909_v6  ;;  %v9574_v50 = vunpack.i.h.bf16 %v12674_v59  ;;  %17664 = vst [vmem:[#allocation49_spill] sm:$0xff] %v12999_v49  ;;  %v9694_v6 = vunpack.i.h.bf16 %v12832_v62  ;;  %v879_v62 = vld [vmem:[%s11595_s22 + $0xf8] sm:$0xff]  ;;  %v1293_v49 = vld [vmem:[#allocation2 + $0xe1] sm:$0xff] }
 0x2a2   : > { %v2730_v44 = vsel %vm2570_vm6, %v2682_v32, %v9809_v37  ;;  %5405 = vmatpush.msrb.mxu2 %v879_v62 }
 0x2a3   : > { %v12963_v63 = vpop.f32.mrf.mxu1  ;;  %v2636_v59 = vsel %vm2472_vm4, %v1096_v42, %v9574_v50  ;;  %v1305_v50 = vld [vmem:[#allocation2 + $0x141] sm:$0xff]  ;;  %v882_v42 = vld [vmem:[%s11595_s22 + $0x110] sm:$0xff] }
 0x2a4   : > { %17662 = vst [vmem:[#allocation40_spill] sm:$0xff] %v12963_v63  ;;  %v12974_v63 = vpop.f32.mrf.mxu0  ;;  %v12991_v10 = vpop.f32.mrf.mxu2  ;;  %5406 = vmatpush.msrb.mxu2 %v878_v46 }
 0x2a5   : > { %8914 = vmatmul.msk.f32.gmra.mxu2 %vm2472_vm4, %v1291_v26  ;;  %v1292_v26 = vld [vmem:[#allocation2 + $0xd9] sm:$0xff] }
 0x2a6   : > { %3129 = vmatmul.f32.gmra.mxu1 %v2729_v29  ;;  %v1095_v29 = vld [vmem:[#allocation2 + $0xa0] sm:$0xff] }
 0x2ab   : > { %v12979_v0 = vpop.f32.mrf.mxu1 }
 0x2ac   : > { %17663 = vst [vmem:[#allocation53_spill] sm:$0xff] %v12979_v0  ;;  %v2635_v0 = vsel %vm2472_vm4, %v1095_v29, %v9573_v52  ;;  %v12995_v56 = vpop.f32.mrf.mxu0  ;;  %v1304_v29 = vld [vmem:[#allocation2 + $0x139] sm:$0xff] }
 0x2ad   : > { %v2683_v37 = vsel %vm2521_vm5, %v2635_v0, %v9693_v14  ;;  %8915 = vmatmul.msk.f32.gmra.mxu2 %vm2472_vm4, %v1292_v26  ;;  %8927 = vmatmul.msk.f32.gmra.mxu3 %vm2472_vm4, %v1304_v29  ;;  %v13007_v14 = vpop.f32.mrf.mxu2  ;;  %v2931_v26 = vadd.f32 %v12987_v12, %v12923_v16  ;;  %v9817_v29 = vpop.permute.xlu0 %9816 }
 0x2ae   : > { %3132 = vmatmul.f32.gmra.mxu1 %v2730_v44  ;;  %v2731_v52 = vsel %vm2570_vm6, %v2683_v37, %v9813_v35  ;;  %v2684_v37 = vsel %vm2521_vm5, %v2636_v59, %v9694_v6  ;;  %v1097_v59 = vld [vmem:[#allocation2 + $0xb0] sm:$0xff]  ;;  %v9818_v62 = vunpack.i.l.bf16 %v9817_v29 }
 0x2b3   : > { %v3088_v32 = vpop.f32.mrf.mxu1 }
 0x2b4   : > { %v3089_v44 = vadd.f32 %v3088_v32, %v2928_v18  ;;  %v9814_v18 = vunpack.i.h.bf16 %v9812_v61  ;;  %v17665_v32 = vld [vmem:[#allocation10_spill] sm:$0xff]  ;;  %v9578_v61 = vunpack.i.l.bf16 %v12634_v21 }
 0x2b5   : > { %8916 = vmatmul.msk.f32.gmra.mxu2 %vm2472_vm4, %v1293_v49  ;;  %8928 = vmatmul.msk.f32.gmra.mxu3 %vm2472_vm4, %v1305_v50  ;;  %v9698_v49 = vunpack.i.l.bf16 %v12807_v33 }
 0x2b6   : > { %v3250_v53 = vadd.f32 %v12947_v13, %v3089_v44  ;;  %3135 = vmatmul.f32.gmra.mxu1 %v2731_v52  ;;  %v883_v44 = vld [vmem:[%s11595_s22 + $0x118] sm:$0xff]  ;;  %v13015_v52 = vpop.f32.mrf.mxu0  ;;  %v2732_v16 = vsel %vm2570_vm6, %v2684_v37, %v9814_v18  ;;  %v2637_v18 = vsel %vm2472_vm4, %v1097_v59, %v9578_v61  ;;  %v9579_v61 = vunpack.i.h.bf16 %v12634_v21 }
 0x2b7   : > { %5578 = vmatpush.msrb.mxu0 %v883_v44  ;;  %v1268_v37 = vld [vmem:[#allocation2 + $0x198] sm:$0xff]  ;;  %v1294_v44 = vld [vmem:[#allocation2 + $0xe9] sm:$0xff] }
 0x2b8   : > { %v3393_v0 = vmax.f32 %v3250_v53, 0.0 }
 0x2b9   : > { %5579 = vmatpush.msrb.mxu0 %v882_v42  ;;  %v2685_v42 = vsel %vm2521_vm5, %v2637_v18, %v9698_v49  ;;  %v9699_v18 = vunpack.i.h.bf16 %v12807_v33 }
 0x2ba   : > { %v3441_v35 = vmul.f32 %v3393_v0, %v17665_v32  ;;  %v13024_v0 = vpop.f32.mrf.mxu2  ;;  %v2733_v59 = vsel %vm2570_vm6, %v2685_v42, %v9818_v62 }
 0x2bb   : > { %v3091_v13 = vpop.f32.mrf.mxu1 }
 0x2bc   : > { %3490 = vst.msk [vmem:[#allocation3 + $0x20] sm:$0xff] %vm2472_vm4, %v3441_v35  ;;  %v3092_v53 = vadd.f32 %v3091_v13, %v2931_v26  ;;  %v881_v26 = vld [vmem:[%s11595_s22 + $0x108] sm:$0xff]  ;;  %v880_v13 = vld [vmem:[%s11595_s22 + $0x100] sm:$0xff] }
 0x2bd   : > { %5580 = vmatpush.msrb.mxu0 %v881_v26  ;;  %8917 = vmatmul.msk.f32.gmra.mxu2 %vm2472_vm4, %v1294_v44  ;;  %v1306_v26 = vld [vmem:[#allocation2 + $0x149] sm:$0xff] }
 0x2be   : > { %v3253_v6 = vadd.f32 %v12960_v15, %v3092_v53  ;;  %3138 = vmatmul.f32.gmra.mxu1 %v2732_v16  ;;  %v2934_v15 = vadd.f32 %v12987_v12, %v12938_v11  ;;  %v13038_v11 = vpop.f32.mrf.mxu0  ;;  %8929 = vmatmul.msk.f32.gmra.mxu3 %vm2472_vm4, %v1306_v26  ;;  %v17666_v44 = vld [vmem:[#allocation11_spill] sm:$0xff]  ;;  %v9583_v26 = vunpack.i.l.bf16 %v12602_v3 }
 0x2bf   : > { %5581 = vmatpush.msrb.mxu0 %v880_v13  ;;  %v1098_v13 = vld [vmem:[#allocation2 + $0xb8] sm:$0xff] }
 0x2c0   : > { %v3394_v35 = vmax.f32 %v3253_v6, 0.0  ;;  %v2638_v46 = vsel %vm2472_vm4, %v1098_v13, %v9579_v61  ;;  %v1307_v61 = vld [vmem:[#allocation2 + $0x151] sm:$0xff]  ;;  %v9703_v13 = vunpack.i.l.bf16 %v12785_v36 }
 0x2c1   : > { %v2686_v33 = vsel %vm2521_vm5, %v2638_v46, %v9699_v18  ;;  %v3588_v46 = vld [vmem:[#allocation3 + $0x10] sm:$0xff] }
 0x2c2   : > { %3491 = vst.msk [vmem:[#allocation3 + $0x28] sm:$0xff] %vm2472_vm4, %v3394_v35  ;;  %v13042_v49 = vpop.f32.mrf.mxu2 }
 0x2c3   : > { %v3094_v53 = vpop.f32.mrf.mxu1  ;;  %v3541_v16 = vld [vmem:[#allocation3 + $0x1f] sm:$0xff] }
 0x2c4   : > { %v3095_v50 = vadd.f32 %v3094_v53, %v2934_v15  ;;  %v9880_v6 = vpack.i.bf16 %v3541_v16, %v1268_v37  ;;  %v3587_v15 = vld [vmem:[#allocation3 + $0x8] sm:$0xff]  ;;  %v9819_v37 = vunpack.i.h.bf16 %v9817_v29 }
 0x2c6   : > { %v3256_v35 = vadd.f32 %v12971_v25, %v3095_v50  ;;  %3141 = vmatmul.f32.gmra.mxu1 %v2733_v59  ;;  %9881 = vrot.lane.b32.xlu1 %v9880_v6, %s11467_s4  ;;  %v2937_v25 = vadd.f32 %v12987_v12, %v12956_v51  ;;  %v1295_v50 = vld [vmem:[#allocation2 + $0xf1] sm:$0xff]  ;;  %v2734_v29 = vsel %vm2570_vm6, %v2686_v33, %v9819_v37  ;;  %v9822_v51 = vpop.permute.xlu1 %9821 }
 0x2c7   : > { %8918 = vmatmul.msk.f32.gmra.mxu2 %vm2472_vm4, %v1295_v50  ;;  %8930 = vmatmul.msk.f32.gmra.mxu3 %vm2472_vm4, %v1307_v61  ;;  %v9823_v37 = vunpack.i.l.bf16 %v9822_v51 }
 0x2c8   : > { %v3395_v21 = vmax.f32 %v3256_v35, 0.0 }
 0x2c9   : > { %v13046_v62 = vld [vmem:[#allocation3 + $0x21] sm:$0xff] }
 0x2ca   : > { %v3443_v53 = vmul.f32 %v3395_v21, %v17666_v44  ;;  %v9885_v16 = vpack.i.bf16 %v13046_v62, %v3587_v15  ;;  %v13060_v35 = vpop.f32.mrf.mxu2  ;;  %v13064_v15 = vpop.f32.mrf.mxu0  ;;  %v1099_v21 = vld [vmem:[#allocation2 + $0xc0] sm:$0xff] }
 0x2cb   : > { %v3097_v42 = vpop.f32.mrf.mxu1 }
 0x2cc   : > { %3492 = vst.msk [vmem:[#allocation3 + $0x30] sm:$0xff] %vm2472_vm4, %v3443_v53  ;;  %v3098_v6 = vadd.f32 %v3097_v42, %v2937_v25  ;;  %9886 = vrot.lane.b32.xlu2 %v9885_v16, %s11465_s1  ;;  %v2940_v25 = vadd.f32 %v12987_v12, %v12974_v63  ;;  %v877_v53 = vld [vmem:[%s11595_s22 + $0xe8] sm:$0xff]  ;;  %v1296_v16 = vld [vmem:[#allocation2 + $0xf9] sm:$0xff]  ;;  %v2639_v42 = vsel %vm2472_vm4, %v1099_v21, %v9583_v26  ;;  %v9704_v21 = vunpack.i.h.bf16 %v12785_v36 }
 0x2cd   : > { %5407 = vmatpush.msrb.mxu2 %v877_v53  ;;  %v863_v63 = vld [vmem:[%s11595_s22 + $0x78] sm:$0xff]  ;;  %v3635_v53 = vld [vmem:[#allocation3 + $0x9] sm:$0xff] }
 0x2ce   : > { %v3259_v59 = vadd.f32 %v12991_v10, %v3098_v6  ;;  %3144 = vmatmul.f32.gmra.mxu1 %v2734_v29  ;;  %v2687_v29 = vsel %vm2521_vm5, %v2639_v42, %v9703_v13  ;;  %5244 = vmatpush.msra.mxu3 %v863_v63  ;;  %v3542_v36 = vld [vmem:[#allocation3 + $0x27] sm:$0xff]  ;;  %v9588_v42 = vunpack.i.l.bf16 %v12699_v2 }
 0x2cf   : > { %8919 = vmatmul.msk.f32.gmra.mxu2 %vm2472_vm4, %v1296_v16  ;;  %v2943_v16 = vadd.f32 %v12987_v12, %v12995_v56 }
 0x2d0   : > { %v3396_v18 = vmax.f32 %v3259_v59, 0.0  ;;  %v2735_v59 = vsel %vm2570_vm6, %v2687_v29, %v9823_v37  ;;  %v3589_v37 = vld [vmem:[#allocation3 + $0x18] sm:$0xff] }
 0x2d2   : > { %v3444_v10 = vmul.f32 %v3396_v18, %v17665_v32  ;;  %v1308_v18 = vld [vmem:[#allocation2 + $0x159] sm:$0xff]  ;;  %v13083_v13 = vpop.f32.mrf.mxu2  ;;  %v13088_v3 = vpop.f32.mrf.mxu0 }
 0x2d3   : > { %v3100_v50 = vpop.f32.mrf.mxu1  ;;  %v13071_v6 = vld [vmem:[#allocation3 + $0x29] sm:$0xff]  ;;  %8931 = vmatmul.msk.f32.gmra.mxu3 %vm2472_vm4, %v1308_v18 }
 0x2d4   : > { %3493 = vst.msk [vmem:[#allocation3 + $0x38] sm:$0xff] %vm2472_vm4, %v3444_v10  ;;  %v3101_v33 = vadd.f32 %v3100_v50, %v2940_v25  ;;  %v9890_v61 = vpack.i.bf16 %v13071_v6, %v3588_v46  ;;  %v1100_v25 = vld [vmem:[#allocation2 + $0xc8] sm:$0xff]  ;;  %v9824_v10 = vunpack.i.h.bf16 %v9822_v51 }
 0x2d5   : > { %v1297_v50 = vld [vmem:[#allocation2 + $0x101] sm:$0xff] }
 0x2d6   : > { %v3262_v26 = vadd.f32 %v13007_v14, %v3101_v33  ;;  %3147 = vmatmul.f32.gmra.mxu1 %v2735_v59  ;;  %9891 = vrot.lane.b32.xlu2 %v9890_v61, %s11465_s1  ;;  %v2640_v14 = vsel %vm2472_vm4, %v1100_v25, %v9584_v30  ;;  %v876_v25 = vld [vmem:[%s11595_s22 + $0xe0] sm:$0xff] }
 0x2d7   : > { %v2688_v29 = vsel %vm2521_vm5, %v2640_v14, %v9704_v21  ;;  %8920 = vmatmul.msk.f32.gmra.mxu2 %vm2472_vm4, %v1297_v50  ;;  %v1309_v21 = vld [vmem:[#allocation2 + $0x161] sm:$0xff]  ;;  %v9708_v14 = vunpack.i.l.bf16 %v12848_v40  ;;  %v9829_v40 = vunpack.i.h.bf16 %v13107_v17 }
 0x2d8   : > { %v3397_v46 = vmax.f32 %v3262_v26, 0.0  ;;  %v1101_v26 = vld [vmem:[#allocation2 + $0xd0] sm:$0xff]  ;;  %5408 = vmatpush.msrb.mxu2 %v876_v25 }
 0x2da   : > { %3494 = vst.msk [vmem:[#allocation3 + $0x40] sm:$0xff] %vm2472_vm4, %v3397_v46  ;;  %v2736_v46 = vsel %vm2570_vm6, %v2688_v29, %v9824_v10  ;;  %v2946_v29 = vadd.f32 %v12987_v12, %v13015_v52  ;;  %v13131_v25 = vpop.f32.mrf.mxu0 }
 0x2db   : > { %v3103_v33 = vpop.f32.mrf.mxu1  ;;  %v13094_v51 = vld [vmem:[#allocation3 + $0x37] sm:$0xff]  ;;  %8932 = vmatmul.msk.f32.gmra.mxu3 %vm2472_vm4, %v1309_v21  ;;  %v13135_v21 = vld [vmem:[#allocation3 + $0x20] sm:$0xff] }
 0x2dc   : > { %v13096_v61 = vld [vmem:[#allocation3 + $0x31] sm:$0xff]  ;;  %v3104_v56 = vadd.f32 %v3103_v33, %v2943_v16  ;;  %v9895_v59 = vpack.i.bf16 %v13094_v51, %v3635_v53  ;;  %v2641_v53 = vsel %vm2472_vm4, %v1101_v26, %v9588_v42 }
 0x2dd   : > { %v13098_v63 = vld [vmem:[#allocation3 + $0x38] sm:$0xff]  ;;  %v9905_v18 = vpack.i.bf16 %v13096_v61, %v3589_v37  ;;  %v13114_v37 = vpop.f32.mrf.mxu2  ;;  %v2689_v42 = vsel %vm2521_vm5, %v2641_v53, %v9708_v14  ;;  %v1310_v53 = vld [vmem:[#allocation2 + $0x169] sm:$0xff] }
 0x2de   : > { %v9900_v30 = vpack.i.bf16 %v3542_v36, %v13098_v63  ;;  %v3265_v16 = vadd.f32 %v13024_v0, %v3104_v56  ;;  %3150 = vmatmul.f32.gmra.mxu1 %v2736_v46  ;;  %9896 = vrot.lane.b32.xlu0 %v9895_v59, %s11466_s3  ;;  %v9828_v36 = vunpack.i.l.bf16 %v13107_v17  ;;  %v3636_v0 = vld [vmem:[#allocation3 + $0x11] sm:$0xff]  ;;  %v9593_v17 = vunpack.i.l.bf16 %v12656_v55 }
 0x2df   : > { %9906 = vrot.lane.b32.xlu2 %v9905_v18, %s11465_s1  ;;  %v9589_v18 = vunpack.i.h.bf16 %v12699_v2  ;;  %v1102_v26 = vld [vmem:[#allocation2 + $0xd8] sm:$0xff] }
 0x2e0   : > { %9901 = vrot.lane.b32.xlu1 %v9900_v30, %s11467_s4  ;;  %v3398_v10 = vmax.f32 %v3265_v16, 0.0  ;;  %v3543_v16 = vld [vmem:[#allocation3 + $0x2f] sm:$0xff]  ;;  %v2737_v60 = vsel %vm2570_vm6, %v2689_v42, %v9828_v36  ;;  %v3637_v42 = vld [vmem:[#allocation3 + $0x19] sm:$0xff] }
 0x2e1   : > { %v13118_v50 = vld [vmem:[#allocation3 + $0x39] sm:$0xff]  ;;  %v2642_v36 = vsel %vm2472_vm4, %v1102_v26, %v9589_v18 }
 0x2e2   : > { %v13120_v33 = vld [vmem:[#allocation3 + $0x3f] sm:$0xff]  ;;  %v3446_v56 = vmul.f32 %v3398_v10, %v17666_v44  ;;  %8943 = vmatmul.msk.f32.vlgmr.msrb.gmra.mxu0 %vm2472_vm4, %v13118_v50  ;;  %v862_v10 = vld [vmem:[%s11595_s22 + $0x70] sm:$0xff]  ;;  %v9920_v14 = vpack.i.bf16 %v13118_v50, %v13135_v21 }
 0x2e3   : > { %v13128_v59 = vld [vmem:[#allocation3 + $0x40] sm:$0xff]  ;;  %v3106_v30 = vpop.f32.mrf.mxu1  ;;  %v9910_v52 = vpack.i.bf16 %v13120_v33, %v3636_v0  ;;  %5245 = vmatpush.msra.mxu3 %v862_v10 }
 0x2e4   : > { %3495 = vst.msk [vmem:[#allocation3 + $0x48] sm:$0xff] %vm2472_vm4, %v3446_v56  ;;  %v3107_v46 = vadd.f32 %v3106_v30, %v2946_v29  ;;  %v9915_v2 = vpack.i.bf16 %v3543_v16, %v13128_v59  ;;  %8933 = vmatmul.msk.f32.gmra.mxu3 %vm2472_vm4, %v1310_v53  ;;  %v13155_v30 = vld [vmem:[#allocation3 + $0x28] sm:$0xff]  ;;  %v875_v16 = vld [vmem:[%s11595_s22 + $0xd8] sm:$0xff] }
 0x2e5   : > { %v13148_v0 = vpop.f32.mrf.mxu2  ;;  %5409 = vmatpush.msrb.mxu2 %v875_v16  ;;  %v9832_v16 = vpop.permute.xlu0 %9831 }
 0x2e6   : > { %v3268_v29 = vadd.f32 %v13042_v49, %v3107_v46  ;;  %3153 = vmatmul.f32.gmra.mxu1 %v2737_v60  ;;  %9911 = vrot.lane.b32.xlu0 %v9910_v52, %s11466_s3  ;;  %v2949_v49 = vadd.f32 %v12987_v12, %v13038_v11  ;;  %v2690_v46 = vsel %vm2521_vm5, %v2642_v36, %v9709_v20  ;;  %v861_v52 = vld [vmem:[%s11595_s22 + $0x68] sm:$0xff]  ;;  %v1103_v36 = vld [vmem:[#allocation2 + $0xe0] sm:$0xff] }
 0x2e7   : > { %9921 = vrot.lane.b32.xlu2 %v9920_v14, %s11465_s1  ;;  %5246 = vmatpush.msra.mxu3 %v861_v52  ;;  %v2738_v53 = vsel %vm2570_vm6, %v2690_v46, %v9829_v40  ;;  %v13176_v52 = vpop.f32.mrf.mxu0  ;;  %v9833_v46 = vunpack.i.l.bf16 %v9832_v16 }
 0x2e8   : > { %9916 = vrot.lane.b32.xlu1 %v9915_v2, %s11467_s4  ;;  %v3399_v56 = vmax.f32 %v3268_v29, 0.0 }
 0x2ea   : > { %v3447_v60 = vmul.f32 %v3399_v56, %v17665_v32  ;;  %v1311_v56 = vld [vmem:[#allocation2 + $0x171] sm:$0xff] }
 0x2eb   : > { %v3109_v18 = vpop.f32.mrf.mxu1  ;;  %v13160_v26 = vld [vmem:[#allocation3 + $0x41] sm:$0xff] }
 0x2ec   : > { %v13162_v10 = vld [vmem:[#allocation3 + $0x47] sm:$0xff]  ;;  %3496 = vst.msk [vmem:[#allocation3 + $0x50] sm:$0xff] %vm2472_vm4, %v3447_v60  ;;  %v3110_v11 = vadd.f32 %v3109_v18, %v2949_v49  ;;  %8944 = vmatmul.msk.f32.gmra.mxu0 %vm2472_vm4, %v13160_v26  ;;  %v9935_v20 = vpack.i.bf16 %v13160_v26, %v13155_v30  ;;  %v9713_v60 = vunpack.i.l.bf16 %v12820_v58  ;;  %8934 = vmatmul.msk.f32.gmra.mxu3 %vm2472_vm4, %v1311_v56  ;;  %v13190_v18 = vld [vmem:[#allocation3 + $0x30] sm:$0xff] }
 0x2ed   : > { %v13164_v14 = vld [vmem:[#allocation3 + $0x48] sm:$0xff]  ;;  %v9925_v2 = vpack.i.bf16 %v13162_v10, %v3637_v42  ;;  %v13183_v40 = vpop.f32.mrf.mxu2 }
 0x2ee   : > { %v9930_v29 = vpack.i.bf16 %v13094_v51, %v13164_v14  ;;  %v3271_v49 = vadd.f32 %v13060_v35, %v3110_v11  ;;  %3156 = vmatmul.f32.gmra.mxu1 %v2738_v53  ;;  %v2643_v51 = vsel %vm2472_vm4, %v1103_v36, %v9593_v17  ;;  %v2952_v35 = vadd.f32 %v12987_v12, %v13064_v15 }
 0x2ef   : > { %9926 = vrot.lane.b32.xlu0 %v9925_v2, %s11466_s3  ;;  %9936 = vrot.lane.b32.xlu2 %v9935_v20, %s11465_s1  ;;  %v2691_v2 = vsel %vm2521_vm5, %v2643_v51, %v9713_v60  ;;  %v9594_v60 = vunpack.i.h.bf16 %v12656_v55  ;;  %v1312_v51 = vld [vmem:[#allocation2 + $0x179] sm:$0xff] }
 0x2f0   : > { %9931 = vrot.lane.b32.xlu1 %v9930_v29, %s11467_s4  ;;  %v3400_v42 = vmax.f32 %v3271_v49, 0.0  ;;  %v860_v49 = vld [vmem:[%s11595_s22 + $0x60] sm:$0xff] }
 0x2f1   : > { %5247 = vmatpush.msra.mxu3 %v860_v49  ;;  %v9598_v49 = vunpack.i.l.bf16 %v12626_v1 }
 0x2f2   : > { %3497 = vst.msk [vmem:[#allocation3 + $0x58] sm:$0xff] %vm2472_vm4, %v3400_v42  ;;  %v2739_v42 = vsel %vm2570_vm6, %v2691_v2, %v9833_v46  ;;  %v9834_v46 = vunpack.i.h.bf16 %v9832_v16 }
 0x2f3   : > { %v3112_v11 = vpop.f32.mrf.mxu1  ;;  %v13192_v20 = vld [vmem:[#allocation3 + $0x49] sm:$0xff] }
 0x2f4   : > { %v13195_v53 = vld [vmem:[#allocation3 + $0x4f] sm:$0xff]  ;;  %v3113_v17 = vadd.f32 %v3112_v11, %v2952_v35  ;;  %8945 = vmatmul.msk.f32.gmra.mxu0 %vm2472_vm4, %v13192_v20  ;;  %v9950_v15 = vpack.i.bf16 %v13192_v20, %v13190_v18  ;;  %8935 = vmatmul.msk.f32.gmra.mxu3 %vm2472_vm4, %v1312_v51 }
 0x2f5   : > { %v13197_v29 = vld [vmem:[#allocation3 + $0x50] sm:$0xff]  ;;  %v9940_v36 = vpack.i.bf16 %v13195_v53, %v13046_v62  ;;  %v1104_v11 = vld [vmem:[#allocation2 + $0xe8] sm:$0xff]  ;;  %v9714_v62 = vunpack.i.h.bf16 %v12820_v58  ;;  %v13217_v55 = vpop.f32.mrf.mxu2 }
 0x2f6   : > { %v9945_v56 = vpack.i.bf16 %v13120_v33, %v13197_v29  ;;  %v3274_v35 = vadd.f32 %v13083_v13, %v3113_v17  ;;  %3159 = vmatmul.f32.gmra.mxu1 %v2739_v42  ;;  %v13215_v33 = vpop.f32.mrf.mxu0  ;;  %v2644_v13 = vsel %vm2472_vm4, %v1104_v11, %v9594_v60  ;;  %v2955_v17 = vadd.f32 %v12987_v12, %v13088_v3  ;;  %v874_v60 = vld [vmem:[%s11595_s22 + $0xd0] sm:$0xff] }
 0x2f7   : > { %9941 = vrot.lane.b32.xlu0 %v9940_v36, %s11466_s3  ;;  %9951 = vrot.lane.b32.xlu2 %v9950_v15, %s11465_s1  ;;  %v2692_v16 = vsel %vm2521_vm5, %v2644_v13, %v9714_v62  ;;  %v1105_v11 = vld [vmem:[#allocation2 + $0xf0] sm:$0xff] }
 0x2f8   : > { %9946 = vrot.lane.b32.xlu1 %v9945_v56, %s11467_s4  ;;  %v3401_v39 = vmax.f32 %v3274_v35, 0.0  ;;  %v2740_v51 = vsel %vm2570_vm6, %v2692_v16, %v9834_v46  ;;  %5410 = vmatpush.msrb.mxu2 %v874_v60  ;;  %v13252_v46 = vpop.f32.mrf.mxu3 }
 0x2f9   : > { %v13221_v2 = vld [vmem:[#allocation3 + $0x57] sm:$0xff]  ;;  %17667 = vst [vmem:[#allocation39_spill] sm:$0xff] %v13252_v46 }
 0x2fa   : > { %v3449_v15 = vmul.f32 %v3401_v39, %v17666_v44  ;;  %v13226_v36 = vld [vmem:[#allocation3 + $0x51] sm:$0xff]  ;;  %v9955_v3 = vpack.i.bf16 %v13221_v2, %v13071_v6  ;;  %v9723_v6 = vunpack.i.l.bf16 %v12859_v41 }
 0x2fb   : > { %v13228_v58 = vld [vmem:[#allocation3 + $0x58] sm:$0xff]  ;;  %v3115_v56 = vpop.f32.mrf.mxu1  ;;  %v9965_v39 = vpack.i.bf16 %v13226_v36, %v13098_v63 }
 0x2fc   : > { %3498 = vst.msk [vmem:[#allocation3 + $0x60] sm:$0xff] %vm2472_vm4, %v3449_v15  ;;  %v3116_v42 = vadd.f32 %v3115_v56, %v2955_v17  ;;  %8946 = vmatmul.msk.f32.gmra.mxu0 %vm2472_vm4, %v13226_v36  ;;  %v9960_v35 = vpack.i.bf16 %v13162_v10, %v13228_v58  ;;  %v1313_v17 = vld [vmem:[#allocation2 + $0x181] sm:$0xff]  ;;  %v13243_v15 = vpop.permute.xlu1 %9836  ;;  %v2645_v10 = vsel %vm2472_vm4, %v1105_v11, %v9598_v49 }
 0x2fd   : > { %8936 = vmatmul.msk.f32.gmra.mxu3 %vm2472_vm4, %v1313_v17  ;;  %v9838_v13 = vunpack.i.l.bf16 %v13243_v15  ;;  %v13260_v16 = vpop.f32.mrf.mxu2  ;;  %v2693_v49 = vsel %vm2521_vm5, %v2645_v10, %v9723_v6  ;;  %v873_v6 = vld [vmem:[%s11595_s22 + $0xc8] sm:$0xff] }
 0x2fe   : > { %v3277_v62 = vadd.f32 %v13114_v37, %v3116_v42  ;;  %3162 = vmatmul.f32.gmra.mxu1 %v2740_v51  ;;  %v2958_v37 = vadd.f32 %v12987_v12, %v13131_v25  ;;  %v13257_v56 = vpop.f32.mrf.mxu0  ;;  %v9599_v25 = vunpack.i.h.bf16 %v12626_v1  ;;  %5411 = vmatpush.msrb.mxu2 %v873_v6  ;;  %v1314_v1 = vld [vmem:[#allocation2 + $0x189] sm:$0xff] }
 0x2ff   : > { %9956 = vrot.lane.b32.xlu0 %v9955_v3, %s11466_s3  ;;  %9966 = vrot.lane.b32.xlu2 %v9965_v39, %s11465_s1  ;;  %v859_v3 = vld [vmem:[%s11595_s22 + $0x58] sm:$0xff] }
 0x300   : > { %9961 = vrot.lane.b32.xlu1 %v9960_v35, %s11467_s4  ;;  %v3402_v63 = vmax.f32 %v3277_v62, 0.0  ;;  %5248 = vmatpush.msra.mxu3 %v859_v3  ;;  %v1106_v3 = vld [vmem:[#allocation2 + $0xf8] sm:$0xff] }
 0x302   : > { %v3450_v42 = vmul.f32 %v3402_v63, %v17665_v32  ;;  %v2741_v63 = vsel %vm2570_vm6, %v2693_v49, %v9838_v13  ;;  %v2646_v13 = vsel %vm2472_vm4, %v1106_v3, %v9599_v25  ;;  %v1107_v3 = vld [vmem:[#allocation2 + $0x100] sm:$0xff] }
 0x303   : > { %v3118_v60 = vpop.f32.mrf.mxu1  ;;  %v13263_v39 = vld [vmem:[#allocation3 + $0x59] sm:$0xff] }
 0x304   : > { %v13266_v51 = vld [vmem:[#allocation3 + $0x5f] sm:$0xff]  ;;  %3499 = vst.msk [vmem:[#allocation3 + $0x68] sm:$0xff] %vm2472_vm4, %v3450_v42  ;;  %v3119_v11 = vadd.f32 %v3118_v60, %v2958_v37  ;;  %v9980_v17 = vpack.i.bf16 %v13263_v39, %v13128_v59  ;;  %8947 = vmatmul.msk.f32.gmra.mxu0 %vm2472_vm4, %v13263_v39  ;;  %v9724_v59 = vunpack.i.h.bf16 %v12859_v41  ;;  %v13290_v42 = vpop.f32.mrf.mxu3  ;;  %v9603_v41 = vunpack.i.l.bf16 %v12724_v34  ;;  %v13296_v60 = vpop.permute.xlu2 %9841 }
 0x305   : > { %v13268_v35 = vld [vmem:[#allocation3 + $0x60] sm:$0xff]  ;;  %v9970_v62 = vpack.i.bf16 %v13266_v51, %v13096_v61  ;;  %8937 = vmatmul.msk.f32.gmra.mxu3 %vm2472_vm4, %v1314_v1  ;;  %v13315_v1 = vpop.f32.mrf.mxu2 }
 0x306   : > { %v9975_v10 = vpack.i.bf16 %v13195_v53, %v13268_v35  ;;  %v3280_v37 = vadd.f32 %v13148_v0, %v3119_v11  ;;  %3165 = vmatmul.f32.gmra.mxu1 %v2741_v63  ;;  %v9839_v53 = vunpack.i.h.bf16 %v13243_v15  ;;  %v2961_v0 = vadd.f32 %v12987_v12, %v13176_v52 }
 0x307   : > { %9971 = vrot.lane.b32.xlu0 %v9970_v62, %s11466_s3  ;;  %9981 = vrot.lane.b32.xlu2 %v9980_v17, %s11465_s1  ;;  %v2694_v25 = vsel %vm2521_vm5, %v2646_v13, %v9724_v59  ;;  %v13305_v62 = vpop.f32.mrf.mxu0  ;;  %v9728_v13 = vunpack.i.l.bf16 %v12834_v23 }
 0x308   : > { %9976 = vrot.lane.b32.xlu1 %v9975_v10, %s11467_s4  ;;  %v3403_v61 = vmax.f32 %v3280_v37, 0.0  ;;  %v858_v37 = vld [vmem:[%s11595_s22 + $0x50] sm:$0xff]  ;;  %v2742_v59 = vsel %vm2570_vm6, %v2694_v25, %v9839_v53  ;;  %v9843_v53 = vunpack.i.l.bf16 %v13296_v60 }
 0x309   : > { %5249 = vmatpush.msra.mxu3 %v858_v37  ;;  %v1108_v37 = vld [vmem:[#allocation2 + $0x108] sm:$0xff] }
 0x30a   : > { %3500 = vst.msk [vmem:[#allocation3 + $0x70] sm:$0xff] %vm2472_vm4, %v3403_v61  ;;  %v1315_v61 = vld [vmem:[#allocation2 + $0x191] sm:$0xff] }
 0x30b   : > { %v3121_v49 = vpop.f32.mrf.mxu1  ;;  %v13298_v11 = vld [vmem:[#allocation3 + $0x61] sm:$0xff] }
 0x30c   : > { %v13301_v17 = vld [vmem:[#allocation3 + $0x67] sm:$0xff]  ;;  %v3122_v6 = vadd.f32 %v3121_v49, %v2961_v0  ;;  %v9995_v52 = vpack.i.bf16 %v13298_v11, %v13164_v14  ;;  %8948 = vmatmul.msk.f32.gmra.mxu0 %vm2472_vm4, %v13298_v11  ;;  %v13329_v49 = vpop.f32.mrf.mxu3 }
 0x30d   : > { %v13303_v15 = vld [vmem:[#allocation3 + $0x68] sm:$0xff]  ;;  %v9985_v63 = vpack.i.bf16 %v13301_v17, %v13118_v50  ;;  %v2647_v50 = vsel %vm2472_vm4, %v1107_v3, %v9603_v41  ;;  %8938 = vmatmul.msk.f32.gmra.mxu3 %vm2472_vm4, %v1315_v61  ;;  %v13346_v61 = vpop.permute.xlu2 %9856 }
 0x30e   : > { %v9990_v10 = vpack.i.bf16 %v13221_v2, %v13303_v15  ;;  %v3283_v14 = vadd.f32 %v13183_v40, %v3122_v6  ;;  %3168 = vmatmul.f32.gmra.mxu1 %v2742_v59  ;;  %v2964_v40 = vadd.f32 %v12987_v12, %v13215_v33  ;;  %v872_v59 = vld [vmem:[%s11595_s22 + $0xc0] sm:$0xff] }
 0x30f   : > { %9986 = vrot.lane.b32.xlu0 %v9985_v63, %s11466_s3  ;;  %9996 = vrot.lane.b32.xlu2 %v9995_v52, %s11465_s1  ;;  %v2695_v52 = vsel %vm2521_vm5, %v2647_v50, %v9728_v13  ;;  %v9604_v63 = vunpack.i.h.bf16 %v12724_v34  ;;  %v1316_v50 = vld [vmem:[#allocation2 + $0x199] sm:$0xff] }
 0x310   : > { %9991 = vrot.lane.b32.xlu1 %v9990_v10, %s11467_s4  ;;  %v3404_v2 = vmax.f32 %v3283_v14, 0.0  ;;  %v2743_v14 = vsel %vm2570_vm6, %v2695_v52, %v9843_v53  ;;  %5412 = vmatpush.msrb.mxu2 %v872_v59 }
 0x311   : > { %v13327_v0 = vld [vmem:[#allocation3 + $0x6f] sm:$0xff] }
 0x312   : > { %v3452_v25 = vmul.f32 %v3404_v2, %v17666_v44  ;;  %v13334_v6 = vld [vmem:[#allocation3 + $0x69] sm:$0xff]  ;;  %v10000_v33 = vpack.i.bf16 %v13327_v0, %v13160_v26  ;;  %v9729_v2 = vunpack.i.h.bf16 %v12834_v23  ;;  %v9844_v23 = vunpack.i.h.bf16 %v13296_v60 }
 0x313   : > { %v13337_v41 = vld [vmem:[#allocation3 + $0x70] sm:$0xff]  ;;  %v3124_v10 = vpop.f32.mrf.mxu1  ;;  %v10010_v13 = vpack.i.bf16 %v13334_v6, %v13197_v29  ;;  %v2648_v29 = vsel %vm2472_vm4, %v1108_v37, %v9604_v63  ;;  %v9608_v60 = vunpack.i.l.bf16 %v12676_v48 }
 0x314   : > { %3501 = vst.msk [vmem:[#allocation3 + $0x78] sm:$0xff] %vm2472_vm4, %v3452_v25  ;;  %v3125_v3 = vadd.f32 %v3124_v10, %v2964_v40  ;;  %8949 = vmatmul.msk.f32.gmra.mxu0 %vm2472_vm4, %v13334_v6  ;;  %v10005_v34 = vpack.i.bf16 %v13266_v51, %v13337_v41  ;;  %v13354_v40 = vpop.f32.mrf.mxu0  ;;  %v13358_v25 = vpop.f32.mrf.mxu2  ;;  %v2696_v10 = vsel %vm2521_vm5, %v2648_v29, %v9729_v2  ;;  %v1109_v2 = vld [vmem:[#allocation2 + $0x110] sm:$0xff] }
 0x315   : > { %8939 = vmatmul.msk.f32.gmra.mxu3 %vm2472_vm4, %v1316_v50  ;;  %v13365_v53 = vpop.f32.mrf.mxu3  ;;  %v13389_v29 = vpop.permute.xlu0 %9846 }
 0x316   : > { %v3286_v26 = vadd.f32 %v13217_v55, %v3125_v3  ;;  %3171 = vmatmul.f32.gmra.mxu1 %v2743_v14  ;;  %17668 = vst [vmem:[#allocation52_spill] sm:$0xff] %v13365_v53  ;;  %v2967_v55 = vadd.f32 %v12987_v12, %v13257_v56  ;;  %v857_v3 = vld [vmem:[%s11595_s22 + $0x48] sm:$0xff] }
 0x317   : > { %10001 = vrot.lane.b32.xlu0 %v10000_v33, %s11466_s3  ;;  %10011 = vrot.lane.b32.xlu2 %v10010_v13, %s11465_s1 }
 0x318   : > { %10006 = vrot.lane.b32.xlu1 %v10005_v34, %s11467_s4  ;;  %v3405_v51 = vmax.f32 %v3286_v26, 0.0  ;;  %5250 = vmatpush.msra.mxu3 %v857_v3  ;;  %v2744_v34 = vsel %vm2570_vm6, %v2696_v10, %v9844_v23  ;;  %v1317_v26 = vld [vmem:[#allocation2 + $0x1a1] sm:$0xff]  ;;  %v2649_v23 = vsel %vm2472_vm4, %v1109_v2, %v9608_v60  ;;  %v2970_v3 = vadd.f32 %v12987_v12, %v13305_v62 }
 0x31a   : > { %v3453_v52 = vmul.f32 %v3405_v51, %v17665_v32 }
 0x31b   : > { %v3127_v33 = vpop.f32.mrf.mxu1  ;;  %v13372_v59 = vld [vmem:[#allocation3 + $0x71] sm:$0xff] }
 0x31c   : > { %v13374_v13 = vld [vmem:[#allocation3 + $0x77] sm:$0xff]  ;;  %3502 = vst.msk [vmem:[#allocation3 + $0x80] sm:$0xff] %vm2472_vm4, %v3453_v52  ;;  %v3128_v37 = vadd.f32 %v3127_v33, %v2967_v55  ;;  %v10025_v56 = vpack.i.bf16 %v13372_v59, %v13228_v58  ;;  %8950 = vmatmul.msk.f32.gmra.mxu0 %vm2472_vm4, %v13372_v59  ;;  %v9738_v58 = vunpack.i.l.bf16 %v12870_v45  ;;  %v13394_v55 = vpop.permute.xlu2 %9871  ;;  %v13401_v52 = vpop.f32.mrf.mxu2 }
 0x31d   : > { %v13376_v63 = vld [vmem:[#allocation3 + $0x78] sm:$0xff]  ;;  %v10015_v14 = vpack.i.bf16 %v13374_v13, %v13192_v20  ;;  %v13398_v20 = vpop.f32.mrf.mxu0  ;;  %8940 = vmatmul.msk.f32.gmra.mxu3 %vm2472_vm4, %v1317_v26  ;;  %v13405_v10 = vpop.f32.mrf.mxu3 }
 0x31e   : > { %v10020_v50 = vpack.i.bf16 %v13301_v17, %v13376_v63  ;;  %v3289_v51 = vadd.f32 %v13260_v16, %v3128_v37  ;;  %3174 = vmatmul.f32.gmra.mxu1 %v2744_v34  ;;  %v9848_v16 = vunpack.i.l.bf16 %v13389_v29  ;;  %17669 = vst [vmem:[#allocation38_spill] sm:$0xff] %v13405_v10  ;;  %v2697_v60 = vsel %vm2521_vm5, %v2649_v23, %v9738_v58  ;;  %v871_v26 = vld [vmem:[%s11595_s22 + $0xb8] sm:$0xff] }
 0x31f   : > { %10016 = vrot.lane.b32.xlu0 %v10015_v14, %s11466_s3  ;;  %10026 = vrot.lane.b32.xlu2 %v10025_v56, %s11465_s1  ;;  %v9609_v58 = vunpack.i.h.bf16 %v12676_v48  ;;  %v9739_v48 = vunpack.i.h.bf16 %v12870_v45  ;;  %v2973_v45 = vadd.f32 %v12987_v12, %v13354_v40 }
 0x320   : > { %10021 = vrot.lane.b32.xlu1 %v10020_v50, %s11467_s4  ;;  %v3406_v17 = vmax.f32 %v3289_v51, 0.0  ;;  %v856_v51 = vld [vmem:[%s11595_s22 + $0x40] sm:$0xff]  ;;  %5413 = vmatpush.msrb.mxu2 %v871_v26 }
 0x321   : > { %5251 = vmatpush.msra.mxu3 %v856_v51 }
 0x322   : > { %3503 = vst.msk [vmem:[#allocation3 + $0x88] sm:$0xff] %vm2472_vm4, %v3406_v17  ;;  %v2745_v17 = vsel %vm2570_vm6, %v2697_v60, %v9848_v16  ;;  %v854_v16 = vld [vmem:[%s11595_s22 + $0x30] sm:$0xff]  ;;  %v9849_v60 = vunpack.i.h.bf16 %v13389_v29 }
 0x323   : > { %v3130_v33 = vpop.f32.mrf.mxu1  ;;  %v13410_v37 = vld [vmem:[#allocation3 + $0x79] sm:$0xff] }
 0x324   : > { %v13413_v56 = vld [vmem:[#allocation3 + $0x7f] sm:$0xff]  ;;  %v3131_v34 = vadd.f32 %v3130_v33, %v2970_v3  ;;  %v10040_v50 = vpack.i.bf16 %v13410_v37, %v13268_v35  ;;  %8951 = vmatmul.msk.f32.gmra.mxu0 %vm2472_vm4, %v13410_v37  ;;  %v1318_v35 = vld [vmem:[#allocation2 + $0x1a9] sm:$0xff]  ;;  %v13455_v29 = vpop.f32.mrf.mxu2 }
 0x325   : > { %v13415_v14 = vld [vmem:[#allocation3 + $0x80] sm:$0xff]  ;;  %v10030_v62 = vpack.i.bf16 %v13413_v56, %v13226_v36  ;;  %v1110_v36 = vld [vmem:[#allocation2 + $0x118] sm:$0xff]  ;;  %8941 = vmatmul.msk.f32.gmra.mxu3 %vm2472_vm4, %v1318_v35  ;;  %v13450_v26 = vpop.f32.mrf.mxu0  ;;  %v869_v35 = vld [vmem:[%s11595_s22 + $0xa8] sm:$0xff] }
 0x326   : > { %v10035_v2 = vpack.i.bf16 %v13327_v0, %v13415_v14  ;;  %v3292_v23 = vadd.f32 %v13315_v1, %v3131_v34  ;;  %3177 = vmatmul.f32.gmra.mxu1 %v2745_v17  ;;  %v855_v3 = vld [vmem:[%s11595_s22 + $0x38] sm:$0xff]  ;;  %v13435_v33 = vpop.permute.xlu2 %9886  ;;  %v870_v1 = vld [vmem:[%s11595_s22 + $0xb0] sm:$0xff] }
 0x327   : > { %10031 = vrot.lane.b32.xlu0 %v10030_v62, %s11466_s3  ;;  %10041 = vrot.lane.b32.xlu2 %v10040_v50, %s11465_s1  ;;  %v2650_v62 = vsel %vm2472_vm4, %v1110_v36, %v9609_v58  ;;  %v853_v58 = vld [vmem:[%s11595_s22 + $0x28] sm:$0xff] }
 0x328   : > { %10036 = vrot.lane.b32.xlu1 %v10035_v2, %s11467_s4  ;;  %v3407_v0 = vmax.f32 %v3292_v23, 0.0  ;;  %5252 = vmatpush.msra.mxu3 %v855_v3  ;;  %v13446_v2 = vpop.f32.mrf.mxu3  ;;  %v2698_v12 = vsel %vm2521_vm5, %v2650_v62, %v9739_v48  ;;  %v868_v3 = vld [vmem:[%s11595_s22 + $0xa0] sm:$0xff]  ;;  %v13473_v48 = vpop.permute.xlu1 %9851  ;;  %v9748_v62 = vunpack.i.l.bf16 %v12897_v28 }
 0x329   : > { %v13441_v34 = vld [vmem:[#allocation3 + $0x81] sm:$0xff]  ;;  %17670 = vst [vmem:[#allocation48_spill] sm:$0xff] %v13446_v2  ;;  %5414 = vmatpush.msrb.mxu2 %v870_v1  ;;  %v2746_v1 = vsel %vm2570_vm6, %v2698_v12, %v9849_v60  ;;  %v867_v60 = vld [vmem:[%s11595_s22 + $0x98] sm:$0xff] }
 0x32a   : > { %v13444_v50 = vld [vmem:[#allocation3 + $0x87] sm:$0xff]  ;;  %v3455_v51 = vmul.f32 %v3407_v0, %v17666_v44  ;;  %5253 = vmatpush.msra.mxu3 %v854_v16  ;;  %v10055_v0 = vpack.i.bf16 %v13441_v34, %v13303_v15  ;;  %v1319_v15 = vld [vmem:[#allocation2 + $0x1b1] sm:$0xff] }
 0x32b   : > { %v13453_v17 = vld [vmem:[#allocation3 + $0x88] sm:$0xff]  ;;  %v3133_v23 = vpop.f32.mrf.mxu1  ;;  %5415 = vmatpush.msrb.mxu2 %v869_v35  ;;  %v10045_v40 = vpack.i.bf16 %v13444_v50, %v13263_v39 }
 0x32c   : > { %3504 = vst.msk [vmem:[#allocation3 + $0x90] sm:$0xff] %vm2472_vm4, %v3455_v51  ;;  %v3134_v36 = vadd.f32 %v3133_v23, %v2973_v45  ;;  %8952 = vmatmul.msk.f32.gmra.mxu0 %vm2472_vm4, %v13441_v34  ;;  %v10050_v16 = vpack.i.bf16 %v13374_v13, %v13453_v17  ;;  %5254 = vmatpush.msra.mxu3 %v853_v58  ;;  %v852_v45 = vld [vmem:[%s11595_s22 + $0x20] sm:$0xff]  ;;  %v9613_v51 = vunpack.i.l.bf16 %v12650_v31  ;;  %v851_v58 = vld [vmem:[%s11595_s22 + $0x18] sm:$0xff] }
 0x32d   : > { %5416 = vmatpush.msrb.mxu2 %v868_v3  ;;  %v1111_v13 = vld [vmem:[#allocation2 + $0x120] sm:$0xff]  ;;  %8942 = vmatmul.msk.f32.gmra.mxu3 %vm2472_vm4, %v1319_v15  ;;  %v2981_v2 = vpop.f32.mrf.mxu0 }
 0x32e   : > { %v3295_v39 = vadd.f32 %v13358_v25, %v3134_v36  ;;  %3180 = vmatmul.f32.gmra.mxu1 %v2746_v1  ;;  %5255 = vmatpush.msra.mxu3 %v852_v45  ;;  %v866_v25 = vld [vmem:[%s11595_s22 + $0x90] sm:$0xff]  ;;  %v9853_v36 = vunpack.i.l.bf16 %v13473_v48  ;;  %v13491_v3 = vld [vmem:[%s11579_s13] ss:$0 sm:$0xff]  ;;  %v865_v45 = vld [vmem:[%s11595_s22 + $0x88] sm:$0xff] }
 0x32f   : > { %10046 = vrot.lane.b32.xlu0 %v10045_v40, %s11466_s3  ;;  %10056 = vrot.lane.b32.xlu2 %v10055_v0, %s11465_s1  ;;  %v850_v40 = vld [vmem:[%s11595_s22 + $0x10] sm:$0xff]  ;;  %v2976_v0 = vadd.f32 %v13491_v3, %v13398_v20 }
 0x330   : > { %10051 = vrot.lane.b32.xlu1 %v10050_v16, %s11467_s4  ;;  %v3408_v35 = vmax.f32 %v3295_v39, 0.0  ;;  %v13482_v23 = vpop.permute.xlu2 %9891  ;;  %5417 = vmatpush.msrb.mxu2 %v867_v60  ;;  %v13487_v12 = vpop.f32.mrf.mxu3  ;;  %v2651_v16 = vsel %vm2472_vm4, %v1111_v13, %v9613_v51 }
 0x331   : > { %17671 = vst [vmem:[#allocation61_spill] sm:$0xff] %v13487_v12  ;;  %5256 = vmatpush.msra.mxu3 %v851_v58  ;;  %v2699_v15 = vsel %vm2521_vm5, %v2651_v16, %v9748_v62  ;;  %v13512_v58 = vpop.f32.mrf.mxu2 }
 0x332   : > { %v3456_v1 = vmul.f32 %v3408_v35, %v17665_v32  ;;  %5418 = vmatpush.msrb.mxu2 %v866_v25  ;;  %v2747_v62 = vsel %vm2570_vm6, %v2699_v15, %v9853_v36  ;;  %v849_v25 = vld [vmem:[%s11595_s22 + $0x8] sm:$0xff] }
 0x333   : > { %v3136_v39 = vpop.f32.mrf.mxu1  ;;  %v13498_v60 = vld [vmem:[#allocation3 + $0x89] sm:$0xff]  ;;  %5257 = vmatpush.msra.mxu3 %v850_v40  ;;  %v848_v40 = vld [vmem:[%s11595_s22] sm:$0xff] }
 0x334   : > { %v13501_v46 = vld [vmem:[#allocation3 + $0x8f] sm:$0xff]  ;;  %3505 = vst.msk [vmem:[#allocation3 + $0x98] sm:$0xff] %vm2472_vm4, %v3456_v1  ;;  %v3137_v20 = vadd.f32 %v3136_v39, %v2976_v0  ;;  %v10070_v51 = vpack.i.bf16 %v13498_v60, %v13337_v41  ;;  %8953 = vmatmul.msk.f32.gmra.mxu0 %vm2472_vm4, %v13498_v60  ;;  %5419 = vmatpush.msrb.mxu2 %v865_v45  ;;  %v864_v0 = vld [vmem:[%s11595_s22 + $0x80] sm:$0xff]  ;;  %v9614_v41 = vunpack.i.h.bf16 %v12650_v31  ;;  %v9618_v39 = vunpack.i.l.bf16 %v12751_v5 }
 0x335   : > { %v13503_v12 = vld [vmem:[#allocation3 + $0x90] sm:$0xff]  ;;  %v10060_v13 = vpack.i.bf16 %v13501_v46, %v13298_v11  ;;  %v9749_v11 = vunpack.i.h.bf16 %v12897_v28  ;;  %v1112_v36 = vld [vmem:[#allocation2 + $0x128] sm:$0xff]  ;;  %5258 = vmatpush.msra.mxu3 %v849_v25  ;;  %v2979_v31 = vadd.f32 %v13491_v3, %v13450_v26 }
 0x336   : > { %v10065_v35 = vpack.i.bf16 %v13413_v56, %v13503_v12  ;;  %v3298_v1 = vadd.f32 %v13401_v52, %v3137_v20  ;;  %3183 = vmatmul.f32.gmra.mxu1 %v2747_v62  ;;  %5420 = vmatpush.msrb.mxu2 %v864_v0  ;;  %v9854_v56 = vunpack.i.h.bf16 %v13473_v48  ;;  %v2652_v28 = vsel %vm2472_vm4, %v1112_v36, %v9614_v41  ;;  %v1113_v0 = vld [vmem:[#allocation2 + $0x130] sm:$0xff]  ;;  %v13551_v41 = vpop.permute.xlu0 %9861  ;;  %v2984_v36 = vpop.f32.mrf.mxu0 }
 0x337   : > { %10061 = vrot.lane.b32.xlu0 %v10060_v13, %s11466_s3  ;;  %10071 = vrot.lane.b32.xlu2 %v10070_v51, %s11465_s1  ;;  %v2700_v51 = vsel %vm2521_vm5, %v2652_v28, %v9749_v11  ;;  %v9753_v11 = vunpack.i.l.bf16 %v12882_v8 }
 0x338   : > { %10066 = vrot.lane.b32.xlu1 %v10065_v35, %s11467_s4  ;;  %v3409_v16 = vmax.f32 %v3298_v1, 0.0  ;;  %5259 = vmatpush.msra.mxu3 %v848_v40  ;;  %v13533_v52 = vpop.f32.mrf.mxu3  ;;  %v2748_v1 = vsel %vm2570_vm6, %v2700_v51, %v9854_v56 }
 0x339   : > { %v13527_v45 = vpop.permute.xlu2 %9906  ;;  %17672 = vst [vmem:[#allocation51_spill] sm:$0xff] %v13533_v52 }
 0x33a   : > { %3506 = vst.msk [vmem:[#allocation3 + $0xa0] sm:$0xff] %vm2472_vm4, %v3409_v16  ;;  %v9858_v16 = vunpack.i.l.bf16 %v13346_v61 }
 0x33b   : > { %v3139_v15 = vpop.f32.mrf.mxu1  ;;  %v13536_v20 = vld [vmem:[#allocation3 + $0x91] sm:$0xff] }
 0x33c   : > { %v13539_v48 = vld [vmem:[#allocation3 + $0x97] sm:$0xff]  ;;  %v3140_v62 = vadd.f32 %v3139_v15, %v2979_v31  ;;  %v10085_v26 = vpack.i.bf16 %v13536_v20, %v13376_v63  ;;  %8954 = vmatmul.msk.f32.gmra.mxu0 %vm2472_vm4, %v13536_v20  ;;  %v3306_v63 = vpop.f32.mrf.mxu2  ;;  %v13561_v31 = vpop.permute.xlu1 %9866 }
 0x33d   : > { %v13541_v13 = vld [vmem:[#allocation3 + $0x98] sm:$0xff]  ;;  %v10075_v35 = vpack.i.bf16 %v13539_v48, %v13334_v6  ;;  %v2653_v6 = vsel %vm2472_vm4, %v1113_v0, %v9618_v39  ;;  %v9619_v39 = vunpack.i.h.bf16 %v12751_v5 }
 0x33e   : > { %v10080_v25 = vpack.i.bf16 %v13444_v50, %v13541_v13  ;;  %v3301_v40 = vadd.f32 %v13455_v29, %v3140_v62  ;;  %3186 = vmatmul.f32.gmra.mxu1 %v2748_v1  ;;  %v2982_v29 = vadd.f32 %v13491_v3, %v2981_v2  ;;  %v2701_v62 = vsel %vm2521_vm5, %v2653_v6, %v9753_v11  ;;  %v1114_v1 = vld [vmem:[#allocation2 + $0x138] sm:$0xff] }
 0x33f   : > { %10076 = vrot.lane.b32.xlu0 %v10075_v35, %s11466_s3  ;;  %10086 = vrot.lane.b32.xlu2 %v10085_v26, %s11465_s1  ;;  %v9754_v6 = vunpack.i.h.bf16 %v12882_v8 }
 0x340   : > { %10081 = vrot.lane.b32.xlu1 %v10080_v25, %s11467_s4  ;;  %v3410_v50 = vmax.f32 %v3301_v40, 0.0  ;;  %v13575_v25 = vpop.f32.mrf.mxu3  ;;  %v2749_v40 = vsel %vm2570_vm6, %v2701_v62, %v9858_v16  ;;  %v2985_v62 = vadd.f32 %v13491_v3, %v2984_v36 }
 0x341   : > { %v13563_v56 = vpop.permute.xlu2 %9921  ;;  %v13565_v28 = vld [vmem:[#allocation3 + $0x9f] sm:$0xff]  ;;  %17673 = vst [vmem:[#allocation47_spill] sm:$0xff] %v13575_v25  ;;  %v3538_v25 = vld [vmem:[#allocation3 + $0x7] sm:$0xff] }
 0x342   : > { %v3458_v15 = vmul.f32 %v3410_v50, %v17666_v44  ;;  %v13569_v51 = vld [vmem:[#allocation3 + $0x99] sm:$0xff]  ;;  %v10090_v2 = vpack.i.bf16 %v13565_v28, %v13372_v59  ;;  %v2654_v59 = vsel %vm2472_vm4, %v1114_v1, %v9619_v39 }
 0x343   : > { %v13572_v26 = vld [vmem:[#allocation3 + $0xa0] sm:$0xff]  ;;  %v3142_v35 = vpop.f32.mrf.mxu1  ;;  %v10100_v11 = vpack.i.bf16 %v13569_v51, %v13415_v14  ;;  %v2987_v14 = vpop.f32.mrf.mxu0 }
 0x344   : > { %3507 = vst.msk [vmem:[#allocation3 + $0xa8] sm:$0xff] %vm2472_vm4, %v3458_v15  ;;  %v3143_v0 = vadd.f32 %v3142_v35, %v2982_v29  ;;  %8955 = vmatmul.msk.f32.gmra.mxu0 %vm2472_vm4, %v13569_v51  ;;  %v10095_v5 = vpack.i.bf16 %v13501_v46, %v13572_v26  ;;  %v13590_v29 = vpop.permute.xlu0 %9876  ;;  %v13595_v15 = vpop.f32.mrf.mxu2  ;;  %v9859_v46 = vunpack.i.h.bf16 %v13346_v61 }
 0x345   : > { %v13598_v8 = vpop.permute.xlu1 %9881 }
 0x346   : > { %v3304_v50 = vadd.f32 %v13512_v58, %v3143_v0  ;;  %3189 = vmatmul.f32.gmra.mxu1 %v2749_v40  ;;  %17674 = vst [vmem:[#allocation21_spill] sm:$0xff] %v13598_v8  ;;  %v2702_v0 = vsel %vm2521_vm5, %v2654_v59, %v9754_v6  ;;  %v9623_v40 = vunpack.i.l.bf16 %v12701_v47 }
 0x347   : > { %10091 = vrot.lane.b32.xlu0 %v10090_v2, %s11466_s3  ;;  %10101 = vrot.lane.b32.xlu2 %v10100_v11, %s11465_s1 }
 0x348   : > { %10096 = vrot.lane.b32.xlu1 %v10095_v5, %s11467_s4  ;;  %v3411_v16 = vmax.f32 %v3304_v50, 0.0  ;;  %v13619_v6 = vpop.f32.mrf.mxu3  ;;  %v2750_v50 = vsel %vm2570_vm6, %v2702_v0, %v9859_v46  ;;  %v9863_v0 = vunpack.i.l.bf16 %v13551_v41 }
 0x349   : > { %v13600_v58 = vpop.permute.xlu2 %9936  ;;  %17675 = vst [vmem:[#allocation45_spill] sm:$0xff] %v13619_v6  ;;  %v2988_v6 = vadd.f32 %v13491_v3, %v2987_v14  ;;  %v9624_v14 = vunpack.i.h.bf16 %v12701_v47 }
 0x34a   : > { %v3459_v35 = vmul.f32 %v3411_v16, %v17665_v32  ;;  %v1115_v16 = vld [vmem:[#allocation2 + $0x140] sm:$0xff] }
 0x34b   : > { %v3145_v2 = vpop.f32.mrf.mxu1  ;;  %v13605_v11 = vld [vmem:[#allocation3 + $0xa1] sm:$0xff] }
 0x34c   : > { %v13607_v39 = vld [vmem:[#allocation3 + $0xa7] sm:$0xff]  ;;  %3508 = vst.msk [vmem:[#allocation3 + $0xb0] sm:$0xff] %vm2472_vm4, %v3459_v35  ;;  %v3146_v61 = vadd.f32 %v3145_v2, %v2985_v62  ;;  %v10115_v5 = vpack.i.bf16 %v13605_v11, %v13453_v17  ;;  %8956 = vmatmul.msk.f32.gmra.mxu0 %vm2472_vm4, %v13605_v11  ;;  %v9889_v35 = vunpack.i.h.bf16 %v13435_v33  ;;  %v9888_v62 = vunpack.i.l.bf16 %v13435_v33 }
 0x34d   : > { %v13609_v1 = vld [vmem:[#allocation3 + $0xa8] sm:$0xff]  ;;  %v10105_v36 = vpack.i.bf16 %v13607_v39, %v13410_v37  ;;  %v9763_v17 = vunpack.i.l.bf16 %v12912_v9 }
 0x34e   : > { %v10110_v59 = vpack.i.bf16 %v13539_v48, %v13609_v1  ;;  %v3307_v2 = vadd.f32 %v3306_v63, %v3146_v61  ;;  %3192 = vmatmul.f32.gmra.mxu1 %v2750_v50  ;;  %v2655_v48 = vsel %vm2472_vm4, %v1115_v16, %v9623_v40  ;;  %v2990_v50 = vpop.f32.mrf.mxu0  ;;  %v13643_v16 = vpop.f32.mrf.mxu2 }
 0x34f   : > { %10106 = vrot.lane.b32.xlu0 %v10105_v36, %s11466_s3  ;;  %10116 = vrot.lane.b32.xlu2 %v10115_v5, %s11465_s1  ;;  %v4998_v5 = vsel %vm2472_vm4, %v13135_v21, %v9889_v35  ;;  %v2703_v21 = vsel %vm2521_vm5, %v2655_v48, %v9763_v17  ;;  %v1116_v48 = vld [vmem:[#allocation2 + $0x148] sm:$0xff] }
 0x350   : > { %10111 = vrot.lane.b32.xlu1 %v10110_v59, %s11467_s4  ;;  %v3412_v37 = vmax.f32 %v3307_v2, 0.0  ;;  %v9897_v46 = vpop.permute.xlu0 %9896  ;;  %v4854_v59 = vsel %vm2472_vm4, %v3538_v25, %v9888_v62  ;;  %v9884_v2 = vunpack.i.h.bf16 %v13598_v8 }
 0x351   : > { %v9899_v33 = vunpack.i.h.bf16 %v9897_v46  ;;  %v9898_v63 = vunpack.i.l.bf16 %v9897_v46  ;;  %v13633_v61 = vpop.permute.xlu2 %9951 }
 0x352   : > { %v13635_v36 = vpop.permute.xlu1 %9901  ;;  %3509 = vst.msk [vmem:[#allocation3 + $0xb8] sm:$0xff] %vm2472_vm4, %v3412_v37 }
 0x353   : > { %v9903_v40 = vunpack.i.l.bf16 %v13635_v36  ;;  %v3148_v46 = vpop.f32.mrf.mxu1  ;;  %v13646_v52 = vld [vmem:[#allocation3 + $0xa9] sm:$0xff]  ;;  %v4902_v10 = vsel %vm2521_vm5, %v4854_v59, %v9898_v63  ;;  %v5046_v53 = vsel %vm2521_vm5, %v4998_v5, %v9899_v33  ;;  %v2751_v33 = vsel %vm2570_vm6, %v2703_v21, %v9863_v0 }
 0x354   : > { %v13651_v25 = vld [vmem:[#allocation3 + $0xaf] sm:$0xff]  ;;  %v3149_v62 = vadd.f32 %v3148_v46, %v2988_v6  ;;  %v10130_v37 = vpack.i.bf16 %v13646_v52, %v13503_v12  ;;  %8957 = vmatmul.msk.f32.gmra.mxu0 %vm2472_vm4, %v13646_v52  ;;  %v4950_v47 = vsel %vm2570_vm6, %v4902_v10, %v9884_v2  ;;  %v9894_v12 = vunpack.i.h.bf16 %v13482_v23  ;;  %v13669_v10 = vpop.f32.mrf.mxu3 }
 0x355   : > { %v13653_v35 = vld [vmem:[#allocation3 + $0xb0] sm:$0xff]  ;;  %v5094_v8 = vsel %vm2570_vm6, %v5046_v53, %v9903_v40  ;;  %5260 = vmatmul.f32.vlgmr.msra.gmra.mxu3 %v4950_v47  ;;  %v10120_v17 = vpack.i.bf16 %v13651_v25, %v13441_v34  ;;  %v9893_v63 = vunpack.i.l.bf16 %v13482_v23  ;;  %v9764_v34 = vunpack.i.h.bf16 %v12912_v9 }
 0x356   : > { %5421 = vmatmul.f32.vlgmr.msrb.gmra.mxu2 %v5094_v8  ;;  %v10125_v6 = vpack.i.bf16 %v13565_v28, %v13653_v35  ;;  %v3310_v5 = vadd.f32 %v13595_v15, %v3149_v62  ;;  %3195 = vmatmul.f32.gmra.mxu1 %v2751_v33  ;;  %v3539_v53 = vld [vmem:[#allocation3 + $0xf] sm:$0xff]  ;;  %v2656_v0 = vsel %vm2472_vm4, %v1116_v48, %v9624_v14  ;;  %v9864_v23 = vunpack.i.h.bf16 %v13551_v41  ;;  %v2993_v48 = vpop.f32.mrf.mxu0 }
 0x357   : > { %10121 = vrot.lane.b32.xlu0 %v10120_v17, %s11466_s3  ;;  %10131 = vrot.lane.b32.xlu2 %v10130_v37, %s11465_s1  ;;  %v2991_v15 = vadd.f32 %v13491_v3, %v2990_v50  ;;  %v9904_v21 = vunpack.i.h.bf16 %v13635_v36  ;;  %v4855_v37 = vsel %vm2472_vm4, %v3539_v53, %v9893_v63  ;;  %v4999_v14 = vsel %vm2472_vm4, %v13155_v30, %v9894_v12 }
 0x358   : > { %v3413_v8 = vmax.f32 %v3310_v5, 0.0  ;;  %10126 = vrot.lane.b32.xlu1 %v10125_v6, %s11467_s4  ;;  %v9912_v28 = vpop.permute.xlu0 %9911  ;;  %v9628_v36 = vunpack.i.l.bf16 %v12670_v24  ;;  %v2704_v12 = vsel %vm2521_vm5, %v2656_v0, %v9764_v34  ;;  %v3315_v5 = vpop.f32.mrf.mxu2  ;;  %v9768_v34 = vunpack.i.l.bf16 %v12895_v4  ;;  %v3540_v0 = vld [vmem:[#allocation3 + $0x17] sm:$0xff] }
 0x359   : > { %v9914_v59 = vunpack.i.h.bf16 %v9912_v28  ;;  %v9913_v2 = vunpack.i.l.bf16 %v9912_v28  ;;  %v13678_v40 = vpop.permute.xlu2 %9966  ;;  %v13684_v62 = vld [vmem:[#allocation3 + $0xb1] sm:$0xff]  ;;  %v2752_v28 = vsel %vm2570_vm6, %v2704_v12, %v9864_v23 }
 0x35a   : > { %v13680_v46 = vpop.permute.xlu1 %9916  ;;  %v3461_v9 = vmul.f32 %v3413_v8, %v17666_v44  ;;  %v13689_v41 = vld [vmem:[#allocation3 + $0xb7] sm:$0xff]  ;;  %v10145_v53 = vpack.i.bf16 %v13684_v62, %v13541_v13 }
 0x35b   : > { %v9918_v50 = vunpack.i.l.bf16 %v13680_v46  ;;  %v3151_v47 = vpop.f32.mrf.mxu1  ;;  %v4903_v33 = vsel %vm2521_vm5, %v4855_v37, %v9913_v2  ;;  %v5047_v17 = vsel %vm2521_vm5, %v4999_v14, %v9914_v59  ;;  %v13694_v6 = vld [vmem:[#allocation3 + $0xb8] sm:$0xff]  ;;  %v10135_v59 = vpack.i.bf16 %v13689_v41, %v13498_v60 }
 0x35c   : > { %3510 = vst.msk [vmem:[#allocation3 + $0xc0] sm:$0xff] %vm2472_vm4, %v3461_v9  ;;  %v3152_v63 = vadd.f32 %v3151_v47, %v2991_v15  ;;  %8958 = vmatmul.msk.f32.gmra.mxu0 %vm2472_vm4, %v13684_v62  ;;  %v4951_v30 = vsel %vm2570_vm6, %v4903_v33, %v9904_v21  ;;  %v1117_v15 = vld [vmem:[#allocation2 + $0x150] sm:$0xff]  ;;  %v9909_v2 = vunpack.i.h.bf16 %v13527_v45  ;;  %v9908_v9 = vunpack.i.l.bf16 %v13527_v45  ;;  %v13718_v37 = vpop.f32.mrf.mxu3 }
 0x35d   : > { %5263 = vmatmul.f32.gmra.mxu3 %v4951_v30  ;;  %v5095_v8 = vsel %vm2570_vm6, %v5047_v17, %v9918_v50  ;;  %v10140_v13 = vpack.i.bf16 %v13607_v39, %v13694_v6  ;;  %v2657_v45 = vsel %vm2472_vm4, %v1117_v15, %v9628_v36  ;;  %v2994_v14 = vadd.f32 %v13491_v3, %v2993_v48 }
 0x35e   : > { %v3313_v21 = vadd.f32 %v13643_v16, %v3152_v63  ;;  %5424 = vmatmul.f32.gmra.mxu2 %v5095_v8  ;;  %3198 = vmatmul.f32.gmra.mxu1 %v2752_v28  ;;  %v9868_v16 = vunpack.i.l.bf16 %v13561_v31  ;;  %v9919_v17 = vunpack.i.h.bf16 %v13680_v46  ;;  %v4856_v30 = vsel %vm2472_vm4, %v3540_v0, %v9908_v9 }
 0x35f   : > { %10136 = vrot.lane.b32.xlu0 %v10135_v59, %s11466_s3  ;;  %10146 = vrot.lane.b32.xlu2 %v10145_v53, %s11465_s1  ;;  %v5000_v36 = vsel %vm2472_vm4, %v13190_v18, %v9909_v2  ;;  %v2705_v59 = vsel %vm2521_vm5, %v2657_v45, %v9768_v34  ;;  %v9629_v9 = vunpack.i.h.bf16 %v12670_v24  ;;  %v9923_v45 = vunpack.i.l.bf16 %v13563_v56 }
 0x360   : > { %v3414_v60 = vmax.f32 %v3313_v21, 0.0  ;;  %10141 = vrot.lane.b32.xlu1 %v10140_v13, %s11467_s4  ;;  %v2753_v34 = vsel %vm2570_vm6, %v2705_v59, %v9868_v16 }
 0x361   : > { %v9927_v23 = vpop.permute.xlu0 %9926  ;;  %v13722_v47 = vpop.permute.xlu2 %9981 }
 0x362   : > { %v9929_v39 = vunpack.i.h.bf16 %v9927_v23  ;;  %v9928_v50 = vunpack.i.l.bf16 %v9927_v23  ;;  %v13724_v33 = vpop.permute.xlu1 %9931  ;;  %v3462_v63 = vmul.f32 %v3414_v60, %v17665_v32  ;;  %v1118_v60 = vld [vmem:[#allocation2 + $0x158] sm:$0xff]  ;;  %v2996_v23 = vpop.f32.mrf.mxu0 }
 0x363   : > { %v9933_v12 = vunpack.i.l.bf16 %v13724_v33  ;;  %v3154_v53 = vpop.f32.mrf.mxu1  ;;  %v13732_v8 = vld [vmem:[#allocation3 + $0xb9] sm:$0xff] }
 0x364   : > { %v4904_v48 = vsel %vm2521_vm5, %v4856_v30, %v9928_v50  ;;  %v5048_v28 = vsel %vm2521_vm5, %v5000_v36, %v9929_v39  ;;  %v13737_v15 = vld [vmem:[#allocation3 + $0xbf] sm:$0xff]  ;;  %3511 = vst.msk [vmem:[#allocation3 + $0xc8] sm:$0xff] %vm2472_vm4, %v3462_v63  ;;  %v3155_v18 = vadd.f32 %v3154_v53, %v2994_v14  ;;  %v10160_v2 = vpack.i.bf16 %v13732_v8, %v13572_v26  ;;  %v3318_v39 = vpop.f32.mrf.mxu2 }
 0x365   : > { %v13739_v46 = vld [vmem:[#allocation3 + $0xc0] sm:$0xff]  ;;  %8959 = vmatmul.msk.f32.gmra.mxu0 %vm2472_vm4, %v13732_v8  ;;  %v4952_v21 = vsel %vm2570_vm6, %v4904_v48, %v9919_v17  ;;  %v5096_v13 = vsel %vm2570_vm6, %v5048_v28, %v9933_v12  ;;  %v10150_v0 = vpack.i.bf16 %v13737_v15, %v13536_v20  ;;  %v9924_v26 = vunpack.i.h.bf16 %v13563_v56  ;;  %v3689_v12 = vld [vmem:[#allocation3 + $0x38] sm:$0xff] }
 0x366   : > { %5266 = vmatmul.f32.gmra.mxu3 %v4952_v21  ;;  %v10155_v24 = vpack.i.bf16 %v13651_v25, %v13739_v46  ;;  %v3316_v14 = vadd.f32 %v3315_v5, %v3155_v18  ;;  %5427 = vmatmul.f32.gmra.mxu2 %v5096_v13  ;;  %v9769_v50 = vunpack.i.h.bf16 %v12895_v4  ;;  %v9633_v20 = vunpack.i.l.bf16 %v12772_v7  ;;  %v10617_v28 = vld [vmem:[#allocation3 + $0x1f] sm:$0xff]  ;;  %v13773_v18 = vpop.f32.mrf.mxu3 }
 0x367   : > { %3201 = vmatmul.f32.gmra.mxu1 %v2753_v34  ;;  %10151 = vrot.lane.b32.xlu0 %v10150_v0, %s11466_s3  ;;  %v2658_v17 = vsel %vm2472_vm4, %v1118_v60, %v9629_v9  ;;  %v9869_v56 = vunpack.i.h.bf16 %v13561_v31  ;;  %v2997_v5 = vadd.f32 %v13491_v3, %v2996_v23  ;;  %v9934_v53 = vunpack.i.h.bf16 %v13724_v33  ;;  %v1119_v9 = vld [vmem:[#allocation2 + $0x160] sm:$0xff] }
 0x368   : > { %10161 = vrot.lane.b32.xlu2 %v10160_v2, %s11465_s1  ;;  %v3415_v16 = vmax.f32 %v3316_v14, 0.0  ;;  %10156 = vrot.lane.b32.xlu1 %v10155_v24, %s11467_s4  ;;  %v4857_v59 = vsel %vm2472_vm4, %v10617_v28, %v9923_v45  ;;  %v5001_v31 = vsel %vm2472_vm4, %v3689_v12, %v9924_v26  ;;  %v2706_v33 = vsel %vm2521_vm5, %v2658_v17, %v9769_v50  ;;  %v3690_v28 = vld [vmem:[#allocation3 + $0x40] sm:$0xff] }
 0x369   : > { %v9942_v25 = vpop.permute.xlu0 %9941  ;;  %v13764_v36 = vpop.permute.xlu2 %9996  ;;  %v9778_v14 = vunpack.i.l.bf16 %v12925_v54  ;;  %v2754_v50 = vsel %vm2570_vm6, %v2706_v33, %v9869_v56  ;;  %v9938_v17 = vunpack.i.l.bf16 %v13600_v58  ;;  %v9634_v56 = vunpack.i.h.bf16 %v12772_v7  ;;  %v1120_v7 = vld [vmem:[#allocation2 + $0x168] sm:$0xff] }
 0x36a   : > { %v9944_v63 = vunpack.i.h.bf16 %v9942_v25  ;;  %v9943_v30 = vunpack.i.l.bf16 %v9942_v25  ;;  %v13766_v4 = vpop.permute.xlu1 %9946  ;;  %3512 = vst.msk [vmem:[#allocation3 + $0xd0] sm:$0xff] %vm2472_vm4, %v3415_v16  ;;  %v1270_v33 = vld [vmem:[#allocation2 + $0x1a8] sm:$0xff] }
 0x36b   : > { %v9948_v48 = vunpack.i.l.bf16 %v13766_v4  ;;  %v3157_v2 = vpop.f32.mrf.mxu1  ;;  %v13775_v21 = vld [vmem:[#allocation3 + $0xc1] sm:$0xff] }
 0x36c   : > { %v4905_v13 = vsel %vm2521_vm5, %v4857_v59, %v9943_v30  ;;  %v5049_v34 = vsel %vm2521_vm5, %v5001_v31, %v9944_v63  ;;  %v13780_v0 = vld [vmem:[#allocation3 + $0xc7] sm:$0xff]  ;;  %v3158_v60 = vadd.f32 %v3157_v2, %v2997_v5  ;;  %v10175_v23 = vpack.i.bf16 %v13775_v21, %v13609_v1  ;;  %v3321_v12 = vpop.f32.mrf.mxu2 }
 0x36d   : > { %v13782_v24 = vld [vmem:[#allocation3 + $0xc8] sm:$0xff]  ;;  %8960 = vmatmul.msk.f32.gmra.mxu0 %vm2472_vm4, %v13775_v21  ;;  %v4953_v26 = vsel %vm2570_vm6, %v4905_v13, %v9934_v53  ;;  %v5097_v45 = vsel %vm2570_vm6, %v5049_v34, %v9948_v48  ;;  %v10165_v16 = vpack.i.bf16 %v13780_v0, %v13569_v51  ;;  %v9939_v1 = vunpack.i.h.bf16 %v13600_v58 }
 0x36e   : > { %5269 = vmatmul.f32.gmra.mxu3 %v4953_v26  ;;  %v10170_v25 = vpack.i.bf16 %v13689_v41, %v13782_v24  ;;  %v3319_v5 = vadd.f32 %v3318_v39, %v3158_v60  ;;  %5430 = vmatmul.f32.gmra.mxu2 %v5097_v45  ;;  %v2659_v63 = vsel %vm2472_vm4, %v1119_v9, %v9633_v20  ;;  %v9873_v58 = vunpack.i.l.bf16 %v13394_v55  ;;  %v10618_v9 = vld [vmem:[#allocation3 + $0x27] sm:$0xff] }
 0x36f   : > { %3204 = vmatmul.f32.gmra.mxu1 %v2754_v50  ;;  %10166 = vrot.lane.b32.xlu0 %v10165_v16, %s11466_s3  ;;  %v3000_v51 = vadd.f32 %v13491_v3, %v12689_v38  ;;  %v2707_v59 = vsel %vm2521_vm5, %v2659_v63, %v9778_v14  ;;  %v9949_v31 = vunpack.i.h.bf16 %v13766_v4  ;;  %v4858_v2 = vsel %vm2472_vm4, %v10618_v9, %v9938_v17  ;;  %v1269_v4 = vld [vmem:[#allocation2 + $0x1a0] sm:$0xff] }
 0x370   : > { %10176 = vrot.lane.b32.xlu2 %v10175_v23, %s11465_s1  ;;  %v3416_v30 = vmax.f32 %v3319_v5, 0.0  ;;  %10171 = vrot.lane.b32.xlu1 %v10170_v25, %s11467_s4  ;;  %v5002_v13 = vsel %vm2472_vm4, %v3690_v28, %v9939_v1  ;;  %v9779_v16 = vunpack.i.h.bf16 %v12925_v54  ;;  %v2660_v17 = vsel %vm2472_vm4, %v1120_v7, %v9634_v56  ;;  %v13830_v5 = vpop.f32.mrf.mxu3 }
 0x371   : > { %v9957_v41 = vpop.permute.xlu0 %9956  ;;  %v13806_v48 = vpop.permute.xlu2 %10011  ;;  %v13815_v34 = vld [vmem:[#allocation3 + $0xcf] sm:$0xff] }
 0x372   : > { %v9959_v39 = vunpack.i.h.bf16 %v9957_v41  ;;  %v9958_v53 = vunpack.i.l.bf16 %v9957_v41  ;;  %v13808_v20 = vpop.permute.xlu1 %9961  ;;  %v3464_v38 = vmul.f32 %v3416_v30, %v17666_v44  ;;  %v13818_v26 = vld [vmem:[#allocation3 + $0xc9] sm:$0xff]  ;;  %v2755_v30 = vsel %vm2570_vm6, %v2707_v59, %v9873_v58 }
 0x373   : > { %v9963_v60 = vunpack.i.l.bf16 %v13808_v20  ;;  %v3160_v23 = vpop.f32.mrf.mxu1  ;;  %v13822_v50 = vld [vmem:[#allocation3 + $0xd0] sm:$0xff]  ;;  %v10185_v54 = vpack.i.bf16 %v13815_v34, %v13605_v11  ;;  %v10180_v41 = vpack.i.bf16 %v13780_v0, %v1270_v33  ;;  %v3003_v58 = vadd.f32 %v13491_v3, %v12710_v19 }
 0x374   : > { %v4906_v45 = vsel %vm2521_vm5, %v4858_v2, %v9958_v53  ;;  %v5050_v14 = vsel %vm2521_vm5, %v5002_v13, %v9959_v39  ;;  %3513 = vst.msk [vmem:[#allocation3 + $0xd8] sm:$0xff] %vm2472_vm4, %v3464_v38  ;;  %v3161_v25 = vadd.f32 %v3160_v23, %v3000_v51  ;;  %v9954_v51 = vunpack.i.h.bf16 %v13633_v61  ;;  %v10619_v19 = vld [vmem:[#allocation3 + $0x2f] sm:$0xff] }
 0x375   : > { %8961 = vmatmul.msk.f32.gmra.mxu0 %vm2472_vm4, %v13818_v26  ;;  %v4954_v1 = vsel %vm2570_vm6, %v4906_v45, %v9949_v31  ;;  %v5098_v63 = vsel %vm2570_vm6, %v5050_v14, %v9963_v60  ;;  %v9953_v39 = vunpack.i.l.bf16 %v13633_v61  ;;  %v10190_v56 = vpack.i.bf16 %v1269_v4, %v13822_v50  ;;  %v3691_v31 = vld [vmem:[#allocation3 + $0x48] sm:$0xff]  ;;  %v3324_v45 = vpop.f32.mrf.mxu2 }
 0x376   : > { %5272 = vmatmul.f32.gmra.mxu3 %v4954_v1  ;;  %v3322_v53 = vadd.f32 %v3321_v12, %v3161_v25  ;;  %5433 = vmatmul.f32.gmra.mxu2 %v5098_v63  ;;  %v9874_v0 = vunpack.i.h.bf16 %v13394_v55  ;;  %v2708_v38 = vsel %vm2521_vm5, %v2660_v17, %v9779_v16  ;;  %v9964_v9 = vunpack.i.h.bf16 %v13808_v20 }
 0x377   : > { %3207 = vmatmul.f32.gmra.mxu1 %v2755_v30  ;;  %10186 = vrot.lane.b32.xlu0 %v10185_v54, %s11466_s3  ;;  %v4859_v13 = vsel %vm2472_vm4, %v10619_v19, %v9953_v39  ;;  %v5003_v33 = vsel %vm2472_vm4, %v3691_v31, %v9954_v51  ;;  %v9968_v51 = vunpack.i.l.bf16 %v13678_v40 }
 0x378   : > { %10181 = vrot.lane.b32.xlu2 %v10180_v41, %s11467_s4  ;;  %v3417_v28 = vmax.f32 %v3322_v53, 0.0  ;;  %10191 = vrot.lane.b32.xlu1 %v10190_v56, %s11467_s4  ;;  %v2756_v63 = vsel %vm2570_vm6, %v2708_v38, %v9874_v0  ;;  %v9969_v41 = vunpack.i.h.bf16 %v13678_v40  ;;  %v13876_v53 = vpop.f32.mrf.mxu3  ;;  %v9638_v56 = vunpack.i.l.bf16 %v12726_v22  ;;  %v3692_v38 = vld [vmem:[#allocation3 + $0x50] sm:$0xff] }
 0x379   : > { %v9972_v11 = vpop.permute.xlu0 %9971  ;;  %v13846_v12 = vpop.permute.xlu2 %10026  ;;  %v9878_v40 = vunpack.i.l.bf16 %v13590_v29 }
 0x37a   : > { %v9974_v59 = vunpack.i.h.bf16 %v9972_v11  ;;  %v9973_v61 = vunpack.i.l.bf16 %v9972_v11  ;;  %v13848_v7 = vpop.permute.xlu1 %9976  ;;  %v3465_v2 = vmul.f32 %v3417_v28, %v17665_v32  ;;  %v3006_v11 = vadd.f32 %v13491_v3, %v12730_v57 }
 0x37b   : > { %v9978_v55 = vunpack.i.l.bf16 %v13848_v7  ;;  %v3163_v60 = vpop.f32.mrf.mxu1  ;;  %v13856_v23 = vld [vmem:[#allocation3 + $0xd1] sm:$0xff] }
 0x37c   : > { %v4907_v14 = vsel %vm2521_vm5, %v4859_v13, %v9973_v61  ;;  %v5051_v4 = vsel %vm2521_vm5, %v5003_v33, %v9974_v59  ;;  %v13860_v16 = vld [vmem:[#allocation3 + $0xd7] sm:$0xff]  ;;  %3514 = vst.msk [vmem:[#allocation3 + $0xe0] sm:$0xff] %vm2472_vm4, %v3465_v2  ;;  %v3164_v25 = vadd.f32 %v3163_v60, %v3003_v58  ;;  %v9788_v58 = vunpack.i.l.bf16 %v12976_v43 }
 0x37d   : > { %v13862_v20 = vld [vmem:[#allocation3 + $0xd8] sm:$0xff]  ;;  %8962 = vmatmul.msk.f32.gmra.mxu0 %vm2472_vm4, %v13856_v23  ;;  %v4955_v1 = vsel %vm2570_vm6, %v4907_v14, %v9964_v9  ;;  %v5099_v17 = vsel %vm2570_vm6, %v5051_v4, %v9978_v55  ;;  %v10195_v30 = vpack.i.bf16 %v13860_v16, %v13646_v52  ;;  %v13889_v9 = vpop.f32.mrf.mxu0  ;;  %v9979_v2 = vunpack.i.h.bf16 %v13848_v7  ;;  %v1271_v55 = vld [vmem:[#allocation2 + $0x1b0] sm:$0xff] }
 0x37e   : > { %5275 = vmatmul.f32.gmra.mxu3 %v4955_v1  ;;  %v10205_v54 = vpack.i.bf16 %v13862_v20, %v13737_v15  ;;  %v3325_v39 = vadd.f32 %v3324_v45, %v3164_v25  ;;  %5436 = vmatmul.f32.gmra.mxu2 %v5099_v17  ;;  %v1121_v15 = vld [vmem:[#allocation2 + $0x170] sm:$0xff]  ;;  %v5004_v33 = vsel %vm2472_vm4, %v3692_v38, %v9969_v41 }
 0x37f   : > { %3210 = vmatmul.f32.gmra.mxu1 %v2756_v63  ;;  %10196 = vrot.lane.b32.xlu0 %v10195_v30, %s11466_s3  ;;  %v10620_v13 = vld [vmem:[#allocation3 + $0x37] sm:$0xff]  ;;  %v2661_v25 = vsel %vm2472_vm4, %v1121_v15, %v9638_v56  ;;  %v10200_v41 = vpack.i.bf16 %v13818_v26, %v13653_v35  ;;  %v9789_v35 = vunpack.i.h.bf16 %v12976_v43 }
 0x380   : > { %v3418_v28 = vmax.f32 %v3325_v39, 0.0  ;;  %10206 = vrot.lane.b32.xlu1 %v10205_v54, %s11467_s4  ;;  %v4860_v57 = vsel %vm2472_vm4, %v10620_v13, %v9968_v51  ;;  %v2709_v54 = vsel %vm2521_vm5, %v2661_v25, %v9788_v58  ;;  %v9639_v58 = vunpack.i.h.bf16 %v12726_v22 }
 0x381   : > { %v9987_v52 = vpop.permute.xlu0 %9986  ;;  %v13885_v61 = vpop.permute.xlu2 %10041  ;;  %v2757_v51 = vsel %vm2570_vm6, %v2709_v54, %v9878_v40  ;;  %v1122_v40 = vld [vmem:[#allocation2 + $0x178] sm:$0xff] }
 0x382   : > { %v9989_v0 = vunpack.i.h.bf16 %v9987_v52  ;;  %v9988_v59 = vunpack.i.l.bf16 %v9987_v52  ;;  %v13887_v31 = vpop.permute.xlu1 %9991  ;;  %3515 = vst.msk [vmem:[#allocation3 + $0xe8] sm:$0xff] %vm2472_vm4, %v3418_v28  ;;  %v9984_v28 = vunpack.i.h.bf16 %v13722_v47  ;;  %v9983_v52 = vunpack.i.l.bf16 %v13722_v47 }
 0x383   : > { %v9993_v19 = vunpack.i.l.bf16 %v13887_v31  ;;  %v3166_v60 = vpop.f32.mrf.mxu1  ;;  %v13896_v45 = vld [vmem:[#allocation3 + $0xd9] sm:$0xff]  ;;  %v9879_v47 = vunpack.i.h.bf16 %v13590_v29  ;;  %v9994_v13 = vunpack.i.h.bf16 %v13887_v31  ;;  %v2662_v31 = vsel %vm2472_vm4, %v1122_v40, %v9639_v58 }
 0x384   : > { %v4908_v14 = vsel %vm2521_vm5, %v4860_v57, %v9988_v59  ;;  %v5052_v4 = vsel %vm2521_vm5, %v5004_v33, %v9989_v0  ;;  %v13901_v7 = vld [vmem:[#allocation3 + $0xe0] sm:$0xff]  ;;  %v3167_v17 = vadd.f32 %v3166_v60, %v3006_v11  ;;  %v13924_v0 = vpop.f32.mrf.mxu3  ;;  %v9999_v58 = vunpack.i.h.bf16 %v13764_v36 }
 0x385   : > { %v13903_v1 = vld [vmem:[#allocation3 + $0xdf] sm:$0xff]  ;;  %8963 = vmatmul.msk.f32.gmra.mxu0 %vm2472_vm4, %v13896_v45  ;;  %v4956_v63 = vsel %vm2570_vm6, %v4908_v14, %v9979_v2  ;;  %v5100_v30 = vsel %vm2570_vm6, %v5052_v4, %v9993_v19  ;;  %v10220_v39 = vpack.i.bf16 %v1271_v55, %v13901_v7  ;;  %v13933_v43 = vpop.f32.mrf.mxu0 }
 0x386   : > { %5278 = vmatmul.f32.gmra.mxu3 %v4956_v63  ;;  %v10215_v56 = vpack.i.bf16 %v13903_v1, %v13684_v62  ;;  %v3328_v15 = vadd.f32 %v13290_v42, %v3167_v17  ;;  %5439 = vmatmul.f32.gmra.mxu2 %v5100_v30  ;;  %v3009_v42 = vadd.f32 %v13491_v3, %v12755_v27  ;;  %v3693_v19 = vld [vmem:[#allocation3 + $0x58] sm:$0xff]  ;;  %v17677_v40 = vld [vmem:[#allocation50_spill] sm:$0xff] }
 0x387   : > { %3213 = vmatmul.f32.gmra.mxu1 %v2757_v51  ;;  %10201 = vrot.lane.b32.xlu0 %v10200_v41, %s11465_s1  ;;  %v10621_v33 = vld [vmem:[#allocation3 + $0x3f] sm:$0xff]  ;;  %v5005_v27 = vsel %vm2472_vm4, %v3693_v19, %v9984_v28 }
 0x388   : > { %10221 = vrot.lane.b32.xlu2 %v10220_v39, %s11467_s4  ;;  %v3419_v11 = vmax.f32 %v3328_v15, 0.0  ;;  %10216 = vrot.lane.b32.xlu1 %v10215_v56, %s11466_s3  ;;  %v4861_v55 = vsel %vm2472_vm4, %v10621_v33, %v9983_v52  ;;  %v17676_v30 = vld [vmem:[#allocation17_spill] sm:$0xff]  ;;  %v2710_v39 = vsel %vm2521_vm5, %v2662_v31, %v9789_v35  ;;  %v10210_v56 = vpack.i.bf16 %v13856_v23, %v13694_v6  ;;  %v1123_v6 = vld [vmem:[#allocation2 + $0x180] sm:$0xff] }
 0x389   : > { %v10002_v62 = vpop.permute.xlu0 %10001  ;;  %v13929_v38 = vpop.permute.xlu2 %10056  ;;  %v13939_v60 = vld [vmem:[#allocation3 + $0xe8] sm:$0xff]  ;;  %v9643_v54 = vunpack.i.l.bf16 %v17676_v30  ;;  %v2758_v52 = vsel %vm2570_vm6, %v2710_v39, %v9879_v47  ;;  %v17678_v47 = vld [vmem:[#allocation21_spill] sm:$0xff]  ;;  %v3694_v33 = vld [vmem:[#allocation3 + $0x60] sm:$0xff] }
 0x38a   : > { %v10004_v59 = vunpack.i.h.bf16 %v10002_v62  ;;  %v10003_v22 = vunpack.i.l.bf16 %v10002_v62  ;;  %v13931_v2 = vpop.permute.xlu1 %10006  ;;  %v3467_v57 = vmul.f32 %v3419_v11, %v17666_v44  ;;  %v13942_v4 = vld [vmem:[#allocation3 + $0xe1] sm:$0xff]  ;;  %v10235_v15 = vpack.i.bf16 %v13939_v60, %v13815_v34 }
 0x38b   : > { %v10008_v29 = vunpack.i.l.bf16 %v13931_v2  ;;  %v3169_v14 = vpop.f32.mrf.mxu1  ;;  %v13947_v63 = vld [vmem:[#allocation3 + $0xe7] sm:$0xff]  ;;  %v9998_v11 = vunpack.i.l.bf16 %v13764_v36  ;;  %v9883_v34 = vunpack.i.l.bf16 %v17678_v47  ;;  %v10014_v47 = vunpack.i.h.bf16 %v13806_v48 }
 0x38c   : > { %v4909_v25 = vsel %vm2521_vm5, %v4861_v55, %v10003_v22  ;;  %v5053_v17 = vsel %vm2521_vm5, %v5005_v27, %v10004_v59  ;;  %3516 = vst.msk [vmem:[#allocation3 + $0xf0] sm:$0xff] %vm2472_vm4, %v3467_v57  ;;  %v3170_v41 = vadd.f32 %v3169_v14, %v3009_v42  ;;  %v10230_v35 = vpack.i.bf16 %v13947_v63, %v13732_v8  ;;  %v17679_v22 = vld [vmem:[#allocation22_spill] sm:$0xff]  ;;  %v13980_v31 = vpop.f32.mrf.mxu3 }
 0x38d   : > { %8964 = vmatmul.msk.f32.gmra.mxu0 %vm2472_vm4, %v13942_v4  ;;  %v4957_v51 = vsel %vm2570_vm6, %v4909_v25, %v9994_v13  ;;  %v5101_v28 = vsel %vm2570_vm6, %v5053_v17, %v10008_v29  ;;  %v9793_v42 = vunpack.i.l.bf16 %v17677_v40  ;;  %v2663_v55 = vsel %vm2472_vm4, %v1123_v6, %v9643_v54  ;;  %v10622_v14 = vld [vmem:[#allocation3 + $0x47] sm:$0xff] }
 0x38e   : > { %5281 = vmatmul.f32.gmra.mxu3 %v4957_v51  ;;  %v3331_v62 = vadd.f32 %v13329_v49, %v3170_v41  ;;  %5442 = vmatmul.f32.gmra.mxu2 %v5101_v28  ;;  %v3012_v49 = vadd.f32 %v13491_v3, %v17679_v22  ;;  %v10009_v27 = vunpack.i.h.bf16 %v13931_v2  ;;  %v4862_v25 = vsel %vm2472_vm4, %v10622_v14, %v9998_v11  ;;  %v10624_v14 = vld [vmem:[#allocation3 + $0x4f] sm:$0xff] }
 0x38f   : > { %3216 = vmatmul.f32.gmra.mxu1 %v2758_v52  ;;  %10211 = vrot.lane.b32.xlu0 %v10210_v56, %s11465_s1  ;;  %v5006_v17 = vsel %vm2472_vm4, %v3694_v33, %v9999_v58  ;;  %v2711_v28 = vsel %vm2521_vm5, %v2663_v55, %v9793_v42  ;;  %v13991_v52 = vpop.f32.mrf.mxu0  ;;  %v3695_v55 = vld [vmem:[#allocation3 + $0x68] sm:$0xff] }
 0x390   : > { %10236 = vrot.lane.b32.xlu2 %v10235_v15, %s11467_s4  ;;  %v3420_v59 = vmax.f32 %v3331_v62, 0.0  ;;  %10231 = vrot.lane.b32.xlu1 %v10230_v35, %s11466_s3  ;;  %v2759_v11 = vsel %vm2570_vm6, %v2711_v28, %v9883_v34  ;;  %v10225_v62 = vpack.i.bf16 %v13896_v45, %v13739_v46 }
 0x391   : > { %v10017_v36 = vpop.permute.xlu0 %10016  ;;  %v13973_v57 = vpop.permute.xlu2 %10071 }
 0x392   : > { %v10019_v19 = vunpack.i.h.bf16 %v10017_v36  ;;  %v10018_v13 = vunpack.i.l.bf16 %v10017_v36  ;;  %v10022_v8 = vpop.permute.xlu1 %10021  ;;  %v3468_v29 = vmul.f32 %v3420_v59, %v17665_v32  ;;  %v10013_v59 = vunpack.i.l.bf16 %v13806_v48  ;;  %v17680_v36 = vld [vmem:[#allocation52_spill] sm:$0xff] }
 0x393   : > { %v10023_v3 = vunpack.i.l.bf16 %v10022_v8  ;;  %v3172_v41 = vpop.f32.mrf.mxu1  ;;  %v13982_v51 = vld [vmem:[#allocation3 + $0xe9] sm:$0xff] }
 0x394   : > { %v4910_v39 = vsel %vm2521_vm5, %v4862_v25, %v10018_v13  ;;  %v5054_v56 = vsel %vm2521_vm5, %v5006_v17, %v10019_v19  ;;  %v13986_v54 = vld [vmem:[#allocation3 + $0xf0] sm:$0xff]  ;;  %3517 = vst.msk [vmem:[#allocation3 + $0xf8] sm:$0xff] %vm2472_vm4, %v3468_v29  ;;  %v3173_v15 = vadd.f32 %v3172_v41, %v3012_v49  ;;  %v17681_v49 = vld [vmem:[#allocation35_spill] sm:$0xff]  ;;  %v4863_v25 = vsel %vm2472_vm4, %v10624_v14, %v10013_v59 }
 0x395   : > { %v13988_v2 = vld [vmem:[#allocation3 + $0xef] sm:$0xff]  ;;  %8965 = vmatmul.msk.f32.gmra.mxu0 %vm2472_vm4, %v13982_v51  ;;  %v4958_v58 = vsel %vm2570_vm6, %v4910_v39, %v10009_v27  ;;  %v5102_v35 = vsel %vm2570_vm6, %v5054_v56, %v10023_v3  ;;  %v10250_v6 = vpack.i.bf16 %v13986_v54, %v13860_v16  ;;  %v14012_v16 = vld [vmem:[%s11579_s13] ss:$0 sm:$0xff]  ;;  %v10024_v27 = vunpack.i.h.bf16 %v10022_v8 }
 0x396   : > { %5284 = vmatmul.f32.gmra.mxu3 %v4958_v58  ;;  %v10245_v42 = vpack.i.bf16 %v13988_v2, %v13775_v21  ;;  %v3334_v22 = vadd.f32 %v17680_v36, %v3173_v15  ;;  %5445 = vmatmul.f32.gmra.mxu2 %v5102_v35  ;;  %v3015_v21 = vadd.f32 %v14012_v16, %v17681_v49  ;;  %v10028_v59 = vunpack.i.l.bf16 %v13846_v12 }
 0x397   : > { %3219 = vmatmul.f32.gmra.mxu1 %v2759_v11  ;;  %10226 = vrot.lane.b32.xlu0 %v10225_v62, %s11465_s1  ;;  %v5007_v17 = vsel %vm2472_vm4, %v3695_v55, %v10014_v47  ;;  %v14033_v62 = vpop.f32.mrf.mxu3  ;;  %v10240_v35 = vpack.i.bf16 %v13942_v4, %v13782_v24  ;;  %v10029_v47 = vunpack.i.h.bf16 %v13846_v12  ;;  %v14043_v36 = vpop.f32.mrf.mxu0 }
 0x398   : > { %10251 = vrot.lane.b32.xlu2 %v10250_v6, %s11467_s4  ;;  %v3421_v46 = vmax.f32 %v3334_v22, 0.0  ;;  %10246 = vrot.lane.b32.xlu1 %v10245_v42, %s11466_s3  ;;  %v17682_v22 = vld [vmem:[#allocation38_spill] sm:$0xff] }
 0x399   : > { %v10032_v34 = vpop.permute.xlu0 %10031  ;;  %v14016_v48 = vpop.permute.xlu2 %10086 }
 0x39a   : > { %v10034_v19 = vunpack.i.h.bf16 %v10032_v34  ;;  %v10033_v13 = vunpack.i.l.bf16 %v10032_v34  ;;  %v10037_v33 = vpop.permute.xlu1 %10036  ;;  %3518 = vst.msk [vmem:[#allocation3 + $0x100] sm:$0xff] %vm2472_vm4, %v3421_v46  ;;  %v17683_v34 = vld [vmem:[#allocation24_spill] sm:$0xff] }
 0x39b   : > { %v10038_v29 = vunpack.i.l.bf16 %v10037_v33  ;;  %v3175_v3 = vpop.f32.mrf.mxu1  ;;  %v14021_v41 = vld [vmem:[#allocation3 + $0xf1] sm:$0xff]  ;;  %v10039_v55 = vunpack.i.h.bf16 %v10037_v33 }
 0x39c   : > { %v4911_v39 = vsel %vm2521_vm5, %v4863_v25, %v10033_v13  ;;  %v5055_v56 = vsel %vm2521_vm5, %v5007_v17, %v10034_v19  ;;  %v14025_v28 = vld [vmem:[#allocation3 + $0xf8] sm:$0xff]  ;;  %v3176_v8 = vadd.f32 %v3175_v3, %v3015_v21  ;;  %v3696_v13 = vld [vmem:[#allocation3 + $0x70] sm:$0xff] }
 0x39d   : > { %v14027_v15 = vld [vmem:[#allocation3 + $0xf7] sm:$0xff]  ;;  %8966 = vmatmul.msk.f32.gmra.mxu0 %vm2472_vm4, %v14021_v41  ;;  %v4959_v58 = vsel %vm2570_vm6, %v4911_v39, %v10024_v27  ;;  %v5103_v11 = vsel %vm2570_vm6, %v5055_v56, %v10038_v29  ;;  %v10265_v6 = vpack.i.bf16 %v14025_v28, %v13903_v1  ;;  %v5008_v25 = vsel %vm2472_vm4, %v3696_v13, %v10029_v47 }
 0x39e   : > { %5287 = vmatmul.f32.gmra.mxu3 %v4959_v58  ;;  %v10260_v42 = vpack.i.bf16 %v14027_v15, %v13818_v26  ;;  %v3337_v46 = vadd.f32 %v17682_v22, %v3176_v8  ;;  %5448 = vmatmul.f32.gmra.mxu2 %v5103_v11  ;;  %v3018_v26 = vadd.f32 %v14012_v16, %v17683_v34  ;;  %v10625_v29 = vld [vmem:[#allocation3 + $0x57] sm:$0xff]  ;;  %v10043_v22 = vunpack.i.l.bf16 %v13885_v61 }
 0x39f   : > { %10241 = vrot.lane.b32.xlu0 %v10240_v35, %s11465_s1  ;;  %v4864_v14 = vsel %vm2472_vm4, %v10625_v29, %v10028_v59  ;;  %v10044_v59 = vunpack.i.h.bf16 %v13885_v61  ;;  %v14078_v34 = vpop.f32.mrf.mxu3 }
 0x3a0   : > { %10266 = vrot.lane.b32.xlu2 %v10265_v6, %s11467_s4  ;;  %v3422_v24 = vmax.f32 %v3337_v46, 0.0  ;;  %10261 = vrot.lane.b32.xlu1 %v10260_v42, %s11466_s3  ;;  %v10255_v6 = vpack.i.bf16 %v13982_v51, %v13822_v50  ;;  %v17684_v46 = vld [vmem:[#allocation48_spill] sm:$0xff]  ;;  %v14082_v50 = vpop.f32.mrf.mxu0 }
 0x3a1   : > { %v10047_v1 = vpop.permute.xlu0 %10046  ;;  %v14051_v19 = vpop.permute.xlu2 %10101  ;;  %v14056_v17 = vld [vmem:[#allocation3 + $0x100] sm:$0xff] }
 0x3a2   : > { %v10049_v49 = vunpack.i.h.bf16 %v10047_v1  ;;  %v10048_v21 = vunpack.i.l.bf16 %v10047_v1  ;;  %v10052_v12 = vpop.permute.xlu1 %10051  ;;  %v3470_v27 = vmul.f32 %v3422_v24, %v17666_v44  ;;  %v14058_v56 = vld [vmem:[#allocation3 + $0xf9] sm:$0xff]  ;;  %v10280_v47 = vpack.i.bf16 %v14056_v17, %v13947_v63 }
 0x3a3   : > { %v10053_v3 = vunpack.i.l.bf16 %v10052_v12  ;;  %v3178_v39 = vpop.f32.mrf.mxu1  ;;  %v14062_v11 = vld [vmem:[#allocation3 + $0xff] sm:$0xff]  ;;  %v10054_v29 = vunpack.i.h.bf16 %v10052_v12 }
 0x3a4   : > { %v4912_v8 = vsel %vm2521_vm5, %v4864_v14, %v10048_v21  ;;  %v5056_v58 = vsel %vm2521_vm5, %v5008_v25, %v10049_v49  ;;  %3519 = vst.msk [vmem:[#allocation3 + $0x108] sm:$0xff] %vm2472_vm4, %v3470_v27  ;;  %v3179_v33 = vadd.f32 %v3178_v39, %v3018_v26  ;;  %v10275_v1 = vpack.i.bf16 %v14062_v11, %v13856_v23  ;;  %v17685_v49 = vld [vmem:[#allocation34_spill] sm:$0xff]  ;;  %v3697_v27 = vld [vmem:[#allocation3 + $0x78] sm:$0xff] }
 0x3a5   : > { %8967 = vmatmul.msk.f32.gmra.mxu0 %vm2472_vm4, %v14058_v56  ;;  %v4960_v35 = vsel %vm2570_vm6, %v4912_v8, %v10039_v55  ;;  %v5104_v42 = vsel %vm2570_vm6, %v5056_v58, %v10053_v3  ;;  %v3021_v61 = vadd.f32 %v14012_v16, %v17685_v49  ;;  %v10626_v25 = vld [vmem:[#allocation3 + $0x5f] sm:$0xff]  ;;  %v5009_v39 = vsel %vm2472_vm4, %v3697_v27, %v10044_v59 }
 0x3a6   : > { %5290 = vmatmul.f32.gmra.mxu3 %v4960_v35  ;;  %v3340_v24 = vadd.f32 %v17684_v46, %v3179_v33  ;;  %5451 = vmatmul.f32.gmra.mxu2 %v5104_v42  ;;  %v4865_v3 = vsel %vm2472_vm4, %v10626_v25, %v10043_v22  ;;  %v10270_v22 = vpack.i.bf16 %v14021_v41, %v13862_v20  ;;  %v17686_v49 = vld [vmem:[#allocation61_spill] sm:$0xff]  ;;  %v3698_v25 = vld [vmem:[#allocation3 + $0x80] sm:$0xff] }
 0x3a7   : > { %10256 = vrot.lane.b32.xlu0 %v10255_v6, %s11465_s1 }
 0x3a8   : > { %10281 = vrot.lane.b32.xlu2 %v10280_v47, %s11467_s4  ;;  %v3423_v26 = vmax.f32 %v3340_v24, 0.0  ;;  %10276 = vrot.lane.b32.xlu1 %v10275_v1, %s11466_s3 }
 0x3a9   : > { %v10062_v63 = vpop.permute.xlu0 %10061  ;;  %v14087_v55 = vpop.permute.xlu2 %10116 }
 0x3aa   : > { %v10064_v21 = vunpack.i.h.bf16 %v10062_v63  ;;  %v10063_v13 = vunpack.i.l.bf16 %v10062_v63  ;;  %v10067_v23 = vpop.permute.xlu1 %10066  ;;  %v3471_v14 = vmul.f32 %v3423_v26, %v17665_v32  ;;  %v10059_v26 = vunpack.i.h.bf16 %v13929_v38 }
 0x3ab   : > { %v10068_v8 = vunpack.i.l.bf16 %v10067_v23  ;;  %v3181_v58 = vpop.f32.mrf.mxu1  ;;  %v14092_v33 = vld [vmem:[#allocation3 + $0x101] sm:$0xff]  ;;  %v10058_v63 = vunpack.i.l.bf16 %v13929_v38 }
 0x3ac   : > { %v4913_v35 = vsel %vm2521_vm5, %v4865_v3, %v10063_v13  ;;  %v5057_v6 = vsel %vm2521_vm5, %v5009_v39, %v10064_v21  ;;  %v14096_v42 = vld [vmem:[#allocation3 + $0x108] sm:$0xff]  ;;  %3520 = vst.msk [vmem:[#allocation3 + $0x110] sm:$0xff] %vm2472_vm4, %v3471_v14  ;;  %v3182_v12 = vadd.f32 %v3181_v58, %v3021_v61  ;;  %v14117_v13 = vpop.f32.mrf.mxu3  ;;  %v14123_v3 = vpop.f32.mrf.mxu0  ;;  %v10069_v39 = vunpack.i.h.bf16 %v10067_v23 }
 0x3ad   : > { %v14098_v47 = vld [vmem:[#allocation3 + $0x107] sm:$0xff]  ;;  %8968 = vmatmul.msk.f32.gmra.mxu0 %vm2472_vm4, %v14092_v33  ;;  %v4961_v59 = vsel %vm2570_vm6, %v4913_v35, %v10054_v29  ;;  %v5105_v46 = vsel %vm2570_vm6, %v5057_v6, %v10068_v8  ;;  %v10295_v24 = vpack.i.bf16 %v14096_v42, %v13988_v2  ;;  %17687 = vst [vmem:[#allocation60_spill] sm:$0xff] %v14117_v13  ;;  %v1125_v13 = vld [vmem:[#allocation2 + $0x190] sm:$0xff] }
 0x3ae   : > { %5293 = vmatmul.f32.gmra.mxu3 %v4961_v59  ;;  %v10290_v1 = vpack.i.bf16 %v14098_v47, %v13896_v45  ;;  %v3343_v61 = vadd.f32 %v17686_v49, %v3182_v12  ;;  %5454 = vmatmul.f32.gmra.mxu2 %v5105_v46  ;;  %v17688_v2 = vld [vmem:[#allocation26_spill] sm:$0xff]  ;;  %v5010_v6 = vsel %vm2472_vm4, %v3698_v25, %v10059_v26  ;;  %v17690_v25 = vld [vmem:[#allocation23_spill] sm:$0xff] }
 0x3af   : > { %10271 = vrot.lane.b32.xlu0 %v10270_v22, %s11465_s1  ;;  %v3024_v45 = vadd.f32 %v14012_v16, %v17688_v2  ;;  %v10627_v58 = vld [vmem:[#allocation3 + $0x67] sm:$0xff]  ;;  %v10285_v26 = vpack.i.bf16 %v14058_v56, %v13901_v7  ;;  %v10073_v2 = vunpack.i.l.bf16 %v13973_v57 }
 0x3b0   : > { %10296 = vrot.lane.b32.xlu2 %v10295_v24, %s11467_s4  ;;  %v3424_v20 = vmax.f32 %v3343_v61, 0.0  ;;  %10291 = vrot.lane.b32.xlu1 %v10290_v1, %s11466_s3  ;;  %v4866_v35 = vsel %vm2472_vm4, %v10627_v58, %v10058_v63  ;;  %v3699_v58 = vld [vmem:[#allocation3 + $0x88] sm:$0xff] }
 0x3b1   : > { %v10077_v21 = vpop.permute.xlu0 %10076  ;;  %v14121_v14 = vpop.permute.xlu2 %10131 }
 0x3b2   : > { %v10079_v27 = vunpack.i.h.bf16 %v10077_v21  ;;  %v10078_v29 = vunpack.i.l.bf16 %v10077_v21  ;;  %v10082_v38 = vpop.permute.xlu1 %10081  ;;  %3521 = vst.msk [vmem:[#allocation3 + $0x118] sm:$0xff] %vm2472_vm4, %v3424_v20  ;;  %v10074_v21 = vunpack.i.h.bf16 %v13973_v57 }
 0x3b3   : > { %v10083_v8 = vunpack.i.l.bf16 %v10082_v38  ;;  %v3184_v12 = vpop.f32.mrf.mxu1  ;;  %v14128_v59 = vld [vmem:[#allocation3 + $0x109] sm:$0xff] }
 0x3b4   : > { %v4914_v22 = vsel %vm2521_vm5, %v4866_v35, %v10078_v29  ;;  %v5058_v46 = vsel %vm2521_vm5, %v5010_v6, %v10079_v27  ;;  %v14132_v24 = vld [vmem:[#allocation3 + $0x110] sm:$0xff]  ;;  %v3185_v23 = vadd.f32 %v3184_v12, %v3024_v45  ;;  %v17689_v45 = vld [vmem:[#allocation51_spill] sm:$0xff]  ;;  %v10084_v35 = vunpack.i.h.bf16 %v10082_v38 }
 0x3b5   : > { %v14134_v1 = vld [vmem:[#allocation3 + $0x10f] sm:$0xff]  ;;  %8969 = vmatmul.msk.f32.gmra.mxu0 %vm2472_vm4, %v14128_v59  ;;  %v4962_v49 = vsel %vm2570_vm6, %v4914_v22, %v10069_v39  ;;  %v5106_v63 = vsel %vm2570_vm6, %v5058_v46, %v10083_v8  ;;  %v10310_v61 = vpack.i.bf16 %v14132_v24, %v14027_v15  ;;  %v3027_v15 = vadd.f32 %v14012_v16, %v17690_v25 }
 0x3b6   : > { %5296 = vmatmul.f32.gmra.mxu3 %v4962_v49  ;;  %v10305_v20 = vpack.i.bf16 %v14134_v1, %v13942_v4  ;;  %v3346_v27 = vadd.f32 %v17689_v45, %v3185_v23  ;;  %5457 = vmatmul.f32.gmra.mxu2 %v5106_v63  ;;  %v10628_v6 = vld [vmem:[#allocation3 + $0x6f] sm:$0xff]  ;;  %v5011_v22 = vsel %vm2472_vm4, %v3699_v58, %v10074_v21  ;;  %v14159_v23 = vpop.f32.mrf.mxu3 }
 0x3b7   : > { %10286 = vrot.lane.b32.xlu0 %v10285_v26, %s11465_s1  ;;  %v4867_v12 = vsel %vm2472_vm4, %v10628_v6, %v10073_v2  ;;  %17691 = vst [vmem:[#allocation56_spill] sm:$0xff] %v14159_v23  ;;  %v17692_v58 = vld [vmem:[#allocation47_spill] sm:$0xff]  ;;  %v17693_v6 = vld [vmem:[#allocation18_spill] sm:$0xff] }
 0x3b8   : > { %10311 = vrot.lane.b32.xlu2 %v10310_v61, %s11467_s4  ;;  %v3425_v29 = vmax.f32 %v3346_v27, 0.0  ;;  %10306 = vrot.lane.b32.xlu1 %v10305_v20, %s11466_s3  ;;  %v14169_v27 = vpop.f32.mrf.mxu0 }
 0x3b9   : > { %v10092_v7 = vpop.permute.xlu0 %10091  ;;  %v14157_v46 = vld [vmem:[#allocation3 + $0x118] sm:$0xff]  ;;  %v14161_v49 = vpop.permute.xlu2 %10146 }
 0x3ba   : > { %v10094_v39 = vunpack.i.h.bf16 %v10092_v7  ;;  %v10093_v4 = vunpack.i.l.bf16 %v10092_v7  ;;  %v10097_v8 = vpop.permute.xlu1 %10096  ;;  %v3473_v57 = vmul.f32 %v3425_v29, %v17666_v44  ;;  %v14163_v61 = vld [vmem:[#allocation3 + $0x111] sm:$0xff]  ;;  %v10300_v29 = vpack.i.bf16 %v14092_v33, %v13939_v60 }
 0x3bb   : > { %v10098_v63 = vunpack.i.l.bf16 %v10097_v8  ;;  %v3187_v26 = vpop.f32.mrf.mxu1  ;;  %v14167_v45 = vld [vmem:[#allocation3 + $0x117] sm:$0xff]  ;;  %v10325_v25 = vpack.i.bf16 %v14157_v46, %v14062_v11  ;;  %v3030_v11 = vadd.f32 %v14012_v16, %v17693_v6 }
 0x3bc   : > { %v4915_v20 = vsel %vm2521_vm5, %v4867_v12, %v10093_v4  ;;  %v5059_v38 = vsel %vm2521_vm5, %v5011_v22, %v10094_v39  ;;  %3522 = vst.msk [vmem:[#allocation3 + $0x120] sm:$0xff] %vm2472_vm4, %v3473_v57  ;;  %v3188_v21 = vadd.f32 %v3187_v26, %v3027_v15  ;;  %v10089_v39 = vunpack.i.h.bf16 %v14016_v48 }
 0x3bd   : > { %8970 = vmatmul.msk.f32.gmra.mxu0 %vm2472_vm4, %v14163_v61  ;;  %v4963_v2 = vsel %vm2570_vm6, %v4915_v20, %v10084_v35  ;;  %v5107_v7 = vsel %vm2570_vm6, %v5059_v38, %v10098_v63  ;;  %v10088_v4 = vunpack.i.l.bf16 %v14016_v48  ;;  %v10320_v57 = vpack.i.bf16 %v14167_v45, %v13982_v51  ;;  %v3700_v63 = vld [vmem:[#allocation3 + $0x90] sm:$0xff] }
 0x3be   : > { %5299 = vmatmul.f32.gmra.mxu3 %v4963_v2  ;;  %v3349_v15 = vadd.f32 %v17692_v58, %v3188_v21  ;;  %5460 = vmatmul.f32.gmra.mxu2 %v5107_v7  ;;  %v10099_v26 = vunpack.i.h.bf16 %v10097_v8  ;;  %v10629_v38 = vld [vmem:[#allocation3 + $0x77] sm:$0xff]  ;;  %v5012_v21 = vsel %vm2472_vm4, %v3700_v63, %v10089_v39 }
 0x3bf   : > { %10301 = vrot.lane.b32.xlu0 %v10300_v29, %s11465_s1  ;;  %v4868_v51 = vsel %vm2472_vm4, %v10629_v38, %v10088_v4  ;;  %v14205_v4 = vpop.f32.mrf.mxu3  ;;  %v17695_v63 = vld [vmem:[#allocation45_spill] sm:$0xff] }
 0x3c0   : > { %10326 = vrot.lane.b32.xlu2 %v10325_v25, %s11467_s4  ;;  %v3426_v60 = vmax.f32 %v3349_v15, 0.0  ;;  %10321 = vrot.lane.b32.xlu1 %v10320_v57, %s11466_s3  ;;  %17694 = vst [vmem:[#allocation62_spill] sm:$0xff] %v14205_v4 }
 0x3c1   : > { %v10107_v35 = vpop.permute.xlu0 %10106 }
 0x3c2   : > { %v10109_v12 = vunpack.i.h.bf16 %v10107_v35  ;;  %v10108_v22 = vunpack.i.l.bf16 %v10107_v35  ;;  %v10112_v48 = vpop.permute.xlu1 %10111  ;;  %v3474_v20 = vmul.f32 %v3426_v60, %v17665_v32  ;;  %v10315_v60 = vpack.i.bf16 %v14128_v59, %v13986_v54  ;;  %v14209_v35 = vpop.permute.xlu2 %10161 }
 0x3c3   : > { %v10113_v2 = vunpack.i.l.bf16 %v10112_v48  ;;  %v3190_v29 = vpop.f32.mrf.mxu1  ;;  %v14193_v7 = vld [vmem:[#allocation3 + $0x119] sm:$0xff]  ;;  %v10103_v54 = vunpack.i.l.bf16 %v14051_v19 }
 0x3c4   : > { %v4916_v25 = vsel %vm2521_vm5, %v4868_v51, %v10108_v22  ;;  %v5060_v58 = vsel %vm2521_vm5, %v5012_v21, %v10109_v12  ;;  %v14197_v15 = vld [vmem:[#allocation3 + $0x120] sm:$0xff]  ;;  %3523 = vst.msk [vmem:[#allocation3 + $0x128] sm:$0xff] %vm2472_vm4, %v3474_v20  ;;  %v3191_v8 = vadd.f32 %v3190_v29, %v3030_v11  ;;  %v14216_v22 = vpop.f32.mrf.mxu0  ;;  %v10104_v20 = vunpack.i.h.bf16 %v14051_v19  ;;  %v17696_v51 = vld [vmem:[#allocation44_spill] sm:$0xff] }
 0x3c5   : > { %v14199_v57 = vld [vmem:[#allocation3 + $0x11f] sm:$0xff]  ;;  %8971 = vmatmul.msk.f32.gmra.mxu0 %vm2472_vm4, %v14193_v7  ;;  %v4964_v39 = vsel %vm2570_vm6, %v4916_v25, %v10099_v26  ;;  %v5108_v6 = vsel %vm2570_vm6, %v5060_v58, %v10113_v2  ;;  %v10340_v12 = vpack.i.bf16 %v14197_v15, %v14098_v47  ;;  %v10114_v58 = vunpack.i.h.bf16 %v10112_v48 }
 0x3c6   : > { %5302 = vmatmul.f32.gmra.mxu3 %v4964_v39  ;;  %v10335_v11 = vpack.i.bf16 %v14199_v57, %v14021_v41  ;;  %v3352_v26 = vadd.f32 %v17695_v63, %v3191_v8  ;;  %5463 = vmatmul.f32.gmra.mxu2 %v5108_v6  ;;  %v3033_v41 = vadd.f32 %v14012_v16, %v17696_v51  ;;  %v3701_v25 = vld [vmem:[#allocation3 + $0x98] sm:$0xff] }
 0x3c7   : > { %10316 = vrot.lane.b32.xlu0 %v10315_v60, %s11465_s1  ;;  %v10630_v60 = vld [vmem:[#allocation3 + $0x7f] sm:$0xff] }
 0x3c8   : > { %10341 = vrot.lane.b32.xlu2 %v10340_v12, %s11467_s4  ;;  %v3427_v38 = vmax.f32 %v3352_v26, 0.0  ;;  %10336 = vrot.lane.b32.xlu1 %v10335_v11, %s11466_s3  ;;  %v4869_v6 = vsel %vm2472_vm4, %v10630_v60, %v10103_v54  ;;  %v5013_v12 = vsel %vm2472_vm4, %v3701_v25, %v10104_v20  ;;  %v10330_v26 = vpack.i.bf16 %v14163_v61, %v14025_v28 }
 0x3c9   : > { %v10122_v47 = vpop.permute.xlu0 %10121 }
 0x3ca   : > { %3524 = vst.msk [vmem:[#allocation3 + $0x130] sm:$0xff] %vm2472_vm4, %v3427_v38  ;;  %v10124_v21 = vunpack.i.h.bf16 %v10122_v47  ;;  %v10123_v2 = vunpack.i.l.bf16 %v10122_v47  ;;  %v10127_v29 = vpop.permute.xlu1 %10126 }
 0x3cb   : > { %v10128_v8 = vunpack.i.l.bf16 %v10127_v29  ;;  %v3193_v19 = vpop.f32.mrf.mxu1  ;;  %v14227_v39 = vld [vmem:[#allocation3 + $0x121] sm:$0xff] }
 0x3cc   : > { %v14231_v11 = vld [vmem:[#allocation3 + $0x128] sm:$0xff]  ;;  %v3194_v38 = vadd.f32 %v3193_v19, %v3033_v41  ;;  %v4917_v48 = vsel %vm2521_vm5, %v4869_v6, %v10123_v2  ;;  %v5061_v47 = vsel %vm2521_vm5, %v5013_v12, %v10124_v21  ;;  %v14248_v41 = vpop.f32.mrf.mxu3  ;;  %v10119_v2 = vunpack.i.h.bf16 %v14087_v55  ;;  %v14252_v19 = vpop.permute.xlu2 %10176 }
 0x3cd   : > { %v14233_v63 = vld [vmem:[#allocation3 + $0x127] sm:$0xff]  ;;  %8972 = vmatmul.msk.f32.gmra.mxu0 %vm2472_vm4, %v14227_v39  ;;  %v4965_v51 = vsel %vm2570_vm6, %v4917_v48, %v10114_v58  ;;  %v5109_v54 = vsel %vm2570_vm6, %v5061_v47, %v10128_v8  ;;  %v10355_v20 = vpack.i.bf16 %v14231_v11, %v14134_v1  ;;  %17697 = vst [vmem:[#allocation58_spill] sm:$0xff] %v14248_v41  ;;  %v10118_v21 = vunpack.i.l.bf16 %v14087_v55  ;;  %v14256_v1 = vpop.f32.mrf.mxu0 }
 0x3ce   : > { %v10350_v25 = vpack.i.bf16 %v14233_v63, %v14058_v56  ;;  %v3355_v28 = vadd.f32 %v13669_v10, %v3194_v38  ;;  %5305 = vmatmul.f32.gmra.mxu3 %v4965_v51  ;;  %5466 = vmatmul.f32.gmra.mxu2 %v5109_v54  ;;  %17698 = vst [vmem:[#allocation71_spill] sm:$0xff] %v14256_v1  ;;  %v17699_v56 = vld [vmem:[#allocation42_spill] sm:$0xff] }
 0x3cf   : > { %10331 = vrot.lane.b32.xlu0 %v10330_v26, %s11465_s1  ;;  %v3036_v8 = vadd.f32 %v14012_v16, %v17699_v56  ;;  %v3702_v38 = vld [vmem:[#allocation3 + $0xa0] sm:$0xff]  ;;  %v10129_v26 = vunpack.i.h.bf16 %v10127_v29  ;;  %v10345_v41 = vpack.i.bf16 %v14193_v7, %v14056_v17  ;;  %v10134_v17 = vunpack.i.h.bf16 %v14121_v14 }
 0x3d0   : > { %10356 = vrot.lane.b32.xlu2 %v10355_v20, %s11467_s4  ;;  %v3428_v58 = vmax.f32 %v3355_v28, 0.0  ;;  %10351 = vrot.lane.b32.xlu1 %v10350_v25, %s11466_s3  ;;  %v10631_v20 = vld [vmem:[#allocation3 + $0x87] sm:$0xff]  ;;  %v5014_v28 = vsel %vm2472_vm4, %v3702_v38, %v10119_v2  ;;  %v14282_v38 = vld [vmem:[%s11585_s16] ss:$0 sm:$0xff] }
 0x3d1   : > { %v10137_v10 = vpop.permute.xlu0 %10136  ;;  %v14262_v48 = vld [vmem:[#allocation3 + $0x130] sm:$0xff]  ;;  %v4870_v25 = vsel %vm2472_vm4, %v10631_v20, %v10118_v21 }
 0x3d2   : > { %v3476_v60 = vmul.f32 %v3428_v58, %v17666_v44  ;;  %v10139_v6 = vunpack.i.h.bf16 %v10137_v10  ;;  %v10138_v12 = vunpack.i.l.bf16 %v10137_v10  ;;  %v10142_v55 = vpop.permute.xlu1 %10141  ;;  %v14264_v54 = vld [vmem:[#allocation3 + $0x129] sm:$0xff]  ;;  %v10370_v2 = vpack.i.bf16 %v14262_v48, %v14167_v45 }
 0x3d3   : > { %v10143_v47 = vunpack.i.l.bf16 %v10142_v55  ;;  %v3196_v51 = vpop.f32.mrf.mxu1  ;;  %v14268_v56 = vld [vmem:[#allocation3 + $0x12f] sm:$0xff] }
 0x3d4   : > { %3525 = vst.msk [vmem:[#allocation3 + $0x138] sm:$0xff] %vm2472_vm4, %v3476_v60  ;;  %v3197_v58 = vadd.f32 %v3196_v51, %v3036_v8  ;;  %v4918_v29 = vsel %vm2521_vm5, %v4870_v25, %v10138_v12  ;;  %v5062_v10 = vsel %vm2521_vm5, %v5014_v28, %v10139_v6  ;;  %v10133_v8 = vunpack.i.l.bf16 %v14121_v14 }
 0x3d5   : > { %8973 = vmatmul.msk.f32.gmra.mxu0 %vm2472_vm4, %v14264_v54  ;;  %v4966_v4 = vsel %vm2570_vm6, %v4918_v29, %v10129_v26  ;;  %v5110_v21 = vsel %vm2570_vm6, %v5062_v10, %v10143_v47  ;;  %v10365_v6 = vpack.i.bf16 %v14268_v56, %v14092_v33  ;;  %v17700_v47 = vld [vmem:[#allocation30_spill] sm:$0xff]  ;;  %v14297_v33 = vpop.f32.mrf.mxu0  ;;  %v3703_v10 = vld [vmem:[#allocation3 + $0xa8] sm:$0xff] }
 0x3d6   : > { %v3358_v60 = vadd.f32 %v13718_v37, %v3197_v58  ;;  %5308 = vmatmul.f32.gmra.mxu3 %v4966_v4  ;;  %5469 = vmatmul.f32.gmra.mxu2 %v5110_v21  ;;  %v3039_v51 = vadd.f32 %v14012_v16, %v17700_v47  ;;  %v14294_v37 = vpop.permute.xlu2 %10181  ;;  %17701 = vst [vmem:[#allocation67_spill] sm:$0xff] %v14297_v33  ;;  %v10632_v58 = vld [vmem:[#allocation3 + $0x8f] sm:$0xff]  ;;  %v10144_v21 = vunpack.i.h.bf16 %v10142_v55 }
 0x3d7   : > { %10346 = vrot.lane.b32.xlu0 %v10345_v41, %s11465_s1  ;;  %v4871_v29 = vsel %vm2472_vm4, %v10632_v58, %v10133_v8  ;;  %v10360_v33 = vpack.i.bf16 %v14227_v39, %v14096_v42 }
 0x3d8   : > { %10371 = vrot.lane.b32.xlu2 %v10370_v2, %s11467_s4  ;;  %v3429_v12 = vmax.f32 %v3358_v60, 0.0  ;;  %10366 = vrot.lane.b32.xlu1 %v10365_v6, %s11466_s3  ;;  %v5261_v45 = vpop.f32.mrf.mxu3 }
 0x3d9   : > { %v5422_v26 = vpop.f32.mrf.mxu2  ;;  %v10152_v4 = vpop.permute.xlu0 %10151  ;;  %v5262_v20 = vadd.f32 %v14282_v38, %v5261_v45  ;;  %v5015_v45 = vsel %vm2472_vm4, %v3703_v10, %v10134_v17  ;;  %v10148_v10 = vunpack.i.l.bf16 %v14161_v49 }
 0x3da   : > { %v3477_v14 = vmul.f32 %v3429_v12, %v17665_v32  ;;  %v10154_v41 = vunpack.i.h.bf16 %v10152_v4  ;;  %v10153_v25 = vunpack.i.l.bf16 %v10152_v4  ;;  %v14300_v28 = vpop.permute.xlu1 %10156  ;;  %v10149_v4 = vunpack.i.h.bf16 %v14161_v49 }
 0x3db   : > { %v10158_v2 = vunpack.i.l.bf16 %v14300_v28  ;;  %v5423_v60 = vadd.f32 %v5422_v26, %v5262_v20  ;;  %v3199_v6 = vpop.f32.mrf.mxu1  ;;  %v14304_v47 = vld [vmem:[#allocation3 + $0x131] sm:$0xff] }
 0x3dc   : > { %v14307_v23 = vld [vmem:[#allocation3 + $0x138] sm:$0xff]  ;;  %3526 = vst.msk [vmem:[#allocation3 + $0x140] sm:$0xff] %vm2472_vm4, %v3477_v14  ;;  %v3200_v55 = vadd.f32 %v3199_v6, %v3039_v51  ;;  %v4919_v8 = vsel %vm2521_vm5, %v4871_v29, %v10153_v25  ;;  %v5063_v20 = vsel %vm2521_vm5, %v5015_v45, %v10154_v41  ;;  %v3704_v6 = vld [vmem:[#allocation3 + $0xb0] sm:$0xff] }
 0x3dd   : > { %v14309_v12 = vld [vmem:[#allocation3 + $0x137] sm:$0xff]  ;;  %8974 = vmatmul.msk.f32.gmra.mxu0 %vm2472_vm4, %v14304_v47  ;;  %v5584_v26 = vadd.f32 %v13889_v9, %v5423_v60  ;;  %v4967_v17 = vsel %vm2570_vm6, %v4919_v8, %v10144_v21  ;;  %v10385_v58 = vpack.i.bf16 %v14307_v23, %v14199_v57  ;;  %v5111_v51 = vsel %vm2570_vm6, %v5063_v20, %v10158_v2  ;;  %v17702_v9 = vld [vmem:[#allocation31_spill] sm:$0xff] }
 0x3de   : > { %v3361_v42 = vadd.f32 %v13773_v18, %v3200_v55  ;;  %5311 = vmatmul.f32.gmra.mxu3 %v4967_v17  ;;  %v10380_v14 = vpack.i.bf16 %v14309_v12, %v14128_v59  ;;  %5472 = vmatmul.f32.gmra.mxu2 %v5111_v51  ;;  %v9648_v41 = vunpack.i.l.bf16 %v17702_v9  ;;  %v9644_v18 = vunpack.i.h.bf16 %v17676_v30  ;;  %v17703_v21 = vld [vmem:[#allocation43_spill] sm:$0xff] }
 0x3df   : > { %v5727_v25 = vmul.f32 %v5584_v26, %v17665_v32  ;;  %10361 = vrot.lane.b32.xlu0 %v10360_v33, %s11465_s1  ;;  %v9794_v57 = vunpack.i.h.bf16 %v17677_v40  ;;  %v3042_v59 = vadd.f32 %v14012_v16, %v17703_v21  ;;  %v10633_v26 = vld [vmem:[#allocation3 + $0x97] sm:$0xff]  ;;  %v5016_v17 = vsel %vm2472_vm4, %v3704_v6, %v10149_v4  ;;  %v1124_v6 = vld [vmem:[#allocation2 + $0x188] sm:$0xff] }
 0x3e0   : > { %v3430_v29 = vmax.f32 %v3361_v42, 0.0  ;;  %10386 = vrot.lane.b32.xlu2 %v10385_v58, %s11467_s4  ;;  %10381 = vrot.lane.b32.xlu1 %v10380_v14, %s11466_s3  ;;  %v5264_v49 = vpop.f32.mrf.mxu3  ;;  %v4872_v40 = vsel %vm2472_vm4, %v10633_v26, %v10148_v10  ;;  %v10163_v20 = vunpack.i.l.bf16 %v14209_v35  ;;  %v10159_v58 = vunpack.i.h.bf16 %v14300_v28 }
 0x3e1   : > { %5775 = vst.msk [vmem:[#allocation4] sm:$0xff] %vm2472_vm4, %v5727_v25  ;;  %v10167_v2 = vpop.permute.xlu0 %10166  ;;  %v5265_v33 = vadd.f32 %v14282_v38, %v5264_v49  ;;  %v5425_v30 = vpop.f32.mrf.mxu2  ;;  %v10375_v10 = vpack.i.bf16 %v14264_v54, %v14132_v24  ;;  %v10164_v24 = vunpack.i.h.bf16 %v14209_v35 }
 0x3e2   : > { %v14338_v60 = vpop.permute.xlu2 %10221  ;;  %3527 = vst.msk [vmem:[#allocation3 + $0x148] sm:$0xff] %vm2472_vm4, %v3430_v29  ;;  %v10169_v45 = vunpack.i.h.bf16 %v10167_v2  ;;  %v10168_v55 = vunpack.i.l.bf16 %v10167_v2  ;;  %v14342_v8 = vpop.permute.xlu1 %10171 }
 0x3e3   : > { %v10173_v42 = vunpack.i.l.bf16 %v14342_v8  ;;  %v5426_v51 = vadd.f32 %v5425_v30, %v5265_v33  ;;  %v14349_v49 = vld [vmem:[#allocation3 + $0x139] sm:$0xff]  ;;  %v14355_v2 = vpop.f32.mrf.mxu0 }
 0x3e4   : > { %v3202_v14 = vpop.f32.mrf.mxu1  ;;  %v14351_v29 = vld [vmem:[#allocation3 + $0x140] sm:$0xff]  ;;  %17704 = vst [vmem:[#allocation57_spill] sm:$0xff] %v14355_v2  ;;  %v4920_v28 = vsel %vm2521_vm5, %v4872_v40, %v10168_v55  ;;  %v5064_v33 = vsel %vm2521_vm5, %v5016_v17, %v10169_v45  ;;  %v9649_v45 = vunpack.i.h.bf16 %v17702_v9 }
 0x3e5   : > { %v14353_v21 = vld [vmem:[#allocation3 + $0x13f] sm:$0xff]  ;;  %v3203_v4 = vadd.f32 %v3202_v14, %v3042_v59  ;;  %8975 = vmatmul.msk.f32.gmra.mxu0 %vm2472_vm4, %v14349_v49  ;;  %v5587_v30 = vadd.f32 %v13933_v43, %v5426_v51  ;;  %v4968_v26 = vsel %vm2570_vm6, %v4920_v28, %v10159_v58  ;;  %v5112_v1 = vsel %vm2570_vm6, %v5064_v33, %v10173_v42 }
 0x3e6   : > { %v10400_v2 = vpack.i.bf16 %v14351_v29, %v14233_v63  ;;  %5314 = vmatmul.f32.gmra.mxu3 %v4968_v26  ;;  %v10395_v55 = vpack.i.bf16 %v14353_v21, %v14163_v61  ;;  %v5823_v43 = vsel %vm2472_vm4, %v5727_v25, 0.0  ;;  %5475 = vmatmul.f32.gmra.mxu2 %v5112_v1  ;;  %v2664_v63 = vsel %vm2472_vm4, %v1124_v6, %v9644_v18  ;;  %v17705_v58 = vld [vmem:[#allocation49_spill] sm:$0xff] }
 0x3e7   : > { %v3364_v59 = vadd.f32 %v13830_v5, %v3203_v4  ;;  %5776 = vst.msk [vmem:[#allocation4 + $0x8] sm:$0xff] %vm2472_vm4, %v5587_v30  ;;  %v5824_v40 = vsel %vm2472_vm4, %v5587_v30, 0.0  ;;  %10376 = vrot.lane.b32.xlu0 %v10375_v10, %s11465_s1  ;;  %v2712_v17 = vsel %vm2521_vm5, %v2664_v63, %v9794_v57  ;;  %v2665_v25 = vsel %vm2472_vm4, %v1125_v13, %v9648_v41  ;;  %v17706_v51 = vld [vmem:[#allocation33_spill] sm:$0xff] }
 0x3e8   : > { %v14378_v35 = vadd.f32 %v5824_v40, %v5823_v43  ;;  %10401 = vrot.lane.b32.xlu2 %v10400_v2, %s11467_s4  ;;  %10396 = vrot.lane.b32.xlu1 %v10395_v55, %s11466_s3  ;;  %v9803_v42 = vunpack.i.l.bf16 %v17705_v58  ;;  %v3045_v1 = vadd.f32 %v14012_v16, %v17706_v51  ;;  %v10634_v4 = vld [vmem:[#allocation3 + $0x9f] sm:$0xff]  ;;  %v10174_v26 = vunpack.i.h.bf16 %v14342_v8 }
 0x3e9   : > { %v3431_v5 = vmax.f32 %v3364_v59, 0.0  ;;  %v5267_v61 = vpop.f32.mrf.mxu3  ;;  %v10187_v14 = vpop.permute.xlu0 %10186  ;;  %v4873_v2 = vsel %vm2472_vm4, %v10634_v4, %v10163_v20  ;;  %v3705_v28 = vld [vmem:[#allocation3 + $0xb8] sm:$0xff]  ;;  %v14394_v63 = vld [vmem:[#allocation3 + $0x141] sm:$0xff]  ;;  %v10178_v20 = vunpack.i.l.bf16 %v14252_v19 }
 0x3ea   : > { %v14387_v10 = vpop.permute.xlu2 %10236  ;;  %v5268_v18 = vadd.f32 %v14282_v38, %v5267_v61  ;;  %v10189_v6 = vunpack.i.h.bf16 %v10187_v14  ;;  %v10188_v57 = vunpack.i.l.bf16 %v10187_v14  ;;  %v10192_v30 = vpop.permute.xlu1 %10191  ;;  %v5017_v41 = vsel %vm2472_vm4, %v3705_v28, %v10164_v24  ;;  %v14396_v61 = vld [vmem:[#allocation3 + $0x148] sm:$0xff] }
 0x3eb   : > { %v3479_v33 = vmul.f32 %v3431_v5, %v17666_v44  ;;  %v5428_v13 = vpop.f32.mrf.mxu2  ;;  %v10194_v59 = vunpack.i.h.bf16 %v10192_v30  ;;  %v10193_v55 = vunpack.i.l.bf16 %v10192_v30  ;;  %v10390_v5 = vpack.i.bf16 %v14304_v47, %v14157_v46  ;;  %v14405_v24 = vld [vmem:[#allocation3 + $0x147] sm:$0xff]  ;;  %v1126_v30 = vld [vmem:[#allocation2 + $0x198] sm:$0xff]  ;;  %v14411_v46 = vpop.f32.mrf.mxu0 }
 0x3ec   : > { %v5429_v43 = vadd.f32 %v5428_v13, %v5268_v18  ;;  %v3205_v40 = vpop.f32.mrf.mxu1  ;;  %v4921_v8 = vsel %vm2521_vm5, %v4873_v2, %v10188_v57  ;;  %v5065_v28 = vsel %vm2521_vm5, %v5017_v41, %v10189_v6  ;;  %v10415_v2 = vpack.i.bf16 %v14396_v61, %v14268_v56  ;;  %v17707_v56 = vld [vmem:[#allocation29_spill] sm:$0xff] }
 0x3ed   : > { %3528 = vst.msk [vmem:[#allocation3 + $0x150] sm:$0xff] %vm2472_vm4, %v3479_v33  ;;  %v3206_v51 = vadd.f32 %v3205_v40, %v3045_v1  ;;  %8976 = vmatmul.msk.f32.gmra.mxu0 %vm2472_vm4, %v14394_v63  ;;  %v2760_v18 = vsel %vm2570_vm6, %v2712_v17, %v10194_v59  ;;  %v4969_v4 = vsel %vm2570_vm6, %v4921_v8, %v10174_v26  ;;  %v10183_v17 = vunpack.i.l.bf16 %v14294_v37  ;;  %v10635_v40 = vld [vmem:[#allocation3 + $0xa7] sm:$0xff] }
 0x3ee   : > { %v5590_v14 = vadd.f32 %v13991_v52, %v5429_v43  ;;  %3222 = vmatmul.f32.gmra.mxu1 %v2760_v18  ;;  %5317 = vmatmul.f32.gmra.mxu3 %v4969_v4  ;;  %v5113_v33 = vsel %vm2570_vm6, %v5065_v28, %v10193_v55  ;;  %v10179_v52 = vunpack.i.h.bf16 %v14252_v19  ;;  %v10410_v6 = vpack.i.bf16 %v14405_v24, %v14193_v7 }
 0x3ef   : > { %v3367_v1 = vadd.f32 %v13876_v53, %v3206_v51  ;;  %5478 = vmatmul.f32.gmra.mxu2 %v5113_v33  ;;  %10391 = vrot.lane.b32.xlu0 %v10390_v5, %s11465_s1  ;;  %v2713_v41 = vsel %vm2521_vm5, %v2665_v25, %v9803_v42  ;;  %v2666_v19 = vsel %vm2472_vm4, %v1126_v30, %v9649_v45 }
 0x3f0   : > { %v5729_v57 = vmul.f32 %v5590_v14, %v17666_v44  ;;  %10416 = vrot.lane.b32.xlu2 %v10415_v2, %s11467_s4  ;;  %v3048_v26 = vadd.f32 %v14012_v16, %v17707_v56  ;;  %10411 = vrot.lane.b32.xlu1 %v10410_v6, %s11466_s3  ;;  %v4874_v25 = vsel %vm2472_vm4, %v10635_v40, %v10178_v20  ;;  %v3706_v14 = vld [vmem:[#allocation3 + $0xc0] sm:$0xff] }
 0x3f1   : > { %v3432_v53 = vmax.f32 %v3367_v1, 0.0  ;;  %v5270_v13 = vpop.f32.mrf.mxu3  ;;  %v10197_v7 = vpop.permute.xlu0 %10196  ;;  %v2761_v30 = vsel %vm2570_vm6, %v2713_v41, %v10183_v17  ;;  %v5018_v33 = vsel %vm2472_vm4, %v3706_v14, %v10179_v52 }
 0x3f2   : > { %5777 = vst.msk [vmem:[#allocation4 + $0x10] sm:$0xff] %vm2472_vm4, %v5729_v57  ;;  %v5826_v59 = vsel %vm2472_vm4, %v5729_v57, 0.0  ;;  %v14433_v55 = vpop.permute.xlu2 %10251  ;;  %v5271_v43 = vadd.f32 %v14282_v38, %v5270_v13  ;;  %v10199_v42 = vunpack.i.h.bf16 %v10197_v7  ;;  %v10198_v5 = vunpack.i.l.bf16 %v10197_v7  ;;  %v10207_v51 = vpop.permute.xlu1 %10206 }
 0x3f3   : > { %v5827_v9 = vadd.f32 %v5826_v59, %v14378_v35  ;;  %v3480_v45 = vmul.f32 %v3432_v53, %v17665_v32  ;;  %v5431_v8 = vpop.f32.mrf.mxu2  ;;  %v10209_v18 = vunpack.i.h.bf16 %v10207_v51  ;;  %v10208_v4 = vunpack.i.l.bf16 %v10207_v51  ;;  %v14463_v59 = vpop.f32.mrf.mxu0 }
 0x3f4   : > { %v3208_v28 = vpop.f32.mrf.mxu1  ;;  %v14440_v1 = vld [vmem:[#allocation3 + $0x149] sm:$0xff]  ;;  %v9804_v35 = vunpack.i.h.bf16 %v17705_v58  ;;  %v10405_v57 = vpack.i.bf16 %v14349_v49, %v14197_v15  ;;  %v5432_v6 = vadd.f32 %v5431_v8, %v5271_v43  ;;  %v4922_v17 = vsel %vm2521_vm5, %v4874_v25, %v10198_v5 }
 0x3f5   : > { %v14443_v2 = vld [vmem:[#allocation3 + $0x150] sm:$0xff]  ;;  %3529 = vst.msk [vmem:[#allocation3 + $0x158] sm:$0xff] %vm2472_vm4, %v3480_v45  ;;  %v3209_v53 = vadd.f32 %v3208_v28, %v3048_v26  ;;  %8977 = vmatmul.msk.f32.gmra.mxu0 %vm2472_vm4, %v14440_v1  ;;  %v5066_v52 = vsel %vm2521_vm5, %v5018_v33, %v10199_v42  ;;  %v4970_v56 = vsel %vm2570_vm6, %v4922_v17, %v10208_v4  ;;  %v10224_v7 = vunpack.i.h.bf16 %v14338_v60 }
 0x3f6   : > { %v14445_v20 = vld [vmem:[#allocation3 + $0x14f] sm:$0xff]  ;;  %v10430_v13 = vpack.i.bf16 %v14443_v2, %v14309_v12  ;;  %v5593_v41 = vadd.f32 %v14043_v36, %v5432_v6  ;;  %3225 = vmatmul.f32.gmra.mxu1 %v2761_v30  ;;  %v5114_v26 = vsel %vm2570_vm6, %v5066_v52, %v10209_v18  ;;  %5320 = vmatmul.f32.gmra.mxu3 %v4970_v56  ;;  %v10184_v5 = vunpack.i.h.bf16 %v14294_v37 }
 0x3f7   : > { %v10425_v58 = vpack.i.bf16 %v14445_v20, %v14227_v39  ;;  %v3370_v15 = vadd.f32 %v13924_v0, %v3209_v53  ;;  %5481 = vmatmul.f32.gmra.mxu2 %v5114_v26  ;;  %10406 = vrot.lane.b32.xlu0 %v10405_v57, %s11465_s1  ;;  %v17708_v0 = vld [vmem:[#allocation16_spill] sm:$0xff]  ;;  %v2714_v42 = vsel %vm2521_vm5, %v2666_v19, %v9804_v35 }
 0x3f8   : > { %v5730_v12 = vmul.f32 %v5593_v41, %v17665_v32  ;;  %10431 = vrot.lane.b32.xlu2 %v10430_v13, %s11467_s4  ;;  %v3051_v39 = vadd.f32 %v14012_v16, %v17708_v0  ;;  %v10223_v16 = vunpack.i.l.bf16 %v14338_v60  ;;  %v2762_v17 = vsel %vm2570_vm6, %v2714_v42, %v10224_v7 }
 0x3f9   : > { %v3433_v43 = vmax.f32 %v3370_v15, 0.0  ;;  %v5273_v36 = vpop.f32.mrf.mxu3  ;;  %10426 = vrot.lane.b32.xlu1 %v10425_v58, %s11466_s3  ;;  %v10202_v40 = vpop.permute.xlu0 %10201  ;;  %v10420_v52 = vpack.i.bf16 %v14394_v63, %v14231_v11  ;;  %v10636_v58 = vld [vmem:[#allocation3 + $0xaf] sm:$0xff] }
 0x3fa   : > { %v14472_v25 = vpop.permute.xlu2 %10266  ;;  %v5274_v45 = vadd.f32 %v14282_v38, %v5273_v36  ;;  %5778 = vst.msk [vmem:[#allocation4 + $0x18] sm:$0xff] %vm2472_vm4, %v5730_v12  ;;  %v5828_v51 = vsel %vm2472_vm4, %v5730_v12, 0.0  ;;  %v10204_v8 = vunpack.i.h.bf16 %v10202_v40  ;;  %v10203_v14 = vunpack.i.l.bf16 %v10202_v40  ;;  %v10217_v18 = vpop.permute.xlu1 %10216  ;;  %v14513_v40 = vld [vmem:[%s11579_s13] ss:$0 sm:$0xff] }
 0x3fb   : > { %v5434_v4 = vpop.f32.mrf.mxu2  ;;  %v5829_v28 = vadd.f32 %v5828_v51, %v5827_v9  ;;  %3530 = vst.msk [vmem:[#allocation3 + $0x160] sm:$0xff] %vm2472_vm4, %v3433_v43  ;;  %v10219_v30 = vunpack.i.h.bf16 %v10217_v18  ;;  %v10218_v33 = vunpack.i.l.bf16 %v10217_v18  ;;  %v3707_v9 = vld [vmem:[#allocation3 + $0xc8] sm:$0xff] }
 0x3fc   : > { %v3211_v57 = vpop.f32.mrf.mxu1  ;;  %v14481_v6 = vld [vmem:[#allocation3 + $0x151] sm:$0xff]  ;;  %v5435_v35 = vadd.f32 %v5434_v4, %v5274_v45  ;;  %v4875_v41 = vsel %vm2472_vm4, %v10636_v58, %v10203_v14  ;;  %v5019_v15 = vsel %vm2472_vm4, %v3707_v9, %v10204_v8 }
 0x3fd   : > { %v14483_v19 = vld [vmem:[#allocation3 + $0x158] sm:$0xff]  ;;  %v3212_v53 = vadd.f32 %v3211_v57, %v3051_v39  ;;  %8978 = vmatmul.msk.f32.gmra.mxu0 %vm2472_vm4, %v14481_v6  ;;  %v4923_v7 = vsel %vm2521_vm5, %v4875_v41, %v10218_v33 }
 0x3fe   : > { %v14485_v37 = vld [vmem:[#allocation3 + $0x157] sm:$0xff]  ;;  %v10445_v60 = vpack.i.bf16 %v14483_v19, %v14353_v21  ;;  %v5596_v56 = vadd.f32 %v14082_v50, %v5435_v35  ;;  %3228 = vmatmul.f32.gmra.mxu1 %v2762_v17  ;;  %v5067_v21 = vsel %vm2521_vm5, %v5019_v15, %v10219_v30  ;;  %v4971_v11 = vsel %vm2570_vm6, %v4923_v7, %v10184_v5  ;;  %v14522_v35 = vpop.f32.mrf.mxu0 }
 0x3ff   : > { %v10440_v13 = vpack.i.bf16 %v14485_v37, %v14264_v54  ;;  %v3373_v26 = vadd.f32 %v13980_v31, %v3212_v53  ;;  %v5115_v12 = vsel %vm2570_vm6, %v5067_v21, %v10223_v16  ;;  %10421 = vrot.lane.b32.xlu0 %v10420_v52, %s11465_s1  ;;  %5323 = vmatmul.f32.gmra.mxu3 %v4971_v11  ;;  %v17709_v45 = vld [vmem:[#allocation41_spill] sm:$0xff]  ;;  %v10239_v53 = vunpack.i.h.bf16 %v14387_v10  ;;  %v3708_v52 = vld [vmem:[#allocation3 + $0xd0] sm:$0xff] }
 0x400   : > { %5779 = vst.msk [vmem:[#allocation4 + $0x20] sm:$0xff] %vm2472_vm4, %v5596_v56  ;;  %v5830_v54 = vsel %vm2472_vm4, %v5596_v56, 0.0  ;;  %10446 = vrot.lane.b32.xlu2 %v10445_v60, %s11467_s4  ;;  %v3054_v42 = vadd.f32 %v14513_v40, %v17709_v45  ;;  %5484 = vmatmul.f32.gmra.mxu2 %v5115_v12  ;;  %v10238_v17 = vunpack.i.l.bf16 %v14387_v10  ;;  %v10638_v41 = vld [vmem:[#allocation3 + $0xb7] sm:$0xff] }
 0x401   : > { %v3434_v43 = vmax.f32 %v3373_v26, 0.0  ;;  %v5276_v31 = vpop.f32.mrf.mxu3  ;;  %v5831_v50 = vadd.f32 %v5830_v54, %v5829_v28  ;;  %10441 = vrot.lane.b32.xlu1 %v10440_v13, %s11466_s3  ;;  %v10212_v36 = vpop.permute.xlu0 %10211  ;;  %v10435_v13 = vpack.i.bf16 %v14440_v1, %v14262_v48 }
 0x402   : > { %v14509_v0 = vpop.permute.xlu2 %10281  ;;  %v5277_v39 = vadd.f32 %v14282_v38, %v5276_v31  ;;  %v10214_v51 = vunpack.i.h.bf16 %v10212_v36  ;;  %v10213_v8 = vunpack.i.l.bf16 %v10212_v36  ;;  %v10232_v14 = vpop.permute.xlu1 %10231  ;;  %v14518_v33 = vld [vmem:[#allocation3 + $0x159] sm:$0xff] }
 0x403   : > { %v3482_v5 = vmul.f32 %v3434_v43, %v17666_v44  ;;  %v5437_v18 = vpop.f32.mrf.mxu2  ;;  %v10234_v4 = vunpack.i.h.bf16 %v10232_v14  ;;  %v10233_v16 = vunpack.i.l.bf16 %v10232_v14  ;;  %v14520_v57 = vld [vmem:[#allocation3 + $0x160] sm:$0xff] }
 0x404   : > { %v5438_v28 = vadd.f32 %v5437_v18, %v5277_v39  ;;  %v3214_v30 = vpop.f32.mrf.mxu1  ;;  %v14529_v9 = vld [vmem:[#allocation3 + $0x15f] sm:$0xff]  ;;  %v4876_v15 = vsel %vm2472_vm4, %v10638_v41, %v10213_v8  ;;  %v5020_v56 = vsel %vm2472_vm4, %v3708_v52, %v10214_v51  ;;  %v10460_v26 = vpack.i.bf16 %v14520_v57, %v14405_v24 }
 0x405   : > { %3531 = vst.msk [vmem:[#allocation3 + $0x168] sm:$0xff] %vm2472_vm4, %v3482_v5  ;;  %v3215_v60 = vadd.f32 %v3214_v30, %v3054_v42  ;;  %8979 = vmatmul.msk.f32.gmra.mxu0 %vm2472_vm4, %v14518_v33  ;;  %v4924_v7 = vsel %vm2521_vm5, %v4876_v15, %v10233_v16  ;;  %v5068_v21 = vsel %vm2521_vm5, %v5020_v56, %v10234_v4  ;;  %v17710_v24 = vld [vmem:[#allocation46_spill] sm:$0xff]  ;;  %v10254_v18 = vunpack.i.h.bf16 %v14433_v55 }
 0x406   : > { %v5599_v58 = vadd.f32 %v14123_v3, %v5438_v28  ;;  %v10455_v48 = vpack.i.bf16 %v14529_v9, %v14304_v47  ;;  %v4972_v3 = vsel %vm2570_vm6, %v4924_v7, %v10238_v17  ;;  %v5116_v12 = vsel %vm2570_vm6, %v5068_v21, %v10239_v53  ;;  %v10639_v56 = vld [vmem:[#allocation3 + $0xbf] sm:$0xff] }
 0x407   : > { %v3376_v10 = vadd.f32 %v14033_v62, %v3215_v60  ;;  %10436 = vrot.lane.b32.xlu0 %v10435_v13, %s11465_s1  ;;  %v3057_v43 = vadd.f32 %v14513_v40, %v17710_v24  ;;  %5326 = vmatmul.f32.gmra.mxu3 %v4972_v3  ;;  %v10450_v60 = vpack.i.bf16 %v14481_v6, %v14307_v23  ;;  %v14576_v23 = vpop.f32.mrf.mxu0 }
 0x408   : > { %v5732_v11 = vmul.f32 %v5599_v58, %v17666_v44  ;;  %10461 = vrot.lane.b32.xlu2 %v10460_v26, %s11467_s4  ;;  %5487 = vmatmul.f32.gmra.mxu2 %v5116_v12  ;;  %v3709_v58 = vld [vmem:[#allocation3 + $0xd8] sm:$0xff] }
 0x409   : > { %v3435_v54 = vmax.f32 %v3376_v10, 0.0  ;;  %v5279_v62 = vpop.f32.mrf.mxu3  ;;  %10456 = vrot.lane.b32.xlu1 %v10455_v48, %s11466_s3  ;;  %v10227_v47 = vpop.permute.xlu0 %10226 }
 0x40a   : > { %5780 = vst.msk [vmem:[#allocation4 + $0x28] sm:$0xff] %vm2472_vm4, %v5732_v11  ;;  %v5832_v31 = vsel %vm2472_vm4, %v5732_v11, 0.0  ;;  %v14553_v36 = vpop.permute.xlu2 %10296  ;;  %v5280_v39 = vadd.f32 %v14282_v38, %v5279_v62  ;;  %v10229_v5 = vunpack.i.h.bf16 %v10227_v47  ;;  %v10228_v51 = vunpack.i.l.bf16 %v10227_v47  ;;  %v10247_v8 = vpop.permute.xlu1 %10246  ;;  %v17711_v62 = vld [vmem:[#allocation20_spill] sm:$0xff] }
 0x40b   : > { %v5833_v45 = vadd.f32 %v5832_v31, %v5831_v50  ;;  %v3483_v42 = vmul.f32 %v3435_v54, %v17665_v32  ;;  %v5440_v14 = vpop.f32.mrf.mxu2  ;;  %v10249_v4 = vunpack.i.h.bf16 %v10247_v8  ;;  %v10248_v16 = vunpack.i.l.bf16 %v10247_v8 }
 0x40c   : > { %v3217_v28 = vpop.f32.mrf.mxu1  ;;  %v14558_v30 = vld [vmem:[#allocation3 + $0x161] sm:$0xff]  ;;  %v10253_v50 = vunpack.i.l.bf16 %v14433_v55  ;;  %v5441_v52 = vadd.f32 %v5440_v14, %v5280_v39  ;;  %v4877_v55 = vsel %vm2472_vm4, %v10639_v56, %v10228_v51  ;;  %v5021_v10 = vsel %vm2472_vm4, %v3709_v58, %v10229_v5 }
 0x40d   : > { %v14560_v53 = vld [vmem:[#allocation3 + $0x168] sm:$0xff]  ;;  %3532 = vst.msk [vmem:[#allocation3 + $0x170] sm:$0xff] %vm2472_vm4, %v3483_v42  ;;  %v3218_v13 = vadd.f32 %v3217_v28, %v3057_v43  ;;  %8980 = vmatmul.msk.f32.gmra.mxu0 %vm2472_vm4, %v14558_v30  ;;  %v4925_v21 = vsel %vm2521_vm5, %v4877_v55, %v10248_v16  ;;  %v5069_v11 = vsel %vm2521_vm5, %v5021_v10, %v10249_v4  ;;  %v10269_v5 = vunpack.i.h.bf16 %v14472_v25  ;;  %v17712_v10 = vld [vmem:[#allocation60_spill] sm:$0xff] }
 0x40e   : > { %v14562_v17 = vld [vmem:[#allocation3 + $0x167] sm:$0xff]  ;;  %v10475_v41 = vpack.i.bf16 %v14560_v53, %v14445_v20  ;;  %v5602_v26 = vadd.f32 %v14169_v27, %v5441_v52  ;;  %v4973_v20 = vsel %vm2570_vm6, %v4925_v21, %v10253_v50  ;;  %v5117_v48 = vsel %vm2570_vm6, %v5069_v11, %v10254_v18 }
 0x40f   : > { %v10470_v15 = vpack.i.bf16 %v14562_v17, %v14349_v49  ;;  %v3379_v7 = vadd.f32 %v14078_v34, %v3218_v13  ;;  %10451 = vrot.lane.b32.xlu0 %v10450_v60, %s11465_s1  ;;  %5329 = vmatmul.f32.gmra.mxu3 %v4973_v20  ;;  %v3060_v24 = vadd.f32 %v14513_v40, %v17711_v62  ;;  %v10268_v50 = vunpack.i.l.bf16 %v14472_v25  ;;  %v3710_v13 = vld [vmem:[#allocation3 + $0xe0] sm:$0xff]  ;;  %v14620_v11 = vpop.f32.mrf.mxu0 }
 0x410   : > { %v5733_v49 = vmul.f32 %v5602_v26, %v17665_v32  ;;  %10476 = vrot.lane.b32.xlu2 %v10475_v41, %s11467_s4  ;;  %5490 = vmatmul.f32.gmra.mxu2 %v5117_v48  ;;  %v10465_v58 = vpack.i.bf16 %v14518_v33, %v14351_v29 }
 0x411   : > { %v3436_v3 = vmax.f32 %v3379_v7, 0.0  ;;  %v5282_v12 = vpop.f32.mrf.mxu3  ;;  %10471 = vrot.lane.b32.xlu1 %v10470_v15, %s11466_s3  ;;  %v10242_v34 = vpop.permute.xlu0 %10241  ;;  %v10640_v15 = vld [vmem:[#allocation3 + $0xc7] sm:$0xff] }
 0x412   : > { %v14588_v27 = vpop.permute.xlu2 %10311  ;;  %v5283_v54 = vadd.f32 %v14282_v38, %v5282_v12  ;;  %5781 = vst.msk [vmem:[#allocation4 + $0x30] sm:$0xff] %vm2472_vm4, %v5733_v49  ;;  %v5834_v43 = vsel %vm2472_vm4, %v5733_v49, 0.0  ;;  %v10244_v31 = vunpack.i.h.bf16 %v10242_v34  ;;  %v10243_v47 = vunpack.i.l.bf16 %v10242_v34  ;;  %v10262_v39 = vpop.permute.xlu1 %10261 }
 0x413   : > { %v5443_v42 = vpop.f32.mrf.mxu2  ;;  %v5835_v51 = vadd.f32 %v5834_v43, %v5833_v45  ;;  %3533 = vst.msk [vmem:[#allocation3 + $0x178] sm:$0xff] %vm2472_vm4, %v3436_v3  ;;  %v10264_v8 = vunpack.i.h.bf16 %v10262_v39  ;;  %v10263_v14 = vunpack.i.l.bf16 %v10262_v39 }
 0x414   : > { %v3220_v18 = vpop.f32.mrf.mxu1  ;;  %v14597_v4 = vld [vmem:[#allocation3 + $0x169] sm:$0xff]  ;;  %v5444_v60 = vadd.f32 %v5443_v42, %v5283_v54  ;;  %v4878_v56 = vsel %vm2472_vm4, %v10640_v15, %v10243_v47  ;;  %v5022_v25 = vsel %vm2472_vm4, %v3710_v13, %v10244_v31 }
 0x415   : > { %v14599_v16 = vld [vmem:[#allocation3 + $0x170] sm:$0xff]  ;;  %v3221_v52 = vadd.f32 %v3220_v18, %v3060_v24  ;;  %8981 = vmatmul.msk.f32.gmra.mxu0 %vm2472_vm4, %v14597_v4  ;;  %v4926_v7 = vsel %vm2521_vm5, %v4878_v56, %v10263_v14  ;;  %v3711_v14 = vld [vmem:[#allocation3 + $0xe8] sm:$0xff]  ;;  %v10283_v18 = vunpack.i.l.bf16 %v14509_v0 }
 0x416   : > { %v14601_v28 = vld [vmem:[#allocation3 + $0x16f] sm:$0xff]  ;;  %v10490_v45 = vpack.i.bf16 %v14599_v16, %v14485_v37  ;;  %v5605_v55 = vadd.f32 %v14216_v22, %v5444_v60  ;;  %v5070_v37 = vsel %vm2521_vm5, %v5022_v25, %v10264_v8  ;;  %v4974_v21 = vsel %vm2570_vm6, %v4926_v7, %v10268_v50 }
 0x417   : > { %v10485_v41 = vpack.i.bf16 %v14601_v28, %v14394_v63  ;;  %v3382_v26 = vadd.f32 %v17712_v10, %v3221_v52  ;;  %v5118_v29 = vsel %vm2570_vm6, %v5070_v37, %v10269_v5  ;;  %10466 = vrot.lane.b32.xlu0 %v10465_v58, %s11465_s1  ;;  %5332 = vmatmul.f32.gmra.mxu3 %v4974_v21  ;;  %v17713_v50 = vld [vmem:[#allocation71_spill] sm:$0xff] }
 0x418   : > { %5782 = vst.msk [vmem:[#allocation4 + $0x38] sm:$0xff] %vm2472_vm4, %v5605_v55  ;;  %v5836_v63 = vsel %vm2472_vm4, %v5605_v55, 0.0  ;;  %10491 = vrot.lane.b32.xlu2 %v10490_v45, %s11467_s4  ;;  %5493 = vmatmul.f32.gmra.mxu2 %v5118_v29  ;;  %v10641_v52 = vld [vmem:[#allocation3 + $0xcf] sm:$0xff]  ;;  %v10480_v58 = vpack.i.bf16 %v14558_v30, %v14396_v61 }
 0x419   : > { %v3437_v20 = vmax.f32 %v3382_v26, 0.0  ;;  %v5285_v22 = vpop.f32.mrf.mxu3  ;;  %v5837_v48 = vadd.f32 %v5836_v63, %v5835_v51  ;;  %10486 = vrot.lane.b32.xlu1 %v10485_v41, %s11466_s3  ;;  %v10257_v49 = vpop.permute.xlu0 %10256  ;;  %v10284_v51 = vunpack.i.h.bf16 %v14509_v0  ;;  %v5929_v26 = vld [vmem:[%s11607_s20 + $0x18] sm:$0xff] }
 0x41a   : > { %v14627_v3 = vpop.permute.xlu2 %10326  ;;  %v5286_v12 = vadd.f32 %v14282_v38, %v5285_v22  ;;  %v10259_v54 = vunpack.i.h.bf16 %v10257_v49  ;;  %v10258_v62 = vunpack.i.l.bf16 %v10257_v49  ;;  %v10277_v24 = vpop.permute.xlu1 %10276  ;;  %v14631_v42 = vld [vmem:[#allocation3 + $0x171] sm:$0xff]  ;;  %5946 = vmatpush.msra.mxu1 %v5929_v26 }
 0x41b   : > { %v3485_v34 = vmul.f32 %v3437_v20, %v17666_v44  ;;  %v5446_v43 = vpop.f32.mrf.mxu2  ;;  %v10279_v31 = vunpack.i.h.bf16 %v10277_v24  ;;  %v10278_v47 = vunpack.i.l.bf16 %v10277_v24  ;;  %v14633_v5 = vld [vmem:[#allocation3 + $0x178] sm:$0xff]  ;;  %v3712_v49 = vld [vmem:[#allocation3 + $0xf0] sm:$0xff] }
 0x41c   : > { %v5447_v39 = vadd.f32 %v5446_v43, %v5286_v12  ;;  %v14639_v8 = vld [vmem:[#allocation3 + $0x177] sm:$0xff]  ;;  %v4879_v45 = vsel %vm2472_vm4, %v10641_v52, %v10258_v62  ;;  %v5023_v13 = vsel %vm2472_vm4, %v3711_v14, %v10259_v54  ;;  %v10505_v41 = vpack.i.bf16 %v14633_v5, %v14529_v9  ;;  %v17714_v14 = vld [vmem:[#allocation67_spill] sm:$0xff] }
 0x41d   : > { %3534 = vst.msk [vmem:[#allocation3 + $0x180] sm:$0xff] %vm2472_vm4, %v3485_v34  ;;  %8982 = vmatmul.msk.f32.gmra.mxu0 %vm2472_vm4, %v14631_v42  ;;  %v4927_v15 = vsel %vm2521_vm5, %v4879_v45, %v10278_v47  ;;  %v5071_v56 = vsel %vm2521_vm5, %v5023_v13, %v10279_v31  ;;  %v10500_v25 = vpack.i.bf16 %v14639_v8, %v14440_v1  ;;  %v14671_v31 = vpop.f32.mrf.mxu0  ;;  %v10298_v47 = vunpack.i.l.bf16 %v14553_v36  ;;  %v10642_v52 = vld [vmem:[#allocation3 + $0xd7] sm:$0xff] }
 0x41e   : > { %v5608_v60 = vadd.f32 %v17713_v50, %v5447_v39  ;;  %v4975_v55 = vsel %vm2570_vm6, %v4927_v15, %v10283_v18  ;;  %v5119_v10 = vsel %vm2570_vm6, %v5071_v56, %v10284_v51 }
 0x41f   : > { %10481 = vrot.lane.b32.xlu0 %v10480_v58, %s11465_s1  ;;  %5335 = vmatmul.f32.gmra.mxu3 %v4975_v55 }
 0x420   : > { %v5735_v0 = vmul.f32 %v5608_v60, %v17666_v44  ;;  %10506 = vrot.lane.b32.xlu2 %v10505_v41, %s11467_s4  ;;  %5496 = vmatmul.f32.gmra.mxu2 %v5119_v10 }
 0x421   : > { %v5288_v61 = vpop.f32.mrf.mxu3  ;;  %10501 = vrot.lane.b32.xlu1 %v10500_v25, %s11466_s3  ;;  %v10272_v7 = vpop.permute.xlu0 %10271 }
 0x422   : > { %5783 = vst.msk [vmem:[#allocation4 + $0x40] sm:$0xff] %vm2472_vm4, %v5735_v0  ;;  %v5838_v9 = vsel %vm2472_vm4, %v5735_v0, 0.0  ;;  %v14662_v37 = vpop.permute.xlu2 %10341  ;;  %v5289_v1 = vadd.f32 %v14282_v38, %v5288_v61  ;;  %v10274_v29 = vunpack.i.h.bf16 %v10272_v7  ;;  %v10273_v63 = vunpack.i.l.bf16 %v10272_v7  ;;  %v10292_v20 = vpop.permute.xlu1 %10291 }
 0x423   : > { %v5839_v21 = vadd.f32 %v5838_v9, %v5837_v48  ;;  %v5449_v22 = vpop.f32.mrf.mxu2  ;;  %v10294_v12 = vunpack.i.h.bf16 %v10292_v20  ;;  %v10293_v34 = vunpack.i.l.bf16 %v10292_v20  ;;  %v10299_v48 = vunpack.i.h.bf16 %v14553_v36  ;;  %v10643_v20 = vld [vmem:[#allocation3 + $0xdf] sm:$0xff] }
 0x424   : > { %v5450_v54 = vadd.f32 %v5449_v22, %v5289_v1  ;;  %v14665_v62 = vld [vmem:[#allocation3 + $0x179] sm:$0xff]  ;;  %v5024_v39 = vsel %vm2472_vm4, %v3712_v49, %v10274_v29  ;;  %v4880_v45 = vsel %vm2472_vm4, %v10642_v52, %v10273_v63  ;;  %v10495_v36 = vpack.i.bf16 %v14597_v4, %v14443_v2 }
 0x425   : > { %v14667_v24 = vld [vmem:[#allocation3 + $0x180] sm:$0xff]  ;;  %8983 = vmatmul.msk.f32.gmra.mxu0 %vm2472_vm4, %v14665_v62  ;;  %v5072_v50 = vsel %vm2521_vm5, %v5024_v39, %v10294_v12  ;;  %v4928_v13 = vsel %vm2521_vm5, %v4880_v45, %v10293_v34  ;;  %v3713_v29 = vld [vmem:[#allocation3 + $0xf8] sm:$0xff]  ;;  %v10313_v63 = vunpack.i.l.bf16 %v14588_v27  ;;  %v10314_v12 = vunpack.i.h.bf16 %v14588_v27 }
 0x426   : > { %v14669_v43 = vld [vmem:[#allocation3 + $0x17f] sm:$0xff]  ;;  %v10520_v51 = vpack.i.bf16 %v14667_v24, %v14562_v17  ;;  %v5611_v18 = vadd.f32 %v17714_v14, %v5450_v54  ;;  %v5120_v41 = vsel %vm2570_vm6, %v5072_v50, %v10299_v48  ;;  %v4976_v17 = vsel %vm2570_vm6, %v4928_v13, %v10298_v47 }
 0x427   : > { %v10515_v60 = vpack.i.bf16 %v14669_v43, %v14481_v6  ;;  %10496 = vrot.lane.b32.xlu0 %v10495_v36, %s11465_s1  ;;  %5338 = vmatmul.f32.gmra.mxu3 %v4976_v17  ;;  %v17715_v34 = vld [vmem:[#allocation57_spill] sm:$0xff]  ;;  %v10510_v47 = vpack.i.bf16 %v14631_v42, %v14483_v19  ;;  %v3714_v17 = vld [vmem:[#allocation3 + $0x100] sm:$0xff] }
 0x428   : > { %v5736_v58 = vmul.f32 %v5611_v18, %v17665_v32  ;;  %10521 = vrot.lane.b32.xlu2 %v10520_v51, %s11467_s4  ;;  %5499 = vmatmul.f32.gmra.mxu2 %v5120_v41 }
 0x429   : > { %v5291_v15 = vpop.f32.mrf.mxu3  ;;  %10516 = vrot.lane.b32.xlu1 %v10515_v60, %s11466_s3  ;;  %v10287_v2 = vpop.permute.xlu0 %10286 }
 0x42a   : > { %5784 = vst.msk [vmem:[#allocation4 + $0x48] sm:$0xff] %vm2472_vm4, %v5736_v58  ;;  %v5840_v6 = vsel %vm2472_vm4, %v5736_v58, 0.0  ;;  %v14696_v56 = vpop.permute.xlu2 %10356  ;;  %v5292_v0 = vadd.f32 %v14282_v38, %v5291_v15  ;;  %v10289_v55 = vunpack.i.h.bf16 %v10287_v2  ;;  %v10288_v10 = vunpack.i.l.bf16 %v10287_v2  ;;  %v10307_v61 = vpop.permute.xlu1 %10306 }
 0x42b   : > { %v5841_v25 = vadd.f32 %v5840_v6, %v5839_v21  ;;  %v5452_v26 = vpop.f32.mrf.mxu2  ;;  %v10309_v9 = vunpack.i.h.bf16 %v10307_v61  ;;  %v10308_v7 = vunpack.i.l.bf16 %v10307_v61  ;;  %v10328_v15 = vunpack.i.l.bf16 %v14627_v3 }
 0x42c   : > { %v5453_v1 = vadd.f32 %v5452_v26, %v5292_v0  ;;  %v4881_v22 = vsel %vm2472_vm4, %v10643_v20, %v10288_v10  ;;  %v5025_v49 = vsel %vm2472_vm4, %v3713_v29, %v10289_v55  ;;  %v10644_v0 = vld [vmem:[#allocation3 + $0xe7] sm:$0xff]  ;;  %v10525_v26 = vpack.i.bf16 %v14665_v62, %v14520_v57  ;;  %v14735_v57 = vpop.f32.mrf.mxu0 }
 0x42d   : > { %v4929_v54 = vsel %vm2521_vm5, %v4881_v22, %v10308_v7  ;;  %v5073_v48 = vsel %vm2521_vm5, %v5025_v49, %v10309_v9 }
 0x42e   : > { %v5614_v21 = vadd.f32 %v17715_v34, %v5453_v1  ;;  %v4977_v39 = vsel %vm2570_vm6, %v4929_v54, %v10313_v63  ;;  %v5121_v14 = vsel %vm2570_vm6, %v5073_v48, %v10314_v12  ;;  %v14732_v63 = vld [vmem:[%s11585_s16] ss:$0 sm:$0xff] }
 0x42f   : > { %10511 = vrot.lane.b32.xlu0 %v10510_v47, %s11465_s1  ;;  %5341 = vmatmul.f32.gmra.mxu3 %v4977_v39  ;;  %v3715_v47 = vld [vmem:[#allocation3 + $0x108] sm:$0xff]  ;;  %v10343_v39 = vunpack.i.l.bf16 %v14662_v37 }
 0x430   : > { %5785 = vst.msk [vmem:[#allocation4 + $0x50] sm:$0xff] %vm2472_vm4, %v5614_v21  ;;  %v5842_v51 = vsel %vm2472_vm4, %v5614_v21, 0.0  ;;  %5502 = vmatmul.f32.gmra.mxu2 %v5121_v14  ;;  %v10646_v14 = vld [vmem:[#allocation3 + $0xef] sm:$0xff] }
 0x431   : > { %v5843_v18 = vadd.f32 %v5842_v51, %v5841_v25  ;;  %v5294_v27 = vpop.f32.mrf.mxu3  ;;  %v10302_v50 = vpop.permute.xlu0 %10301 }
 0x432   : > { %v5295_v60 = vadd.f32 %v14282_v38, %v5294_v27  ;;  %v10304_v52 = vunpack.i.h.bf16 %v10302_v50  ;;  %v10303_v45 = vunpack.i.l.bf16 %v10302_v50  ;;  %v10322_v19 = vpop.permute.xlu1 %10321  ;;  %v14715_v6 = vpop.permute.xlu2 %10371  ;;  %v10329_v38 = vunpack.i.h.bf16 %v14627_v3 }
 0x433   : > { %v5455_v36 = vpop.f32.mrf.mxu2  ;;  %v10324_v13 = vunpack.i.h.bf16 %v10322_v19  ;;  %v10323_v58 = vunpack.i.l.bf16 %v10322_v19 }
 0x434   : > { %v5456_v41 = vadd.f32 %v5455_v36, %v5295_v60  ;;  %v5026_v2 = vsel %vm2472_vm4, %v3714_v17, %v10304_v52  ;;  %v4882_v25 = vsel %vm2472_vm4, %v10644_v0, %v10303_v45  ;;  %v10344_v60 = vunpack.i.h.bf16 %v14662_v37 }
 0x435   : > { %v5074_v10 = vsel %vm2521_vm5, %v5026_v2, %v10324_v13  ;;  %v4930_v61 = vsel %vm2521_vm5, %v4882_v25, %v10323_v58 }
 0x436   : > { %v5617_v55 = vadd.f32 %v14411_v46, %v5456_v41  ;;  %v4978_v9 = vsel %vm2570_vm6, %v4930_v61, %v10328_v15  ;;  %v5122_v1 = vsel %vm2570_vm6, %v5074_v10, %v10329_v38  ;;  %v3716_v10 = vld [vmem:[#allocation3 + $0x110] sm:$0xff]  ;;  %v14752_v61 = vpop.f32.mrf.mxu0 }
 0x437   : > { %10526 = vrot.lane.b32.xlu0 %v10525_v26, %s11465_s1  ;;  %5344 = vmatmul.f32.gmra.mxu3 %v4978_v9 }
 0x438   : > { %v5738_v7 = vmul.f32 %v5617_v55, %v17666_v44  ;;  %5505 = vmatmul.f32.gmra.mxu2 %v5122_v1 }
 0x439   : > { %v5297_v29 = vpop.f32.mrf.mxu3  ;;  %v10317_v3 = vpop.permute.xlu0 %10316 }
 0x43a   : > { %5786 = vst.msk [vmem:[#allocation4 + $0x58] sm:$0xff] %vm2472_vm4, %v5738_v7  ;;  %v5844_v46 = vsel %vm2472_vm4, %v5738_v7, 0.0  ;;  %v5298_v20 = vadd.f32 %v14732_v63, %v5297_v29  ;;  %v10319_v49 = vunpack.i.h.bf16 %v10317_v3  ;;  %v10318_v12 = vunpack.i.l.bf16 %v10317_v3  ;;  %v10337_v34 = vpop.permute.xlu1 %10336  ;;  %v14743_v45 = vpop.permute.xlu2 %10386  ;;  %v10647_v7 = vld [vmem:[#allocation3 + $0xf7] sm:$0xff] }
 0x43b   : > { %v5845_v22 = vadd.f32 %v5844_v46, %v5843_v18  ;;  %v10339_v21 = vunpack.i.h.bf16 %v10337_v34  ;;  %v10338_v54 = vunpack.i.l.bf16 %v10337_v34  ;;  %v5458_v48 = vpop.f32.mrf.mxu2  ;;  %v10359_v46 = vunpack.i.h.bf16 %v14696_v56 }
 0x43c   : > { %v5459_v51 = vadd.f32 %v5458_v48, %v5298_v20  ;;  %v4883_v27 = vsel %vm2472_vm4, %v10646_v14, %v10318_v12  ;;  %v5027_v50 = vsel %vm2472_vm4, %v3715_v47, %v10319_v49  ;;  %v10358_v3 = vunpack.i.l.bf16 %v14696_v56 }
 0x43d   : > { %v4931_v18 = vsel %vm2521_vm5, %v4883_v27, %v10338_v54  ;;  %v5075_v52 = vsel %vm2521_vm5, %v5027_v50, %v10339_v21 }
 0x43e   : > { %v5620_v19 = vadd.f32 %v14463_v59, %v5459_v51  ;;  %v4979_v36 = vsel %vm2570_vm6, %v4931_v18, %v10343_v39  ;;  %v5123_v13 = vsel %vm2570_vm6, %v5075_v52, %v10344_v60  ;;  %v3717_v18 = vld [vmem:[#allocation3 + $0x118] sm:$0xff]  ;;  %v10373_v52 = vunpack.i.l.bf16 %v14715_v6 }
 0x43f   : > { %5347 = vmatmul.f32.gmra.mxu3 %v4979_v36  ;;  %v10648_v36 = vld [vmem:[#allocation3 + $0xff] sm:$0xff] }
 0x440   : > { %v5739_v58 = vmul.f32 %v5620_v19, %v17665_v32  ;;  %5508 = vmatmul.f32.gmra.mxu2 %v5123_v13 }
 0x441   : > { %v5300_v41 = vpop.f32.mrf.mxu3  ;;  %v10332_v17 = vpop.permute.xlu0 %10331 }
 0x442   : > { %v5301_v15 = vadd.f32 %v14732_v63, %v5300_v41  ;;  %5787 = vst.msk [vmem:[#allocation4 + $0x60] sm:$0xff] %vm2472_vm4, %v5739_v58  ;;  %v5846_v37 = vsel %vm2472_vm4, %v5739_v58, 0.0  ;;  %v10334_v2 = vunpack.i.h.bf16 %v10332_v17  ;;  %v10333_v0 = vunpack.i.l.bf16 %v10332_v17  ;;  %v10352_v25 = vpop.permute.xlu1 %10351  ;;  %v14763_v21 = vpop.permute.xlu2 %10401 }
 0x443   : > { %v5847_v59 = vadd.f32 %v5846_v37, %v5845_v22  ;;  %v10354_v38 = vunpack.i.h.bf16 %v10352_v25  ;;  %v5461_v55 = vpop.f32.mrf.mxu2  ;;  %v10353_v26 = vunpack.i.l.bf16 %v10352_v25  ;;  %v10374_v41 = vunpack.i.h.bf16 %v14715_v6  ;;  %v14774_v37 = vpop.f32.mrf.mxu0 }
 0x444   : > { %v5462_v9 = vadd.f32 %v5461_v55, %v5301_v15  ;;  %v4884_v1 = vsel %vm2472_vm4, %v10647_v7, %v10333_v0  ;;  %v5028_v29 = vsel %vm2472_vm4, %v3716_v10, %v10334_v2 }
 0x445   : > { %v5076_v20 = vsel %vm2521_vm5, %v5028_v29, %v10354_v38  ;;  %v4932_v49 = vsel %vm2521_vm5, %v4884_v1, %v10353_v26 }
 0x446   : > { %v5623_v22 = vadd.f32 %v14522_v35, %v5462_v9  ;;  %v4980_v12 = vsel %vm2570_vm6, %v4932_v49, %v10358_v3  ;;  %v5124_v34 = vsel %vm2570_vm6, %v5076_v20, %v10359_v46  ;;  %v3718_v3 = vld [vmem:[#allocation3 + $0x120] sm:$0xff] }
 0x447   : > { %5350 = vmatmul.f32.gmra.mxu3 %v4980_v12  ;;  %v10649_v49 = vld [vmem:[#allocation3 + $0x107] sm:$0xff] }
 0x448   : > { %5788 = vst.msk [vmem:[#allocation4 + $0x68] sm:$0xff] %vm2472_vm4, %v5623_v22  ;;  %v5848_v54 = vsel %vm2472_vm4, %v5623_v22, 0.0  ;;  %5511 = vmatmul.f32.gmra.mxu2 %v5124_v34 }
 0x449   : > { %v5303_v48 = vpop.f32.mrf.mxu3  ;;  %v5849_v47 = vadd.f32 %v5848_v54, %v5847_v59  ;;  %v10347_v56 = vpop.permute.xlu0 %10346  ;;  %v10389_v54 = vunpack.i.h.bf16 %v14743_v45 }
 0x44a   : > { %v5304_v39 = vadd.f32 %v14732_v63, %v5303_v48  ;;  %v10349_v35 = vunpack.i.h.bf16 %v10347_v56  ;;  %v10348_v51 = vunpack.i.l.bf16 %v10347_v56  ;;  %v10367_v14 = vpop.permute.xlu1 %10366  ;;  %v14780_v10 = vpop.permute.xlu2 %10416  ;;  %v10388_v48 = vunpack.i.l.bf16 %v14743_v45 }
 0x44b   : > { %v10369_v27 = vunpack.i.h.bf16 %v10367_v14  ;;  %v10368_v50 = vunpack.i.l.bf16 %v10367_v14  ;;  %v5464_v60 = vpop.f32.mrf.mxu2  ;;  %v14794_v14 = vpop.f32.mrf.mxu0 }
 0x44c   : > { %v5465_v19 = vadd.f32 %v5464_v60, %v5304_v39  ;;  %v4885_v13 = vsel %vm2472_vm4, %v10648_v36, %v10348_v51  ;;  %v5029_v58 = vsel %vm2472_vm4, %v3717_v18, %v10349_v35 }
 0x44d   : > { %v4933_v17 = vsel %vm2521_vm5, %v4885_v13, %v10368_v50  ;;  %v5077_v15 = vsel %vm2521_vm5, %v5029_v58, %v10369_v27 }
 0x44e   : > { %v5626_v2 = vadd.f32 %v14576_v23, %v5465_v19  ;;  %v4981_v0 = vsel %vm2570_vm6, %v4933_v17, %v10373_v52  ;;  %v5125_v25 = vsel %vm2570_vm6, %v5077_v15, %v10374_v41  ;;  %v3719_v41 = vld [vmem:[#allocation3 + $0x128] sm:$0xff] }
 0x44f   : > { %5353 = vmatmul.f32.gmra.mxu3 %v4981_v0  ;;  %v10650_v0 = vld [vmem:[#allocation3 + $0x10f] sm:$0xff] }
 0x450   : > { %v5741_v59 = vmul.f32 %v5626_v2, %v17666_v44  ;;  %5514 = vmatmul.f32.gmra.mxu2 %v5125_v25 }
 0x451   : > { %v10362_v38 = vpop.permute.xlu0 %10361  ;;  %v5306_v55 = vpop.f32.mrf.mxu3 }
 0x452   : > { %5789 = vst.msk [vmem:[#allocation4 + $0x70] sm:$0xff] %vm2472_vm4, %v5741_v59  ;;  %v5850_v6 = vsel %vm2472_vm4, %v5741_v59, 0.0  ;;  %v10364_v26 = vunpack.i.h.bf16 %v10362_v38  ;;  %v10363_v9 = vunpack.i.l.bf16 %v10362_v38  ;;  %v10382_v7 = vpop.permute.xlu1 %10381  ;;  %v5307_v23 = vadd.f32 %v14732_v63, %v5306_v55  ;;  %v14800_v17 = vpop.permute.xlu2 %10431 }
 0x453   : > { %v5851_v1 = vadd.f32 %v5850_v6, %v5849_v47  ;;  %v10384_v29 = vunpack.i.h.bf16 %v10382_v7  ;;  %v5467_v46 = vpop.f32.mrf.mxu2  ;;  %v10383_v20 = vunpack.i.l.bf16 %v10382_v7  ;;  %v10404_v38 = vunpack.i.h.bf16 %v14763_v21 }
 0x454   : > { %v5468_v22 = vadd.f32 %v5467_v46, %v5307_v23  ;;  %v4886_v12 = vsel %vm2472_vm4, %v10649_v49, %v10363_v9  ;;  %v5030_v34 = vsel %vm2472_vm4, %v3718_v3, %v10364_v26  ;;  %v10403_v55 = vunpack.i.l.bf16 %v14763_v21 }
 0x455   : > { %v5078_v56 = vsel %vm2521_vm5, %v5030_v34, %v10384_v29  ;;  %v4934_v47 = vsel %vm2521_vm5, %v4886_v12, %v10383_v20  ;;  %v14813_v20 = vpop.f32.mrf.mxu0 }
 0x456   : > { %v5629_v39 = vadd.f32 %v14620_v11, %v5468_v22  ;;  %v4982_v35 = vsel %vm2570_vm6, %v4934_v47, %v10388_v48  ;;  %v5126_v51 = vsel %vm2570_vm6, %v5078_v56, %v10389_v54  ;;  %v10651_v56 = vld [vmem:[#allocation3 + $0x117] sm:$0xff] }
 0x457   : > { %5356 = vmatmul.f32.gmra.mxu3 %v4982_v35  ;;  %v3720_v47 = vld [vmem:[#allocation3 + $0x130] sm:$0xff]  ;;  %v10419_v35 = vunpack.i.h.bf16 %v14780_v10 }
 0x458   : > { %v5742_v27 = vmul.f32 %v5629_v39, %v17665_v32  ;;  %5517 = vmatmul.f32.gmra.mxu2 %v5126_v51  ;;  %v10418_v51 = vunpack.i.l.bf16 %v14780_v10 }
 0x459   : > { %v10377_v50 = vpop.permute.xlu0 %10376  ;;  %v5309_v60 = vpop.f32.mrf.mxu3 }
 0x45a   : > { %5790 = vst.msk [vmem:[#allocation4 + $0x78] sm:$0xff] %vm2472_vm4, %v5742_v27  ;;  %v5852_v45 = vsel %vm2472_vm4, %v5742_v27, 0.0  ;;  %v10379_v18 = vunpack.i.h.bf16 %v10377_v50  ;;  %v10378_v11 = vunpack.i.l.bf16 %v10377_v50  ;;  %v10397_v52 = vpop.permute.xlu1 %10396  ;;  %v5310_v19 = vadd.f32 %v14732_v63, %v5309_v60  ;;  %v14820_v50 = vpop.permute.xlu2 %10446 }
 0x45b   : > { %v5853_v36 = vadd.f32 %v5852_v45, %v5851_v1  ;;  %v10399_v13 = vunpack.i.h.bf16 %v10397_v52  ;;  %v5470_v58 = vpop.f32.mrf.mxu2  ;;  %v10398_v15 = vunpack.i.l.bf16 %v10397_v52 }
 0x45c   : > { %v5471_v2 = vadd.f32 %v5470_v58, %v5310_v19  ;;  %v4887_v25 = vsel %vm2472_vm4, %v10650_v0, %v10378_v11  ;;  %v5031_v59 = vsel %vm2472_vm4, %v3719_v41, %v10379_v18  ;;  %v17716_v58 = vld [vmem:[#allocation40_spill] sm:$0xff] }
 0x45d   : > { %v5079_v6 = vsel %vm2521_vm5, %v5031_v59, %v10399_v13  ;;  %v4935_v9 = vsel %vm2521_vm5, %v4887_v25, %v10398_v15  ;;  %v3063_v41 = vadd.f32 %v14513_v40, %v17716_v58 }
 0x45e   : > { %v5632_v26 = vadd.f32 %v14671_v31, %v5471_v2  ;;  %v4983_v7 = vsel %vm2570_vm6, %v4935_v9, %v10403_v55  ;;  %v5127_v23 = vsel %vm2570_vm6, %v5079_v6, %v10404_v38  ;;  %v14833_v38 = vpop.f32.mrf.mxu0  ;;  %v10434_v55 = vunpack.i.h.bf16 %v14800_v17 }
 0x45f   : > { %5359 = vmatmul.f32.gmra.mxu3 %v4983_v7 }
 0x460   : > { %5791 = vst.msk [vmem:[#allocation4 + $0x80] sm:$0xff] %vm2472_vm4, %v5632_v26  ;;  %v5854_v1 = vsel %vm2472_vm4, %v5632_v26, 0.0  ;;  %5520 = vmatmul.f32.gmra.mxu2 %v5127_v23  ;;  %v3721_v23 = vld [vmem:[#allocation3 + $0x138] sm:$0xff] }
 0x461   : > { %v5855_v29 = vadd.f32 %v5854_v1, %v5853_v36  ;;  %v10392_v46 = vpop.permute.xlu0 %10391  ;;  %v5312_v3 = vpop.f32.mrf.mxu3  ;;  %v10433_v1 = vunpack.i.l.bf16 %v14800_v17 }
 0x462   : > { %v10394_v21 = vunpack.i.h.bf16 %v10392_v46  ;;  %v10393_v22 = vunpack.i.l.bf16 %v10392_v46  ;;  %v5313_v31 = vadd.f32 %v14732_v63, %v5312_v3  ;;  %v10412_v49 = vpop.permute.xlu1 %10411  ;;  %v10652_v3 = vld [vmem:[#allocation3 + $0x11f] sm:$0xff] }
 0x463   : > { %v5473_v12 = vpop.f32.mrf.mxu2  ;;  %v10414_v34 = vunpack.i.h.bf16 %v10412_v49  ;;  %v10413_v54 = vunpack.i.l.bf16 %v10412_v49 }
 0x464   : > { %v5474_v48 = vadd.f32 %v5473_v12, %v5313_v31  ;;  %v4888_v39 = vsel %vm2472_vm4, %v10651_v56, %v10393_v22  ;;  %v5032_v27 = vsel %vm2472_vm4, %v3720_v47, %v10394_v21  ;;  %v17717_v12 = vld [vmem:[#allocation56_spill] sm:$0xff]  ;;  %v14845_v56 = vpop.permute.xlu2 %10461 }
 0x465   : > { %v4936_v45 = vsel %vm2521_vm5, %v4888_v39, %v10413_v54  ;;  %v5080_v18 = vsel %vm2521_vm5, %v5032_v27, %v10414_v34 }
 0x466   : > { %v5635_v60 = vadd.f32 %v14735_v57, %v5474_v48  ;;  %v4984_v11 = vsel %vm2570_vm6, %v4936_v45, %v10418_v51  ;;  %v5128_v52 = vsel %vm2570_vm6, %v5080_v18, %v10419_v35  ;;  %v17718_v35 = vld [vmem:[#allocation53_spill] sm:$0xff] }
 0x467   : > { %5362 = vmatmul.f32.gmra.mxu3 %v4984_v11 }
 0x468   : > { %v5744_v19 = vmul.f32 %v5635_v60, %v17666_v44  ;;  %5523 = vmatmul.f32.gmra.mxu2 %v5128_v52 }
 0x469   : > { %v5315_v36 = vpop.f32.mrf.mxu3  ;;  %v10407_v13 = vpop.permute.xlu0 %10406 }
 0x46a   : > { %5792 = vst.msk [vmem:[#allocation4 + $0x88] sm:$0xff] %vm2472_vm4, %v5744_v19  ;;  %v5856_v10 = vsel %vm2472_vm4, %v5744_v19, 0.0  ;;  %v5316_v57 = vadd.f32 %v14732_v63, %v5315_v36  ;;  %v10409_v2 = vunpack.i.h.bf16 %v10407_v13  ;;  %v10408_v0 = vunpack.i.l.bf16 %v10407_v13 }
 0x46b   : > { %v5857_v15 = vadd.f32 %v5856_v10, %v5855_v29  ;;  %v10427_v25 = vpop.permute.xlu1 %10426  ;;  %v5476_v59 = vpop.f32.mrf.mxu2  ;;  %v10449_v10 = vunpack.i.h.bf16 %v14820_v50  ;;  %v10448_v13 = vunpack.i.l.bf16 %v14820_v50 }
 0x46c   : > { %v10429_v6 = vunpack.i.h.bf16 %v10427_v25  ;;  %v10428_v26 = vunpack.i.l.bf16 %v10427_v25  ;;  %v5477_v9 = vadd.f32 %v5476_v59, %v5316_v57  ;;  %v3223_v7 = vpop.f32.mrf.mxu1  ;;  %v4889_v21 = vsel %vm2472_vm4, %v10652_v3, %v10408_v0  ;;  %v10653_v59 = vld [vmem:[#allocation3 + $0x127] sm:$0xff] }
 0x46d   : > { %v3224_v46 = vadd.f32 %v3223_v7, %v3063_v41  ;;  %v5033_v29 = vsel %vm2472_vm4, %v3721_v23, %v10409_v2  ;;  %v3722_v2 = vld [vmem:[#allocation3 + $0x140] sm:$0xff] }
 0x46e   : > { %v5638_v22 = vadd.f32 %v14752_v61, %v5477_v9  ;;  %v4937_v31 = vsel %vm2521_vm5, %v4889_v21, %v10428_v26  ;;  %v5081_v49 = vsel %vm2521_vm5, %v5033_v29, %v10429_v6  ;;  %v3066_v61 = vadd.f32 %v14513_v40, %v17718_v35  ;;  %v14859_v6 = vpop.f32.mrf.mxu0  ;;  %v17719_v7 = vld [vmem:[#allocation62_spill] sm:$0xff]  ;;  %v14869_v29 = vpop.permute.xlu2 %10476 }
 0x46f   : > { %v3385_v34 = vadd.f32 %v17717_v12, %v3224_v46  ;;  %v4985_v54 = vsel %vm2570_vm6, %v4937_v31, %v10433_v1  ;;  %v5129_v48 = vsel %vm2570_vm6, %v5081_v49, %v10434_v55  ;;  %v17720_v49 = vld [vmem:[#allocation39_spill] sm:$0xff] }
 0x470   : > { %v5745_v17 = vmul.f32 %v5638_v22, %v17665_v32  ;;  %5365 = vmatmul.f32.gmra.mxu3 %v4985_v54  ;;  %5526 = vmatmul.f32.gmra.mxu2 %v5129_v48 }
 0x471   : > { %v3438_v39 = vmax.f32 %v3385_v34, 0.0  ;;  %v5318_v47 = vpop.f32.mrf.mxu3  ;;  %v10422_v27 = vpop.permute.xlu0 %10421 }
 0x472   : > { %5793 = vst.msk [vmem:[#allocation4 + $0x90] sm:$0xff] %vm2472_vm4, %v5745_v17  ;;  %v5858_v51 = vsel %vm2472_vm4, %v5745_v17, 0.0  ;;  %v5319_v60 = vadd.f32 %v14732_v63, %v5318_v47  ;;  %v10424_v11 = vunpack.i.h.bf16 %v10422_v27  ;;  %v10423_v52 = vunpack.i.l.bf16 %v10422_v27 }
 0x473   : > { %v5859_v45 = vadd.f32 %v5858_v51, %v5857_v15  ;;  %v3486_v18 = vmul.f32 %v3438_v39, %v17665_v32  ;;  %v10442_v19 = vpop.permute.xlu1 %10441  ;;  %v5479_v36 = vpop.f32.mrf.mxu2  ;;  %v10464_v17 = vunpack.i.h.bf16 %v14845_v56 }
 0x474   : > { %v10444_v57 = vunpack.i.h.bf16 %v10442_v19  ;;  %v10443_v58 = vunpack.i.l.bf16 %v10442_v19  ;;  %v3226_v41 = vpop.f32.mrf.mxu1  ;;  %v5480_v0 = vadd.f32 %v5479_v36, %v5319_v60  ;;  %v4890_v15 = vsel %vm2472_vm4, %v10653_v59, %v10423_v52  ;;  %v3723_v19 = vld [vmem:[#allocation3 + $0x148] sm:$0xff] }
 0x475   : > { %3535 = vst.msk [vmem:[#allocation3 + $0x188] sm:$0xff] %vm2472_vm4, %v3486_v18  ;;  %v3227_v25 = vadd.f32 %v3226_v41, %v3066_v61  ;;  %v5034_v55 = vsel %vm2472_vm4, %v3722_v2, %v10424_v11 }
 0x476   : > { %v4938_v26 = vsel %vm2521_vm5, %v4890_v15, %v10443_v58  ;;  %v5082_v9 = vsel %vm2521_vm5, %v5034_v55, %v10444_v57  ;;  %v5641_v50 = vadd.f32 %v14774_v37, %v5480_v0  ;;  %v3069_v37 = vadd.f32 %v14513_v40, %v17720_v49  ;;  %v17721_v58 = vld [vmem:[#allocation58_spill] sm:$0xff]  ;;  %v14898_v2 = vpop.f32.mrf.mxu0 }
 0x477   : > { %v3388_v23 = vadd.f32 %v17719_v7, %v3227_v25  ;;  %v4986_v1 = vsel %vm2570_vm6, %v4938_v26, %v10448_v13  ;;  %v5130_v46 = vsel %vm2570_vm6, %v5082_v9, %v10449_v10  ;;  %v10463_v40 = vunpack.i.l.bf16 %v14845_v56  ;;  %v10654_v13 = vld [vmem:[#allocation3 + $0x12f] sm:$0xff] }
 0x478   : > { %5794 = vst.msk [vmem:[#allocation4 + $0x98] sm:$0xff] %vm2472_vm4, %v5641_v50  ;;  %v5860_v3 = vsel %vm2472_vm4, %v5641_v50, 0.0  ;;  %5368 = vmatmul.f32.gmra.mxu3 %v4986_v1  ;;  %5529 = vmatmul.f32.gmra.mxu2 %v5130_v46  ;;  %v10479_v9 = vunpack.i.h.bf16 %v14869_v29 }
 0x479   : > { %v3439_v21 = vmax.f32 %v3388_v23, 0.0  ;;  %v5861_v22 = vadd.f32 %v5860_v3, %v5859_v45  ;;  %v10437_v31 = vpop.permute.xlu0 %10436  ;;  %v5321_v48 = vpop.f32.mrf.mxu3  ;;  %v10478_v3 = vunpack.i.l.bf16 %v14869_v29  ;;  %v3724_v29 = vld [vmem:[#allocation3 + $0x150] sm:$0xff] }
 0x47a   : > { %v10439_v12 = vunpack.i.h.bf16 %v10437_v31  ;;  %v10438_v34 = vunpack.i.l.bf16 %v10437_v31  ;;  %v5322_v35 = vadd.f32 %v14732_v63, %v5321_v48 }
 0x47b   : > { %3536 = vst.msk [vmem:[#allocation3 + $0x190] sm:$0xff] %vm2472_vm4, %v3439_v21  ;;  %v10457_v54 = vpop.permute.xlu1 %10456  ;;  %v5482_v61 = vpop.f32.mrf.mxu2 }
 0x47c   : > { %v10459_v39 = vunpack.i.h.bf16 %v10457_v54  ;;  %v10458_v47 = vunpack.i.l.bf16 %v10457_v54  ;;  %v3229_v51 = vpop.f32.mrf.mxu1  ;;  %v14876_v27 = vld [vmem:[#allocation3 + $0x181] sm:$0xff]  ;;  %v5483_v36 = vadd.f32 %v5482_v61, %v5322_v35  ;;  %v4891_v57 = vsel %vm2472_vm4, %v10654_v13, %v10438_v34  ;;  %v10492_v34 = vpop.permute.xlu2 %10491  ;;  %v10655_v61 = vld [vmem:[#allocation3 + $0x137] sm:$0xff] }
 0x47d   : > { %v14878_v60 = vld [vmem:[#allocation3 + $0x188] sm:$0xff]  ;;  %v3230_v18 = vadd.f32 %v3229_v51, %v3069_v37  ;;  %v10540_v11 = vpack.i.bf16 %v14876_v27, %v14560_v53  ;;  %8984 = vmatmul.msk.f32.gmra.mxu0 %vm2472_vm4, %v14876_v27  ;;  %v5035_v56 = vsel %vm2472_vm4, %v3723_v19, %v10439_v12  ;;  %v5928_v12 = vld [vmem:[%s11607_s20 + $0x10] sm:$0xff] }
 0x47e   : > { %v14880_v45 = vld [vmem:[#allocation3 + $0x187] sm:$0xff]  ;;  %v10535_v52 = vpack.i.bf16 %v14878_v60, %v14601_v28  ;;  %v4939_v53 = vsel %vm2521_vm5, %v4891_v57, %v10458_v47  ;;  %v5083_v28 = vsel %vm2521_vm5, %v5035_v56, %v10459_v39  ;;  %v5644_v0 = vadd.f32 %v14794_v14, %v5483_v36  ;;  %5947 = vmatpush.msra.mxu1 %v5928_v12 }
 0x47f   : > { %v10530_v10 = vpack.i.bf16 %v14880_v45, %v14518_v33  ;;  %v3391_v41 = vadd.f32 %v17721_v58, %v3230_v18  ;;  %10541 = vrot.lane.b32.xlu0 %v10540_v11, %s11465_s1  ;;  %v4987_v33 = vsel %vm2570_vm6, %v4939_v53, %v10463_v40  ;;  %v5131_v25 = vsel %vm2570_vm6, %v5083_v28, %v10464_v17 }
 0x480   : > { %10536 = vrot.lane.b32.xlu2 %v10535_v52, %s11467_s4  ;;  %5371 = vmatmul.f32.gmra.mxu3 %v4987_v33  ;;  %v5747_v15 = vmul.f32 %v5644_v0, %v17666_v44  ;;  %v14933_v52 = vpop.f32.mrf.mxu0  ;;  %v10494_v56 = vunpack.i.h.bf16 %v10492_v34  ;;  %v10493_v58 = vunpack.i.l.bf16 %v10492_v34 }
 0x481   : > { %10531 = vrot.lane.b32.xlu1 %v10530_v10, %s11466_s3  ;;  %v3440_v59 = vmax.f32 %v3391_v41, 0.0  ;;  %5532 = vmatmul.f32.gmra.mxu2 %v5131_v25  ;;  %v10452_v55 = vpop.permute.xlu0 %10451 }
 0x482   : > { %v3734_v26 = vld [vmem:[#allocation3 + $0x189] sm:$0xff]  ;;  %v10454_v7 = vunpack.i.h.bf16 %v10452_v55  ;;  %v10453_v14 = vunpack.i.l.bf16 %v10452_v55  ;;  %5795 = vst.msk [vmem:[#allocation4 + $0xa0] sm:$0xff] %vm2472_vm4, %v5747_v15  ;;  %v5862_v21 = vsel %vm2472_vm4, %v5747_v15, 0.0  ;;  %v5324_v37 = vpop.f32.mrf.mxu3 }
 0x483   : > { %v3488_v50 = vmul.f32 %v3440_v59, %v17666_v44  ;;  %v10472_v23 = vpop.permute.xlu1 %10471  ;;  %v14907_v1 = vld [vmem:[#allocation3 + $0x190] sm:$0xff]  ;;  %v5863_v54 = vadd.f32 %v5862_v21, %v5861_v22  ;;  %v5325_v48 = vadd.f32 %v14732_v63, %v5324_v37  ;;  %v5485_v17 = vpop.f32.mrf.mxu2  ;;  %v10555_v39 = vpack.i.bf16 %v3734_v26, %v14599_v16 }
 0x484   : > { %v14909_v46 = vld [vmem:[#allocation3 + $0x18f] sm:$0xff]  ;;  %v10474_v31 = vunpack.i.h.bf16 %v10472_v23  ;;  %v10473_v49 = vunpack.i.l.bf16 %v10472_v23  ;;  %v10550_v47 = vpack.i.bf16 %v14907_v1, %v14639_v8  ;;  %v4892_v22 = vsel %vm2472_vm4, %v10655_v61, %v10453_v14  ;;  %v10656_v14 = vld [vmem:[#allocation3 + $0x13f] sm:$0xff]  ;;  %v10507_v21 = vpop.permute.xlu2 %10506 }
 0x485   : > { %3537 = vst.msk [vmem:[#allocation3 + $0x198] sm:$0xff] %vm2472_vm4, %v3488_v50  ;;  %8985 = vmatmul.msk.f32.gmra.mxu0 %vm2472_vm4, %v3734_v26  ;;  %v10545_v35 = vpack.i.bf16 %v14909_v46, %v14558_v30  ;;  %v5036_v51 = vsel %vm2472_vm4, %v3724_v29, %v10454_v7  ;;  %v5486_v40 = vadd.f32 %v5485_v17, %v5325_v48 }
 0x486   : > { %v4940_v16 = vsel %vm2521_vm5, %v4892_v22, %v10473_v49  ;;  %v5084_v18 = vsel %vm2521_vm5, %v5036_v51, %v10474_v31  ;;  %v10508_v22 = vunpack.i.l.bf16 %v10507_v21 }
 0x487   : > { %10556 = vrot.lane.b32.xlu0 %v10555_v39, %s11465_s1  ;;  %v4988_v8 = vsel %vm2570_vm6, %v4940_v16, %v10478_v3  ;;  %v5132_v30 = vsel %vm2570_vm6, %v5084_v18, %v10479_v9  ;;  %v5647_v11 = vadd.f32 %v14813_v20, %v5486_v40  ;;  %v3725_v9 = vld [vmem:[#allocation3 + $0x158] sm:$0xff]  ;;  %v3726_v18 = vld [vmem:[#allocation3 + $0x160] sm:$0xff] }
 0x488   : > { %10551 = vrot.lane.b32.xlu2 %v10550_v47, %s11467_s4  ;;  %5374 = vmatmul.f32.gmra.mxu3 %v4988_v8  ;;  %v3786_v47 = vld [vmem:[#allocation3 + $0x1a0] sm:$0xff]  ;;  %v14961_v61 = vpop.f32.mrf.mxu0 }
 0x489   : > { %10546 = vrot.lane.b32.xlu1 %v10545_v35, %s11466_s3  ;;  %5535 = vmatmul.f32.gmra.mxu2 %v5132_v30  ;;  %v10467_v19 = vpop.permute.xlu0 %10466  ;;  %v5748_v36 = vmul.f32 %v5647_v11, %v17665_v32 }
 0x48a   : > { %v10469_v10 = vunpack.i.h.bf16 %v10467_v19  ;;  %v10468_v13 = vunpack.i.l.bf16 %v10467_v19  ;;  %v5327_v28 = vpop.f32.mrf.mxu3  ;;  %v10657_v19 = vld [vmem:[#allocation3 + $0x147] sm:$0xff] }
 0x48b   : > { %v10487_v57 = vpop.permute.xlu1 %10486  ;;  %5796 = vst.msk [vmem:[#allocation4 + $0xa8] sm:$0xff] %vm2472_vm4, %v5748_v36  ;;  %v5864_v20 = vsel %vm2472_vm4, %v5748_v36, 0.0  ;;  %v5328_v59 = vadd.f32 %v14732_v63, %v5327_v28  ;;  %v5488_v15 = vpop.f32.mrf.mxu2  ;;  %v3738_v28 = vld [vmem:[#allocation3 + $0x1a7] sm:$0xff] }
 0x48c   : > { %v10489_v41 = vunpack.i.h.bf16 %v10487_v57  ;;  %v10488_v53 = vunpack.i.l.bf16 %v10487_v57  ;;  %v3735_v0 = vld [vmem:[#allocation3 + $0x191] sm:$0xff]  ;;  %v5865_v50 = vadd.f32 %v5864_v20, %v5863_v54  ;;  %v4893_v23 = vsel %vm2472_vm4, %v10656_v14, %v10468_v13  ;;  %v3736_v34 = vld [vmem:[#allocation3 + $0x199] sm:$0xff] }
 0x48d   : > { %v14936_v33 = vld [vmem:[#allocation3 + $0x198] sm:$0xff]  ;;  %v10590_v55 = vpack.i.bf16 %v3735_v0, %v14633_v5  ;;  %8986 = vmatmul.msk.f32.gmra.mxu0 %vm2472_vm4, %v3735_v0  ;;  %v5037_v3 = vsel %vm2472_vm4, %v3725_v9, %v10469_v10  ;;  %v5489_v31 = vadd.f32 %v5488_v15, %v5328_v59  ;;  %v10509_v54 = vunpack.i.h.bf16 %v10507_v21  ;;  %v10522_v0 = vpop.permute.xlu2 %10521  ;;  %v3787_v9 = vld [vmem:[#allocation3 + $0x1a8] sm:$0xff] }
 0x48e   : > { %v14938_v25 = vld [vmem:[#allocation3 + $0x197] sm:$0xff]  ;;  %v10565_v26 = vpack.i.bf16 %v14936_v33, %v14669_v43  ;;  %v4941_v5 = vsel %vm2521_vm5, %v4893_v23, %v10488_v53  ;;  %v5085_v49 = vsel %vm2521_vm5, %v5037_v3, %v10489_v41  ;;  %v3737_v35 = vld [vmem:[#allocation3 + $0x19f] sm:$0xff]  ;;  %v10595_v11 = vpack.i.bf16 %v3736_v34, %v14667_v24  ;;  %v3727_v21 = vld [vmem:[#allocation3 + $0x168] sm:$0xff] }
 0x48f   : > { %v10560_v7 = vpack.i.bf16 %v14938_v25, %v14597_v4  ;;  %10591 = vrot.lane.b32.xlu0 %v10590_v55, %s11465_s1  ;;  %v4989_v43 = vsel %vm2570_vm6, %v4941_v5, %v10493_v58  ;;  %v5133_v4 = vsel %vm2570_vm6, %v5085_v49, %v10494_v56  ;;  %v5650_v37 = vadd.f32 %v14833_v38, %v5489_v31 }
 0x490   : > { %10566 = vrot.lane.b32.xlu2 %v10565_v26, %s11467_s4  ;;  %5377 = vmatmul.f32.gmra.mxu3 %v4989_v43  ;;  %v10570_v13 = vpack.i.bf16 %v3786_v47, %v14880_v45  ;;  %v10575_v57 = vpack.i.bf16 %v3737_v35, %v14631_v42  ;;  %v10580_v20 = vpack.i.bf16 %v3738_v28, %v14665_v62  ;;  %v10658_v62 = vld [vmem:[#allocation3 + $0x14f] sm:$0xff] }
 0x491   : > { %10561 = vrot.lane.b32.xlu1 %v10560_v7, %s11466_s3  ;;  %5538 = vmatmul.f32.gmra.mxu2 %v5133_v4  ;;  %v10482_v12 = vpop.permute.xlu0 %10481  ;;  %5797 = vst.msk [vmem:[#allocation4 + $0xb0] sm:$0xff] %vm2472_vm4, %v5650_v37  ;;  %v5866_v48 = vsel %vm2472_vm4, %v5650_v37, 0.0  ;;  %v10523_v7 = vunpack.i.l.bf16 %v10522_v0  ;;  %v5664_v4 = vpop.f32.mrf.mxu0  ;;  %v3739_v47 = vld [vmem:[#allocation3 + $0x1af] sm:$0xff] }
 0x492   : > { %v10484_v17 = vunpack.i.h.bf16 %v10482_v12  ;;  %v10483_v39 = vunpack.i.l.bf16 %v10482_v12  ;;  %v5867_v51 = vadd.f32 %v5866_v48, %v5865_v50  ;;  %v5330_v16 = vpop.f32.mrf.mxu3  ;;  %v10524_v50 = vunpack.i.h.bf16 %v10522_v0  ;;  %v3788_v35 = vld [vmem:[#allocation3 + $0x1b0] sm:$0xff] }
 0x493   : > { %v10502_v29 = vpop.permute.xlu1 %10501  ;;  %v5331_v8 = vadd.f32 %v14732_v63, %v5330_v16  ;;  %v5491_v30 = vpop.f32.mrf.mxu2  ;;  %v10585_v12 = vpack.i.bf16 %v3787_v9, %v14909_v46  ;;  %v10600_v16 = vpack.i.bf16 %v3739_v47, %v14876_v27 }
 0x494   : > { %v10504_v40 = vunpack.i.h.bf16 %v10502_v29  ;;  %v10503_v38 = vunpack.i.l.bf16 %v10502_v29  ;;  %v4894_v36 = vsel %vm2472_vm4, %v10657_v19, %v10483_v39  ;;  %v5038_v10 = vsel %vm2472_vm4, %v3726_v18, %v10484_v17  ;;  %v5955_v19 = vld [vmem:[%s11613_s19] sm:$0x3] }
 0x495   : > { %8987 = vmatmul.msk.f32.gmra.mxu0 %vm2472_vm4, %v3736_v34  ;;  %v5492_v41 = vadd.f32 %v5491_v30, %v5331_v8  ;;  %8992 = vmatpush.msk.msrb.mxu3 %vm5961_vm7, %v5955_v19 }
 0x496   : > { %v4942_v56 = vsel %vm2521_vm5, %v4894_v36, %v10503_v38  ;;  %v5086_v58 = vsel %vm2521_vm5, %v5038_v10, %v10504_v40 }
 0x497   : > { %10596 = vrot.lane.b32.xlu0 %v10595_v11, %s11465_s1  ;;  %v4990_v53 = vsel %vm2570_vm6, %v4942_v56, %v10508_v22  ;;  %v5134_v24 = vsel %vm2570_vm6, %v5086_v58, %v10509_v54  ;;  %v5653_v45 = vadd.f32 %v14859_v6, %v5492_v41 }
 0x498   : > { %10571 = vrot.lane.b32.xlu2 %v10570_v13, %s11467_s4  ;;  %5380 = vmatmul.f32.gmra.mxu3 %v4990_v53 }
 0x499   : > { %10576 = vrot.lane.b32.xlu1 %v10575_v57, %s11466_s3  ;;  %5541 = vmatmul.f32.gmra.mxu2 %v5134_v24  ;;  %v10497_v42 = vpop.permute.xlu0 %10496  ;;  %v5750_v59 = vmul.f32 %v5653_v45, %v17666_v44  ;;  %v5667_v30 = vpop.f32.mrf.mxu0 }
 0x49a   : > { %v10499_v15 = vunpack.i.h.bf16 %v10497_v42  ;;  %v10498_v55 = vunpack.i.l.bf16 %v10497_v42  ;;  %v5333_v3 = vpop.f32.mrf.mxu3 }
 0x49b   : > { %v10517_v26 = vpop.permute.xlu1 %10516  ;;  %5798 = vst.msk [vmem:[#allocation4 + $0xb8] sm:$0xff] %vm2472_vm4, %v5750_v59  ;;  %v5868_v6 = vsel %vm2472_vm4, %v5750_v59, 0.0  ;;  %v5334_v31 = vadd.f32 %v14732_v63, %v5333_v3  ;;  %v5494_v5 = vpop.f32.mrf.mxu2 }
 0x49c   : > { %v10519_v14 = vunpack.i.h.bf16 %v10517_v26  ;;  %v10518_v23 = vunpack.i.l.bf16 %v10517_v26  ;;  %v4895_v49 = vsel %vm2472_vm4, %v10658_v62, %v10498_v55  ;;  %v5039_v43 = vsel %vm2472_vm4, %v3727_v21, %v10499_v15 }
 0x49d   : > { %v5869_v37 = vadd.f32 %v5868_v6, %v5867_v51  ;;  %v5495_v48 = vadd.f32 %v5494_v5, %v5334_v31 }
 0x49e   : > { %v4943_v34 = vsel %vm2521_vm5, %v4895_v49, %v10518_v23  ;;  %v5087_v54 = vsel %vm2521_vm5, %v5039_v43, %v10519_v14 }
 0x49f   : > { %v4991_v17 = vsel %vm2570_vm6, %v4943_v34, %v10523_v7  ;;  %v5135_v39 = vsel %vm2570_vm6, %v5087_v54, %v10524_v50  ;;  %v5656_v29 = vadd.f32 %v14898_v2, %v5495_v48  ;;  %v10605_v2 = vpack.i.bf16 %v3788_v35, %v14938_v25 }
 0x4a0   : > { %10586 = vrot.lane.b32.xlu2 %v10585_v12, %s11467_s4  ;;  %5383 = vmatmul.f32.gmra.mxu3 %v4991_v17 }
 0x4a1   : > { %10581 = vrot.lane.b32.xlu1 %v10580_v20, %s11466_s3  ;;  %5544 = vmatmul.f32.gmra.mxu2 %v5135_v39  ;;  %v5751_v46 = vmul.f32 %v5656_v29, %v17665_v32  ;;  %v5670_v58 = vpop.f32.mrf.mxu0 }
 0x4a2   : > { %v5336_v22 = vpop.f32.mrf.mxu3 }
 0x4a3   : > { %5799 = vst.msk [vmem:[#allocation4 + $0xc0] sm:$0xff] %vm2472_vm4, %v5751_v46  ;;  %v5870_v51 = vsel %vm2472_vm4, %v5751_v46, 0.0  ;;  %v5337_v40 = vadd.f32 %v14732_v63, %v5336_v22  ;;  %v5497_v38 = vpop.f32.mrf.mxu2 }
 0x4a4   : > { %v5871_v18 = vadd.f32 %v5870_v51, %v5869_v37 }
 0x4a5   : > { %v5498_v8 = vadd.f32 %v5497_v38, %v5337_v40 }
 0x4a7   : > { %v5659_v11 = vadd.f32 %v14933_v52, %v5498_v8 }
 0x4a8   : > { %10606 = vrot.lane.b32.xlu2 %v10605_v2, %s11467_s4 }
 0x4a9   : > { %10601 = vrot.lane.b32.xlu1 %v10600_v16, %s11466_s3  ;;  %5800 = vst.msk [vmem:[#allocation4 + $0xc8] sm:$0xff] %vm2472_vm4, %v5659_v11  ;;  %v5872_v36 = vsel %vm2472_vm4, %v5659_v11, 0.0  ;;  %v5673_v59 = vpop.f32.mrf.mxu0 }
 0x4aa   : > { %v5873_v10 = vadd.f32 %v5872_v36, %v5871_v18  ;;  %v5339_v27 = vpop.f32.mrf.mxu3 }
 0x4ab   : > { %v5340_v13 = vadd.f32 %v14732_v63, %v5339_v27  ;;  %v5500_v25 = vpop.f32.mrf.mxu2 }
 0x4ad   : > { %v5501_v57 = vadd.f32 %v5500_v25, %v5340_v13  ;;  %v5927_v13 = vld [vmem:[%s11607_s20 + $0x8] sm:$0xff]  ;;  %v10512_v25 = vpop.permute.xlu0 %10511 }
 0x4ae   : > { %5948 = vmatpush.msra.mxu1 %v5927_v13 }
 0x4af   : > { %v5662_v56 = vadd.f32 %v14961_v61, %v5501_v57 }
 0x4b1   : > { %v5753_v41 = vmul.f32 %v5662_v56, %v17666_v44  ;;  %v5676_v31 = vpop.f32.mrf.mxu0 }
 0x4b2   : > { %v5342_v53 = vpop.f32.mrf.mxu3 }
 0x4b3   : > { %5801 = vst.msk [vmem:[#allocation4 + $0xd0] sm:$0xff] %vm2472_vm4, %v5753_v41  ;;  %v5874_v52 = vsel %vm2472_vm4, %v5753_v41, 0.0  ;;  %v5343_v24 = vadd.f32 %v14732_v63, %v5342_v53  ;;  %v5503_v28 = vpop.f32.mrf.mxu2 }
 0x4b4   : > { %v5875_v0 = vadd.f32 %v5874_v52, %v5873_v10 }
 0x4b5   : > { %v5504_v45 = vadd.f32 %v5503_v28, %v5343_v24 }
 0x4b7   : > { %v5665_v42 = vadd.f32 %v5664_v4, %v5504_v45 }
 0x4b9   : > { %v5754_v20 = vmul.f32 %v5665_v42, %v17665_v32  ;;  %v5679_v48 = vpop.f32.mrf.mxu0  ;;  %v15038_v42 = vld [vmem:[%s11585_s16] ss:$0 sm:$0xff] }
 0x4ba   : > { %v5345_v15 = vpop.f32.mrf.mxu3 }
 0x4bb   : > { %5802 = vst.msk [vmem:[#allocation4 + $0xd8] sm:$0xff] %vm2472_vm4, %v5754_v20  ;;  %v5876_v61 = vsel %vm2472_vm4, %v5754_v20, 0.0  ;;  %v5346_v55 = vadd.f32 %v14732_v63, %v5345_v15  ;;  %v5506_v26 = vpop.f32.mrf.mxu2 }
 0x4bc   : > { %v5877_v9 = vadd.f32 %v5876_v61, %v5875_v0  ;;  %v10527_v61 = vpop.permute.xlu0 %10526 }
 0x4bd   : > { %v5507_v50 = vadd.f32 %v5506_v26, %v5346_v55  ;;  %v10514_v26 = vunpack.i.h.bf16 %v10512_v25 }
 0x4bf   : > { %v5668_v7 = vadd.f32 %v5667_v30, %v5507_v50 }
 0x4c1   : > { %5803 = vst.msk [vmem:[#allocation4 + $0xe0] sm:$0xff] %vm2472_vm4, %v5668_v7  ;;  %v5878_v14 = vsel %vm2472_vm4, %v5668_v7, 0.0  ;;  %v5682_v38 = vpop.f32.mrf.mxu0 }
 0x4c2   : > { %v5879_v23 = vadd.f32 %v5878_v14, %v5877_v9  ;;  %v5348_v3 = vpop.f32.mrf.mxu3  ;;  %v10513_v9 = vunpack.i.l.bf16 %v10512_v25 }
 0x4c3   : > { %v5349_v21 = vadd.f32 %v14732_v63, %v5348_v3  ;;  %v5509_v6 = vpop.f32.mrf.mxu2 }
 0x4c5   : > { %v5510_v5 = vadd.f32 %v5509_v6, %v5349_v21  ;;  %v3728_v21 = vld [vmem:[#allocation3 + $0x170] sm:$0xff] }
 0x4c7   : > { %v5671_v62 = vadd.f32 %v5670_v58, %v5510_v5 }
 0x4c9   : > { %v5756_v49 = vmul.f32 %v5671_v62, %v17666_v44  ;;  %v5685_v10 = vpop.f32.mrf.mxu0 }
 0x4ca   : > { %v5351_v43 = vpop.f32.mrf.mxu3 }
 0x4cb   : > { %5804 = vst.msk [vmem:[#allocation4 + $0xe8] sm:$0xff] %vm2472_vm4, %v5756_v49  ;;  %v5880_v4 = vsel %vm2472_vm4, %v5756_v49, 0.0  ;;  %v5352_v37 = vadd.f32 %v14732_v63, %v5351_v43  ;;  %v5512_v12 = vpop.f32.mrf.mxu2  ;;  %v5040_v49 = vsel %vm2472_vm4, %v3728_v21, %v10514_v26  ;;  %v3730_v26 = vld [vmem:[#allocation3 + $0x180] sm:$0xff] }
 0x4cc   : > { %v5881_v34 = vadd.f32 %v5880_v4, %v5879_v23 }
 0x4cd   : > { %v5513_v54 = vadd.f32 %v5512_v12, %v5352_v37  ;;  %v10660_v12 = vld [vmem:[#allocation3 + $0x157] sm:$0xff] }
 0x4cf   : > { %v5674_v17 = vadd.f32 %v5673_v59, %v5513_v54 }
 0x4d1   : > { %v5757_v39 = vmul.f32 %v5674_v17, %v17665_v32  ;;  %v5688_v15 = vpop.f32.mrf.mxu0 }
 0x4d2   : > { %v5354_v29 = vpop.f32.mrf.mxu3 }
 0x4d3   : > { %5805 = vst.msk [vmem:[#allocation4 + $0xf0] sm:$0xff] %vm2472_vm4, %v5757_v39  ;;  %v5882_v47 = vsel %vm2472_vm4, %v5757_v39, 0.0  ;;  %v5355_v46 = vadd.f32 %v14732_v63, %v5354_v29  ;;  %v5515_v35 = vpop.f32.mrf.mxu2 }
 0x4d4   : > { %v5883_v22 = vadd.f32 %v5882_v47, %v5881_v34  ;;  %v4896_v34 = vsel %vm2472_vm4, %v10660_v12, %v10513_v9  ;;  %v3790_v9 = vld [vmem:[#allocation3 + $0x1a9] sm:$0xff] }
 0x4d5   : > { %v5516_v51 = vadd.f32 %v5515_v35, %v5355_v46  ;;  %v10529_v35 = vunpack.i.h.bf16 %v10527_v61 }
 0x4d7   : > { %v5677_v40 = vadd.f32 %v5676_v31, %v5516_v51 }
 0x4d9   : > { %5806 = vst.msk [vmem:[#allocation4 + $0xf8] sm:$0xff] %vm2472_vm4, %v5677_v40  ;;  %v5884_v16 = vsel %vm2472_vm4, %v5677_v40, 0.0  ;;  %v5691_v46 = vpop.f32.mrf.mxu0 }
 0x4da   : > { %v5885_v18 = vadd.f32 %v5884_v16, %v5883_v22  ;;  %v5357_v2 = vpop.f32.mrf.mxu3  ;;  %v10537_v53 = vpop.permute.xlu2 %10536  ;;  %v10528_v22 = vunpack.i.l.bf16 %v10527_v61 }
 0x4db   : > { %v5358_v8 = vadd.f32 %v14732_v63, %v5357_v2  ;;  %v5518_v30 = vpop.f32.mrf.mxu2  ;;  %v10539_v6 = vunpack.i.h.bf16 %v10537_v53  ;;  %v10538_v43 = vunpack.i.l.bf16 %v10537_v53  ;;  %v3729_v2 = vld [vmem:[#allocation3 + $0x178] sm:$0xff] }
 0x4dd   : > { %v5519_v11 = vadd.f32 %v5518_v30, %v5358_v8  ;;  %v3789_v8 = vld [vmem:[#allocation3 + $0x1a1] sm:$0xff] }
 0x4de   : > { %8988 = vmatmul.msk.f32.gmra.mxu0 %vm2472_vm4, %v3789_v8  ;;  %v10663_v8 = vld [vmem:[#allocation3 + $0x16f] sm:$0xff] }
 0x4df   : > { %v5680_v19 = vadd.f32 %v5679_v48, %v5519_v11 }
 0x4e1   : > { %v5759_v36 = vmul.f32 %v5680_v19, %v17666_v44 }
 0x4e2   : > { %v5360_v27 = vpop.f32.mrf.mxu3  ;;  %v10552_v50 = vpop.permute.xlu2 %10551 }
 0x4e3   : > { %5807 = vst.msk [vmem:[#allocation4 + $0x100] sm:$0xff] %vm2472_vm4, %v5759_v36  ;;  %v5886_v57 = vsel %vm2472_vm4, %v5759_v36, 0.0  ;;  %v5361_v56 = vadd.f32 %v14732_v63, %v5360_v27  ;;  %v5521_v58 = vpop.f32.mrf.mxu2  ;;  %v10554_v30 = vunpack.i.h.bf16 %v10552_v50  ;;  %v10661_v36 = vld [vmem:[#allocation3 + $0x15f] sm:$0xff]  ;;  %v5041_v27 = vsel %vm2472_vm4, %v3729_v2, %v10529_v35 }
 0x4e4   : > { %v5887_v41 = vadd.f32 %v5886_v57, %v5885_v18  ;;  %v10553_v13 = vunpack.i.l.bf16 %v10552_v50 }
 0x4e5   : > { %v5522_v52 = vadd.f32 %v5521_v58, %v5361_v56 }
 0x4e6   : > { %8989 = vmatmul.msk.f32.gmra.mxu0 %vm2472_vm4, %v3790_v9 }
 0x4e7   : > { %v5683_v24 = vadd.f32 %v5682_v38, %v5522_v52 }
 0x4e9   : > { %v5760_v28 = vmul.f32 %v5683_v24, %v17665_v32 }
 0x4ea   : > { %v5363_v0 = vpop.f32.mrf.mxu3  ;;  %v10567_v38 = vpop.permute.xlu2 %10566 }
 0x4eb   : > { %5808 = vst.msk [vmem:[#allocation4 + $0x108] sm:$0xff] %vm2472_vm4, %v5760_v28  ;;  %v5888_v45 = vsel %vm2472_vm4, %v5760_v28, 0.0  ;;  %v5364_v20 = vadd.f32 %v15038_v42, %v5363_v0  ;;  %v5524_v59 = vpop.f32.mrf.mxu2  ;;  %v10569_v50 = vunpack.i.h.bf16 %v10567_v38 }
 0x4ec   : > { %v5889_v63 = vadd.f32 %v5888_v45, %v5887_v41 }
 0x4ed   : > { %v5525_v55 = vadd.f32 %v5524_v59, %v5364_v20 }
 0x4ef   : > { %v5686_v7 = vadd.f32 %v5685_v10, %v5525_v55  ;;  %v4897_v10 = vsel %vm2472_vm4, %v10661_v36, %v10528_v22 }
 0x4f1   : > { %5809 = vst.msk [vmem:[#allocation4 + $0x110] sm:$0xff] %vm2472_vm4, %v5686_v7  ;;  %v5890_v23 = vsel %vm2472_vm4, %v5686_v7, 0.0  ;;  %v10542_v39 = vpop.permute.xlu0 %10541  ;;  %v10568_v7 = vunpack.i.l.bf16 %v10567_v38 }
 0x4f2   : > { %v5891_v31 = vadd.f32 %v5890_v23, %v5889_v63  ;;  %v10544_v0 = vunpack.i.h.bf16 %v10542_v39  ;;  %v10543_v45 = vunpack.i.l.bf16 %v10542_v39  ;;  %v10572_v21 = vpop.permute.xlu2 %10571 }
 0x4f3   : > { %v10532_v14 = vpop.permute.xlu1 %10531  ;;  %v5366_v62 = vpop.f32.mrf.mxu3 }
 0x4f4   : > { %v10534_v3 = vunpack.i.h.bf16 %v10532_v14  ;;  %v10533_v5 = vunpack.i.l.bf16 %v10532_v14  ;;  %v5367_v4 = vadd.f32 %v15038_v42, %v5366_v62  ;;  %v5527_v37 = vpop.f32.mrf.mxu2  ;;  %v10662_v62 = vld [vmem:[#allocation3 + $0x167] sm:$0xff] }
 0x4f6   : > { %v5088_v54 = vsel %vm2521_vm5, %v5040_v49, %v10534_v3  ;;  %v4944_v48 = vsel %vm2521_vm5, %v4896_v34, %v10533_v5  ;;  %v5528_v29 = vadd.f32 %v5527_v37, %v5367_v4  ;;  %v5042_v3 = vsel %vm2472_vm4, %v3730_v26, %v10544_v0 }
 0x4f7   : > { %v5136_v17 = vsel %vm2570_vm6, %v5088_v54, %v10539_v6  ;;  %v4992_v47 = vsel %vm2570_vm6, %v4944_v48, %v10538_v43  ;;  %v4898_v49 = vsel %vm2472_vm4, %v10662_v62, %v10543_v45 }
 0x4f8   : > { %5547 = vmatmul.f32.gmra.mxu2 %v5136_v17  ;;  %5386 = vmatmul.f32.gmra.mxu3 %v4992_v47  ;;  %v5689_v51 = vadd.f32 %v5688_v15, %v5528_v29  ;;  %v5694_v15 = vpop.f32.mrf.mxu0  ;;  %v10574_v47 = vunpack.i.h.bf16 %v10572_v21 }
 0x4f9   : > { %v10557_v20 = vpop.permute.xlu0 %10556 }
 0x4fa   : > { %v5762_v16 = vmul.f32 %v5689_v51, %v17666_v44  ;;  %v10559_v48 = vunpack.i.h.bf16 %v10557_v20  ;;  %v10558_v17 = vunpack.i.l.bf16 %v10557_v20 }
 0x4fb   : > { %v10547_v40 = vpop.permute.xlu1 %10546  ;;  %v5369_v19 = vpop.f32.mrf.mxu3 }
 0x4fc   : > { %v10549_v18 = vunpack.i.h.bf16 %v10547_v40  ;;  %v10548_v11 = vunpack.i.l.bf16 %v10547_v40  ;;  %5810 = vst.msk [vmem:[#allocation4 + $0x118] sm:$0xff] %vm2472_vm4, %v5762_v16  ;;  %v5892_v25 = vsel %vm2472_vm4, %v5762_v16, 0.0  ;;  %v5370_v57 = vadd.f32 %v15038_v42, %v5369_v19  ;;  %v5530_v56 = vpop.f32.mrf.mxu2  ;;  %v3791_v40 = vld [vmem:[#allocation3 + $0x1b1] sm:$0xff] }
 0x4fd   : > { %v5893_v41 = vadd.f32 %v5892_v25, %v5891_v31  ;;  %v10573_v16 = vunpack.i.l.bf16 %v10572_v21  ;;  %8990 = vmatmul.msk.f32.gmra.mxu0 %vm2472_vm4, %v3791_v40 }
 0x4fe   : > { %v5089_v58 = vsel %vm2521_vm5, %v5041_v27, %v10549_v18  ;;  %v4945_v53 = vsel %vm2521_vm5, %v4897_v10, %v10548_v11  ;;  %v5531_v24 = vadd.f32 %v5530_v56, %v5370_v57  ;;  %v5043_v11 = vsel %vm2472_vm4, %v14878_v60, %v10559_v48  ;;  %v10587_v57 = vpop.permute.xlu2 %10586 }
 0x4ff   : > { %v5137_v52 = vsel %vm2570_vm6, %v5089_v58, %v10554_v30  ;;  %v4993_v28 = vsel %vm2570_vm6, %v4945_v53, %v10553_v13  ;;  %v4899_v30 = vsel %vm2472_vm4, %v10663_v8, %v10558_v17  ;;  %v10589_v0 = vunpack.i.h.bf16 %v10587_v57  ;;  %v10665_v17 = vld [vmem:[#allocation3 + $0x17f] sm:$0xff] }
 0x500   : > { %5550 = vmatmul.f32.gmra.mxu2 %v5137_v52  ;;  %5389 = vmatmul.f32.gmra.mxu3 %v4993_v28  ;;  %v5692_v59 = vadd.f32 %v5691_v46, %v5531_v24  ;;  %v5697_v38 = vpop.f32.mrf.mxu0  ;;  %v10588_v45 = vunpack.i.l.bf16 %v10587_v57 }
 0x501   : > { %v10592_v46 = vpop.permute.xlu0 %10591 }
 0x502   : > { %v5763_v61 = vmul.f32 %v5692_v59, %v17665_v32  ;;  %v10594_v58 = vunpack.i.h.bf16 %v10592_v46  ;;  %v10664_v59 = vld [vmem:[#allocation3 + $0x177] sm:$0xff] }
 0x503   : > { %v10562_v63 = vpop.permute.xlu1 %10561  ;;  %v5372_v23 = vpop.f32.mrf.mxu3 }
 0x504   : > { %v10564_v55 = vunpack.i.h.bf16 %v10562_v63  ;;  %v10563_v14 = vunpack.i.l.bf16 %v10562_v63  ;;  %5811 = vst.msk [vmem:[#allocation4 + $0x120] sm:$0xff] %vm2472_vm4, %v5763_v61  ;;  %v5894_v6 = vsel %vm2472_vm4, %v5763_v61, 0.0  ;;  %v5373_v31 = vadd.f32 %v15038_v42, %v5372_v23  ;;  %v5533_v5 = vpop.f32.mrf.mxu2  ;;  %v5926_v61 = vld [vmem:[%s11607_s20] sm:$0xff] }
 0x505   : > { %v5895_v4 = vadd.f32 %v5894_v6, %v5893_v41  ;;  %v10593_v41 = vunpack.i.l.bf16 %v10592_v46  ;;  %v5044_v63 = vsel %vm2472_vm4, %v14907_v1, %v10594_v58  ;;  %5949 = vmatpush.msra.mxu1 %v5926_v61 }
 0x506   : > { %v5090_v43 = vsel %vm2521_vm5, %v5042_v3, %v10564_v55  ;;  %v4946_v37 = vsel %vm2521_vm5, %v4898_v49, %v10563_v14  ;;  %v5534_v34 = vadd.f32 %v5533_v5, %v5373_v31  ;;  %v10607_v62 = vpop.permute.xlu2 %10606 }
 0x507   : > { %v5138_v12 = vsel %vm2570_vm6, %v5090_v43, %v10569_v50  ;;  %v4994_v54 = vsel %vm2570_vm6, %v4946_v37, %v10568_v7 }
 0x508   : > { %5553 = vmatmul.f32.gmra.mxu2 %v5138_v12  ;;  %5392 = vmatmul.f32.gmra.mxu3 %v4994_v54  ;;  %v5695_v39 = vadd.f32 %v5694_v15, %v5534_v34  ;;  %v4900_v15 = vsel %vm2472_vm4, %v10664_v59, %v10593_v41  ;;  %v5700_v23 = vpop.f32.mrf.mxu0  ;;  %v10609_v34 = vunpack.i.h.bf16 %v10607_v62  ;;  %v10608_v54 = vunpack.i.l.bf16 %v10607_v62 }
 0x509   : > { %v10597_v55 = vpop.permute.xlu0 %10596 }
 0x50a   : > { %5812 = vst.msk [vmem:[#allocation4 + $0x128] sm:$0xff] %vm2472_vm4, %v5695_v39  ;;  %v5896_v35 = vsel %vm2472_vm4, %v5695_v39, 0.0  ;;  %v10599_v31 = vunpack.i.h.bf16 %v10597_v55  ;;  %v10598_v5 = vunpack.i.l.bf16 %v10597_v55 }
 0x50b   : > { %v10577_v29 = vpop.permute.xlu1 %10576  ;;  %v5897_v18 = vadd.f32 %v5896_v35, %v5895_v4  ;;  %v5375_v2 = vpop.f32.mrf.mxu3 }
 0x50c   : > { %v10579_v22 = vunpack.i.h.bf16 %v10577_v29  ;;  %v10578_v51 = vunpack.i.l.bf16 %v10577_v29  ;;  %v5376_v19 = vadd.f32 %v15038_v42, %v5375_v2  ;;  %v5536_v36 = vpop.f32.mrf.mxu2  ;;  %v5045_v48 = vsel %vm2472_vm4, %v14936_v33, %v10599_v31 }
 0x50d   : > { %v4901_v39 = vsel %vm2472_vm4, %v10665_v17, %v10598_v5 }
 0x50e   : > { %v4947_v10 = vsel %vm2521_vm5, %v4899_v30, %v10578_v51  ;;  %v5091_v27 = vsel %vm2521_vm5, %v5043_v11, %v10579_v22  ;;  %v5537_v56 = vadd.f32 %v5536_v36, %v5376_v19 }
 0x50f   : > { %v4995_v13 = vsel %vm2570_vm6, %v4947_v10, %v10573_v16  ;;  %v5139_v25 = vsel %vm2570_vm6, %v5091_v27, %v10574_v47 }
 0x510   : > { %5556 = vmatmul.f32.gmra.mxu2 %v5139_v25  ;;  %5395 = vmatmul.f32.gmra.mxu3 %v4995_v13  ;;  %v5698_v60 = vadd.f32 %v5697_v38, %v5537_v56 }
 0x512   : > { %v5765_v52 = vmul.f32 %v5698_v60, %v17666_v44 }
 0x513   : > { %v10582_v53 = vpop.permute.xlu1 %10581  ;;  %v5378_v20 = vpop.f32.mrf.mxu3 }
 0x514   : > { %v10584_v24 = vunpack.i.h.bf16 %v10582_v53  ;;  %v10583_v28 = vunpack.i.l.bf16 %v10582_v53  ;;  %5813 = vst.msk [vmem:[#allocation4 + $0x130] sm:$0xff] %vm2472_vm4, %v5765_v52  ;;  %v5898_v26 = vsel %vm2472_vm4, %v5765_v52, 0.0  ;;  %v5379_v9 = vadd.f32 %v15038_v42, %v5378_v20  ;;  %v5539_v50 = vpop.f32.mrf.mxu2 }
 0x515   : > { %v5899_v3 = vadd.f32 %v5898_v26, %v5897_v18  ;;  %v5703_v18 = vpop.f32.mrf.mxu0 }
 0x516   : > { %v4948_v7 = vsel %vm2521_vm5, %v4900_v15, %v10583_v28  ;;  %v5092_v14 = vsel %vm2521_vm5, %v5044_v63, %v10584_v24  ;;  %v5540_v6 = vadd.f32 %v5539_v50, %v5379_v9 }
 0x517   : > { %v4996_v21 = vsel %vm2570_vm6, %v4948_v7, %v10588_v45  ;;  %v5140_v1 = vsel %vm2570_vm6, %v5092_v14, %v10589_v0 }
 0x518   : > { %5559 = vmatmul.f32.gmra.mxu2 %v5140_v1  ;;  %5398 = vmatmul.f32.gmra.mxu3 %v4996_v21  ;;  %v5701_v49 = vadd.f32 %v5700_v23, %v5540_v6 }
 0x51a   : > { %v5766_v4 = vmul.f32 %v5701_v49, %v17665_v32 }
 0x51b   : > { %v10602_v43 = vpop.permute.xlu1 %10601  ;;  %v5381_v29 = vpop.f32.mrf.mxu3 }
 0x51c   : > { %v10604_v37 = vunpack.i.h.bf16 %v10602_v43  ;;  %v10603_v12 = vunpack.i.l.bf16 %v10602_v43  ;;  %5814 = vst.msk [vmem:[#allocation4 + $0x138] sm:$0xff] %vm2472_vm4, %v5766_v4  ;;  %v5900_v47 = vsel %vm2472_vm4, %v5766_v4, 0.0  ;;  %v5382_v46 = vadd.f32 %v15038_v42, %v5381_v29  ;;  %v5542_v35 = vpop.f32.mrf.mxu2 }
 0x51d   : > { %v5901_v40 = vadd.f32 %v5900_v47, %v5899_v3  ;;  %v5706_v27 = vpop.f32.mrf.mxu0 }
 0x51e   : > { %v4949_v22 = vsel %vm2521_vm5, %v4901_v39, %v10603_v12  ;;  %v5093_v51 = vsel %vm2521_vm5, %v5045_v48, %v10604_v37  ;;  %v5543_v16 = vadd.f32 %v5542_v35, %v5382_v46 }
 0x51f   : > { %v4997_v38 = vsel %vm2570_vm6, %v4949_v22, %v10608_v54  ;;  %v5141_v33 = vsel %vm2570_vm6, %v5093_v51, %v10609_v34 }
 0x520   : > { %5562 = vmatmul.f32.gmra.mxu2 %v5141_v33  ;;  %5401 = vmatmul.f32.gmra.mxu3 %v4997_v38  ;;  %v5704_v2 = vadd.f32 %v5703_v18, %v5543_v16 }
 0x522   : > { %5815 = vst.msk [vmem:[#allocation4 + $0x140] sm:$0xff] %vm2472_vm4, %v5704_v2  ;;  %v5902_v8 = vsel %vm2472_vm4, %v5704_v2, 0.0 }
 0x523   : > { %v5903_v30 = vadd.f32 %v5902_v8, %v5901_v40  ;;  %v5384_v11 = vpop.f32.mrf.mxu3 }
 0x524   : > { %v5385_v19 = vadd.f32 %v15038_v42, %v5384_v11  ;;  %v5545_v36 = vpop.f32.mrf.mxu2 }
 0x525   : > { %v5709_v58 = vpop.f32.mrf.mxu0 }
 0x526   : > { %v5546_v10 = vadd.f32 %v5545_v36, %v5385_v19 }
 0x528   : > { %v5707_v13 = vadd.f32 %v5706_v27, %v5546_v10 }
 0x52a   : > { %v5768_v25 = vmul.f32 %v5707_v13, %v17666_v44 }
 0x52c   : > { %5816 = vst.msk [vmem:[#allocation4 + $0x148] sm:$0xff] %vm2472_vm4, %v5768_v25  ;;  %v5904_v57 = vsel %vm2472_vm4, %v5768_v25, 0.0 }
 0x52d   : > { %v5905_v56 = vadd.f32 %v5904_v57, %v5903_v30  ;;  %v5712_v52 = vpop.f32.mrf.mxu0 }
 0x535   : > { %v5715_v63 = vpop.f32.mrf.mxu0 }
 0x55b   : > { %v5718_v14 = vpop.f32.mrf.mxu0 }
 0x563   : > { %v5721_v62 = vpop.f32.mrf.mxu0 }
 0x57a   : > { %v5724_v46 = vpop.f32.mrf.mxu0 }
 0x57b   : > { %v5548_v41 = vpop.f32.mrf.mxu2  ;;  %v5387_v60 = vpop.f32.mrf.mxu3 }
 0x57c   : > { %v5388_v53 = vadd.f32 %v15038_v42, %v5387_v60 }
 0x57e   : > { %v5549_v24 = vadd.f32 %v5548_v41, %v5388_v53 }
 0x580   : > { %v5710_v28 = vadd.f32 %v5709_v58, %v5549_v24 }
 0x582   : > { %v5769_v0 = vmul.f32 %v5710_v28, %v17665_v32 }
 0x583   : > { %v5551_v45 = vpop.f32.mrf.mxu2  ;;  %v5390_v20 = vpop.f32.mrf.mxu3 }
 0x584   : > { %5817 = vst.msk [vmem:[#allocation4 + $0x150] sm:$0xff] %vm2472_vm4, %v5769_v0  ;;  %v5391_v59 = vadd.f32 %v15038_v42, %v5390_v20  ;;  %v5906_v12 = vsel %vm2472_vm4, %v5769_v0, 0.0 }
 0x585   : > { %v5907_v48 = vadd.f32 %v5906_v12, %v5905_v56  ;;  %v5956_v56 = vld [vmem:[%s526_s29] sm:$0x1] }
 0x586   : > { %v5552_v15 = vadd.f32 %v5551_v45, %v5391_v59  ;;  %v6008_v12 = vld [vmem:[#allocation2 + $0x40] sm:$0xff] }
 0x588   : > { %v5713_v61 = vadd.f32 %v5712_v52, %v5552_v15 }
 0x58a   : > { %5818 = vst.msk [vmem:[#allocation4 + $0x158] sm:$0xff] %vm2472_vm4, %v5713_v61  ;;  %v5908_v54 = vsel %vm2472_vm4, %v5713_v61, 0.0 }
 0x58b   : > { %v5554_v55 = vpop.f32.mrf.mxu2  ;;  %v5393_v26 = vpop.f32.mrf.mxu3  ;;  %v5909_v29 = vadd.f32 %v5908_v54, %v5907_v48  ;;  %v6059_v54 = vld [vmem:[#allocation4 + $0x38] sm:$0xff]  ;;  %v6009_v48 = vld [vmem:[#allocation2 + $0x48] sm:$0xff] }
 0x58c   : > { %v5394_v9 = vadd.f32 %v15038_v42, %v5393_v26 }
 0x58e   : > { %v5555_v50 = vadd.f32 %v5554_v55, %v5394_v9  ;;  %v6052_v9 = vld [vmem:[#allocation4] sm:$0xff] }
 0x590   : > { %v5716_v7 = vadd.f32 %v5715_v63, %v5555_v50  ;;  %v6053_v50 = vld [vmem:[#allocation4 + $0x8] sm:$0xff] }
 0x592   : > { %v5771_v23 = vmul.f32 %v5716_v7, %v17666_v44  ;;  %v6054_v7 = vld [vmem:[#allocation4 + $0x10] sm:$0xff] }
 0x593   : > { %v5557_v3 = vpop.f32.mrf.mxu2  ;;  %v5396_v21 = vpop.f32.mrf.mxu3 }
 0x594   : > { %5819 = vst.msk [vmem:[#allocation4 + $0x160] sm:$0xff] %vm2472_vm4, %v5771_v23  ;;  %v5397_v1 = vadd.f32 %v15038_v42, %v5396_v21  ;;  %v5910_v39 = vsel %vm2472_vm4, %v5771_v23, 0.0  ;;  %v6056_v23 = vld [vmem:[#allocation4 + $0x20] sm:$0xff] }
 0x595   : > { %v5911_v51 = vadd.f32 %v5910_v39, %v5909_v29 }
 0x596   : > { %v5558_v6 = vadd.f32 %v5557_v3, %v5397_v1 }
 0x598   : > { %v5719_v31 = vadd.f32 %v5718_v14, %v5558_v6  ;;  %v6055_v14 = vld [vmem:[#allocation4 + $0x18] sm:$0xff]  ;;  %v6004_v6 = vld [vmem:[#allocation2 + $0x20] sm:$0xff] }
 0x59a   : > { %v5772_v5 = vmul.f32 %v5719_v31, %v17665_v32  ;;  %v6005_v31 = vld [vmem:[#allocation2 + $0x28] sm:$0xff] }
 0x59b   : > { %v5399_v49 = vpop.f32.mrf.mxu3  ;;  %v5560_v43 = vpop.f32.mrf.mxu2 }
 0x59c   : > { %5820 = vst.msk [vmem:[#allocation4 + $0x168] sm:$0xff] %vm2472_vm4, %v5772_v5  ;;  %v5400_v4 = vadd.f32 %v15038_v42, %v5399_v49  ;;  %v5912_v35 = vsel %vm2472_vm4, %v5772_v5, 0.0  ;;  %v6006_v5 = vld [vmem:[#allocation2 + $0x30] sm:$0xff]  ;;  %v6057_v49 = vld [vmem:[#allocation4 + $0x28] sm:$0xff] }
 0x59d   : > { %v5913_v33 = vadd.f32 %v5912_v35, %v5911_v51  ;;  %v6061_v51 = vld [vmem:[#allocation4 + $0x48] sm:$0xff] }
 0x59e   : > { %v5561_v37 = vadd.f32 %v5560_v43, %v5400_v4  ;;  %v6007_v43 = vld [vmem:[#allocation2 + $0x38] sm:$0xff] }
 0x5a0   : > { %v5722_v34 = vadd.f32 %v5721_v62, %v5561_v37  ;;  %v6058_v37 = vld [vmem:[#allocation4 + $0x30] sm:$0xff] }
 0x5a2   : > { %5821 = vst.msk [vmem:[#allocation4 + $0x170] sm:$0xff] %vm2472_vm4, %v5722_v34  ;;  %v5914_v40 = vsel %vm2472_vm4, %v5722_v34, 0.0 }
 0x5a3   : > { %v5402_v17 = vpop.f32.mrf.mxu3  ;;  %v5563_v47 = vpop.f32.mrf.mxu2  ;;  %v5915_v18 = vadd.f32 %v5914_v40, %v5913_v33  ;;  %v6011_v40 = vld [vmem:[#allocation2 + $0x58] sm:$0xff] }
 0x5a4   : > { %v5403_v32 = vadd.f32 %v15038_v42, %v5402_v17 }
 0x5a6   : > { %v5564_v22 = vadd.f32 %v5563_v47, %v5403_v32  ;;  %v6060_v47 = vld [vmem:[#allocation4 + $0x40] sm:$0xff] }
 0x5a8   : > { %v5725_v38 = vadd.f32 %v5724_v46, %v5564_v22  ;;  %v6010_v46 = vld [vmem:[#allocation2 + $0x50] sm:$0xff] }
 0x5aa   : > { %v5774_v16 = vmul.f32 %v5725_v38, %v17666_v44  ;;  %v5930_v44 = vld [vmem:[%s519_s14] sm:$0x1] }
 0x5ac   : > { %5822 = vst.msk [vmem:[#allocation4 + $0x178] sm:$0xff] %vm2472_vm4, %v5774_v16  ;;  %v5916_v2 = vsel %vm2472_vm4, %v5774_v16, 0.0  ;;  %v6062_v16 = vld [vmem:[#allocation4 + $0x50] sm:$0xff] }
 0x5ad   : > { %v5917_v42 = vadd.f32 %v5916_v2, %v5915_v18  ;;  %v6012_v18 = vld [vmem:[#allocation2 + $0x60] sm:$0xff] }
 0x5af   : > { %v5918_v8 = vrot.slane %v5917_v42, 4 }
 0x5b1   : > { %v5919_v30 = vadd.f32 %v5918_v8, %v5917_v42  ;;  %v6063_v8 = vld [vmem:[#allocation4 + $0x58] sm:$0xff] }
 0x5b3   : > { %v5920_v11 = vrot.slane %v5919_v30, 2 }
 0x5b5   : > { %v5921_v19 = vadd.f32 %v5920_v11, %v5919_v30  ;;  %v6013_v30 = vld [vmem:[#allocation2 + $0x68] sm:$0xff] }
 0x5b7   : > { %v5922_v36 = vrot.slane %v5921_v19, 1 }
 0x5b9   : > { %v5923_v10 = vadd.f32 %v5922_v36, %v5921_v19  ;;  %v6064_v36 = vld [vmem:[#allocation4 + $0x60] sm:$0xff] }
 0x5bb   : > { %v5925_v27 = vmul.f32 0.00390625, %v5923_v10  ;;  %v6014_v10 = vld [vmem:[#allocation2 + $0x70] sm:$0xff] }
 0x5bd   : > { %8991 = vmatmul.msk.f32.vlgmr.msra.gmra.mxu1 %vm2472_vm4, %v5925_v27 }
 0x63a   : > { %v5951_v13 = vpop.f32.mrf.mxu1 }
 0x63b   : > { %v5952_v25 = vadd.f32 %v5951_v13, %v5930_v44  ;;  %v6065_v13 = vld [vmem:[#allocation4 + $0x68] sm:$0xff] }
 0x63d   : > { %v5954_v57 = vmax.f32 %v5952_v25, 0.0  ;;  %v6015_v25 = vld [vmem:[#allocation2 + $0x78] sm:$0xff] }
 0x63f   : > { %8993 = vmatmul.msk.f32.vlgmr.msrb.gmra.mxu3 %vm5957_vm8, %v5954_v57 }
 0x6c2   : > { %v5982_v58 = vpop.f32.mrf.mxu3 }
 0x6c3   : > { %v5983_v41 = vadd.f32 %v5982_v58, %v5956_v56  ;;  %v6066_v58 = vld [vmem:[#allocation4 + $0x70] sm:$0xff] }
 0x6c5   : > { %v8994_v60 = vmul.f32 -1.442695, %v5983_v41  ;;  %v6016_v41 = vld [vmem:[#allocation2 + $0x80] sm:$0xff] }
 0x6c7   : > { %10612 = vpow2.f32 %v8994_v60 }
 0x6cd   : > { %v10613_v53 = vpop.eup %10612 }
 0x6ce   : > { %v5988_v52 = vadd.f32 1.0, %v10613_v53 }
 0x6d0   : > { %10614 = vrcp.f32 %v5988_v52  ;;  %v6000_v59 = vand.u32 2147483648, %v5988_v52  ;;  %vm5994_vm10 = vweird.f32 %v5988_v52  ;;  %v5998_v15 = vand.u32 2147483647, %v5988_v52 }
 0x6d2   : > { %v6001_v61 = vor.u32 1.1754944e-38, %v6000_v59  ;;  %vm5999_vm12 = vcmp.eq.f32.partialorder %v5998_v15, 8.507059e+37 }
 0x6d6   : > { %v10615_v24 = vpop.eup %10614 }
 0x6d7   : > { %v5990_v28 = vmul.f32 %v10615_v24, %v5988_v52  ;;  %vm5995_vm9 = vweird.f32 %v10615_v24  ;;  %v6067_v52 = vld [vmem:[#allocation4 + $0x78] sm:$0xff] }
 0x6d8   : > { %vm5996_vm11 = vmor %vm5994_vm10, %vm5995_vm9 }
 0x6d9   : > { %v5991_v0 = vsub.f32 1.0, %v5990_v28 }
 0x6db   : > { %v5992_v45 = vmul.f32 %v10615_v24, %v5991_v0 }
 0x6dd   : > { %v5993_v20 = vadd.f32 %v10615_v24, %v5992_v45  ;;  %v6068_v45 = vld [vmem:[#allocation4 + $0x80] sm:$0xff] }
 0x6df   : > { %v5997_v63 = vsel %vm5996_vm11, %v10615_v24, %v5993_v20  ;;  %v6017_v24 = vld [vmem:[#allocation2 + $0x88] sm:$0xff]  ;;  %v6018_v20 = vld [vmem:[#allocation2 + $0x90] sm:$0xff] }
 0x6e0   : > { %v6002_v55 = vsel %vm5999_vm12, %v6001_v61, %v5997_v63  ;;  %v6069_v63 = vld [vmem:[#allocation4 + $0x88] sm:$0xff]  ;;  %v6019_v61 = vld [vmem:[#allocation2 + $0x98] sm:$0xff] }
 0x6e1   : > { %v15145_v26 = vperm.slane %v6002_v55, 0 }
 0x6e3   : > { %v6101_v3 = vmul.f32 %v15145_v26, %v6052_v9  ;;  %v6102_v21 = vmul.f32 %v15145_v26, %v6053_v50  ;;  %v6103_v1 = vmul.f32 %v15145_v26, %v6054_v7  ;;  %v6104_v62 = vmul.f32 %v15145_v26, %v6055_v14  ;;  %v6070_v50 = vld [vmem:[#allocation4 + $0x90] sm:$0xff]  ;;  %v6020_v7 = vld [vmem:[#allocation2 + $0xa0] sm:$0xff] }
 0x6e4   : > { %v6105_v4 = vmul.f32 %v15145_v26, %v6056_v23  ;;  %v6106_v34 = vmul.f32 %v15145_v26, %v6057_v49  ;;  %v6107_v17 = vmul.f32 %v15145_v26, %v6058_v37  ;;  %v6108_v35 = vmul.f32 %v15145_v26, %v6059_v54  ;;  %v6024_v54 = vld [vmem:[#allocation2 + $0xc0] sm:$0xff] }
 0x6e5   : > { %v6149_v39 = vadd.f32 %v6101_v3, %v6004_v6  ;;  %v6150_v32 = vadd.f32 %v6102_v21, %v6005_v31  ;;  %v6151_v29 = vadd.f32 %v6103_v1, %v6006_v5  ;;  %v6152_v22 = vadd.f32 %v6104_v62, %v6007_v43  ;;  %v6071_v3 = vld [vmem:[#allocation4 + $0x98] sm:$0xff]  ;;  %v6021_v21 = vld [vmem:[#allocation2 + $0xa8] sm:$0xff]  ;;  %v6072_v31 = vld [vmem:[#allocation4 + $0xa0] sm:$0xff] }
 0x6e6   : > { %v6109_v38 = vmul.f32 %v15145_v26, %v6060_v47  ;;  %v6153_v33 = vadd.f32 %v6105_v4, %v6008_v12  ;;  %v6110_v2 = vmul.f32 %v15145_v26, %v6061_v51  ;;  %v6154_v42 = vadd.f32 %v6106_v34, %v6009_v48  ;;  %v6022_v5 = vld [vmem:[#allocation2 + $0xb0] sm:$0xff]  ;;  %v6073_v43 = vld [vmem:[#allocation4 + $0xa8] sm:$0xff]  ;;  %v6023_v4 = vld [vmem:[#allocation2 + $0xb8] sm:$0xff] }
 0x6e7   : > { %6197 = vst.msk [vmem:[#allocation2 + $0x20] sm:$0xff] %vm2472_vm4, %v6149_v39  ;;  %v6111_v11 = vmul.f32 %v15145_v26, %v6062_v16  ;;  %v6155_v19 = vadd.f32 %v6107_v17, %v6010_v46  ;;  %v6112_v27 = vmul.f32 %v15145_v26, %v6063_v8  ;;  %v6156_v44 = vadd.f32 %v6108_v35, %v6011_v40  ;;  %v6074_v34 = vld [vmem:[#allocation4 + $0xb0] sm:$0xff]  ;;  %v6075_v39 = vld [vmem:[#allocation4 + $0xb8] sm:$0xff]  ;;  %v6076_v46 = vld [vmem:[#allocation4 + $0xc0] sm:$0xff] }
 0x6e8   : > { %6198 = vst.msk [vmem:[#allocation2 + $0x28] sm:$0xff] %vm2472_vm4, %v6150_v32  ;;  %v6113_v57 = vmul.f32 %v15145_v26, %v6064_v36  ;;  %v6157_v56 = vadd.f32 %v6109_v38, %v6012_v18  ;;  %v6114_v60 = vmul.f32 %v15145_v26, %v6065_v13  ;;  %v6158_v53 = vadd.f32 %v6110_v2, %v6013_v30  ;;  %v6025_v32 = vld [vmem:[#allocation2 + $0xc8] sm:$0xff]  ;;  %v6026_v35 = vld [vmem:[#allocation2 + $0xd0] sm:$0xff]  ;;  %v6027_v38 = vld [vmem:[#allocation2 + $0xd8] sm:$0xff] }
 0x6e9   : > { %6199 = vst.msk [vmem:[#allocation2 + $0x30] sm:$0xff] %vm2472_vm4, %v6151_v29  ;;  %v6115_v28 = vmul.f32 %v15145_v26, %v6066_v58  ;;  %v6159_v0 = vadd.f32 %v6111_v11, %v6014_v10  ;;  %v6116_v59 = vmul.f32 %v15145_v26, %v6067_v52  ;;  %v6160_v15 = vadd.f32 %v6112_v27, %v6015_v25  ;;  %v6077_v40 = vld [vmem:[#allocation4 + $0xc8] sm:$0xff]  ;;  %v6078_v18 = vld [vmem:[#allocation4 + $0xd0] sm:$0xff]  ;;  %v6028_v2 = vld [vmem:[#allocation2 + $0xe0] sm:$0xff] }
 0x6ea   : > { %6200 = vst.msk [vmem:[#allocation2 + $0x38] sm:$0xff] %vm2472_vm4, %v6152_v22  ;;  %v6117_v55 = vmul.f32 %v15145_v26, %v6068_v45  ;;  %v6161_v9 = vadd.f32 %v6113_v57, %v6016_v41  ;;  %v6118_v14 = vmul.f32 %v15145_v26, %v6069_v63  ;;  %v6162_v23 = vadd.f32 %v6114_v60, %v6017_v24  ;;  %v6079_v30 = vld [vmem:[#allocation4 + $0xd8] sm:$0xff]  ;;  %v6029_v11 = vld [vmem:[#allocation2 + $0xe8] sm:$0xff]  ;;  %v6080_v10 = vld [vmem:[#allocation4 + $0xe0] sm:$0xff] }
 0x6eb   : > { %6201 = vst.msk [vmem:[#allocation2 + $0x40] sm:$0xff] %vm2472_vm4, %v6153_v33  ;;  %v6119_v1 = vmul.f32 %v15145_v26, %v6070_v50  ;;  %v6163_v6 = vadd.f32 %v6115_v28, %v6018_v20  ;;  %v6120_v62 = vmul.f32 %v15145_v26, %v6071_v3  ;;  %v6164_v49 = vadd.f32 %v6116_v59, %v6019_v61  ;;  %v6030_v27 = vld [vmem:[#allocation2 + $0xf0] sm:$0xff]  ;;  %v6081_v25 = vld [vmem:[#allocation4 + $0xe8] sm:$0xff]  ;;  %v6031_v57 = vld [vmem:[#allocation2 + $0xf8] sm:$0xff] }
 0x6ec   : > { %6202 = vst.msk [vmem:[#allocation2 + $0x48] sm:$0xff] %vm2472_vm4, %v6154_v42  ;;  %v6121_v37 = vmul.f32 %v15145_v26, %v6072_v31  ;;  %v6165_v12 = vadd.f32 %v6117_v55, %v6020_v7  ;;  %v6122_v48 = vmul.f32 %v15145_v26, %v6073_v43  ;;  %v6166_v17 = vadd.f32 %v6118_v14, %v6021_v21  ;;  %v6082_v41 = vld [vmem:[#allocation4 + $0xf0] sm:$0xff]  ;;  %v6032_v60 = vld [vmem:[#allocation2 + $0x100] sm:$0xff]  ;;  %v6083_v24 = vld [vmem:[#allocation4 + $0xf8] sm:$0xff] }
 0x6ed   : > { %6203 = vst.msk [vmem:[#allocation2 + $0x50] sm:$0xff] %vm2472_vm4, %v6155_v19  ;;  %v6123_v29 = vmul.f32 %v15145_v26, %v6074_v34  ;;  %v6167_v47 = vadd.f32 %v6119_v1, %v6022_v5  ;;  %v6124_v22 = vmul.f32 %v15145_v26, %v6075_v39  ;;  %v6168_v51 = vadd.f32 %v6120_v62, %v6023_v4  ;;  %v6033_v28 = vld [vmem:[#allocation2 + $0x108] sm:$0xff]  ;;  %v6084_v20 = vld [vmem:[#allocation4 + $0x100] sm:$0xff]  ;;  %v6034_v59 = vld [vmem:[#allocation2 + $0x110] sm:$0xff] }
 0x6ee   : > { %6204 = vst.msk [vmem:[#allocation2 + $0x58] sm:$0xff] %vm2472_vm4, %v6156_v44  ;;  %v6125_v33 = vmul.f32 %v15145_v26, %v6076_v46  ;;  %v6169_v16 = vadd.f32 %v6121_v37, %v6024_v54  ;;  %v6126_v42 = vmul.f32 %v15145_v26, %v6077_v40  ;;  %v6170_v8 = vadd.f32 %v6122_v48, %v6025_v32  ;;  %v6085_v61 = vld [vmem:[#allocation4 + $0x108] sm:$0xff]  ;;  %v6035_v55 = vld [vmem:[#allocation2 + $0x118] sm:$0xff]  ;;  %v6086_v7 = vld [vmem:[#allocation4 + $0x110] sm:$0xff] }
 0x6ef   : > { %6205 = vst.msk [vmem:[#allocation2 + $0x60] sm:$0xff] %vm2472_vm4, %v6157_v56  ;;  %v6127_v19 = vmul.f32 %v15145_v26, %v6078_v18  ;;  %v6171_v36 = vadd.f32 %v6123_v29, %v6026_v35  ;;  %v6128_v44 = vmul.f32 %v15145_v26, %v6079_v30  ;;  %v6172_v13 = vadd.f32 %v6124_v22, %v6027_v38  ;;  %v6036_v14 = vld [vmem:[#allocation2 + $0x120] sm:$0xff]  ;;  %v6087_v21 = vld [vmem:[#allocation4 + $0x118] sm:$0xff]  ;;  %v6037_v1 = vld [vmem:[#allocation2 + $0x128] sm:$0xff] }
 0x6f0   : > { %6206 = vst.msk [vmem:[#allocation2 + $0x68] sm:$0xff] %vm2472_vm4, %v6158_v53  ;;  %v6129_v56 = vmul.f32 %v15145_v26, %v6080_v10  ;;  %v6173_v58 = vadd.f32 %v6125_v33, %v6028_v2  ;;  %v6130_v53 = vmul.f32 %v15145_v26, %v6081_v25  ;;  %v6174_v52 = vadd.f32 %v6126_v42, %v6029_v11  ;;  %v6088_v5 = vld [vmem:[#allocation4 + $0x120] sm:$0xff]  ;;  %v6038_v62 = vld [vmem:[#allocation2 + $0x130] sm:$0xff]  ;;  %v6089_v4 = vld [vmem:[#allocation4 + $0x128] sm:$0xff] }
 0x6f1   : > { %6207 = vst.msk [vmem:[#allocation2 + $0x70] sm:$0xff] %vm2472_vm4, %v6159_v0  ;;  %v6131_v0 = vmul.f32 %v15145_v26, %v6082_v41  ;;  %v6175_v45 = vadd.f32 %v6127_v19, %v6030_v27  ;;  %v6176_v63 = vadd.f32 %v6128_v44, %v6031_v57  ;;  %v6039_v37 = vld [vmem:[#allocation2 + $0x138] sm:$0xff]  ;;  %v6090_v54 = vld [vmem:[#allocation4 + $0x130] sm:$0xff]  ;;  %v6040_v48 = vld [vmem:[#allocation2 + $0x140] sm:$0xff] }
 0x6f2   : > { %6208 = vst.msk [vmem:[#allocation2 + $0x78] sm:$0xff] %vm2472_vm4, %v6160_v15  ;;  %v6132_v15 = vmul.f32 %v15145_v26, %v6083_v24  ;;  %v6177_v50 = vadd.f32 %v6129_v56, %v6032_v60  ;;  %v6178_v3 = vadd.f32 %v6130_v53, %v6033_v28  ;;  %v6091_v32 = vld [vmem:[#allocation4 + $0x138] sm:$0xff]  ;;  %v6041_v29 = vld [vmem:[#allocation2 + $0x148] sm:$0xff]  ;;  %v6092_v35 = vld [vmem:[#allocation4 + $0x140] sm:$0xff] }
 0x6f3   : > { %6209 = vst.msk [vmem:[#allocation2 + $0x80] sm:$0xff] %vm2472_vm4, %v6161_v9  ;;  %v6133_v9 = vmul.f32 %v15145_v26, %v6084_v20  ;;  %v6179_v31 = vadd.f32 %v6131_v0, %v6034_v59  ;;  %v6042_v22 = vld [vmem:[#allocation2 + $0x150] sm:$0xff]  ;;  %v6093_v38 = vld [vmem:[#allocation4 + $0x148] sm:$0xff]  ;;  %v6043_v33 = vld [vmem:[#allocation2 + $0x158] sm:$0xff] }
 0x6f4   : > { %6210 = vst.msk [vmem:[#allocation2 + $0x88] sm:$0xff] %vm2472_vm4, %v6162_v23  ;;  %v6134_v23 = vmul.f32 %v15145_v26, %v6085_v61  ;;  %v6180_v43 = vadd.f32 %v6132_v15, %v6035_v55  ;;  %v6094_v2 = vld [vmem:[#allocation4 + $0x150] sm:$0xff]  ;;  %v6044_v42 = vld [vmem:[#allocation2 + $0x160] sm:$0xff]  ;;  %v6095_v11 = vld [vmem:[#allocation4 + $0x158] sm:$0xff] }
 0x6f5   : > { %6211 = vst.msk [vmem:[#allocation2 + $0x90] sm:$0xff] %vm2472_vm4, %v6163_v6  ;;  %v6135_v6 = vmul.f32 %v15145_v26, %v6086_v7  ;;  %v6181_v34 = vadd.f32 %v6133_v9, %v6036_v14  ;;  %v6045_v19 = vld [vmem:[#allocation2 + $0x168] sm:$0xff]  ;;  %v6096_v27 = vld [vmem:[#allocation4 + $0x160] sm:$0xff]  ;;  %v6046_v44 = vld [vmem:[#allocation2 + $0x170] sm:$0xff] }
 0x6f6   : > { %6212 = vst.msk [vmem:[#allocation2 + $0x98] sm:$0xff] %vm2472_vm4, %v6164_v49  ;;  %v6136_v49 = vmul.f32 %v15145_v26, %v6087_v21  ;;  %v6182_v39 = vadd.f32 %v6134_v23, %v6037_v1  ;;  %v6097_v57 = vld [vmem:[#allocation4 + $0x168] sm:$0xff]  ;;  %v6047_v56 = vld [vmem:[#allocation2 + $0x178] sm:$0xff]  ;;  %v6098_v60 = vld [vmem:[#allocation4 + $0x170] sm:$0xff] }
 0x6f7   : > { %6213 = vst.msk [vmem:[#allocation2 + $0xa0] sm:$0xff] %vm2472_vm4, %v6165_v12  ;;  %v6137_v12 = vmul.f32 %v15145_v26, %v6088_v5  ;;  %v6183_v46 = vadd.f32 %v6135_v6, %v6038_v62  ;;  %v6048_v53 = vld [vmem:[#allocation2 + $0x180] sm:$0xff]  ;;  %v6099_v28 = vld [vmem:[#allocation4 + $0x178] sm:$0xff]  ;;  %v6049_v0 = vld [vmem:[#allocation2 + $0x188] sm:$0xff] }
 0x6f8   : > { %6214 = vst.msk [vmem:[#allocation2 + $0xa8] sm:$0xff] %vm2472_vm4, %v6166_v17  ;;  %v6138_v17 = vmul.f32 %v15145_v26, %v6089_v4  ;;  %v6184_v40 = vadd.f32 %v6136_v49, %v6039_v37  ;;  %v6050_v59 = vld [vmem:[#allocation2 + $0x190] sm:$0xff]  ;;  %v6148_v15 = vmul.f32 %v15145_v26, %v6099_v28  ;;  %v6051_v61 = vld [vmem:[#allocation2 + $0x198] sm:$0xff] }
 0x6f9   : > { %6215 = vst.msk [vmem:[#allocation2 + $0xb0] sm:$0xff] %vm2472_vm4, %v6167_v47  ;;  %v6139_v47 = vmul.f32 %v15145_v26, %v6090_v54  ;;  %v6185_v18 = vadd.f32 %v6137_v12, %v6040_v48 }
 0x6fa   : > { %6216 = vst.msk [vmem:[#allocation2 + $0xb8] sm:$0xff] %vm2472_vm4, %v6168_v51  ;;  %v6140_v51 = vmul.f32 %v15145_v26, %v6091_v32  ;;  %v6186_v30 = vadd.f32 %v6138_v17, %v6041_v29  ;;  %v6196_v7 = vadd.f32 %v6148_v15, %v6051_v61 }
 0x6fb   : > { %6217 = vst.msk [vmem:[#allocation2 + $0xc0] sm:$0xff] %vm2472_vm4, %v6169_v16  ;;  %v6141_v16 = vmul.f32 %v15145_v26, %v6092_v35  ;;  %v6187_v10 = vadd.f32 %v6139_v47, %v6042_v22 }
 0x6fc   : > { %6218 = vst.msk [vmem:[#allocation2 + $0xc8] sm:$0xff] %vm2472_vm4, %v6170_v8  ;;  %v6142_v8 = vmul.f32 %v15145_v26, %v6093_v38  ;;  %v6188_v25 = vadd.f32 %v6140_v51, %v6043_v33 }
 0x6fd   : > { %6219 = vst.msk [vmem:[#allocation2 + $0xd0] sm:$0xff] %vm2472_vm4, %v6171_v36  ;;  %v6143_v36 = vmul.f32 %v15145_v26, %v6094_v2  ;;  %v6189_v41 = vadd.f32 %v6141_v16, %v6044_v42 }
 0x6fe   : > { %6220 = vst.msk [vmem:[#allocation2 + $0xd8] sm:$0xff] %vm2472_vm4, %v6172_v13  ;;  %v6144_v13 = vmul.f32 %v15145_v26, %v6095_v11  ;;  %v6190_v24 = vadd.f32 %v6142_v8, %v6045_v19 }
 0x6ff   : > { %6221 = vst.msk [vmem:[#allocation2 + $0xe0] sm:$0xff] %vm2472_vm4, %v6173_v58  ;;  %v6145_v58 = vmul.f32 %v15145_v26, %v6096_v27  ;;  %v6191_v20 = vadd.f32 %v6143_v36, %v6046_v44 }
 0x700   : > { %6222 = vst.msk [vmem:[#allocation2 + $0xe8] sm:$0xff] %vm2472_vm4, %v6174_v52  ;;  %v6146_v52 = vmul.f32 %v15145_v26, %v6097_v57 }
 0x701   : > { %6223 = vst.msk [vmem:[#allocation2 + $0xf0] sm:$0xff] %vm2472_vm4, %v6175_v45  ;;  %v6147_v45 = vmul.f32 %v15145_v26, %v6098_v60  ;;  %v6193_v55 = vadd.f32 %v6145_v58, %v6048_v53 }
 0x702   : > { %6224 = vst.msk [vmem:[#allocation2 + $0xf8] sm:$0xff] %vm2472_vm4, %v6176_v63  ;;  %v6192_v63 = vadd.f32 %v6144_v13, %v6047_v56  ;;  %v6194_v9 = vadd.f32 %v6146_v52, %v6049_v0 }
 0x703   : > { %6225 = vst.msk [vmem:[#allocation2 + $0x100] sm:$0xff] %vm2472_vm4, %v6177_v50  ;;  %v6195_v50 = vadd.f32 %v6147_v45, %v6050_v59 }
 0x704   : > { %6226 = vst.msk [vmem:[#allocation2 + $0x108] sm:$0xff] %vm2472_vm4, %v6178_v3 }
 0x705   : > { %6227 = vst.msk [vmem:[#allocation2 + $0x110] sm:$0xff] %vm2472_vm4, %v6179_v31 }
 0x706   : > { %6228 = vst.msk [vmem:[#allocation2 + $0x118] sm:$0xff] %vm2472_vm4, %v6180_v43 }
 0x707   : > { %6229 = vst.msk [vmem:[#allocation2 + $0x120] sm:$0xff] %vm2472_vm4, %v6181_v34 }
 0x708   : > { %6230 = vst.msk [vmem:[#allocation2 + $0x128] sm:$0xff] %vm2472_vm4, %v6182_v39 }
 0x709   : > { %6231 = vst.msk [vmem:[#allocation2 + $0x130] sm:$0xff] %vm2472_vm4, %v6183_v46 }
 0x70a   : > { %6232 = vst.msk [vmem:[#allocation2 + $0x138] sm:$0xff] %vm2472_vm4, %v6184_v40 }
 0x70b   : > { %6233 = vst.msk [vmem:[#allocation2 + $0x140] sm:$0xff] %vm2472_vm4, %v6185_v18 }
 0x70c   : > { %6234 = vst.msk [vmem:[#allocation2 + $0x148] sm:$0xff] %vm2472_vm4, %v6186_v30 }
 0x70d   : > { %6235 = vst.msk [vmem:[#allocation2 + $0x150] sm:$0xff] %vm2472_vm4, %v6187_v10 }
 0x70e   : > { %6236 = vst.msk [vmem:[#allocation2 + $0x158] sm:$0xff] %vm2472_vm4, %v6188_v25 }
 0x70f   : > { %6237 = vst.msk [vmem:[#allocation2 + $0x160] sm:$0xff] %vm2472_vm4, %v6189_v41 }
 0x710   : > { %6238 = vst.msk [vmem:[#allocation2 + $0x168] sm:$0xff] %vm2472_vm4, %v6190_v24 }
 0x711   : > { %6239 = vst.msk [vmem:[#allocation2 + $0x170] sm:$0xff] %vm2472_vm4, %v6191_v20 }
 0x712   : > { %6240 = vst.msk [vmem:[#allocation2 + $0x178] sm:$0xff] %vm2472_vm4, %v6192_v63  ;;  %6248 = sbr.rel (%p8995_p8) target bundleno = 2539 (0x9eb), region = 72 }
 0x713   : > { %6241 = vst.msk [vmem:[#allocation2 + $0x180] sm:$0xff] %vm2472_vm4, %v6193_v55 }
 0x714   : > { %6242 = vst.msk [vmem:[#allocation2 + $0x188] sm:$0xff] %vm2472_vm4, %v6194_v9 }
 0x715   : > { %6243 = vst.msk [vmem:[#allocation2 + $0x190] sm:$0xff] %vm2472_vm4, %v6195_v50 }
 0x716   : > { %6244 = vst.msk [vmem:[#allocation2 + $0x198] sm:$0xff] %vm2472_vm4, %v6196_v7 }
 0x717   : > { %v6342_v26 = vld [vmem:[#allocation2 + $0x48] sm:$0xff]  ;;  %v6343_v14 = vld [vmem:[#allocation2 + $0x50] sm:$0xff]  ;;  %s11468_s24 = smov 32   ;;  %v6344_v62 = vld [vmem:[#allocation2 + $0x58] sm:$0xff]  ;;  %s11469_s17 = smov 64   ;;  %vm8521_vm13 = vcmask 1046528  }
 0x718   : > { %v6338_v23 = vld [vmem:[#allocation2 + $0x28] sm:$0xff]  ;;  %v15244_v3 = vpack.i.bf16 %v6343_v14, %v6342_v26  ;;  %v6339_v21 = vld [vmem:[#allocation2 + $0x30] sm:$0xff]  ;;  %v6345_v49 = vld [vmem:[#allocation2 + $0x60] sm:$0xff]  ;;  %s11470_s18 = smov 96  }
 0x719   : > { %v6334_v1 = vld [vmem:[#allocation2 + $0x8] sm:$0xff]  ;;  %v6335_v6 = vld [vmem:[#allocation2 + $0x10] sm:$0xff]  ;;  %v10676_v31 = vpack.i.bf16 %v6339_v21, %v6338_v23  ;;  %v6340_v43 = vld [vmem:[#allocation2 + $0x38] sm:$0xff]  ;;  %v15250_v34 = vpack.i.bf16 %v6345_v49, %v6344_v62 }
 0x71a   : > { %v10666_v5 = vpack.i.bf16 %v6335_v6, %v6334_v1  ;;  %10687 = vrot.lane.b32.xlu2 %v15244_v3, %s11468_s24  ;;  %v6341_v4 = vld [vmem:[#allocation2 + $0x40] sm:$0xff]  ;;  %v6336_v37 = vld [vmem:[#allocation2 + $0x18] sm:$0xff]  ;;  %v6350_v17 = vld [vmem:[#allocation2 + $0x88] sm:$0xff] }
 0x71b   : > { %10677 = vrot.lane.b32.xlu1 %v10676_v31, %s11468_s24  ;;  %v6337_v12 = vld [vmem:[#allocation2 + $0x20] sm:$0xff]  ;;  %17722 = vst [vmem:[#allocation77_spill] sm:$0xff] %v15250_v34  ;;  %v15252_v54 = vpack.i.bf16 %v6341_v4, %v6340_v43  ;;  %v6351_v39 = vld [vmem:[#allocation2 + $0x90] sm:$0xff]  ;;  %v15259_v32 = vld [vmem:[#allocation2 + $0x78] sm:$0xff] }
 0x71c   : > { %10667 = vrot.lane.b32.xlu0 %v10666_v5, %s11468_s24  ;;  %v10671_v48 = vpack.i.bf16 %v6337_v12, %v6336_v37  ;;  %17723 = vst [vmem:[#allocation78_spill] sm:$0xff] %v15259_v32  ;;  %v6349_v29 = vld [vmem:[#allocation2 + $0x80] sm:$0xff]  ;;  %v15261_v47 = vld [vmem:[#allocation2 + $0x68] sm:$0xff]  ;;  %v15263_v46 = vld [vmem:[#allocation2 + $0x70] sm:$0xff]  ;;  %v10706_v35 = vpack.i.bf16 %v6351_v39, %v6350_v17 }
 0x71d   : > { %17724 = vst [vmem:[#allocation79_spill] sm:$0xff] %v15261_v47  ;;  %v10701_v22 = vpack.i.bf16 %v6349_v29, %v15259_v32  ;;  %v10696_v51 = vpack.i.bf16 %v15263_v46, %v15261_v47  ;;  %v6356_v40 = vld [vmem:[#allocation2 + $0xb8] sm:$0xff]  ;;  %v6357_v38 = vld [vmem:[#allocation2 + $0xc0] sm:$0xff]  ;;  %v6354_v33 = vld [vmem:[#allocation2 + $0xa8] sm:$0xff] }
 0x71e   : > { %17725 = vst [vmem:[#allocation80_spill] sm:$0xff] %v15263_v46  ;;  %v6355_v16 = vld [vmem:[#allocation2 + $0xb0] sm:$0xff]  ;;  %v6352_v18 = vld [vmem:[#allocation2 + $0x98] sm:$0xff]  ;;  %v6353_v2 = vld [vmem:[#allocation2 + $0xa0] sm:$0xff]  ;;  %v10721_v42 = vpack.i.bf16 %v6357_v38, %v6356_v40 }
 0x71f   : > { %v10716_v8 = vpack.i.bf16 %v6355_v16, %v6354_v33  ;;  %v10711_v30 = vpack.i.bf16 %v6353_v2, %v6352_v18  ;;  %v6362_v11 = vld [vmem:[#allocation2 + $0xe8] sm:$0xff]  ;;  %v6363_v19 = vld [vmem:[#allocation2 + $0xf0] sm:$0xff]  ;;  %v6360_v36 = vld [vmem:[#allocation2 + $0xd8] sm:$0xff] }
 0x720   : > { %v6361_v10 = vld [vmem:[#allocation2 + $0xe0] sm:$0xff]  ;;  %v6358_v27 = vld [vmem:[#allocation2 + $0xc8] sm:$0xff]  ;;  %v6359_v44 = vld [vmem:[#allocation2 + $0xd0] sm:$0xff]  ;;  %v10736_v13 = vpack.i.bf16 %v6363_v19, %v6362_v11 }
 0x721   : > { %v10731_v25 = vpack.i.bf16 %v6361_v10, %v6360_v36  ;;  %v10726_v57 = vpack.i.bf16 %v6359_v44, %v6358_v27  ;;  %v6368_v56 = vld [vmem:[#allocation2 + $0x118] sm:$0xff]  ;;  %v6369_v58 = vld [vmem:[#allocation2 + $0x120] sm:$0xff]  ;;  %v6366_v41 = vld [vmem:[#allocation2 + $0x108] sm:$0xff] }
 0x722   : > { %10692 = vrot.lane.b32.xlu2 %v15250_v34, %s11468_s24  ;;  %v6367_v60 = vld [vmem:[#allocation2 + $0x110] sm:$0xff]  ;;  %v6364_v53 = vld [vmem:[#allocation2 + $0xf8] sm:$0xff]  ;;  %v6365_v52 = vld [vmem:[#allocation2 + $0x100] sm:$0xff]  ;;  %v10751_v24 = vpack.i.bf16 %v6369_v58, %v6368_v56 }
 0x723   : > { %10682 = vrot.lane.b32.xlu1 %v15252_v54, %s11468_s24  ;;  %v10746_v28 = vpack.i.bf16 %v6367_v60, %v6366_v41  ;;  %v10741_v0 = vpack.i.bf16 %v6365_v52, %v6364_v53  ;;  %v6374_v45 = vld [vmem:[#allocation2 + $0x148] sm:$0xff]  ;;  %v6375_v20 = vld [vmem:[#allocation2 + $0x150] sm:$0xff]  ;;  %v6372_v59 = vld [vmem:[#allocation2 + $0x138] sm:$0xff] }
 0x724   : > { %10672 = vrot.lane.b32.xlu0 %v10671_v48, %s11468_s24  ;;  %v6373_v15 = vld [vmem:[#allocation2 + $0x140] sm:$0xff]  ;;  %v6370_v63 = vld [vmem:[#allocation2 + $0x128] sm:$0xff]  ;;  %v6371_v61 = vld [vmem:[#allocation2 + $0x130] sm:$0xff]  ;;  %v10766_v55 = vpack.i.bf16 %v6375_v20, %v6374_v45 }
 0x725   : > { %v10761_v9 = vpack.i.bf16 %v6373_v15, %v6372_v59  ;;  %v10756_v50 = vpack.i.bf16 %v6371_v61, %v6370_v63  ;;  %v6380_v7 = vld [vmem:[#allocation2 + $0x178] sm:$0xff]  ;;  %v6381_v26 = vld [vmem:[#allocation2 + $0x180] sm:$0xff]  ;;  %v6378_v14 = vld [vmem:[#allocation2 + $0x168] sm:$0xff] }
 0x726   : > { %v6379_v23 = vld [vmem:[#allocation2 + $0x170] sm:$0xff]  ;;  %v6376_v21 = vld [vmem:[#allocation2 + $0x158] sm:$0xff]  ;;  %v6377_v1 = vld [vmem:[#allocation2 + $0x160] sm:$0xff]  ;;  %v10781_v6 = vpack.i.bf16 %v6381_v26, %v6380_v7 }
 0x727   : > { %v10776_v31 = vpack.i.bf16 %v6379_v23, %v6378_v14  ;;  %v10771_v5 = vpack.i.bf16 %v6377_v1, %v6376_v21  ;;  %v15286_v62 = vld [vmem:[#allocation2 + $0x29] sm:$0xff]  ;;  %v15288_v49 = vld [vmem:[#allocation2 + $0x31] sm:$0xff]  ;;  %v6384_v43 = vld [vmem:[#allocation2 + $0x19] sm:$0xff] }
 0x728   : > { %v15290_v4 = vld [vmem:[#allocation2 + $0x21] sm:$0xff]  ;;  %v6382_v37 = vld [vmem:[#allocation2 + $0x9] sm:$0xff]  ;;  %v6383_v12 = vld [vmem:[#allocation2 + $0x11] sm:$0xff]  ;;  %v10796_v48 = vpack.i.bf16 %v15288_v49, %v15286_v62 }
 0x729   : > { %v10791_v17 = vpack.i.bf16 %v15290_v4, %v6384_v43  ;;  %v10786_v39 = vpack.i.bf16 %v6383_v12, %v6382_v37  ;;  %v15296_v29 = vld [vmem:[#allocation2 + $0x59] sm:$0xff]  ;;  %v15307_v40 = vld [vmem:[#allocation2 + $0x51] sm:$0xff]  ;;  %v15311_v33 = vld [vmem:[#allocation2 + $0x41] sm:$0xff] }
 0x72a   : > { %10707 = vrot.lane.b32.xlu2 %v10706_v35, %s11468_s24  ;;  %v15300_v35 = vld [vmem:[#allocation2 + $0x61] sm:$0xff]  ;;  %v15309_v38 = vld [vmem:[#allocation2 + $0x39] sm:$0xff]  ;;  %v6283_v16 = vld [vmem:[%s17366_s9 + $0x110] sm:$0xff] }
 0x72b   : > { %10702 = vrot.lane.b32.xlu1 %v10701_v22, %s11468_s24  ;;  %17726 = vst [vmem:[#allocation81_spill] sm:$0xff] %v15300_v35  ;;  %v15302_v22 = vld [vmem:[#allocation2 + $0x49] sm:$0xff]  ;;  %v10811_v2 = vpack.i.bf16 %v15300_v35, %v15296_v29  ;;  %v15333_v19 = vld [vmem:[#allocation2 + $0x91] sm:$0xff]  ;;  %v15335_v36 = vld [vmem:[#allocation2 + $0x79] sm:$0xff] }
 0x72c   : > { %10697 = vrot.lane.b32.xlu0 %v10696_v51, %s11468_s24  ;;  %v6284_v51 = vld [vmem:[%s17366_s9 + $0x118] sm:$0xff]  ;;  %v6282_v18 = vld [vmem:[%s17366_s9 + $0x108] sm:$0xff]  ;;  %17728 = vst [vmem:[#allocation83_spill] sm:$0xff] %v15335_v36 }
 0x72d   : > { %8324 = vmatpush.msra.mxu2 %v6284_v51  ;;  %v15331_v11 = vld [vmem:[#allocation2 + $0x89] sm:$0xff]  ;;  %v15337_v10 = vld [vmem:[#allocation2 + $0x81] sm:$0xff]  ;;  %v15341_v44 = vld [vmem:[#allocation2 + $0x71] sm:$0xff] }
 0x72e   : > { %17727 = vst [vmem:[#allocation82_spill] sm:$0xff] %v15331_v11  ;;  %v15339_v27 = vld [vmem:[#allocation2 + $0x69] sm:$0xff]  ;;  %v15354_v56 = vld [vmem:[#allocation2 + $0xb9] sm:$0xff]  ;;  %v15356_v58 = vld [vmem:[#allocation2 + $0xc1] sm:$0xff] }
 0x72f   : > { %8325 = vmatpush.msra.mxu2 %v6283_v16  ;;  %17729 = vst [vmem:[#allocation84_spill] sm:$0xff] %v15337_v10  ;;  %v15358_v41 = vld [vmem:[#allocation2 + $0xa9] sm:$0xff]  ;;  %v15360_v60 = vld [vmem:[#allocation2 + $0xb1] sm:$0xff]  ;;  %v15362_v53 = vld [vmem:[#allocation2 + $0x99] sm:$0xff] }
 0x730   : > { %17730 = vst [vmem:[#allocation85_spill] sm:$0xff] %v15339_v27  ;;  %v15364_v52 = vld [vmem:[#allocation2 + $0xa1] sm:$0xff]  ;;  %v6410_v45 = vld [vmem:[#allocation2 + $0xe9] sm:$0xff]  ;;  %v6411_v20 = vld [vmem:[#allocation2 + $0xf1] sm:$0xff] }
 0x731   : > { %8326 = vmatpush.msra.mxu2 %v6282_v18  ;;  %17731 = vst [vmem:[#allocation86_spill] sm:$0xff] %v15341_v44  ;;  %v15377_v59 = vld [vmem:[#allocation2 + $0xd9] sm:$0xff]  ;;  %v15381_v63 = vld [vmem:[#allocation2 + $0xe1] sm:$0xff]  ;;  %v15383_v61 = vld [vmem:[#allocation2 + $0xc9] sm:$0xff] }
 0x732   : > { %10722 = vrot.lane.b32.xlu2 %v10721_v42, %s11468_s24  ;;  %v10806_v42 = vpack.i.bf16 %v15307_v40, %v15302_v22  ;;  %17732 = vst [vmem:[#allocation87_spill] sm:$0xff] %v15354_v56  ;;  %v6416_v26 = vld [vmem:[#allocation2 + $0x119] sm:$0xff]  ;;  %v6417_v14 = vld [vmem:[#allocation2 + $0x121] sm:$0xff]  ;;  %v6414_v23 = vld [vmem:[#allocation2 + $0x109] sm:$0xff] }
 0x733   : > { %10717 = vrot.lane.b32.xlu1 %v10716_v8, %s11468_s24  ;;  %v10801_v8 = vpack.i.bf16 %v15311_v33, %v15309_v38  ;;  %17733 = vst [vmem:[#allocation88_spill] sm:$0xff] %v15356_v58  ;;  %v6415_v1 = vld [vmem:[#allocation2 + $0x111] sm:$0xff]  ;;  %v6422_v12 = vld [vmem:[#allocation2 + $0x149] sm:$0xff]  ;;  %v15405_v51 = vld [vmem:[#allocation2 + $0x141] sm:$0xff] }
 0x734   : > { %10712 = vrot.lane.b32.xlu0 %v10711_v30, %s11468_s24  ;;  %v6281_v30 = vld [vmem:[%s17366_s9 + $0x100] sm:$0xff]  ;;  %17734 = vst [vmem:[#allocation89_spill] sm:$0xff] %v15377_v59  ;;  %v10866_v43 = vpack.i.bf16 %v6415_v1, %v6414_v23  ;;  %v6418_v16 = vld [vmem:[#allocation2 + $0x129] sm:$0xff]  ;;  %v6419_v18 = vld [vmem:[#allocation2 + $0x131] sm:$0xff] }
 0x735   : > { %8327 = vmatpush.msra.mxu2 %v6281_v30  ;;  %17736 = vst [vmem:[#allocation91_spill] sm:$0xff] %v15381_v63  ;;  %v6428_v30 = vld [vmem:[#allocation2 + $0x179] sm:$0xff] }
 0x736   : > { %8996 = vmatmul.msk.f32.vlgmr.msra.gmra.mxu2 %vm2472_vm4, %v15309_v38  ;;  %17737 = vst [vmem:[#allocation92_spill] sm:$0xff] %v15383_v61  ;;  %v15428_v23 = vld [vmem:[#allocation2 + $0x37] sm:$0xff]  ;;  %v6289_v1 = vld [vmem:[#allocation2 + $0x1f] sm:$0xff] }
 0x737   : > { %17739 = vst [vmem:[#allocation94_spill] sm:$0xff] %v15405_v51  ;;  %v15538_v32 = vld [vmem:[#allocation2 + $0xb7] sm:$0xff] }
 0x73a   : > { %10737 = vrot.lane.b32.xlu2 %v10736_v13, %s11468_s24  ;;  %v10826_v13 = vpack.i.bf16 %v15333_v19, %v15331_v11 }
 0x73b   : > { %10732 = vrot.lane.b32.xlu1 %v10731_v25, %s11468_s24  ;;  %v10821_v25 = vpack.i.bf16 %v15337_v10, %v15335_v36 }
 0x73c   : > { %10727 = vrot.lane.b32.xlu0 %v10726_v57, %s11468_s24  ;;  %v10816_v57 = vpack.i.bf16 %v15341_v44, %v15339_v27 }
 0x73e   : > { %8997 = vmatmul.msk.f32.gmra.mxu2 %vm2472_vm4, %v15311_v33 }
 0x742   : > { %10752 = vrot.lane.b32.xlu2 %v10751_v24, %s11468_s24  ;;  %v10841_v24 = vpack.i.bf16 %v15356_v58, %v15354_v56 }
 0x743   : > { %10747 = vrot.lane.b32.xlu1 %v10746_v28, %s11468_s24  ;;  %v10836_v28 = vpack.i.bf16 %v15360_v60, %v15358_v41 }
 0x744   : > { %10742 = vrot.lane.b32.xlu0 %v10741_v0, %s11468_s24  ;;  %v10831_v0 = vpack.i.bf16 %v15364_v52, %v15362_v53 }
 0x746   : > { %8998 = vmatmul.msk.f32.gmra.mxu2 %vm2472_vm4, %v15302_v22 }
 0x74a   : > { %10767 = vrot.lane.b32.xlu2 %v10766_v55, %s11468_s24  ;;  %v15385_v55 = vld [vmem:[#allocation2 + $0xd1] sm:$0xff] }
 0x74b   : > { %10762 = vrot.lane.b32.xlu1 %v10761_v9, %s11468_s24  ;;  %17738 = vst [vmem:[#allocation93_spill] sm:$0xff] %v15385_v55  ;;  %v10856_v9 = vpack.i.bf16 %v6411_v20, %v6410_v45  ;;  %v10846_v7 = vpack.i.bf16 %v15385_v55, %v15383_v61  ;;  %v15518_v55 = vld [vmem:[#allocation2 + $0xcf] sm:$0xff]  ;;  %v15524_v61 = vld [vmem:[#allocation2 + $0xc7] sm:$0xff] }
 0x74c   : > { %10757 = vrot.lane.b32.xlu0 %v10756_v50, %s11468_s24  ;;  %v10851_v50 = vpack.i.bf16 %v15381_v63, %v15377_v59  ;;  %v15509_v63 = vld [vmem:[#allocation2 + $0x87] sm:$0xff]  ;;  %17743 = vst [vmem:[#allocation98_spill] sm:$0xff] %v15518_v55 }
 0x74d   : > { %17745 = vst [vmem:[#allocation100_spill] sm:$0xff] %v15524_v61 }
 0x74e   : > { %8999 = vmatmul.msk.f32.gmra.mxu2 %vm2472_vm4, %v15307_v40 }
 0x752   : > { %10782 = vrot.lane.b32.xlu2 %v10781_v6, %s11468_s24  ;;  %v6412_v6 = vld [vmem:[#allocation2 + $0xf9] sm:$0xff] }
 0x753   : > { %10777 = vrot.lane.b32.xlu1 %v10776_v31, %s11468_s24  ;;  %v6413_v31 = vld [vmem:[#allocation2 + $0x101] sm:$0xff] }
 0x754   : > { %10772 = vrot.lane.b32.xlu0 %v10771_v5, %s11468_s24  ;;  %v10871_v5 = vpack.i.bf16 %v6417_v14, %v6416_v26  ;;  %v10861_v37 = vpack.i.bf16 %v6413_v31, %v6412_v6  ;;  %v15424_v26 = vld [vmem:[#allocation2 + $0x3f] sm:$0xff] }
 0x756   : > { %9000 = vmatmul.msk.f32.gmra.mxu2 %vm2472_vm4, %v15296_v29 }
 0x75a   : > { %10797 = vrot.lane.b32.xlu2 %v10796_v48, %s11469_s17  ;;  %v6423_v48 = vld [vmem:[#allocation2 + $0x151] sm:$0xff] }
 0x75b   : > { %10792 = vrot.lane.b32.xlu1 %v10791_v17, %s11469_s17  ;;  %v6420_v17 = vld [vmem:[#allocation2 + $0x139] sm:$0xff] }
 0x75c   : > { %10787 = vrot.lane.b32.xlu0 %v10786_v39, %s11469_s17 }
 0x75e   : > { %9001 = vmatmul.msk.f32.gmra.mxu2 %vm2472_vm4, %v15300_v35 }
 0x762   : > { %10812 = vrot.lane.b32.xlu2 %v10811_v2, %s11469_s17  ;;  %v10886_v2 = vpack.i.bf16 %v6423_v48, %v6422_v12 }
 0x763   : > { %10807 = vrot.lane.b32.xlu1 %v10806_v42, %s11469_s17  ;;  %v10881_v42 = vpack.i.bf16 %v15405_v51, %v6420_v17  ;;  %v15439_v17 = vld [vmem:[#allocation2 + $0x2f] sm:$0xff] }
 0x764   : > { %10802 = vrot.lane.b32.xlu0 %v10801_v8, %s11469_s17  ;;  %v10876_v8 = vpack.i.bf16 %v6419_v18, %v6418_v16  ;;  %v15441_v16 = vld [vmem:[#allocation2 + $0x27] sm:$0xff]  ;;  %v10911_v18 = vpack.i.bf16 %v15428_v23, %v15439_v17 }
 0x766   : > { %9002 = vmatmul.msk.f32.gmra.mxu2 %vm2472_vm4, %v15339_v27 }
 0x76a   : > { %10827 = vrot.lane.b32.xlu2 %v10826_v13, %s11469_s17  ;;  %v6429_v13 = vld [vmem:[#allocation2 + $0x181] sm:$0xff] }
 0x76b   : > { %10822 = vrot.lane.b32.xlu1 %v10821_v25, %s11469_s17  ;;  %v6426_v25 = vld [vmem:[#allocation2 + $0x169] sm:$0xff] }
 0x76c   : > { %10817 = vrot.lane.b32.xlu0 %v10816_v57, %s11469_s17 }
 0x76e   : > { %9003 = vmatmul.msk.f32.gmra.mxu2 %vm2472_vm4, %v15341_v44 }
 0x772   : > { %10842 = vrot.lane.b32.xlu2 %v10841_v24, %s11469_s17  ;;  %v6427_v24 = vld [vmem:[#allocation2 + $0x171] sm:$0xff] }
 0x773   : > { %10837 = vrot.lane.b32.xlu1 %v10836_v28, %s11469_s17  ;;  %v6424_v28 = vld [vmem:[#allocation2 + $0x159] sm:$0xff] }
 0x774   : > { %10832 = vrot.lane.b32.xlu0 %v10831_v0, %s11469_s17  ;;  %v15379_v15 = vpop.permute.xlu2 %10687  ;;  %v6425_v0 = vld [vmem:[#allocation2 + $0x161] sm:$0xff] }
 0x775   : > { %17735 = vst [vmem:[#allocation90_spill] sm:$0xff] %v15379_v15 }
 0x776   : > { %9004 = vmatmul.msk.f32.gmra.mxu2 %vm2472_vm4, %v15335_v36  ;;  %v15520_v36 = vld [vmem:[#allocation2 + $0xd7] sm:$0xff] }
 0x777   : > { %17744 = vst [vmem:[#allocation99_spill] sm:$0xff] %v15520_v36 }
 0x77a   : > { %10857 = vrot.lane.b32.xlu2 %v10856_v9, %s11469_s17  ;;  %v10901_v9 = vpack.i.bf16 %v6429_v13, %v6428_v30  ;;  %v15460_v13 = vld [vmem:[#allocation2 + $0x6f] sm:$0xff] }
 0x77b   : > { %10852 = vrot.lane.b32.xlu1 %v10851_v50, %s11469_s17  ;;  %v10896_v50 = vpack.i.bf16 %v6427_v24, %v6426_v25  ;;  %v15462_v25 = vld [vmem:[#allocation2 + $0x77] sm:$0xff] }
 0x77c   : > { %10847 = vrot.lane.b32.xlu0 %v10846_v7, %s11469_s17  ;;  %v15396_v21 = vpop.permute.xlu2 %10692  ;;  %v10891_v7 = vpack.i.bf16 %v6425_v0, %v6424_v28  ;;  %v15466_v28 = vld [vmem:[#allocation2 + $0x67] sm:$0xff] }
 0x77d   : > { %v10694_v34 = vunpack.i.l.bf16 %v15396_v21 }
 0x77e   : > { %9005 = vmatmul.msk.f32.gmra.mxu2 %vm2472_vm4, %v15337_v10 }
 0x782   : > { %10872 = vrot.lane.b32.xlu2 %v10871_v5, %s11469_s17  ;;  %v15434_v5 = vld [vmem:[#allocation2 + $0x47] sm:$0xff] }
 0x783   : > { %10867 = vrot.lane.b32.xlu1 %v10866_v43, %s11469_s17  ;;  %v10916_v48 = vpack.i.bf16 %v15434_v5, %v15424_v26 }
 0x784   : > { %10862 = vrot.lane.b32.xlu0 %v10861_v37, %s11469_s17  ;;  %v15403_v39 = vpop.permute.xlu2 %10707 }
 0x786   : > { %9006 = vmatmul.msk.f32.gmra.mxu2 %vm2472_vm4, %v15331_v11 }
 0x78a   : > { %10887 = vrot.lane.b32.xlu2 %v10886_v2, %s11469_s17  ;;  %v10906_v2 = vpack.i.bf16 %v15441_v16, %v6289_v1 }
 0x78b   : > { %10882 = vrot.lane.b32.xlu1 %v10881_v42, %s11469_s17 }
 0x78c   : > { %10877 = vrot.lane.b32.xlu0 %v10876_v8, %s11469_s17  ;;  %v15413_v57 = vpop.permute.xlu2 %10722 }
 0x78d   : > { %v15417_v45 = vpop.permute.xlu1 %10677 }
 0x78e   : > { %v15419_v20 = vpop.permute.xlu0 %10667  ;;  %v10680_v10 = vunpack.i.h.bf16 %v15417_v45  ;;  %v10679_v46 = vunpack.i.l.bf16 %v15417_v45  ;;  %9007 = vmatmul.msk.f32.gmra.mxu2 %vm2472_vm4, %v15333_v19 }
 0x78f   : > { %17740 = vst [vmem:[#allocation95_spill] sm:$0xff] %v15419_v20 }
 0x790   : > { %v7605_v11 = vsel %vm2472_vm4, %v15439_v17, %v10680_v10  ;;  %v15590_v10 = vld [vmem:[#allocation2 + $0x137] sm:$0xff] }
 0x791   : > { %17757 = vst [vmem:[#allocation112_spill] sm:$0xff] %v15590_v10 }
 0x792   : > { %10902 = vrot.lane.b32.xlu2 %v10901_v9, %s11469_s17 }
 0x793   : > { %10897 = vrot.lane.b32.xlu1 %v10896_v50, %s11469_s17  ;;  %v10931_v50 = vpack.i.bf16 %v15462_v25, %v15460_v13 }
 0x794   : > { %10892 = vrot.lane.b32.xlu0 %v10891_v7, %s11469_s17  ;;  %v15426_v14 = vpop.permute.xlu2 %10737  ;;  %v15476_v7 = vld [vmem:[#allocation2 + $0x5f] sm:$0xff] }
 0x795   : > { %v10683_v6 = vpop.permute.xlu1 %10682 }
 0x796   : > { %v15432_v31 = vpop.permute.xlu0 %10672  ;;  %v10685_v43 = vunpack.i.h.bf16 %v10683_v6  ;;  %v10684_v37 = vunpack.i.l.bf16 %v10683_v6  ;;  %v15480_v6 = vld [vmem:[#allocation2 + $0x57] sm:$0xff]  ;;  %9008 = vmatmul.msk.f32.gmra.mxu2 %vm2472_vm4, %v15362_v53 }
 0x797   : > { %v10675_v12 = vunpack.i.h.bf16 %v15432_v31 }
 0x798   : > { %v15451_v8 = vsel %vm2472_vm4, %v15428_v23, %v10684_v37  ;;  %v15455_v30 = vsel %vm2472_vm4, %v15424_v26, %v10685_v43  ;;  %v10926_v43 = vpack.i.bf16 %v15466_v28, %v15476_v7 }
 0x799   : > { %v15447_v42 = vsel %vm2472_vm4, %v6289_v1, %v10675_v12  ;;  %v15478_v1 = vld [vmem:[#allocation2 + $0x4f] sm:$0xff]  ;;  %v15489_v12 = vld [vmem:[#allocation2 + $0x9f] sm:$0xff] }
 0x79a   : > { %10917 = vrot.lane.b32.xlu2 %v10916_v48, %s11470_s18  ;;  %v10921_v37 = vpack.i.bf16 %v15480_v6, %v15478_v1  ;;  %17741 = vst [vmem:[#allocation96_spill] sm:$0xff] %v15489_v12  ;;  %v15491_v48 = vld [vmem:[#allocation2 + $0xa7] sm:$0xff] }
 0x79b   : > { %10912 = vrot.lane.b32.xlu1 %v10911_v18, %s11470_s18  ;;  %17742 = vst [vmem:[#allocation97_spill] sm:$0xff] %v15491_v48 }
 0x79c   : > { %10907 = vrot.lane.b32.xlu0 %v10906_v2, %s11470_s18  ;;  %v15464_v24 = vpop.permute.xlu2 %10752  ;;  %v15495_v2 = vld [vmem:[#allocation2 + $0x97] sm:$0xff] }
 0x79d   : > { %v15470_v0 = vpop.permute.xlu1 %10702 }
 0x79e   : > { %v15472_v9 = vpop.permute.xlu0 %10697  ;;  %9009 = vmatmul.msk.f32.gmra.mxu2 %vm2472_vm4, %v15364_v52  ;;  %v6264_v52 = vld [vmem:[%s17366_s9 + $0x78] sm:$0xff] }
 0x79f   : > { %7990 = vmatpush.msra.mxu0 %v6264_v52  ;;  %9085 = vmatpush.msra.mxu3 %v6264_v52  ;;  %v10705_v52 = vunpack.i.h.bf16 %v15470_v0 }
 0x7a2   : > { %10932 = vrot.lane.b32.xlu2 %v10931_v50, %s11470_s18  ;;  %v10946_v50 = vpack.i.bf16 %v15491_v48, %v15489_v12  ;;  %v15567_v48 = vld [vmem:[#allocation2 + $0xe7] sm:$0xff]  ;;  %v7604_v12 = vsel %vm2472_vm4, %v15441_v16, %v10679_v46  ;;  %v15588_v46 = vld [vmem:[#allocation2 + $0x12f] sm:$0xff] }
 0x7a3   : > { %10927 = vrot.lane.b32.xlu1 %v10926_v43, %s11470_s18  ;;  %v15505_v43 = vld [vmem:[#allocation2 + $0x8f] sm:$0xff]  ;;  %17756 = vst [vmem:[#allocation111_spill] sm:$0xff] %v15588_v46 }
 0x7a4   : > { %10922 = vrot.lane.b32.xlu0 %v10921_v37, %s11470_s18  ;;  %v15493_v18 = vpop.permute.xlu2 %10767  ;;  %v15507_v37 = vld [vmem:[#allocation2 + $0x7f] sm:$0xff]  ;;  %v10941_v20 = vpack.i.bf16 %v15495_v2, %v15505_v43 }
 0x7a5   : > { %v15499_v15 = vpop.permute.xlu1 %10717  ;;  %v10936_v59 = vpack.i.bf16 %v15509_v63, %v15507_v37 }
 0x7a6   : > { %v15501_v51 = vpop.permute.xlu0 %10712  ;;  %9010 = vmatmul.msk.f32.gmra.mxu2 %vm2472_vm4, %v15358_v41  ;;  %v6262_v41 = vld [vmem:[%s17366_s9 + $0x68] sm:$0xff] }
 0x7aa   : > { %10947 = vrot.lane.b32.xlu2 %v10946_v50, %s11470_s18  ;;  %v15534_v50 = vld [vmem:[#allocation2 + $0xbf] sm:$0xff] }
 0x7ab   : > { %10942 = vrot.lane.b32.xlu1 %v10941_v20, %s11470_s18  ;;  %v10961_v20 = vpack.i.bf16 %v15520_v36, %v15518_v55  ;;  %17748 = vst [vmem:[#allocation103_spill] sm:$0xff] %v15534_v50  ;;  %v10956_v58 = vpack.i.bf16 %v15524_v61, %v15534_v50  ;;  %v15549_v36 = vld [vmem:[#allocation2 + $0xff] sm:$0xff]  ;;  %v15551_v55 = vld [vmem:[#allocation2 + $0x107] sm:$0xff] }
 0x7ac   : > { %10937 = vrot.lane.b32.xlu0 %v10936_v59, %s11470_s18  ;;  %v15522_v44 = vpop.permute.xlu2 %10782  ;;  %v15536_v59 = vld [vmem:[#allocation2 + $0xaf] sm:$0xff]  ;;  %17750 = vst [vmem:[#allocation105_spill] sm:$0xff] %v15549_v36 }
 0x7ad   : > { %v15528_v27 = vpop.permute.xlu1 %10732  ;;  %17749 = vst [vmem:[#allocation104_spill] sm:$0xff] %v15536_v59  ;;  %v10951_v47 = vpack.i.bf16 %v15538_v32, %v15536_v59 }
 0x7ae   : > { %17746 = vst [vmem:[#allocation101_spill] sm:$0xff] %v15528_v27  ;;  %v15530_v35 = vpop.permute.xlu0 %10727  ;;  %9011 = vmatmul.msk.f32.gmra.mxu2 %vm2472_vm4, %v15360_v60  ;;  %v6257_v60 = vld [vmem:[%s17366_s9 + $0x40] sm:$0xff] }
 0x7af   : > { %17747 = vst [vmem:[#allocation102_spill] sm:$0xff] %v15530_v35  ;;  %v15553_v35 = vld [vmem:[#allocation2 + $0xf7] sm:$0xff] }
 0x7b0   : > { %17751 = vst [vmem:[#allocation106_spill] sm:$0xff] %v15551_v55 }
 0x7b2   : > { %10962 = vrot.lane.b32.xlu2 %v10961_v20, %s11470_s18  ;;  %v15565_v20 = vld [vmem:[#allocation2 + $0xdf] sm:$0xff] }
 0x7b3   : > { %10957 = vrot.lane.b32.xlu1 %v10956_v58, %s11470_s18  ;;  %v10976_v58 = vpack.i.bf16 %v15551_v55, %v15549_v36 }
 0x7b4   : > { %10952 = vrot.lane.b32.xlu0 %v10951_v47, %s11470_s18  ;;  %v10798_v56 = vpop.permute.xlu2 %10797  ;;  %v15563_v47 = vld [vmem:[#allocation2 + $0xef] sm:$0xff] }
 0x7b5   : > { %v10800_v61 = vunpack.i.h.bf16 %v10798_v56  ;;  %v10799_v27 = vunpack.i.l.bf16 %v10798_v56  ;;  %v15557_v59 = vpop.permute.xlu1 %10747  ;;  %v10971_v56 = vpack.i.bf16 %v15553_v35, %v15563_v47 }
 0x7b6   : > { %17752 = vst [vmem:[#allocation107_spill] sm:$0xff] %v15557_v59  ;;  %v15559_v45 = vpop.permute.xlu0 %10742  ;;  %v10966_v59 = vpack.i.bf16 %v15567_v48, %v15565_v20 }
 0x7b7   : > { %17753 = vst [vmem:[#allocation108_spill] sm:$0xff] %v15559_v45  ;;  %v15578_v55 = vsel %vm2521_vm5, %v7604_v12, %v10799_v27  ;;  %v15581_v36 = vsel %vm2521_vm5, %v7605_v11, %v10800_v61  ;;  %v10695_v45 = vunpack.i.h.bf16 %v15396_v21  ;;  %v6322_v27 = vld [vmem:[#allocation2 + $0x127] sm:$0xff]  ;;  %v10991_v12 = vpack.i.bf16 %v15590_v10, %v15588_v46 }
 0x7b8   : > { %17754 = vst [vmem:[#allocation109_spill] sm:$0xff] %v15578_v55  ;;  %v10710_v46 = vunpack.i.h.bf16 %v15403_v39 }
 0x7b9   : > { %17755 = vst [vmem:[#allocation110_spill] sm:$0xff] %v15581_v36  ;;  %v7610_v36 = vsel %vm2472_vm4, %v15480_v6, %v10694_v34  ;;  %v7611_v19 = vsel %vm2472_vm4, %v15476_v7, %v10695_v45  ;;  %v15624_v45 = vld [vmem:[#allocation2 + $0x157] sm:$0xff] }
 0x7ba   : > { %10977 = vrot.lane.b32.xlu2 %v10976_v58, %s11470_s18  ;;  %v15600_v58 = vld [vmem:[#allocation2 + $0x11f] sm:$0xff]  ;;  %17762 = vst [vmem:[#allocation117_spill] sm:$0xff] %v15624_v45  ;;  %v7617_v53 = vsel %vm2472_vm4, %v15505_v43, %v10710_v46  ;;  %v6288_v46 = vld [vmem:[#allocation2 + $0x17] sm:$0xff] }
 0x7bb   : > { %10972 = vrot.lane.b32.xlu1 %v10971_v56, %s11470_s18  ;;  %v15604_v56 = vld [vmem:[#allocation2 + $0x117] sm:$0xff] }
 0x7bc   : > { %10967 = vrot.lane.b32.xlu0 %v10966_v59, %s11470_s18  ;;  %v10813_v17 = vpop.permute.xlu2 %10812  ;;  %v15602_v59 = vld [vmem:[#allocation2 + $0x10f] sm:$0xff] }
 0x7bd   : > { %v10815_v11 = vunpack.i.h.bf16 %v10813_v17  ;;  %v10814_v61 = vunpack.i.l.bf16 %v10813_v17  ;;  %v15594_v16 = vpop.permute.xlu1 %10762  ;;  %v10986_v17 = vpack.i.bf16 %v6322_v27, %v15600_v58  ;;  %v10981_v55 = vpack.i.bf16 %v15604_v56, %v15602_v59 }
 0x7be   : > { %17758 = vst [vmem:[#allocation113_spill] sm:$0xff] %v15594_v16  ;;  %v15596_v21 = vpop.permute.xlu0 %10757  ;;  %v10709_v16 = vunpack.i.l.bf16 %v15403_v39  ;;  %v11006_v39 = vpack.i.bf16 %v15286_v62, %v15290_v4 }
 0x7bf   : > { %17759 = vst [vmem:[#allocation114_spill] sm:$0xff] %v15596_v21  ;;  %v15614_v21 = vsel %vm2521_vm5, %v7610_v36, %v10814_v61  ;;  %v15617_v10 = vsel %vm2521_vm5, %v7611_v19, %v10815_v11  ;;  %v15636_v19 = vld [vmem:[#allocation2 + $0x13f] sm:$0xff] }
 0x7c0   : > { %17760 = vst [vmem:[#allocation115_spill] sm:$0xff] %v15614_v21  ;;  %v10724_v21 = vunpack.i.l.bf16 %v15413_v57 }
 0x7c1   : > { %17761 = vst [vmem:[#allocation116_spill] sm:$0xff] %v15617_v10  ;;  %v10725_v10 = vunpack.i.h.bf16 %v15413_v57 }
 0x7c2   : > { %10992 = vrot.lane.b32.xlu2 %v10991_v12, %s11470_s18  ;;  %v15634_v12 = vld [vmem:[#allocation2 + $0x14f] sm:$0xff]  ;;  %v7622_v57 = vsel %vm2472_vm4, %v15538_v32, %v10724_v21 }
 0x7c3   : > { %10987 = vrot.lane.b32.xlu1 %v10986_v17, %s11470_s18  ;;  %v7616_v17 = vsel %vm2472_vm4, %v15509_v63, %v10709_v16  ;;  %v10674_v16 = vunpack.i.l.bf16 %v15432_v31  ;;  %v7623_v31 = vsel %vm2472_vm4, %v15534_v50, %v10725_v10  ;;  %v15851_v50 = vld [vmem:[#allocation2 + $0x177] sm:$0xff] }
 0x7c4   : > { %10982 = vrot.lane.b32.xlu0 %v10981_v55, %s11470_s18  ;;  %v10828_v34 = vpop.permute.xlu2 %10827  ;;  %v15638_v55 = vld [vmem:[#allocation2 + $0x147] sm:$0xff] }
 0x7c5   : > { %v10830_v36 = vunpack.i.h.bf16 %v10828_v34  ;;  %v10829_v27 = vunpack.i.l.bf16 %v10828_v34  ;;  %v15628_v11 = vpop.permute.xlu1 %10777  ;;  %v11001_v34 = vpack.i.bf16 %v15624_v45, %v15634_v12 }
 0x7c6   : > { %17763 = vst [vmem:[#allocation118_spill] sm:$0xff] %v15628_v11  ;;  %v15630_v61 = vpop.permute.xlu0 %10772  ;;  %v10996_v11 = vpack.i.bf16 %v15638_v55, %v15636_v19 }
 0x7c7   : > { %v15649_v62 = vsel %vm2521_vm5, %v7616_v17, %v10829_v27  ;;  %v15652_v4 = vsel %vm2521_vm5, %v7617_v53, %v10830_v36 }
 0x7ca   : > { %11007 = vrot.lane.b32.xlu2 %v11006_v39, %s11468_s24 }
 0x7cb   : > { %11002 = vrot.lane.b32.xlu1 %v11001_v34, %s11470_s18 }
 0x7cc   : > { %10997 = vrot.lane.b32.xlu0 %v10996_v11, %s11470_s18  ;;  %v10843_v45 = vpop.permute.xlu2 %10842  ;;  %v11021_v11 = vpack.i.bf16 %v15309_v38, %v15288_v49  ;;  %v10739_v49 = vunpack.i.l.bf16 %v15426_v14 }
 0x7cd   : > { %v10845_v27 = vunpack.i.h.bf16 %v10843_v45  ;;  %v10844_v36 = vunpack.i.l.bf16 %v10843_v45  ;;  %v10793_v17 = vpop.permute.xlu1 %10792  ;;  %v7602_v45 = vsel %vm2472_vm4, %v6288_v46, %v10674_v16 }
 0x7ce   : > { %v15662_v53 = vpop.permute.xlu0 %10787  ;;  %v10795_v39 = vunpack.i.h.bf16 %v10793_v17  ;;  %v10794_v34 = vunpack.i.l.bf16 %v10793_v17  ;;  %v10740_v17 = vunpack.i.h.bf16 %v15426_v14  ;;  %v10755_v14 = vunpack.i.h.bf16 %v15464_v24 }
 0x7cf   : > { %17764 = vst [vmem:[#allocation119_spill] sm:$0xff] %v15662_v53  ;;  %v11011_v53 = vpack.i.bf16 %v15424_v26, %v15428_v23  ;;  %v15677_v21 = vsel %vm2521_vm5, %v7622_v57, %v10844_v36  ;;  %v15680_v10 = vsel %vm2521_vm5, %v7623_v31, %v10845_v27  ;;  %v6263_v26 = vld [vmem:[%s17366_s9 + $0x70] sm:$0xff]  ;;  %v10754_v23 = vunpack.i.l.bf16 %v15464_v24 }
 0x7d0   : > { %v15685_v38 = vsel %vm2521_vm5, %v7602_v45, %v10794_v34  ;;  %v15689_v16 = vsel %vm2521_vm5, %v15447_v42, %v10795_v39  ;;  %7991 = vmatpush.msra.mxu0 %v6263_v26  ;;  %v7628_v42 = vsel %vm2472_vm4, %v15567_v48, %v10739_v49  ;;  %v10704_v27 = vunpack.i.l.bf16 %v15470_v0  ;;  %9086 = vmatpush.msra.mxu3 %v6263_v26 }
 0x7d1   : > { %17765 = vst [vmem:[#allocation120_spill] sm:$0xff] %v15689_v16  ;;  %v10700_v36 = vunpack.i.h.bf16 %v15472_v9  ;;  %v10699_v39 = vunpack.i.l.bf16 %v15472_v9  ;;  %v11026_v45 = vpack.i.bf16 %v15478_v1, %v15434_v5  ;;  %v15840_v16 = vpop.f32.mrf.mxu2 }
 0x7d2   : > { %11022 = vrot.lane.b32.xlu2 %v11021_v11, %s11468_s24  ;;  %7992 = vmatpush.msra.mxu0 %v6262_v41  ;;  %v6261_v11 = vld [vmem:[%s17366_s9 + $0x60] sm:$0xff]  ;;  %v7614_v26 = vsel %vm2472_vm4, %v15462_v25, %v10704_v27  ;;  %v10769_v27 = vunpack.i.l.bf16 %v15493_v18 }
 0x7d3   : > { %11017 = vrot.lane.b32.xlu1 %v15252_v54, %s11470_s18  ;;  %v7629_v54 = vsel %vm2472_vm4, %v15563_v47, %v10740_v17  ;;  %v11036_v47 = vpack.i.bf16 %v15302_v22, %v15311_v33  ;;  %v6260_v17 = vld [vmem:[%s17366_s9 + $0x58] sm:$0xff]  ;;  %9087 = vmatpush.msra.mxu3 %v6262_v41  ;;  %v7612_v5 = vsel %vm2472_vm4, %v15466_v28, %v10699_v39 }
 0x7d4   : > { %11012 = vrot.lane.b32.xlu0 %v11011_v53, %s11469_s17  ;;  %v10858_v46 = vpop.permute.xlu2 %10857  ;;  %7993 = vmatpush.msra.mxu0 %v6261_v11  ;;  %v7613_v49 = vsel %vm2472_vm4, %v15460_v13, %v10700_v36  ;;  %v10719_v36 = vunpack.i.l.bf16 %v15499_v15 }
 0x7d5   : > { %v10860_v53 = vunpack.i.h.bf16 %v10858_v46  ;;  %v10859_v57 = vunpack.i.l.bf16 %v10858_v46  ;;  %v15708_v31 = vpop.permute.xlu1 %10807  ;;  %9088 = vmatpush.msra.mxu3 %v6261_v11  ;;  %v7634_v46 = vsel %vm2472_vm4, %v15604_v56, %v10754_v23 }
 0x7d6   : > { %v10803_v24 = vpop.permute.xlu0 %10802  ;;  %7994 = vmatpush.msra.mxu0 %v6260_v17 }
 0x7d7   : > { %v10805_v48 = vunpack.i.h.bf16 %v10803_v24  ;;  %v10804_v34 = vunpack.i.l.bf16 %v10803_v24  ;;  %v15726_v9 = vsel %vm2521_vm5, %v7628_v42, %v10859_v57  ;;  %v15729_v22 = vsel %vm2521_vm5, %v7629_v54, %v10860_v53  ;;  %9089 = vmatpush.msra.mxu3 %v6260_v17 }
 0x7d8   : > { %v7635_v42 = vsel %vm2472_vm4, %v15600_v58, %v10755_v14  ;;  %v10770_v54 = vunpack.i.h.bf16 %v15493_v18  ;;  %v10714_v57 = vunpack.i.l.bf16 %v15501_v51  ;;  %v11051_v58 = vpack.i.bf16 %v15296_v29, %v15307_v40  ;;  %v6258_v18 = vld [vmem:[%s17366_s9 + $0x48] sm:$0xff]  ;;  %v6256_v29 = vld [vmem:[%s17366_s9 + $0x38] sm:$0xff] }
 0x7d9   : > { %v15733_v33 = vsel %vm2521_vm5, %v15451_v8, %v10804_v34  ;;  %v15737_v0 = vsel %vm2521_vm5, %v15455_v30, %v10805_v48  ;;  %v6259_v8 = vld [vmem:[%s17366_s9 + $0x50] sm:$0xff]  ;;  %v7615_v30 = vsel %vm2472_vm4, %v15507_v37, %v10705_v52  ;;  %v10715_v34 = vunpack.i.h.bf16 %v15501_v51 }
 0x7da   : > { %17766 = vst [vmem:[#allocation121_spill] sm:$0xff] %v15733_v33  ;;  %11037 = vrot.lane.b32.xlu2 %v11036_v47, %s11468_s24  ;;  %7995 = vmatpush.msra.mxu0 %v6259_v8  ;;  %v11041_v47 = vpack.i.bf16 %v15476_v7, %v15480_v6  ;;  %v7641_v17 = vsel %vm2472_vm4, %v15634_v12, %v10770_v54 }
 0x7db   : > { %17767 = vst [vmem:[#allocation122_spill] sm:$0xff] %v15737_v0  ;;  %11032 = vrot.lane.b32.xlu1 %v15244_v3, %s11470_s18  ;;  %v10720_v3 = vunpack.i.h.bf16 %v15499_v15  ;;  %9090 = vmatpush.msra.mxu3 %v6259_v8  ;;  %v6255_v8 = vld [vmem:[%s17366_s9 + $0x30] sm:$0xff] }
 0x7dc   : > { %11027 = vrot.lane.b32.xlu0 %v11026_v45, %s11469_s17  ;;  %v10873_v53 = vpop.permute.xlu2 %10872  ;;  %7996 = vmatpush.msra.mxu0 %v6258_v18  ;;  %v7640_v45 = vsel %vm2472_vm4, %v15638_v55, %v10769_v27  ;;  %v10784_v27 = vunpack.i.l.bf16 %v15522_v44 }
 0x7dd   : > { %v10875_v24 = vunpack.i.h.bf16 %v10873_v53  ;;  %v10874_v56 = vunpack.i.l.bf16 %v10873_v53  ;;  %v10823_v23 = vpop.permute.xlu1 %10822  ;;  %9091 = vmatpush.msra.mxu3 %v6258_v18  ;;  %v17773_v53 = vld [vmem:[#allocation101_spill] sm:$0xff]  ;;  %v17775_v18 = vld [vmem:[#allocation87_spill] sm:$0xff] }
 0x7de   : > { %v10818_v41 = vpop.permute.xlu0 %10817  ;;  %v10825_v15 = vunpack.i.h.bf16 %v10823_v23  ;;  %v10824_v14 = vunpack.i.l.bf16 %v10823_v23  ;;  %7997 = vmatpush.msra.mxu0 %v6257_v60  ;;  %9012 = vmatmul.msk.f32.gmra.mxu2 %vm2472_vm4, %v17775_v18  ;;  %v15831_v18 = vld [vmem:[#allocation2 + $0x15f] sm:$0xff] }
 0x7df   : > { %v10820_v39 = vunpack.i.h.bf16 %v10818_v41  ;;  %v10819_v48 = vunpack.i.l.bf16 %v10818_v41  ;;  %v15780_v40 = vsel %vm2521_vm5, %v7634_v46, %v10874_v56  ;;  %v15783_v11 = vsel %vm2521_vm5, %v7635_v42, %v10875_v24  ;;  %v17771_v46 = vld [vmem:[#allocation97_spill] sm:$0xff]  ;;  %v17772_v42 = vld [vmem:[#allocation104_spill] sm:$0xff]  ;;  %v17774_v56 = vld [vmem:[#allocation102_spill] sm:$0xff]  ;;  %9092 = vmatpush.msra.mxu3 %v6257_v60 }
 0x7e0   : > { %v15792_v7 = vsel %vm2521_vm5, %v7614_v26, %v10824_v14  ;;  %v15795_v6 = vsel %vm2521_vm5, %v7615_v30, %v10825_v15  ;;  %7998 = vmatpush.msra.mxu0 %v6256_v29  ;;  %v17769_v26 = vld [vmem:[#allocation77_spill] sm:$0xff]  ;;  %v17770_v30 = vld [vmem:[#allocation96_spill] sm:$0xff]  ;;  %v7620_v12 = vsel %vm2472_vm4, %v17771_v46, %v10719_v36  ;;  %v7621_v54 = vsel %vm2472_vm4, %v17772_v42, %v10720_v3 }
 0x7e1   : > { %v15786_v52 = vsel %vm2521_vm5, %v7612_v5, %v10819_v48  ;;  %v15789_v51 = vsel %vm2521_vm5, %v7613_v49, %v10820_v39  ;;  %17768 = vst [vmem:[#allocation123_spill] sm:$0xff] %v15795_v6  ;;  %v7618_v5 = vsel %vm2472_vm4, %v15495_v2, %v10714_v57  ;;  %v10785_v49 = vunpack.i.h.bf16 %v15522_v44  ;;  %v17776_v44 = vld [vmem:[#allocation80_spill] sm:$0xff]  ;;  %v6252_v60 = vld [vmem:[%s17366_s9 + $0x18] sm:$0xff]  ;;  %9093 = vmatpush.msra.mxu3 %v6256_v29 }
 0x7e2   : > { %11052 = vrot.lane.b32.xlu2 %v11051_v58, %s11468_s24  ;;  %v7619_v55 = vsel %vm2472_vm4, %v17770_v30, %v10715_v34  ;;  %v10735_v57 = vunpack.i.h.bf16 %v17773_v53  ;;  %v10734_v24 = vunpack.i.l.bf16 %v17773_v53  ;;  %v10730_v23 = vunpack.i.h.bf16 %v17774_v56  ;;  %v15821_v58 = vld [vmem:[#allocation2 + $0x167] sm:$0xff]  ;;  %7999 = vmatpush.msra.mxu0 %v6255_v8  ;;  %17778 = vst [vmem:[#allocation77_spill] sm:$0xff] %v15840_v16  ;;  %v15853_v6 = vld [vmem:[#allocation2 + $0x17f] sm:$0xff] }
 0x7e3   : > { %11047 = vrot.lane.b32.xlu1 %v17769_v26, %s11470_s18  ;;  %v10729_v36 = vunpack.i.l.bf16 %v17774_v56  ;;  %v11066_v48 = vpack.i.bf16 %v15821_v58, %v17776_v44  ;;  %v6254_v34 = vld [vmem:[%s17366_s9 + $0x28] sm:$0xff]  ;;  %v6253_v56 = vld [vmem:[%s17366_s9 + $0x20] sm:$0xff]  ;;  %v11056_v44 = vpack.i.bf16 %v15460_v13, %v15466_v28  ;;  %9094 = vmatpush.msra.mxu3 %v6255_v8 }
 0x7e4   : > { %11042 = vrot.lane.b32.xlu0 %v11041_v47, %s11469_s17  ;;  %v10888_v41 = vpop.permute.xlu2 %10887  ;;  %8000 = vmatpush.msra.mxu0 %v6254_v34 }
 0x7e5   : > { %v10890_v15 = vunpack.i.h.bf16 %v10888_v41  ;;  %v10889_v14 = vunpack.i.l.bf16 %v10888_v41  ;;  %v10838_v3 = vpop.permute.xlu1 %10837  ;;  %v17777_v41 = vld [vmem:[#allocation79_spill] sm:$0xff]  ;;  %9095 = vmatpush.msra.mxu3 %v6254_v34 }
 0x7e6   : > { %v10833_v39 = vpop.permute.xlu0 %10832  ;;  %v10840_v47 = vunpack.i.h.bf16 %v10838_v3  ;;  %v10839_v26 = vunpack.i.l.bf16 %v10838_v3  ;;  %v11061_v33 = vpack.i.bf16 %v15831_v18, %v17777_v41  ;;  %8001 = vmatpush.msra.mxu0 %v6253_v56 }
 0x7e7   : > { %v10835_v53 = vunpack.i.h.bf16 %v10833_v39  ;;  %v10834_v0 = vunpack.i.l.bf16 %v10833_v39  ;;  %v15846_v3 = vsel %vm2521_vm5, %v7640_v45, %v10889_v14  ;;  %v15849_v39 = vsel %vm2521_vm5, %v7641_v17, %v10890_v15  ;;  %v17785_v14 = vld [vmem:[#allocation99_spill] sm:$0xff]  ;;  %9096 = vmatpush.msra.mxu3 %v6253_v56 }
 0x7e8   : > { %17779 = vst [vmem:[#allocation96_spill] sm:$0xff] %v15846_v3  ;;  %v15862_v41 = vsel %vm2521_vm5, %v7620_v12, %v10839_v26  ;;  %v15865_v29 = vsel %vm2521_vm5, %v7621_v54, %v10840_v47  ;;  %8002 = vmatpush.msra.mxu0 %v6252_v60  ;;  %v7646_v45 = vsel %vm2472_vm4, %v15851_v50, %v10784_v27  ;;  %v15879_v12 = vld [vmem:[#allocation2 + $0x16f] sm:$0xff]  ;;  %v15902_v3 = vpop.f32.mrf.mxu2 }
 0x7e9   : > { %17780 = vst [vmem:[#allocation97_spill] sm:$0xff] %v15849_v39  ;;  %v15856_v13 = vsel %vm2521_vm5, %v7618_v5, %v10834_v0  ;;  %v15859_v28 = vsel %vm2521_vm5, %v7619_v55, %v10835_v53  ;;  %v6251_v0 = vld [vmem:[%s17366_s9 + $0x10] sm:$0xff]  ;;  %v7647_v17 = vsel %vm2472_vm4, %v15853_v6, %v10785_v49  ;;  %v7627_v27 = vsel %vm2472_vm4, %v15565_v20, %v10735_v57  ;;  %v6249_v20 = vld [vmem:[%s17366_s9] sm:$0xff]  ;;  %v17789_v39 = vld [vmem:[#allocation85_spill] sm:$0xff] }
 0x7ea   : > { %17781 = vst [vmem:[#allocation104_spill] sm:$0xff] %v15865_v29  ;;  %11067 = vrot.lane.b32.xlu2 %v11066_v48, %s11470_s18  ;;  %v17782_v5 = vld [vmem:[#allocation100_spill] sm:$0xff]  ;;  %8003 = vmatpush.msra.mxu0 %v6251_v0  ;;  %v7626_v48 = vsel %vm2472_vm4, %v17785_v14, %v10734_v24  ;;  %v11076_v57 = vpack.i.bf16 %v15507_v37, %v15462_v25  ;;  %v17793_v56 = vld [vmem:[#allocation107_spill] sm:$0xff] }
 0x7eb   : > { %11062 = vrot.lane.b32.xlu1 %v11061_v33, %s11470_s18  ;;  %v7624_v8 = vsel %vm2472_vm4, %v17782_v5, %v10729_v36  ;;  %v17783_v54 = vld [vmem:[#allocation88_spill] sm:$0xff]  ;;  %v17784_v33 = vld [vmem:[#allocation98_spill] sm:$0xff]  ;;  %17790 = vst [vmem:[#allocation101_spill] sm:$0xff] %v15902_v3  ;;  %9097 = vmatpush.msra.mxu3 %v6252_v60  ;;  %v11096_v60 = vpack.i.bf16 %v15505_v43, %v15509_v63  ;;  %v17800_v63 = vld [vmem:[#allocation83_spill] sm:$0xff] }
 0x7ec   : > { %11057 = vrot.lane.b32.xlu0 %v11056_v44, %s11469_s17  ;;  %v10903_v55 = vpop.permute.xlu2 %10902  ;;  %9013 = vmatmul.msk.f32.gmra.mxu2 %vm2472_vm4, %v17783_v54  ;;  %v7625_v15 = vsel %vm2472_vm4, %v17784_v33, %v10730_v23  ;;  %v17786_v49 = vld [vmem:[#allocation108_spill] sm:$0xff]  ;;  %v17787_v5 = vld [vmem:[#allocation78_spill] sm:$0xff]  ;;  %v6250_v54 = vld [vmem:[%s17366_s9 + $0x8] sm:$0xff] }
 0x7ed   : > { %v10744_v47 = vunpack.i.l.bf16 %v17786_v49  ;;  %v10905_v26 = vunpack.i.h.bf16 %v10903_v55  ;;  %v10904_v36 = vunpack.i.l.bf16 %v10903_v55  ;;  %v10853_v53 = vpop.permute.xlu1 %10852  ;;  %v11081_v16 = vpack.i.bf16 %v15879_v12, %v17787_v5  ;;  %8004 = vmatpush.msra.mxu0 %v6250_v54  ;;  %v17788_v55 = vld [vmem:[#allocation81_spill] sm:$0xff]  ;;  %9098 = vmatpush.msra.mxu3 %v6251_v0  ;;  %v17808_v3 = vld [vmem:[#allocation115_spill] sm:$0xff] }
 0x7ee   : > { %v10848_v44 = vpop.permute.xlu0 %10847  ;;  %v10855_v23 = vunpack.i.h.bf16 %v10853_v53  ;;  %v10854_v33 = vunpack.i.l.bf16 %v10853_v53  ;;  %v11071_v5 = vpack.i.bf16 %v17789_v39, %v17788_v55  ;;  %v10750_v39 = vunpack.i.h.bf16 %v17793_v56  ;;  %v17798_v55 = vld [vmem:[#allocation114_spill] sm:$0xff] }
 0x7ef   : > { %v10850_v24 = vunpack.i.h.bf16 %v10848_v44  ;;  %v10849_v14 = vunpack.i.l.bf16 %v10848_v44  ;;  %v15905_v34 = vsel %vm2521_vm5, %v7646_v45, %v10904_v36  ;;  %v15908_v53 = vsel %vm2521_vm5, %v7647_v17, %v10905_v26  ;;  %8005 = vmatpush.msra.mxu0 %v6249_v20  ;;  %v17796_v36 = vld [vmem:[#allocation106_spill] sm:$0xff]  ;;  %9099 = vmatpush.msra.mxu3 %v6250_v54 }
 0x7f0   : > { %17791 = vst [vmem:[#allocation102_spill] sm:$0xff] %v15905_v34  ;;  %v15917_v25 = vsel %vm2521_vm5, %v7626_v48, %v10854_v33  ;;  %v15920_v37 = vsel %vm2521_vm5, %v7627_v27, %v10855_v23  ;;  %v10749_v45 = vunpack.i.l.bf16 %v17793_v56  ;;  %v10745_v17 = vunpack.i.h.bf16 %v17786_v49  ;;  %v17795_v49 = vld [vmem:[#allocation105_spill] sm:$0xff]  ;;  %v17799_v56 = vld [vmem:[#allocation86_spill] sm:$0xff] }
 0x7f1   : > { %17792 = vst [vmem:[#allocation87_spill] sm:$0xff] %v15908_v53  ;;  %v15911_v44 = vsel %vm2521_vm5, %v7624_v8, %v10849_v14  ;;  %v15914_v29 = vsel %vm2521_vm5, %v7625_v15, %v10850_v24  ;;  %v17794_v15 = vld [vmem:[#allocation92_spill] sm:$0xff]  ;;  %v7630_v48 = vsel %vm2472_vm4, %v15553_v35, %v10744_v47  ;;  %v7633_v33 = vsel %vm2472_vm4, %v15602_v59, %v10750_v39  ;;  %v17797_v35 = vld [vmem:[#allocation113_spill] sm:$0xff] }
 0x7f2   : > { %11082 = vrot.lane.b32.xlu2 %v11081_v16, %s11470_s18  ;;  %v7631_v16 = vsel %vm2472_vm4, %v17795_v49, %v10745_v17  ;;  %v7632_v23 = vsel %vm2472_vm4, %v17796_v36, %v10749_v45  ;;  %v10764_v47 = vunpack.i.l.bf16 %v17797_v35  ;;  %v11091_v43 = vpack.i.bf16 %v17800_v63, %v17799_v56  ;;  %v15947_v49 = vpop.f32.mrf.mxu2  ;;  %9100 = vmatpush.msra.mxu3 %v6249_v20 }
 0x7f3   : > { %11077 = vrot.lane.b32.xlu1 %v11076_v57, %s11469_s17  ;;  %17801 = vst [vmem:[#allocation80_spill] sm:$0xff] %v15947_v49 }
 0x7f4   : > { %11072 = vrot.lane.b32.xlu0 %v11071_v5, %s11468_s24  ;;  %v15928_v8 = vpop.permute.xlu2 %10917  ;;  %9014 = vmatmul.msk.f32.gmra.mxu2 %vm2472_vm4, %v17794_v15  ;;  %v10760_v5 = vunpack.i.h.bf16 %v17798_v55  ;;  %v11357_v15 = vld [vmem:[#allocation2 + $0x80] sm:$0xff] }
 0x7f5   : > { %v10868_v27 = vpop.permute.xlu1 %10867  ;;  %v11086_v17 = vpack.i.bf16 %v15851_v50, %v11357_v15  ;;  %v17805_v15 = vld [vmem:[#allocation84_spill] sm:$0xff] }
 0x7f6   : > { %v10863_v26 = vpop.permute.xlu0 %10862  ;;  %v10870_v24 = vunpack.i.h.bf16 %v10868_v27  ;;  %v10869_v14 = vunpack.i.l.bf16 %v10868_v27  ;;  %v10765_v27 = vunpack.i.h.bf16 %v17797_v35 }
 0x7f7   : > { %v10865_v0 = vunpack.i.h.bf16 %v10863_v26  ;;  %v10864_v57 = vunpack.i.l.bf16 %v10863_v26  ;;  %v17802_v26 = vld [vmem:[#allocation93_spill] sm:$0xff] }
 0x7f8   : > { %v15956_v54 = vsel %vm2521_vm5, %v7632_v23, %v10869_v14  ;;  %v15959_v45 = vsel %vm2521_vm5, %v7633_v33, %v10870_v24  ;;  %v17804_v23 = vld [vmem:[#allocation112_spill] sm:$0xff]  ;;  %v10775_v24 = vunpack.i.h.bf16 %v15630_v61  ;;  %v7639_v35 = vsel %vm2472_vm4, %v15636_v19, %v10765_v27 }
 0x7f9   : > { %v15950_v59 = vsel %vm2521_vm5, %v7630_v48, %v10864_v57  ;;  %v15953_v39 = vsel %vm2521_vm5, %v7631_v16, %v10865_v0  ;;  %v15965_v48 = vld [vmem:[#allocation2 + $0x187] sm:$0xff]  ;;  %v7638_v33 = vsel %vm2472_vm4, %v17804_v23, %v10764_v47  ;;  %v17810_v19 = vld [vmem:[#allocation116_spill] sm:$0xff] }
 0x7fa   : > { %11097 = vrot.lane.b32.xlu2 %v11096_v60, %s11469_s17  ;;  %v17803_v16 = vld [vmem:[#allocation111_spill] sm:$0xff]  ;;  %v15983_v49 = vpop.f32.mrf.mxu2 }
 0x7fb   : > { %11092 = vrot.lane.b32.xlu1 %v11091_v43, %s11468_s24  ;;  %v7637_v36 = vsel %vm2472_vm4, %v17803_v16, %v10760_v5  ;;  %v11359_v16 = vld [vmem:[#allocation2 + $0x88] sm:$0xff]  ;;  %17807 = vst [vmem:[#allocation79_spill] sm:$0xff] %v15983_v49 }
 0x7fc   : > { %11087 = vrot.lane.b32.xlu0 %v11086_v17, %s11470_s18  ;;  %v10933_v20 = vpop.permute.xlu2 %10932  ;;  %9015 = vmatmul.msk.f32.gmra.mxu2 %vm2472_vm4, %v17802_v26  ;;  %v17806_v17 = vld [vmem:[#allocation82_spill] sm:$0xff]  ;;  %v11358_v26 = vld [vmem:[#allocation2 + $0x90] sm:$0xff]  ;;  %v11101_v23 = vpack.i.bf16 %v15853_v6, %v11359_v16 }
 0x7fd   : > { %v10883_v14 = vpop.permute.xlu1 %10882  ;;  %v10935_v0 = vunpack.i.h.bf16 %v10933_v20  ;;  %v10934_v57 = vunpack.i.l.bf16 %v10933_v20  ;;  %v11111_v5 = vpack.i.bf16 %v17806_v17, %v17805_v15  ;;  %v11106_v47 = vpack.i.bf16 %v15965_v48, %v11358_v26  ;;  %v17813_v16 = vld [vmem:[#allocation118_spill] sm:$0xff] }
 0x7fe   : > { %v15974_v60 = vpop.permute.xlu0 %10877  ;;  %v10885_v56 = vunpack.i.h.bf16 %v10883_v14  ;;  %v10884_v63 = vunpack.i.l.bf16 %v10883_v14  ;;  %v10774_v14 = vunpack.i.l.bf16 %v15630_v61  ;;  %v10779_v49 = vunpack.i.l.bf16 %v17813_v16 }
 0x7ff   : > { %v10880_v43 = vunpack.i.h.bf16 %v15974_v60  ;;  %v15987_v20 = vsel %vm2570_vm6, %v17808_v3, %v10934_v57  ;;  %v15991_v27 = vsel %vm2570_vm6, %v17810_v19, %v10935_v0  ;;  %v16005_v3 = vld [vmem:[#allocation2 + $0x197] sm:$0xff]  ;;  %v10780_v61 = vunpack.i.h.bf16 %v17813_v16  ;;  %v16010_v0 = vld [vmem:[#allocation2 + $0x18f] sm:$0xff]  ;;  %v11360_v19 = vld [vmem:[#allocation2 + $0xa0] sm:$0xff] }
 0x800   : > { %17809 = vst [vmem:[#allocation100_spill] sm:$0xff] %v15987_v20  ;;  %v15998_v17 = vsel %vm2521_vm5, %v7638_v33, %v10884_v63  ;;  %v16001_v26 = vsel %vm2521_vm5, %v7639_v35, %v10885_v56  ;;  %v17814_v33 = vld [vmem:[#allocation89_spill] sm:$0xff]  ;;  %v7643_v56 = vsel %vm2472_vm4, %v15831_v18, %v10775_v24  ;;  %v7644_v16 = vsel %vm2472_vm4, %v15821_v58, %v10779_v49 }
 0x801   : > { %17811 = vst [vmem:[#allocation88_spill] sm:$0xff] %v15991_v27  ;;  %v15995_v15 = vsel %vm2521_vm5, %v7637_v36, %v10880_v43  ;;  %v17815_v57 = vld [vmem:[#allocation117_spill] sm:$0xff]  ;;  %v11116_v24 = vpack.i.bf16 %v17770_v30, %v15495_v2  ;;  %v7645_v2 = vsel %vm2472_vm4, %v15879_v12, %v10780_v61  ;;  %v17818_v30 = vld [vmem:[#allocation95_spill] sm:$0xff] }
 0x802   : > { %17812 = vst [vmem:[#allocation98_spill] sm:$0xff] %v16001_v26  ;;  %11112 = vrot.lane.b32.xlu2 %v11111_v5, %s11468_s24  ;;  %v7642_v35 = vsel %vm2472_vm4, %v17815_v57, %v10774_v14  ;;  %v11361_v20 = vld [vmem:[#allocation2 + $0x98] sm:$0xff]  ;;  %v16024_v26 = vpop.f32.mrf.mxu2  ;;  %v17820_v61 = vld [vmem:[#allocation91_spill] sm:$0xff] }
 0x803   : > { %11107 = vrot.lane.b32.xlu1 %v11106_v47, %s11470_s18  ;;  %v11121_v14 = vpack.i.bf16 %v16010_v0, %v11361_v20  ;;  %17816 = vst [vmem:[#allocation99_spill] sm:$0xff] %v16024_v26  ;;  %v17821_v26 = vld [vmem:[#allocation94_spill] sm:$0xff] }
 0x804   : > { %11102 = vrot.lane.b32.xlu0 %v11101_v23, %s11470_s18  ;;  %v10948_v36 = vpop.permute.xlu2 %10947  ;;  %9016 = vmatmul.msk.f32.gmra.mxu2 %vm2472_vm4, %v17814_v33  ;;  %v11126_v23 = vpack.i.bf16 %v16005_v3, %v11360_v19 }
 0x805   : > { %v10898_v63 = vpop.permute.xlu1 %10897  ;;  %v10950_v5 = vunpack.i.h.bf16 %v10948_v36  ;;  %v10949_v47 = vunpack.i.l.bf16 %v10948_v36 }
 0x806   : > { %v10893_v43 = vpop.permute.xlu0 %10892  ;;  %v10900_v53 = vunpack.i.h.bf16 %v10898_v63  ;;  %v10899_v34 = vunpack.i.l.bf16 %v10898_v63 }
 0x807   : > { %v10895_v27 = vunpack.i.h.bf16 %v10893_v43  ;;  %v10894_v33 = vunpack.i.l.bf16 %v10893_v43  ;;  %v16028_v36 = vsel %vm2570_vm6, %v15649_v62, %v10949_v47  ;;  %v16032_v19 = vsel %vm2570_vm6, %v15652_v4, %v10950_v5  ;;  %v6280_v62 = vld [vmem:[%s17366_s9 + $0xf8] sm:$0xff] }
 0x808   : > { %17817 = vst [vmem:[#allocation108_spill] sm:$0xff] %v16032_v19  ;;  %v16041_v20 = vsel %vm2521_vm5, %v7644_v16, %v10899_v34  ;;  %v10669_v43 = vunpack.i.l.bf16 %v17818_v30  ;;  %v16050_v4 = vsel %vm2521_vm5, %v7645_v2, %v10900_v53  ;;  %8151 = vmatpush.msra.mxu1 %v6280_v62  ;;  %9101 = vmatpush.msrb.mxu3 %v6280_v62  ;;  %v6278_v2 = vld [vmem:[%s17366_s9 + $0xe8] sm:$0xff] }
 0x809   : > { %v16035_v49 = vsel %vm2521_vm5, %v7642_v35, %v10894_v33  ;;  %v16038_v63 = vsel %vm2521_vm5, %v7643_v56, %v10895_v27  ;;  %v17819_v35 = vld [vmem:[#allocation119_spill] sm:$0xff]  ;;  %v6279_v56 = vld [vmem:[%s17366_s9 + $0xf0] sm:$0xff]  ;;  %v11136_v62 = vpack.i.bf16 %v17815_v57, %v17771_v46  ;;  %v10670_v46 = vunpack.i.h.bf16 %v17818_v30  ;;  %v17825_v57 = vld [vmem:[#allocation90_spill] sm:$0xff] }
 0x80a   : > { %v10789_v5 = vunpack.i.l.bf16 %v17819_v35  ;;  %11127 = vrot.lane.b32.xlu2 %v11126_v23, %s11470_s18  ;;  %v6286_v27 = vld [vmem:[#allocation2 + $0x7] sm:$0xff]  ;;  %8152 = vmatpush.msra.mxu1 %v6279_v56 }
 0x80b   : > { %11122 = vrot.lane.b32.xlu1 %v11121_v14, %s11470_s18  ;;  %v7600_v33 = vsel %vm2472_vm4, %v6286_v27, %v10669_v43  ;;  %9102 = vmatpush.msrb.mxu3 %v6279_v56  ;;  %v10690_v56 = vunpack.i.h.bf16 %v17825_v57 }
 0x80c   : > { %11117 = vrot.lane.b32.xlu0 %v11116_v24, %s11469_s17  ;;  %v10963_v34 = vpop.permute.xlu2 %10962  ;;  %9017 = vmatmul.msk.f32.gmra.mxu2 %vm2472_vm4, %v17820_v61  ;;  %v7648_v24 = vsel %vm2521_vm5, %v7600_v33, %v10789_v5  ;;  %v11362_v61 = vld [vmem:[#allocation2 + $0x91] sm:$0xff] }
 0x80d   : > { %v10965_v53 = vunpack.i.h.bf16 %v10963_v34  ;;  %v10964_v47 = vunpack.i.l.bf16 %v10963_v34  ;;  %v16061_v16 = vpop.permute.xlu1 %10912  ;;  %v11131_v19 = vpack.i.bf16 %v17821_v26, %v11362_v61  ;;  %v16071_v34 = vpop.f32.mrf.mxu2  ;;  %8153 = vmatpush.msra.mxu1 %v6278_v2  ;;  %v6277_v26 = vld [vmem:[%s17366_s9 + $0xe0] sm:$0xff]  ;;  %9103 = vmatpush.msrb.mxu3 %v6278_v2 }
 0x80e   : > { %v10908_v23 = vpop.permute.xlu0 %10907  ;;  %17822 = vst [vmem:[#allocation78_spill] sm:$0xff] %v16071_v34  ;;  %v7609_v34 = vsel %vm2472_vm4, %v15478_v1, %v10690_v56  ;;  %v6273_v56 = vld [vmem:[%s17366_s9 + $0xc0] sm:$0xff] }
 0x80f   : > { %v10909_v14 = vunpack.i.l.bf16 %v10908_v23  ;;  %v16075_v43 = vsel %vm2570_vm6, %v15677_v21, %v10964_v47  ;;  %v16079_v5 = vsel %vm2570_vm6, %v15680_v10, %v10965_v53  ;;  %8154 = vmatpush.msra.mxu1 %v6277_v26  ;;  %v6276_v21 = vld [vmem:[%s17366_s9 + $0xd8] sm:$0xff]  ;;  %v10790_v10 = vunpack.i.h.bf16 %v17819_v35  ;;  %v6287_v53 = vld [vmem:[#allocation2 + $0xf] sm:$0xff]  ;;  %9104 = vmatpush.msrb.mxu3 %v6277_v26 }
 0x810   : > { %17823 = vst [vmem:[#allocation81_spill] sm:$0xff] %v16075_v43  ;;  %v10810_v47 = vunpack.i.h.bf16 %v15708_v31  ;;  %v10910_v33 = vunpack.i.h.bf16 %v10908_v23  ;;  %v6275_v35 = vld [vmem:[%s17366_s9 + $0xd0] sm:$0xff]  ;;  %v6274_v26 = vld [vmem:[%s17366_s9 + $0xc8] sm:$0xff] }
 0x811   : > { %17824 = vst [vmem:[#allocation85_spill] sm:$0xff] %v16079_v5  ;;  %v7696_v27 = vsel %vm2570_vm6, %v7648_v24, %v10909_v14  ;;  %8155 = vmatpush.msra.mxu1 %v6276_v21  ;;  %v16094_v14 = vld [vmem:[#allocation2 + $0xe9] sm:$0xff]  ;;  %9105 = vmatpush.msrb.mxu3 %v6276_v21 }
 0x812   : > { %8006 = vmatmul.f32.vlgmr.msra.gmra.mxu0 %v7696_v27  ;;  %v16113_v5 = vld [vmem:[#allocation2 + $0x149] sm:$0xff] }
 0x813   : > { %11137 = vrot.lane.b32.xlu1 %v11136_v62, %s11469_s17  ;;  %v7601_v62 = vsel %vm2472_vm4, %v6287_v53, %v10670_v46  ;;  %8156 = vmatpush.msra.mxu1 %v6275_v35  ;;  %v11151_v46 = vpack.i.bf16 %v15831_v18, %v17772_v42  ;;  %v7657_v42 = vsel %vm2521_vm5, %v7609_v34, %v10810_v47  ;;  %v6272_v18 = vld [vmem:[%s17366_s9 + $0xb8] sm:$0xff]  ;;  %v6271_v34 = vld [vmem:[%s17366_s9 + $0xb0] sm:$0xff] }
 0x814   : > { %11132 = vrot.lane.b32.xlu0 %v11131_v19, %s11468_s24  ;;  %v10978_v30 = vpop.permute.xlu2 %10977  ;;  %9018 = vmatmul.msk.f32.gmra.mxu2 %vm2472_vm4, %v16094_v14  ;;  %v7649_v27 = vsel %vm2521_vm5, %v7601_v62, %v10790_v10 }
 0x815   : > { %v10980_v24 = vunpack.i.h.bf16 %v10978_v30  ;;  %v10979_v2 = vunpack.i.l.bf16 %v10978_v30  ;;  %v16101_v61 = vpop.permute.xlu1 %10927  ;;  %v11364_v30 = vld [vmem:[#allocation2 + $0x99] sm:$0xff]  ;;  %v16118_v21 = vpop.f32.mrf.mxu2  ;;  %9106 = vmatpush.msrb.mxu3 %v6275_v35  ;;  %v7697_v1 = vsel %vm2570_vm6, %v7649_v27, %v10910_v33  ;;  %8157 = vmatpush.msra.mxu1 %v6274_v26  ;;  %v16142_v35 = vld [vmem:[#allocation2 + $0xf1] sm:$0xff] }
 0x816   : > { %v16103_v19 = vpop.permute.xlu0 %10922  ;;  %v10930_v23 = vunpack.i.h.bf16 %v16101_v61  ;;  %v11146_v43 = vpack.i.bf16 %v16113_v5, %v11364_v30  ;;  %17826 = vst [vmem:[#allocation107_spill] sm:$0xff] %v16118_v21  ;;  %v6270_v30 = vld [vmem:[%s17366_s9 + $0xa8] sm:$0xff] }
 0x817   : > { %v16122_v10 = vsel %vm2570_vm6, %v15726_v9, %v10979_v2  ;;  %v16126_v53 = vsel %vm2570_vm6, %v15729_v22, %v10980_v24  ;;  %9107 = vmatpush.msrb.mxu3 %v6274_v26  ;;  %8158 = vmatpush.msra.mxu1 %v6273_v56  ;;  %v10914_v22 = vunpack.i.l.bf16 %v16061_v16 }
 0x818   : > { %17827 = vst [vmem:[#allocation92_spill] sm:$0xff] %v16122_v10  ;;  %v16137_v9 = vsel %vm2570_vm6, %v7657_v42, %v10930_v23  ;;  %v6503_v10 = vld [vmem:[#allocation2 + $0xb8] sm:$0xff] }
 0x819   : > { %17828 = vst [vmem:[#allocation105_spill] sm:$0xff] %v16126_v53  ;;  %8159 = vmatpush.msra.mxu1 %v6272_v18  ;;  %9108 = vmatpush.msrb.mxu3 %v6273_v56  ;;  %v16222_v53 = vld [vmem:[#allocation2 + $0x160] sm:$0xff] }
 0x81a   : > { %8009 = vmatmul.f32.gmra.mxu0 %v7697_v1  ;;  %v16152_v1 = vld [vmem:[#allocation2 + $0x151] sm:$0xff] }
 0x81b   : > { %11152 = vrot.lane.b32.xlu1 %v11151_v46, %s11469_s17  ;;  %8160 = vmatpush.msra.mxu1 %v6271_v34  ;;  %v11367_v46 = vld [vmem:[#allocation2 + $0xa1] sm:$0xff] }
 0x81c   : > { %11147 = vrot.lane.b32.xlu0 %v11146_v43, %s11468_s24  ;;  %v10993_v33 = vpop.permute.xlu2 %10992  ;;  %9019 = vmatmul.msk.f32.gmra.mxu2 %vm2472_vm4, %v16142_v35  ;;  %v11161_v42 = vpack.i.bf16 %v16152_v1, %v11367_v46  ;;  %v6269_v46 = vld [vmem:[%s17366_s9 + $0xa0] sm:$0xff] }
 0x81d   : > { %v10995_v47 = vunpack.i.h.bf16 %v10993_v33  ;;  %v10994_v24 = vunpack.i.l.bf16 %v10993_v33  ;;  %v10943_v2 = vpop.permute.xlu1 %10942  ;;  %v11166_v33 = vpack.i.bf16 %v15821_v58, %v15538_v32  ;;  %v16157_v21 = vpop.f32.mrf.mxu2  ;;  %9109 = vmatpush.msrb.mxu3 %v6272_v18  ;;  %8161 = vmatpush.msra.mxu1 %v6270_v30  ;;  %v6501_v32 = vld [vmem:[#allocation2 + $0xa8] sm:$0xff]  ;;  %v16172_v58 = vld [vmem:[#allocation2 + $0x158] sm:$0xff] }
 0x81e   : > { %v10938_v62 = vpop.permute.xlu0 %10937  ;;  %v10945_v43 = vunpack.i.h.bf16 %v10943_v2  ;;  %v10944_v23 = vunpack.i.l.bf16 %v10943_v2  ;;  %17829 = vst [vmem:[#allocation106_spill] sm:$0xff] %v16157_v21  ;;  %v6502_v21 = vld [vmem:[#allocation2 + $0xb0] sm:$0xff] }
 0x81f   : > { %v10940_v27 = vunpack.i.h.bf16 %v10938_v62  ;;  %v10939_v26 = vunpack.i.l.bf16 %v10938_v62  ;;  %v16161_v56 = vsel %vm2570_vm6, %v15780_v40, %v10994_v24  ;;  %v16165_v2 = vsel %vm2570_vm6, %v15783_v11, %v10995_v47  ;;  %v17832_v47 = vld [vmem:[#allocation123_spill] sm:$0xff]  ;;  %9110 = vmatpush.msrb.mxu3 %v6271_v34  ;;  %8162 = vmatpush.msra.mxu1 %v6269_v46 }
 0x820   : > { %17830 = vst [vmem:[#allocation113_spill] sm:$0xff] %v16161_v56  ;;  %v7698_v62 = vsel %vm2570_vm6, %v15685_v38, %v10914_v22  ;;  %v16184_v11 = vsel %vm2570_vm6, %v15792_v7, %v10944_v23  ;;  %v11141_v38 = vpack.i.bf16 %v16172_v58, %v6501_v32  ;;  %v6268_v22 = vld [vmem:[%s17366_s9 + $0x98] sm:$0xff]  ;;  %v16192_v24 = vsel %vm2570_vm6, %v17832_v47, %v10945_v43  ;;  %v6265_v56 = vld [vmem:[%s17366_s9 + $0x80] sm:$0xff] }
 0x821   : > { %17831 = vst [vmem:[#allocation114_spill] sm:$0xff] %v16165_v2  ;;  %v16176_v18 = vsel %vm2570_vm6, %v15786_v52, %v10939_v26  ;;  %v16180_v40 = vsel %vm2570_vm6, %v15789_v51, %v10940_v27  ;;  %v10915_v52 = vunpack.i.h.bf16 %v16061_v16  ;;  %8163 = vmatpush.msra.mxu1 %v6268_v22  ;;  %v6267_v51 = vld [vmem:[%s17366_s9 + $0x90] sm:$0xff]  ;;  %v16201_v27 = vld [vmem:[#allocation2 + $0xf9] sm:$0xff]  ;;  %9111 = vmatpush.msrb.mxu3 %v6270_v30  ;;  %v6266_v16 = vld [vmem:[%s17366_s9 + $0x88] sm:$0xff] }
 0x822   : > { %8012 = vmatmul.f32.gmra.mxu0 %v7698_v62  ;;  %11142 = vrot.lane.b32.xlu2 %v11141_v38, %s11470_s18  ;;  %v16208_v62 = vld [vmem:[#allocation2 + $0x159] sm:$0xff]  ;;  %v17833_v38 = vld [vmem:[#allocation103_spill] sm:$0xff] }
 0x823   : > { %11167 = vrot.lane.b32.xlu1 %v11166_v33, %s11469_s17  ;;  %8164 = vmatpush.msra.mxu1 %v6267_v51  ;;  %v11370_v33 = vld [vmem:[#allocation2 + $0xa9] sm:$0xff]  ;;  %v11181_v47 = vpack.i.bf16 %v15879_v12, %v17833_v38 }
 0x824   : > { %11162 = vrot.lane.b32.xlu0 %v11161_v42, %s11468_s24  ;;  %9020 = vmatmul.msk.f32.gmra.mxu2 %vm2472_vm4, %v16201_v27  ;;  %v11176_v32 = vpack.i.bf16 %v16208_v62, %v11370_v33  ;;  %v16215_v30 = vpop.permute.xlu2 %11007  ;;  %v17836_v38 = vld [vmem:[#allocation104_spill] sm:$0xff] }
 0x825   : > { %v10958_v7 = vpop.permute.xlu1 %10957  ;;  %v16213_v2 = vpop.f32.mrf.mxu2  ;;  %9112 = vmatpush.msrb.mxu3 %v6269_v46  ;;  %8165 = vmatpush.msra.mxu1 %v6266_v16 }
 0x826   : > { %v10953_v23 = vpop.permute.xlu0 %10952  ;;  %v10960_v34 = vunpack.i.h.bf16 %v10958_v7  ;;  %v10959_v43 = vunpack.i.l.bf16 %v10958_v7  ;;  %17834 = vst [vmem:[#allocation86_spill] sm:$0xff] %v16213_v2  ;;  %v17835_v7 = vld [vmem:[#allocation120_spill] sm:$0xff] }
 0x827   : > { %v10955_v26 = vunpack.i.h.bf16 %v10953_v23  ;;  %v10954_v42 = vunpack.i.l.bf16 %v10953_v23  ;;  %v7699_v23 = vsel %vm2570_vm6, %v17835_v7, %v10915_v52  ;;  %v11156_v52 = vpack.i.bf16 %v16222_v53, %v6502_v21  ;;  %9113 = vmatpush.msrb.mxu3 %v6268_v22  ;;  %8166 = vmatpush.msra.mxu1 %v6265_v56 }
 0x828   : > { %v16234_v46 = vsel %vm2570_vm6, %v15862_v41, %v10959_v43  ;;  %v16239_v7 = vsel %vm2570_vm6, %v17836_v38, %v10960_v34  ;;  %v16245_v43 = vld [vmem:[#allocation2 + $0x101] sm:$0xff]  ;;  %v17839_v38 = vld [vmem:[#allocation109_spill] sm:$0xff] }
 0x829   : > { %v16226_v33 = vsel %vm2570_vm6, %v15856_v13, %v10954_v42  ;;  %v16230_v12 = vsel %vm2570_vm6, %v15859_v28, %v10955_v26  ;;  %17837 = vst [vmem:[#allocation83_spill] sm:$0xff] %v16239_v7  ;;  %v10919_v13 = vunpack.i.l.bf16 %v15928_v8  ;;  %9114 = vmatpush.msrb.mxu3 %v6267_v51  ;;  %v11373_v42 = vld [vmem:[#allocation2 + $0xb1] sm:$0xff]  ;;  %v16257_v7 = vld [vmem:[#allocation2 + $0x168] sm:$0xff] }
 0x82a   : > { %8015 = vmatmul.f32.gmra.mxu0 %v7699_v23  ;;  %11157 = vrot.lane.b32.xlu2 %v11156_v52, %s11470_s18  ;;  %v11375_v23 = vld [vmem:[#allocation2 + $0xc7] sm:$0xff] }
 0x82b   : > { %11182 = vrot.lane.b32.xlu1 %v11181_v47, %s11469_s17  ;;  %9115 = vmatpush.msrb.mxu3 %v6266_v16  ;;  %v11196_v51 = vpack.i.bf16 %v15851_v50, %v11375_v23  ;;  %v7700_v2 = vsel %vm2570_vm6, %v17839_v38, %v10919_v13 }
 0x82c   : > { %11177 = vrot.lane.b32.xlu0 %v11176_v32, %s11468_s24  ;;  %9021 = vmatmul.msk.f32.gmra.mxu2 %vm2472_vm4, %v16245_v43  ;;  %v16249_v32 = vld [vmem:[#allocation2 + $0x161] sm:$0xff] }
 0x82d   : > { %v10973_v28 = vpop.permute.xlu1 %10972  ;;  %v11191_v47 = vpack.i.bf16 %v16249_v32, %v11373_v42  ;;  %v16253_v52 = vpop.f32.mrf.mxu2  ;;  %9116 = vmatpush.msrb.mxu3 %v6265_v56 }
 0x82e   : > { %v10968_v41 = vpop.permute.xlu0 %10967  ;;  %v10975_v21 = vunpack.i.h.bf16 %v10973_v28  ;;  %v10974_v22 = vunpack.i.l.bf16 %v10973_v28  ;;  %17838 = vst [vmem:[#allocation93_spill] sm:$0xff] %v16253_v52  ;;  %v16276_v56 = vpop.permute.xlu2 %11022  ;;  %v16302_v52 = vld [vmem:[#allocation2 + $0x170] sm:$0xff] }
 0x82f   : > { %v10970_v34 = vunpack.i.h.bf16 %v10968_v41  ;;  %v10969_v26 = vunpack.i.l.bf16 %v10968_v41  ;;  %v11171_v41 = vpack.i.bf16 %v16257_v7, %v6503_v10 }
 0x830   : > { %v16269_v50 = vsel %vm2570_vm6, %v15917_v25, %v10974_v22  ;;  %v16274_v13 = vsel %vm2570_vm6, %v15920_v37, %v10975_v21  ;;  %v16282_v22 = vld [vmem:[#allocation2 + $0x109] sm:$0xff] }
 0x831   : > { %v16261_v16 = vsel %vm2570_vm6, %v15911_v44, %v10969_v26  ;;  %v16265_v28 = vsel %vm2570_vm6, %v15914_v29, %v10970_v34  ;;  %17841 = vst [vmem:[#allocation112_spill] sm:$0xff] %v16269_v50  ;;  %v10920_v29 = vunpack.i.h.bf16 %v15928_v8  ;;  %v11377_v34 = vld [vmem:[#allocation2 + $0xb9] sm:$0xff]  ;;  %v16286_v26 = vld [vmem:[#allocation2 + $0x169] sm:$0xff] }
 0x832   : > { %17840 = vst [vmem:[#allocation111_spill] sm:$0xff] %v16265_v28  ;;  %8018 = vmatmul.f32.gmra.mxu0 %v7700_v2  ;;  %11172 = vrot.lane.b32.xlu2 %v11171_v41, %s11470_s18  ;;  %v11206_v42 = vpack.i.bf16 %v16286_v26, %v11377_v34  ;;  %v6434_v28 = vld [vmem:[#allocation2 + $0x28] sm:$0xff] }
 0x833   : > { %17842 = vst [vmem:[#allocation84_spill] sm:$0xff] %v16274_v13  ;;  %11197 = vrot.lane.b32.xlu1 %v11196_v51, %s11469_s17  ;;  %v17844_v51 = vld [vmem:[#allocation110_spill] sm:$0xff] }
 0x834   : > { %11192 = vrot.lane.b32.xlu0 %v11191_v47, %s11468_s24  ;;  %9022 = vmatmul.msk.f32.gmra.mxu2 %vm2472_vm4, %v16282_v22  ;;  %v11379_v47 = vld [vmem:[#allocation2 + $0xcf] sm:$0xff]  ;;  %v7701_v38 = vsel %vm2570_vm6, %v17844_v51, %v10920_v29  ;;  %v10759_v29 = vunpack.i.l.bf16 %v17798_v55 }
 0x835   : > { %v10988_v44 = vpop.permute.xlu1 %10987  ;;  %v11211_v8 = vpack.i.bf16 %v15853_v6, %v11379_v47  ;;  %v16290_v23 = vpop.f32.mrf.mxu2  ;;  %v11382_v47 = vld [vmem:[#allocation2 + $0xc1] sm:$0xff] }
 0x836   : > { %v10983_v25 = vpop.permute.xlu0 %10982  ;;  %v10990_v10 = vunpack.i.h.bf16 %v10988_v44  ;;  %v10989_v37 = vunpack.i.l.bf16 %v10988_v44  ;;  %17843 = vst [vmem:[#allocation82_spill] sm:$0xff] %v16290_v23  ;;  %v17850_v23 = vld [vmem:[#allocation121_spill] sm:$0xff] }
 0x837   : > { %v10985_v2 = vunpack.i.h.bf16 %v10983_v25  ;;  %v10984_v21 = vunpack.i.l.bf16 %v10983_v25  ;;  %v6504_v25 = vld [vmem:[#allocation2 + $0xc0] sm:$0xff] }
 0x838   : > { %v16306_v6 = vsel %vm2570_vm6, %v15956_v54, %v10989_v37  ;;  %v16310_v34 = vsel %vm2570_vm6, %v15959_v45, %v10990_v10  ;;  %v16323_v10 = vld [vmem:[#allocation2 + $0x111] sm:$0xff] }
 0x839   : > { %v16296_v41 = vsel %vm2570_vm6, %v15950_v59, %v10984_v21  ;;  %v16300_v44 = vsel %vm2570_vm6, %v15953_v39, %v10985_v2  ;;  %17847 = vst [vmem:[#allocation118_spill] sm:$0xff] %v16306_v6  ;;  %v11186_v59 = vpack.i.bf16 %v16302_v52, %v6504_v25  ;;  %v10879_v21 = vunpack.i.l.bf16 %v15974_v60  ;;  %v16318_v2 = vpop.permute.xlu2 %11037  ;;  %v16327_v60 = vld [vmem:[#allocation2 + $0x127] sm:$0xff] }
 0x83a   : > { %17845 = vst [vmem:[#allocation115_spill] sm:$0xff] %v16296_v41  ;;  %8021 = vmatmul.f32.gmra.mxu0 %v7701_v38  ;;  %v10924_v39 = vunpack.i.l.bf16 %v16103_v19  ;;  %v7636_v37 = vsel %vm2472_vm4, %v16327_v60, %v10759_v29  ;;  %v11384_v38 = vld [vmem:[#allocation2 + $0xd7] sm:$0xff]  ;;  %v6505_v29 = vld [vmem:[#allocation2 + $0xc8] sm:$0xff] }
 0x83b   : > { %17846 = vst [vmem:[#allocation116_spill] sm:$0xff] %v16300_v44  ;;  %11212 = vrot.lane.b32.xlu1 %v11211_v8, %s11469_s17  ;;  %11187 = vrot.lane.b32.xlu2 %v11186_v59, %s11470_s18  ;;  %v11383_v8 = vld [vmem:[#allocation2 + $0x171] sm:$0xff]  ;;  %v11226_v25 = vpack.i.bf16 %v15965_v48, %v11384_v38  ;;  %v11009_v44 = vunpack.i.l.bf16 %v16215_v30  ;;  %v11010_v38 = vunpack.i.h.bf16 %v16215_v30  ;;  %v11392_v30 = vld [vmem:[%s17366_s9 + $0x100] sm:$0xff] }
 0x83c   : > { %17848 = vst [vmem:[#allocation89_spill] sm:$0xff] %v16310_v34  ;;  %11207 = vrot.lane.b32.xlu0 %v11206_v42, %s11468_s24  ;;  %9023 = vmatmul.msk.f32.gmra.mxu2 %vm2472_vm4, %v16323_v10  ;;  %v7684_v42 = vsel %vm2521_vm5, %v7636_v37, %v10879_v21  ;;  %v11221_v51 = vpack.i.bf16 %v11383_v8, %v11382_v47  ;;  %v16339_v41 = vld [vmem:[#allocation2 + $0x178] sm:$0xff]  ;;  %v6433_v21 = vld [vmem:[#allocation2 + $0x20] sm:$0xff] }
 0x83d   : > { %v16321_v54 = vpop.permute.xlu1 %11002  ;;  %v16333_v59 = vpop.f32.mrf.mxu2  ;;  %v7702_v34 = vsel %vm2570_vm6, %v17850_v23, %v10924_v39  ;;  %v11201_v37 = vpack.i.bf16 %v16339_v41, %v6505_v29  ;;  %v11385_v48 = vld [vmem:[%s17366_s9 + $0x118] sm:$0xff]  ;;  %v10925_v23 = vunpack.i.h.bf16 %v16103_v19 }
 0x83e   : > { %v10998_v45 = vpop.permute.xlu0 %10997  ;;  %17849 = vst [vmem:[#allocation117_spill] sm:$0xff] %v16333_v59  ;;  %v16355_v47 = vld [vmem:[#allocation2 + $0x119] sm:$0xff] }
 0x83f   : > { %v10999_v55 = vunpack.i.l.bf16 %v10998_v45  ;;  %v11000_v39 = vunpack.i.h.bf16 %v10998_v45  ;;  %v11390_v29 = vld [vmem:[#allocation2 + $0x179] sm:$0xff] }
 0x841   : > { %v7732_v6 = vsel %vm2570_vm6, %v7684_v42, %v10999_v55  ;;  %v7744_v42 = vsel %vm2472_vm4, %v6433_v21, %v11009_v44  ;;  %v16359_v8 = vpop.permute.xlu2 %11052  ;;  %v11391_v21 = vld [vmem:[#allocation2 + $0xdf] sm:$0xff]  ;;  %v7733_v13 = vsel %vm2570_vm6, %v15995_v15, %v11000_v39  ;;  %v10809_v39 = vunpack.i.l.bf16 %v15708_v31 }
 0x842   : > { %8024 = vmatmul.f32.gmra.mxu0 %v7702_v34  ;;  %8114 = vmatmul.f32.vlgmr.msra.gmra.mxu3 %v7732_v6  ;;  %v11386_v6 = vld [vmem:[%s17366_s9 + $0x110] sm:$0xff]  ;;  %v16395_v31 = vld [vmem:[#allocation2 + $0x121] sm:$0xff] }
 0x843   : > { %9117 = vmatpush.msra.mxu3 %v11385_v48  ;;  %11227 = vrot.lane.b32.xlu1 %v11226_v25, %s11469_s17  ;;  %v11389_v25 = vld [vmem:[#allocation2 + $0xc9] sm:$0xff] }
 0x844   : > { %11222 = vrot.lane.b32.xlu0 %v11221_v51, %s11468_s24  ;;  %11202 = vrot.lane.b32.xlu2 %v11201_v37, %s11470_s18  ;;  %v11388_v51 = vld [vmem:[%s17366_s9 + $0x108] sm:$0xff]  ;;  %v11236_v44 = vpack.i.bf16 %v11390_v29, %v11389_v25  ;;  %v11241_v37 = vpack.i.bf16 %v16010_v0, %v11391_v21  ;;  %v16378_v25 = vld [vmem:[#allocation2 + $0x180] sm:$0xff]  ;;  %v11395_v21 = vld [vmem:[#allocation2 + $0xd1] sm:$0xff] }
 0x845   : > { %9118 = vmatpush.msra.mxu3 %v11386_v6  ;;  %v16352_v34 = vpop.permute.xlu1 %11017  ;;  %9024 = vmatmul.msk.f32.gmra.mxu2 %vm2472_vm4, %v16355_v47  ;;  %v16367_v48 = vpop.f32.mrf.mxu2  ;;  %v17852_v6 = vld [vmem:[#allocation122_spill] sm:$0xff]  ;;  %17853 = vst [vmem:[#allocation119_spill] sm:$0xff] %v16378_v25 }
 0x846   : > { %v11013_v55 = vpop.permute.xlu0 %11012  ;;  %v11019_v19 = vunpack.i.l.bf16 %v16352_v34  ;;  %17851 = vst [vmem:[#allocation95_spill] sm:$0xff] %v16367_v48  ;;  %v7703_v59 = vsel %vm2570_vm6, %v17852_v6, %v10925_v23  ;;  %v10689_v23 = vunpack.i.l.bf16 %v17825_v57  ;;  %v11024_v57 = vunpack.i.l.bf16 %v16276_v56  ;;  %v11397_v6 = vld [vmem:[#allocation2 + $0xe7] sm:$0xff] }
 0x847   : > { %v11014_v45 = vunpack.i.l.bf16 %v11013_v55  ;;  %9119 = vmatpush.msra.mxu3 %v11388_v51  ;;  %v6506_v51 = vld [vmem:[#allocation2 + $0xd0] sm:$0xff]  ;;  %v11015_v29 = vunpack.i.h.bf16 %v11013_v55 }
 0x848   : > { %v11216_v15 = vpack.i.bf16 %v16378_v25, %v6506_v51 }
 0x849   : > { %v7792_v50 = vsel %vm2521_vm5, %v7744_v42, %v11014_v45  ;;  %9120 = vmatpush.msra.mxu3 %v11392_v30  ;;  %v7745_v42 = vsel %vm2472_vm4, %v6434_v28, %v11010_v38  ;;  %v11394_v28 = vld [vmem:[#allocation2 + $0x47] sm:$0xff]  ;;  %v6435_v38 = vld [vmem:[#allocation2 + $0x30] sm:$0xff]  ;;  %v11256_v30 = vpack.i.bf16 %v16005_v3, %v11397_v6  ;;  %v16405_v51 = vpop.permute.xlu2 %11067 }
 0x84a   : > { %8027 = vmatmul.f32.gmra.mxu0 %v7703_v59  ;;  %8117 = vmatmul.f32.gmra.mxu3 %v7733_v13  ;;  %v7840_v0 = vsel %vm2570_vm6, %v7792_v50, %v11019_v19  ;;  %v10929_v13 = vunpack.i.l.bf16 %v16101_v61  ;;  %v11004_v50 = vunpack.i.l.bf16 %v16321_v54  ;;  %v11020_v59 = vunpack.i.h.bf16 %v16352_v34 }
 0x84b   : > { %8167 = vmatmul.f32.vlgmr.msra.gmra.mxu1 %v7840_v0  ;;  %11242 = vrot.lane.b32.xlu1 %v11241_v37, %s11469_s17  ;;  %v7608_v61 = vsel %vm2472_vm4, %v11394_v28, %v10689_v23  ;;  %v7793_v45 = vsel %vm2521_vm5, %v7745_v42, %v11015_v29  ;;  %v11396_v37 = vld [vmem:[#allocation2 + $0x181] sm:$0xff]  ;;  %v6507_v42 = vld [vmem:[#allocation2 + $0xd8] sm:$0xff] }
 0x84c   : > { %11237 = vrot.lane.b32.xlu0 %v11236_v44, %s11468_s24  ;;  %11217 = vrot.lane.b32.xlu2 %v11216_v15, %s11470_s18  ;;  %v7656_v44 = vsel %vm2521_vm5, %v7608_v61, %v10809_v39  ;;  %v11251_v34 = vpack.i.bf16 %v11396_v37, %v11395_v21  ;;  %v7734_v23 = vsel %vm2570_vm6, %v15998_v17, %v11004_v50  ;;  %v16413_v28 = vld [vmem:[#allocation2 + $0x188] sm:$0xff]  ;;  %v11005_v17 = vunpack.i.h.bf16 %v16321_v54  ;;  %v6484_v50 = vld [vmem:[#allocation2 + $0x19f] sm:$0xff] }
 0x84d   : > { %v16391_v55 = vpop.permute.xlu1 %11032  ;;  %9025 = vmatmul.msk.f32.gmra.mxu2 %vm2472_vm4, %v16395_v31  ;;  %v16403_v0 = vpop.f32.mrf.mxu2  ;;  %v7704_v48 = vsel %vm2570_vm6, %v7656_v44, %v10929_v13  ;;  %v7841_v29 = vsel %vm2570_vm6, %v7793_v45, %v11020_v59  ;;  %v7746_v39 = vsel %vm2472_vm4, %v6435_v38, %v11024_v57  ;;  %17855 = vst [vmem:[#allocation94_spill] sm:$0xff] %v16413_v28  ;;  %v6481_v13 = vld [vmem:[#allocation2 + $0x189] sm:$0xff]  ;;  %v11025_v38 = vunpack.i.h.bf16 %v16276_v56  ;;  %v11399_v54 = vld [vmem:[#allocation2 + $0xd9] sm:$0xff] }
 0x84e   : > { %v16393_v19 = vpop.permute.xlu0 %11027  ;;  %17854 = vst [vmem:[#allocation91_spill] sm:$0xff] %v16403_v0  ;;  %v11231_v3 = vpack.i.bf16 %v16413_v28, %v6507_v42  ;;  %v11034_v61 = vunpack.i.l.bf16 %v16391_v55  ;;  %v16426_v45 = vld [vmem:[#allocation2 + $0x129] sm:$0xff]  ;;  %v11266_v21 = vpack.i.bf16 %v6481_v13, %v11399_v54  ;;  %v11035_v13 = vunpack.i.h.bf16 %v16391_v55  ;;  %v6532_v28 = vld [vmem:[#allocation2 + $0x1a0] sm:$0xff] }
 0x84f   : > { %v11029_v15 = vunpack.i.l.bf16 %v16393_v19  ;;  %v11400_v37 = vld [vmem:[#allocation2 + $0xef] sm:$0xff]  ;;  %v11030_v56 = vunpack.i.h.bf16 %v16393_v19 }
 0x851   : > { %v16439_v42 = vpop.permute.xlu2 %11082 }
 0x852   : > { %8030 = vmatmul.f32.gmra.mxu0 %v7704_v48  ;;  %8120 = vmatmul.f32.gmra.mxu3 %v7734_v23  ;;  %v7794_v48 = vsel %vm2521_vm5, %v7746_v39, %v11029_v15  ;;  %v6436_v23 = vld [vmem:[#allocation2 + $0x38] sm:$0xff]  ;;  %v16437_v39 = vld [vmem:[#allocation2 + $0x190] sm:$0xff] }
 0x853   : > { %8170 = vmatmul.f32.gmra.mxu1 %v7841_v29  ;;  %11257 = vrot.lane.b32.xlu1 %v11256_v30, %s11469_s17  ;;  %v7842_v44 = vsel %vm2570_vm6, %v7794_v48, %v11034_v61  ;;  %v17857_v30 = vld [vmem:[#allocation98_spill] sm:$0xff]  ;;  %17858 = vst [vmem:[#allocation123_spill] sm:$0xff] %v16437_v39  ;;  %v7747_v61 = vsel %vm2472_vm4, %v6436_v23, %v11025_v38 }
 0x854   : > { %11252 = vrot.lane.b32.xlu0 %v11251_v34, %s11468_s24  ;;  %11232 = vrot.lane.b32.xlu2 %v11231_v3, %s11470_s18  ;;  %v11271_v34 = vpack.i.bf16 %v6484_v50, %v11400_v37  ;;  %v7735_v15 = vsel %vm2570_vm6, %v17857_v30, %v11005_v17  ;;  %v6508_v29 = vld [vmem:[#allocation2 + $0xe0] sm:$0xff]  ;;  %v6482_v17 = vld [vmem:[#allocation2 + $0x191] sm:$0xff]  ;;  %v7795_v54 = vsel %vm2521_vm5, %v7747_v61, %v11030_v56  ;;  %v6509_v56 = vld [vmem:[#allocation2 + $0xe8] sm:$0xff] }
 0x855   : > { %v16422_v57 = vpop.permute.xlu1 %11047  ;;  %9026 = vmatmul.msk.f32.gmra.mxu2 %vm2472_vm4, %v16426_v45  ;;  %v16432_v6 = vpop.f32.mrf.mxu2  ;;  %v11246_v3 = vpack.i.bf16 %v16437_v39, %v6508_v29  ;;  %v6485_v48 = vld [vmem:[#allocation2 + $0x1a7] sm:$0xff]  ;;  %v11403_v30 = vld [vmem:[#allocation2 + $0xf7] sm:$0xff]  ;;  %v7843_v0 = vsel %vm2570_vm6, %v7795_v54, %v11035_v13 }
 0x856   : > { %v16424_v59 = vpop.permute.xlu0 %11042  ;;  %17856 = vst [vmem:[#allocation90_spill] sm:$0xff] %v16432_v6  ;;  %v11402_v37 = vld [vmem:[#allocation2 + $0xe1] sm:$0xff]  ;;  %v17860_v29 = vld [vmem:[#allocation96_spill] sm:$0xff]  ;;  %v16467_v61 = vld [vmem:[#allocation2 + $0x198] sm:$0xff] }
 0x857   : > { %v11044_v55 = vunpack.i.l.bf16 %v16424_v59  ;;  %v17861_v6 = vld [vmem:[#allocation100_spill] sm:$0xff]  ;;  %17862 = vst [vmem:[#allocation120_spill] sm:$0xff] %v16467_v61  ;;  %v6483_v54 = vld [vmem:[#allocation2 + $0x199] sm:$0xff]  ;;  %v11045_v25 = vunpack.i.h.bf16 %v16424_v59  ;;  %v11406_v59 = vld [vmem:[#allocation2 + $0x141] sm:$0xff] }
 0x85a   : > { %8033 = vmatmul.f32.gmra.mxu0 %v16137_v9  ;;  %8123 = vmatmul.f32.gmra.mxu3 %v7735_v15  ;;  %v11039_v9 = vunpack.i.l.bf16 %v16318_v2  ;;  %v11286_v15 = vpack.i.bf16 %v6485_v48, %v11403_v30  ;;  %v11049_v48 = vunpack.i.l.bf16 %v16422_v57 }
 0x85b   : > { %8173 = vmatmul.f32.gmra.mxu1 %v7842_v44  ;;  %11272 = vrot.lane.b32.xlu1 %v11271_v34, %s11469_s17  ;;  %v16453_v44 = vld [vmem:[#allocation2 + $0x131] sm:$0xff]  ;;  %v11281_v34 = vpack.i.bf16 %v6482_v17, %v11402_v37  ;;  %v11261_v17 = vpack.i.bf16 %v16467_v61, %v6509_v56  ;;  %v16482_v37 = vld [vmem:[#allocation2 + $0x139] sm:$0xff] }
 0x85c   : > { %11267 = vrot.lane.b32.xlu0 %v11266_v21, %s11468_s24  ;;  %11247 = vrot.lane.b32.xlu2 %v11246_v3, %s11470_s18  ;;  %v6437_v21 = vld [vmem:[#allocation2 + $0x40] sm:$0xff]  ;;  %v6510_v61 = vld [vmem:[#allocation2 + $0xf0] sm:$0xff] }
 0x85d   : > { %v16449_v50 = vpop.permute.xlu1 %11062  ;;  %9027 = vmatmul.msk.f32.gmra.mxu2 %vm2472_vm4, %v16453_v44  ;;  %v16459_v23 = vpop.f32.mrf.mxu2  ;;  %v7748_v39 = vsel %vm2472_vm4, %v6437_v21, %v11039_v9  ;;  %v6486_v9 = vld [vmem:[#allocation2 + $0x1af] sm:$0xff] }
 0x85e   : > { %v16451_v19 = vpop.permute.xlu0 %11057  ;;  %v11065_v38 = vunpack.i.h.bf16 %v16449_v50  ;;  %17859 = vst [vmem:[#allocation103_spill] sm:$0xff] %v16459_v23  ;;  %v7796_v13 = vsel %vm2521_vm5, %v7748_v39, %v11044_v55  ;;  %v11405_v39 = vld [vmem:[#allocation2 + $0xff] sm:$0xff]  ;;  %v17864_v23 = vld [vmem:[#allocation88_spill] sm:$0xff] }
 0x85f   : > { %v7844_v30 = vsel %vm2570_vm6, %v7796_v13, %v11049_v48  ;;  %v11301_v55 = vpack.i.bf16 %v6486_v9, %v11405_v39  ;;  %v6439_v9 = vld [vmem:[#allocation2 + $0x50] sm:$0xff] }
 0x860   : > { %v7736_v3 = vsel %vm2570_vm6, %v17860_v29, %v11065_v38  ;;  %v11070_v38 = vunpack.i.h.bf16 %v16405_v51 }
 0x862   : > { %8036 = vmatmul.f32.gmra.mxu0 %v17861_v6  ;;  %8126 = vmatmul.f32.gmra.mxu3 %v7736_v3  ;;  %v16474_v6 = vpop.permute.xlu2 %11097  ;;  %v17863_v3 = vld [vmem:[#allocation97_spill] sm:$0xff] }
 0x863   : > { %8176 = vmatmul.f32.gmra.mxu1 %v7843_v0  ;;  %11287 = vrot.lane.b32.xlu1 %v11286_v15, %s11469_s17  ;;  %v11296_v15 = vpack.i.bf16 %v6483_v54, %v16094_v14  ;;  %v7737_v56 = vsel %vm2570_vm6, %v17863_v3, %v11070_v38  ;;  %v11085_v14 = vunpack.i.h.bf16 %v16439_v42  ;;  %v11054_v38 = vunpack.i.l.bf16 %v16359_v8  ;;  %v6533_v3 = vld [vmem:[#allocation2 + $0x1a8] sm:$0xff] }
 0x864   : > { %11282 = vrot.lane.b32.xlu0 %v11281_v34, %s11468_s24  ;;  %11262 = vrot.lane.b32.xlu2 %v11261_v17, %s11470_s18  ;;  %v11040_v34 = vunpack.i.h.bf16 %v16318_v2  ;;  %v6438_v17 = vld [vmem:[#allocation2 + $0x48] sm:$0xff]  ;;  %v11276_v2 = vpack.i.bf16 %v6532_v28, %v6510_v61 }
 0x865   : > { %v16478_v21 = vpop.permute.xlu1 %11077  ;;  %9028 = vmatmul.msk.f32.gmra.mxu2 %vm2472_vm4, %v16482_v37  ;;  %v16489_v29 = vpop.f32.mrf.mxu2  ;;  %v7750_v39 = vsel %vm2472_vm4, %v6439_v9, %v11054_v38  ;;  %v6534_v9 = vld [vmem:[#allocation2 + $0x1b0] sm:$0xff] }
 0x866   : > { %v16480_v0 = vpop.permute.xlu0 %11072  ;;  %v7749_v48 = vsel %vm2472_vm4, %v6438_v17, %v11040_v34 }
 0x867   : > { %v7797_v61 = vsel %vm2521_vm5, %v7749_v48, %v11045_v25  ;;  %v11064_v25 = vunpack.i.l.bf16 %v16449_v50  ;;  %v11055_v48 = vunpack.i.h.bf16 %v16359_v8 }
 0x86a   : > { %8039 = vmatmul.f32.gmra.mxu0 %v17864_v23  ;;  %8129 = vmatmul.f32.gmra.mxu3 %v7737_v56  ;;  %v11050_v23 = vunpack.i.h.bf16 %v16422_v57  ;;  %v16507_v28 = vpop.permute.xlu2 %11112 }
 0x86b   : > { %8179 = vmatmul.f32.gmra.mxu1 %v7844_v30  ;;  %11302 = vrot.lane.b32.xlu1 %v11301_v55, %s11469_s17  ;;  %v11059_v30 = vunpack.i.l.bf16 %v16451_v19  ;;  %v6511_v55 = vld [vmem:[#allocation2 + $0xf8] sm:$0xff] }
 0x86c   : > { %11297 = vrot.lane.b32.xlu0 %v11296_v15, %s11468_s24  ;;  %11277 = vrot.lane.b32.xlu2 %v11276_v2, %s11470_s18  ;;  %v7738_v15 = vsel %vm2570_vm6, %v16035_v49, %v11085_v14  ;;  %v7845_v57 = vsel %vm2570_vm6, %v7797_v61, %v11050_v23  ;;  %v11291_v56 = vpack.i.bf16 %v6533_v3, %v6511_v55  ;;  %v6512_v61 = vld [vmem:[#allocation2 + $0x100] sm:$0xff] }
 0x86d   : > { %v16502_v13 = vpop.permute.xlu1 %11092  ;;  %9029 = vmatmul.msk.f32.gmra.mxu2 %vm2472_vm4, %v11406_v59  ;;  %v7798_v2 = vsel %vm2521_vm5, %v7750_v39, %v11059_v30  ;;  %v6440_v59 = vld [vmem:[#allocation2 + $0x58] sm:$0xff]  ;;  %v11060_v30 = vunpack.i.h.bf16 %v16451_v19  ;;  %v6441_v55 = vld [vmem:[#allocation2 + $0x60] sm:$0xff] }
 0x86e   : > { %v16504_v54 = vpop.permute.xlu0 %11087  ;;  %v7846_v14 = vsel %vm2570_vm6, %v7798_v2, %v11064_v25  ;;  %v7751_v8 = vsel %vm2472_vm4, %v6440_v59, %v11055_v48  ;;  %v11407_v48 = vld [vmem:[#allocation2 + $0x107] sm:$0xff]  ;;  %v11084_v59 = vunpack.i.l.bf16 %v16439_v42 }
 0x86f   : > { %v16510_v34 = vpop.f32.mrf.mxu2  ;;  %v11090_v17 = vunpack.i.h.bf16 %v16504_v54  ;;  %v7799_v19 = vsel %vm2521_vm5, %v7751_v8, %v11060_v30  ;;  %v11080_v8 = vunpack.i.h.bf16 %v16478_v21 }
 0x871   : > { %v7739_v23 = vsel %vm2570_vm6, %v16038_v63, %v11090_v17  ;;  %v11074_v63 = vunpack.i.l.bf16 %v16480_v0 }
 0x872   : > { %8042 = vmatmul.f32.gmra.mxu0 %v16176_v18  ;;  %8132 = vmatmul.f32.gmra.mxu3 %v7738_v15  ;;  %v16532_v50 = vpop.permute.xlu2 %11127 }
 0x873   : > { %8182 = vmatmul.f32.gmra.mxu1 %v7845_v57  ;;  %v11069_v57 = vunpack.i.l.bf16 %v16405_v51  ;;  %v7752_v2 = vsel %vm2472_vm4, %v6441_v55, %v11074_v63  ;;  %v11089_v63 = vunpack.i.l.bf16 %v16504_v54  ;;  %v6443_v55 = vld [vmem:[#allocation2 + $0x70] sm:$0xff] }
 0x874   : > { %11292 = vrot.lane.b32.xlu2 %v11291_v56, %s11470_s18  ;;  %v11079_v56 = vunpack.i.l.bf16 %v16478_v21 }
 0x875   : > { %v16522_v49 = vpop.permute.xlu1 %11107  ;;  %9030 = vmatmul.msk.f32.gmra.mxu2 %vm2472_vm4, %v16113_v5  ;;  %v11306_v5 = vpack.i.bf16 %v6534_v9, %v6512_v61  ;;  %v7847_v17 = vsel %vm2570_vm6, %v7799_v19, %v11069_v57  ;;  %v11094_v57 = vunpack.i.l.bf16 %v16502_v13 }
 0x876   : > { %v16524_v18 = vpop.permute.xlu0 %11102 }
 0x877   : > { %v16530_v38 = vpop.f32.mrf.mxu2  ;;  %v11105_v15 = vunpack.i.h.bf16 %v16524_v18 }
 0x879   : > { %v7740_v25 = vsel %vm2570_vm6, %v16041_v20, %v11105_v15  ;;  %v11110_v20 = vunpack.i.h.bf16 %v16522_v49 }
 0x87a   : > { %8045 = vmatmul.f32.gmra.mxu0 %v16180_v40  ;;  %8135 = vmatmul.f32.gmra.mxu3 %v7739_v23 }
 0x87b   : > { %8185 = vmatmul.f32.gmra.mxu1 %v7846_v14  ;;  %v11408_v14 = vld [vmem:[#allocation2 + $0x10f] sm:$0xff]  ;;  %v7741_v30 = vsel %vm2570_vm6, %v16050_v4, %v11110_v20  ;;  %v11130_v20 = vunpack.i.h.bf16 %v16532_v50 }
 0x87c   : > { %11307 = vrot.lane.b32.xlu2 %v11306_v5, %s11470_s18  ;;  %v16555_v51 = vpop.permute.xlu2 %11142  ;;  %v11316_v23 = vpack.i.bf16 %v11408_v14, %v11407_v48  ;;  %v6442_v5 = vld [vmem:[#allocation2 + $0x68] sm:$0xff]  ;;  %v11409_v48 = vld [vmem:[#allocation2 + $0x11f] sm:$0xff]  ;;  %v11410_v14 = vld [vmem:[#allocation2 + $0x117] sm:$0xff] }
 0x87d   : > { %v16543_v39 = vpop.permute.xlu1 %11122  ;;  %9031 = vmatmul.msk.f32.gmra.mxu2 %vm2472_vm4, %v16152_v1  ;;  %v11311_v1 = vpack.i.bf16 %v16201_v27, %v16142_v35  ;;  %v11075_v35 = vunpack.i.h.bf16 %v16480_v0 }
 0x87e   : > { %v16545_v40 = vpop.permute.xlu0 %11117  ;;  %11317 = vrot.lane.b32.xlu1 %v11316_v23, %s11469_s17  ;;  %v11125_v0 = vunpack.i.h.bf16 %v16543_v39  ;;  %v11331_v23 = vpack.i.bf16 %v11409_v48, %v11410_v14  ;;  %v11109_v14 = vunpack.i.l.bf16 %v16522_v49 }
 0x87f   : > { %v16550_v3 = vpop.f32.mrf.mxu2  ;;  %11312 = vrot.lane.b32.xlu0 %v11311_v1, %s11468_s24  ;;  %v7754_v1 = vsel %vm2472_vm4, %v6443_v55, %v11094_v57  ;;  %v17867_v55 = vld [vmem:[#allocation108_spill] sm:$0xff] }
 0x882   : > { %8048 = vmatmul.f32.gmra.mxu0 %v16184_v11  ;;  %8138 = vmatmul.f32.gmra.mxu3 %v7740_v25  ;;  %v7800_v11 = vsel %vm2521_vm5, %v7752_v2, %v11079_v56  ;;  %v11099_v25 = vunpack.i.l.bf16 %v16474_v6 }
 0x883   : > { %8188 = vmatmul.f32.gmra.mxu1 %v7847_v17  ;;  %v7848_v27 = vsel %vm2570_vm6, %v7800_v11, %v11084_v59  ;;  %v17865_v17 = vld [vmem:[#allocation102_spill] sm:$0xff]  ;;  %v11104_v59 = vunpack.i.l.bf16 %v16524_v18 }
 0x884   : > { %v16581_v15 = vpop.permute.xlu2 %11157  ;;  %v7742_v2 = vsel %vm2570_vm6, %v17865_v17, %v11125_v0  ;;  %v17866_v0 = vld [vmem:[#allocation87_spill] sm:$0xff]  ;;  %v16638_v17 = vld [vmem:[#allocation2 + $0x110] sm:$0xff] }
 0x885   : > { %v16569_v9 = vpop.permute.xlu1 %11137  ;;  %9032 = vmatmul.msk.f32.gmra.mxu2 %vm2472_vm4, %v16208_v62  ;;  %v7753_v62 = vsel %vm2472_vm4, %v6442_v5, %v11075_v35  ;;  %v7743_v57 = vsel %vm2570_vm6, %v17866_v0, %v11130_v20 }
 0x886   : > { %v16567_v61 = vpop.permute.xlu0 %11132  ;;  %v7801_v21 = vsel %vm2521_vm5, %v7753_v62, %v11080_v8  ;;  %11332 = vrot.lane.b32.xlu1 %v11331_v23, %s11469_s17  ;;  %v11140_v8 = vunpack.i.h.bf16 %v16569_v9  ;;  %v16650_v23 = vld [vmem:[#allocation2 + $0x148] sm:$0xff] }
 0x887   : > { %v16575_v42 = vpop.f32.mrf.mxu2  ;;  %v7849_v54 = vsel %vm2570_vm6, %v7801_v21, %v11089_v63  ;;  %v11135_v11 = vunpack.i.h.bf16 %v16567_v61  ;;  %v6444_v21 = vld [vmem:[#allocation2 + $0x78] sm:$0xff] }
 0x88a   : > { %8051 = vmatmul.f32.gmra.mxu0 %v16192_v24  ;;  %8141 = vmatmul.f32.gmra.mxu3 %v7741_v30  ;;  %v11095_v30 = vunpack.i.h.bf16 %v16502_v13  ;;  %v11145_v13 = vunpack.i.h.bf16 %v16555_v51 }
 0x88b   : > { %8191 = vmatmul.f32.gmra.mxu1 %v7848_v27  ;;  %v16614_v27 = vld [vmem:[#allocation2 + $0x140] sm:$0xff] }
 0x88c   : > { %v16611_v35 = vpop.permute.xlu2 %11172  ;;  %v7780_v63 = vsel %vm2472_vm4, %v16614_v27, %v11135_v11  ;;  %v6445_v11 = vld [vmem:[#allocation2 + $0x80] sm:$0xff] }
 0x88d   : > { %v16589_v4 = vpop.permute.xlu1 %11152  ;;  %9033 = vmatmul.msk.f32.gmra.mxu2 %vm2472_vm4, %v16249_v32  ;;  %v11326_v32 = vpack.i.bf16 %v16282_v22, %v16245_v43 }
 0x88e   : > { %v16587_v19 = vpop.permute.xlu0 %11147 }
 0x88f   : > { %v16593_v24 = vpop.f32.mrf.mxu0  ;;  %v16596_v56 = vpop.f32.mrf.mxu2  ;;  %11327 = vrot.lane.b32.xlu0 %v11326_v32, %s11468_s24  ;;  %v11150_v48 = vunpack.i.h.bf16 %v16587_v19 }
 0x891   : > { %v7781_v0 = vsel %vm2472_vm4, %v16650_v23, %v11150_v48  ;;  %v6518_v48 = vld [vmem:[#allocation2 + $0x130] sm:$0xff] }
 0x892   : > { %8054 = vmatmul.f32.gmra.mxu0 %v16028_v36  ;;  %8144 = vmatmul.f32.gmra.mxu3 %v7742_v2  ;;  %v7802_v36 = vsel %vm2521_vm5, %v7754_v1, %v11099_v25  ;;  %v16636_v25 = vld [vmem:[#allocation2 + $0x108] sm:$0xff]  ;;  %v11341_v2 = vpack.i.bf16 %v16355_v47, %v16323_v10  ;;  %v7755_v1 = vsel %vm2472_vm4, %v6444_v21, %v11095_v30  ;;  %v11155_v30 = vunpack.i.h.bf16 %v16589_v4 }
 0x893   : > { %8194 = vmatmul.f32.gmra.mxu1 %v7849_v54  ;;  %v7850_v5 = vsel %vm2570_vm6, %v7802_v36, %v11104_v59  ;;  %v7828_v54 = vsel %vm2521_vm5, %v7780_v63, %v11140_v8  ;;  %v11321_v32 = vpack.i.bf16 %v16638_v17, %v16636_v25  ;;  %v11119_v8 = vunpack.i.l.bf16 %v16545_v40 }
 0x894   : > { %v7876_v20 = vsel %vm2570_vm6, %v7828_v54, %v11145_v13  ;;  %v11160_v21 = vunpack.i.h.bf16 %v16581_v15  ;;  %v11124_v13 = vunpack.i.l.bf16 %v16543_v39  ;;  %v11115_v39 = vunpack.i.h.bf16 %v16507_v28 }
 0x895   : > { %v16618_v22 = vpop.permute.xlu1 %11167  ;;  %9034 = vmatmul.msk.f32.gmra.mxu2 %vm2472_vm4, %v16286_v26  ;;  %v11100_v26 = vunpack.i.h.bf16 %v16474_v6  ;;  %v11114_v6 = vunpack.i.l.bf16 %v16507_v28  ;;  %11322 = vrot.lane.b32.xlu2 %v11321_v32, %s11470_s18  ;;  %v11175_v28 = vunpack.i.h.bf16 %v16611_v35 }
 0x896   : > { %v16616_v43 = vpop.permute.xlu0 %11162 }
 0x897   : > { %v16622_v18 = vpop.f32.mrf.mxu0  ;;  %v16627_v62 = vpop.f32.mrf.mxu2  ;;  %11342 = vrot.lane.b32.xlu0 %v11341_v2, %s11468_s24  ;;  %v7803_v36 = vsel %vm2521_vm5, %v7755_v1, %v11100_v26  ;;  %v7756_v63 = vsel %vm2472_vm4, %v6445_v11, %v11114_v6  ;;  %v7829_v2 = vsel %vm2521_vm5, %v7781_v0, %v11155_v30  ;;  %v11165_v1 = vunpack.i.h.bf16 %v16616_v43  ;;  %v6446_v30 = vld [vmem:[#allocation2 + $0x88] sm:$0xff] }
 0x898   : > { %v7804_v54 = vsel %vm2521_vm5, %v7756_v63, %v11119_v8  ;;  %v16701_v63 = vld [vmem:[#allocation2 + $0x118] sm:$0xff] }
 0x89a   : > { %8057 = vmatmul.f32.gmra.mxu0 %v17867_v55  ;;  %8147 = vmatmul.f32.gmra.mxu3 %v7743_v57  ;;  %v7851_v57 = vsel %vm2570_vm6, %v7803_v36, %v11109_v14  ;;  %v11411_v55 = vld [vmem:[#allocation2 + $0x12f] sm:$0xff]  ;;  %v7877_v14 = vsel %vm2570_vm6, %v7829_v2, %v11160_v21  ;;  %v11170_v36 = vunpack.i.h.bf16 %v16618_v22  ;;  %v16703_v21 = vld [vmem:[#allocation2 + $0x120] sm:$0xff]  ;;  %v11351_v2 = vpack.i.bf16 %v16426_v45, %v16395_v31 }
 0x89b   : > { %8197 = vmatmul.f32.gmra.mxu1 %v7850_v5  ;;  %v16662_v5 = vpop.permute.xlu2 %11187  ;;  %v11346_v26 = vpack.i.bf16 %v11411_v55, %v16327_v60  ;;  %v11139_v31 = vunpack.i.l.bf16 %v16569_v9 }
 0x89d   : > { %v16654_v10 = vpop.permute.xlu1 %11182  ;;  %11347 = vrot.lane.b32.xlu1 %v11346_v26, %s11469_s17  ;;  %v7757_v26 = vsel %vm2472_vm4, %v6446_v30, %v11115_v39 }
 0x89e   : > { %v16652_v59 = vpop.permute.xlu0 %11177 }
 0x89f   : > { %v16657_v47 = vpop.f32.mrf.mxu0  ;;  %v16664_v49 = vpop.f32.mrf.mxu2  ;;  %7518 = vrot.lane.b32.xlu0 %v6518_v48, %s11470_s18 }
 0x8a2   : > { %8060 = vmatmul.f32.gmra.mxu0 %v16226_v33  ;;  %8275 = vmatmul.f32.vlgmr.msrb.gmra.mxu3 %v7876_v20  ;;  %v16679_v33 = vld [vmem:[#allocation2 + $0x150] sm:$0xff]  ;;  %v7852_v20 = vsel %vm2570_vm6, %v7804_v54, %v11124_v13  ;;  %v11336_v13 = vpack.i.bf16 %v16703_v21, %v16701_v63  ;;  %v11134_v54 = vunpack.i.l.bf16 %v16567_v61 }
 0x8a3   : > { %8200 = vmatmul.f32.gmra.mxu1 %v7851_v57  ;;  %v7782_v11 = vsel %vm2472_vm4, %v16679_v33, %v11165_v1  ;;  %v16697_v0 = vpop.permute.xlu2 %11202  ;;  %v11120_v57 = vunpack.i.h.bf16 %v16545_v40  ;;  %v11129_v40 = vunpack.i.l.bf16 %v16532_v50 }
 0x8a4   : > { %v7830_v55 = vsel %vm2521_vm5, %v7782_v11, %v11170_v36  ;;  %11337 = vrot.lane.b32.xlu2 %v11336_v13, %s11470_s18  ;;  %v11185_v36 = vunpack.i.h.bf16 %v16654_v10 }
 0x8a5   : > { %v16686_v60 = vpop.permute.xlu1 %11197  ;;  %v7805_v39 = vsel %vm2521_vm5, %v7757_v26, %v11120_v57  ;;  %11352 = vrot.lane.b32.xlu1 %v11351_v2, %s11468_s24  ;;  %v11190_v57 = vunpack.i.h.bf16 %v16662_v5  ;;  %v11149_v26 = vunpack.i.l.bf16 %v16587_v19  ;;  %v6448_v2 = vld [vmem:[#allocation2 + $0x98] sm:$0xff]  ;;  %v11154_v19 = vunpack.i.l.bf16 %v16589_v4 }
 0x8a6   : > { %v16681_v32 = vpop.permute.xlu0 %11192  ;;  %v7853_v61 = vsel %vm2570_vm6, %v7805_v39, %v11129_v40  ;;  %v11412_v40 = vld [vmem:[#allocation2 + $0x13f] sm:$0xff] }
 0x8a7   : > { %v16683_v6 = vpop.f32.mrf.mxu0  ;;  %v16694_v8 = vpop.f32.mrf.mxu2 }
 0x8aa   : > { %8063 = vmatmul.f32.gmra.mxu0 %v16230_v12  ;;  %8278 = vmatmul.f32.gmra.mxu3 %v7877_v14  ;;  %v11180_v12 = vunpack.i.h.bf16 %v16652_v59  ;;  %v7878_v14 = vsel %vm2570_vm6, %v7830_v55, %v11175_v28  ;;  %v11144_v28 = vunpack.i.l.bf16 %v16555_v51 }
 0x8ab   : > { %8203 = vmatmul.f32.gmra.mxu1 %v7852_v20  ;;  %v6447_v20 = vld [vmem:[#allocation2 + $0x90] sm:$0xff]  ;;  %v16736_v55 = vpop.permute.xlu2 %11217 }
 0x8ac   : > { %v7783_v45 = vsel %vm2472_vm4, %v16172_v58, %v11180_v12  ;;  %v7758_v11 = vsel %vm2472_vm4, %v6447_v20, %v11134_v54  ;;  %v16745_v54 = vld [vmem:[#allocation2 + $0x138] sm:$0xff] }
 0x8ad   : > { %v16726_v50 = vpop.permute.xlu1 %11212  ;;  %v7831_v9 = vsel %vm2521_vm5, %v7783_v45, %v11185_v36  ;;  %v7806_v58 = vsel %vm2521_vm5, %v7758_v11, %v11139_v31  ;;  %7330 = vrot.lane.b32.xlu1 %v11412_v40, %s11469_s17  ;;  %7520 = vrot.lane.b32.xlu0 %v16745_v54, %s11470_s18  ;;  %v17868_v36 = vld [vmem:[#allocation83_spill] sm:$0xff]  ;;  %v7759_v31 = vsel %vm2472_vm4, %v6448_v2, %v11149_v26  ;;  %v11205_v45 = vunpack.i.h.bf16 %v16697_v0 }
 0x8ae   : > { %v16714_v1 = vpop.permute.xlu0 %11207  ;;  %v7879_v12 = vsel %vm2570_vm6, %v7831_v9, %v11190_v57  ;;  %v7854_v51 = vsel %vm2570_vm6, %v7806_v58, %v11144_v28  ;;  %v11159_v11 = vunpack.i.l.bf16 %v16581_v15  ;;  %v7807_v4 = vsel %vm2521_vm5, %v7759_v31, %v11154_v19  ;;  %v16773_v2 = vld [vmem:[#allocation2 + $0x128] sm:$0xff]  ;;  %v17869_v19 = vld [vmem:[#allocation81_spill] sm:$0xff] }
 0x8af   : > { %v16717_v48 = vpop.f32.mrf.mxu0  ;;  %v16731_v30 = vpop.f32.mrf.mxu2  ;;  %v11164_v9 = vunpack.i.l.bf16 %v16616_v43  ;;  %v11413_v15 = vld [vmem:[#allocation2 + $0x147] sm:$0xff]  ;;  %7516 = vrot.lane.b32.xlu2 %v16773_v2, %s11470_s18  ;;  %v11169_v43 = vunpack.i.l.bf16 %v16618_v22  ;;  %v11220_v31 = vunpack.i.h.bf16 %v16736_v55 }
 0x8b0   : > { %v7855_v40 = vsel %vm2570_vm6, %v7807_v4, %v11159_v11  ;;  %v11179_v4 = vunpack.i.l.bf16 %v16652_v59 }
 0x8b2   : > { %8066 = vmatmul.f32.gmra.mxu0 %v16234_v46  ;;  %8281 = vmatmul.f32.gmra.mxu3 %v7878_v14  ;;  %v11195_v46 = vunpack.i.h.bf16 %v16681_v32  ;;  %v11200_v14 = vunpack.i.h.bf16 %v16686_v60 }
 0x8b3   : > { %8206 = vmatmul.f32.gmra.mxu1 %v7853_v61  ;;  %v16768_v58 = vpop.permute.xlu2 %11232 }
 0x8b4   : > { %v7784_v20 = vsel %vm2472_vm4, %v16222_v53, %v11195_v46  ;;  %v11210_v53 = vunpack.i.h.bf16 %v16714_v1 }
 0x8b5   : > { %v16759_v61 = vpop.permute.xlu1 %11227  ;;  %v7832_v57 = vsel %vm2521_vm5, %v7784_v20, %v11200_v14  ;;  %7332 = vrot.lane.b32.xlu1 %v11413_v15, %s11469_s17  ;;  %7185 = vrot.lane.b32.xlu0 %v16453_v44, %s11468_s24  ;;  %v11414_v15 = vld [vmem:[#allocation2 + $0x14f] sm:$0xff] }
 0x8b6   : > { %v16749_v39 = vpop.permute.xlu0 %11222  ;;  %v7880_v26 = vsel %vm2570_vm6, %v7832_v57, %v11205_v45  ;;  %v7785_v14 = vsel %vm2472_vm4, %v16257_v7, %v11210_v53  ;;  %v11174_v45 = vunpack.i.l.bf16 %v16611_v35  ;;  %v11230_v59 = vunpack.i.h.bf16 %v16759_v61 }
 0x8b7   : > { %v16741_v13 = vpop.f32.mrf.mxu0  ;;  %v16763_v28 = vpop.f32.mrf.mxu2  ;;  %v11225_v7 = vunpack.i.h.bf16 %v16749_v39 }
 0x8ba   : > { %8069 = vmatmul.f32.gmra.mxu0 %v17868_v36  ;;  %8284 = vmatmul.f32.gmra.mxu3 %v7879_v12  ;;  %v6449_v12 = vld [vmem:[#allocation2 + $0xa0] sm:$0xff] }
 0x8bb   : > { %8209 = vmatmul.f32.gmra.mxu1 %v7854_v51  ;;  %v11215_v51 = vunpack.i.h.bf16 %v16726_v50  ;;  %v7760_v20 = vsel %vm2472_vm4, %v6449_v12, %v11164_v9  ;;  %v16804_v9 = vld [vmem:[%s17367_s10] ss:$0 sm:$0xff]  ;;  %v6450_v12 = vld [vmem:[#allocation2 + $0xa8] sm:$0xff] }
 0x8bc   : > { %v7808_v22 = vsel %vm2521_vm5, %v7760_v20, %v11169_v43  ;;  %v16812_v43 = vpop.permute.xlu2 %11247  ;;  %v7786_v20 = vsel %vm2472_vm4, %v16302_v52, %v11225_v7 }
 0x8bd   : > { %v7833_v11 = vsel %vm2521_vm5, %v7785_v14, %v11215_v51  ;;  %v16796_v57 = vpop.permute.xlu1 %11242  ;;  %7334 = vrot.lane.b32.xlu1 %v11414_v15, %s11469_s17  ;;  %v7856_v51 = vsel %vm2570_vm6, %v7808_v22, %v11174_v45  ;;  %v11415_v14 = vld [vmem:[#allocation2 + $0x137] sm:$0xff]  ;;  %7187 = vrot.lane.b32.xlu0 %v16482_v37, %s11468_s24  ;;  %v7761_v45 = vsel %vm2472_vm4, %v6450_v12, %v11179_v4  ;;  %v11235_v22 = vunpack.i.h.bf16 %v16768_v58 }
 0x8be   : > { %v16787_v36 = vpop.permute.xlu0 %11237  ;;  %7328 = vrot.lane.b32.xlu2 %v11415_v14, %s11469_s17  ;;  %v11189_v15 = vunpack.i.l.bf16 %v16662_v5  ;;  %v7834_v37 = vsel %vm2521_vm5, %v7786_v20, %v11230_v59  ;;  %v11194_v4 = vunpack.i.l.bf16 %v16681_v32  ;;  %v6451_v12 = vld [vmem:[#allocation2 + $0xb0] sm:$0xff]  ;;  %v11245_v20 = vunpack.i.h.bf16 %v16796_v57 }
 0x8bf   : > { %v16770_v46 = vpop.f32.mrf.mxu0  ;;  %v16799_v53 = vpop.f32.mrf.mxu2  ;;  %v11240_v7 = vunpack.i.h.bf16 %v16787_v36  ;;  %v7882_v5 = vsel %vm2570_vm6, %v7834_v37, %v11235_v22  ;;  %v11199_v32 = vunpack.i.l.bf16 %v16686_v60  ;;  %v17873_v37 = vld [vmem:[#allocation101_spill] sm:$0xff]  ;;  %v11204_v60 = vunpack.i.l.bf16 %v16697_v0 }
 0x8c0   : > { %17870 = vst [vmem:[#allocation104_spill] sm:$0xff] %v16799_v53  ;;  %v7762_v22 = vsel %vm2472_vm4, %v6451_v12, %v11194_v4  ;;  %v8014_v0 = vadd.f32 %v16804_v9, %v16657_v47 }
 0x8c2   : > { %8072 = vmatmul.f32.gmra.mxu0 %v17869_v19  ;;  %8287 = vmatmul.f32.gmra.mxu3 %v7880_v26  ;;  %v7881_v26 = vsel %vm2570_vm6, %v7833_v11, %v11220_v31  ;;  %v11184_v19 = vunpack.i.l.bf16 %v16654_v10  ;;  %v17871_v31 = vld [vmem:[#allocation85_spill] sm:$0xff]  ;;  %v8008_v11 = vadd.f32 %v16804_v9, %v16593_v24  ;;  %v8011_v24 = vadd.f32 %v16804_v9, %v16622_v18 }
 0x8c3   : > { %8212 = vmatmul.f32.gmra.mxu1 %v7855_v40  ;;  %v17872_v18 = vld [vmem:[#allocation77_spill] sm:$0xff] }
 0x8c4   : > { %v7809_v52 = vsel %vm2521_vm5, %v7761_v45, %v11184_v19 }
 0x8c5   : > { %v16792_v44 = vpop.f32.mrf.mxu3 }
 0x8c6   : > { %v16827_v14 = vpop.permute.xlu0 %11252  ;;  %7522 = vrot.lane.b32.xlu2 %v16614_v27, %s11470_s18  ;;  %v11250_v27 = vunpack.i.h.bf16 %v16812_v43 }
 0x8c7   : > { %v16806_v35 = vpop.f32.mrf.mxu0  ;;  %v11255_v4 = vunpack.i.h.bf16 %v16827_v14 }
 0x8c8   : > { %v8168_v40 = vpop.f32.mrf.mxu1  ;;  %v16843_v19 = vpop.f32.mrf.mxu2 }
 0x8c9   : > { %v8169_v10 = vadd.f32 %v8168_v40, %v8008_v11  ;;  %v7857_v40 = vsel %vm2570_vm6, %v7809_v52, %v11189_v15  ;;  %v7787_v11 = vsel %vm2472_vm4, %v16339_v41, %v11240_v7  ;;  %v16853_v15 = vpop.permute.xlu2 %11262  ;;  %v8634_v41 = vld [vmem:[%s11570_s28] sm:$0xff] }
 0x8ca   : > { %8075 = vmatmul.f32.gmra.mxu0 %v17871_v31  ;;  %8290 = vmatmul.f32.gmra.mxu3 %v7881_v26 }
 0x8cb   : > { %8215 = vmatmul.f32.gmra.mxu1 %v7856_v51  ;;  %v16839_v51 = vpop.permute.xlu1 %11257  ;;  %v8330_v31 = vadd.f32 %v17872_v18, %v8169_v10  ;;  %v7835_v10 = vsel %vm2521_vm5, %v7787_v11, %v11245_v20 }
 0x8cc   : > { %v7883_v18 = vsel %vm2570_vm6, %v7835_v10, %v11250_v27  ;;  %v17875_v27 = vld [vmem:[#allocation111_spill] sm:$0xff] }
 0x8cd   : > { %v16829_v53 = vpop.f32.mrf.mxu3 }
 0x8ce   : > { %v16865_v12 = vpop.permute.xlu0 %11267  ;;  %7524 = vrot.lane.b32.xlu2 %v16650_v23, %s11470_s18 }
 0x8cf   : > { %v16836_v26 = vpop.f32.mrf.mxu0 }
 0x8d0   : > { %v8171_v59 = vpop.f32.mrf.mxu1  ;;  %v16886_v10 = vpop.f32.mrf.mxu2 }
 0x8d1   : > { %v8172_v45 = vadd.f32 %v8171_v59, %v8011_v24  ;;  %v8522_v24 = vrot.slane %v8330_v31, 1  ;;  %v6452_v31 = vld [vmem:[#allocation2 + $0xb8] sm:$0xff] }
 0x8d2   : > { %8078 = vmatmul.f32.gmra.mxu0 %v16261_v16  ;;  %8293 = vmatmul.f32.gmra.mxu3 %v7882_v5  ;;  %v7810_v16 = vsel %vm2521_vm5, %v7762_v22, %v11199_v32  ;;  %v11209_v5 = vunpack.i.l.bf16 %v16714_v1  ;;  %v11260_v22 = vunpack.i.h.bf16 %v16839_v51  ;;  %v11214_v1 = vunpack.i.l.bf16 %v16726_v50 }
 0x8d3   : > { %v8333_v52 = vadd.f32 %v17873_v37, %v8172_v45  ;;  %8218 = vmatmul.f32.gmra.mxu1 %v7857_v40  ;;  %v7858_v32 = vsel %vm2570_vm6, %v7810_v16, %v11204_v60  ;;  %v17874_v37 = vld [vmem:[#allocation119_spill] sm:$0xff]  ;;  %v11265_v50 = vunpack.i.h.bf16 %v16853_v15  ;;  %v11219_v16 = vunpack.i.l.bf16 %v16736_v55  ;;  %v6453_v55 = vld [vmem:[#allocation2 + $0xc0] sm:$0xff] }
 0x8d4   : > { %v7763_v60 = vsel %vm2472_vm4, %v6452_v31, %v11209_v5  ;;  %v11224_v31 = vunpack.i.l.bf16 %v16749_v39  ;;  %v17877_v39 = vld [vmem:[#allocation94_spill] sm:$0xff] }
 0x8d5   : > { %v8523_v59 = vrot.slane %v8333_v52, 1  ;;  %v16860_v7 = vpop.f32.mrf.mxu3  ;;  %v7788_v52 = vsel %vm2472_vm4, %v17874_v37, %v11255_v4  ;;  %v7811_v5 = vsel %vm2521_vm5, %v7763_v60, %v11214_v1  ;;  %v11229_v1 = vunpack.i.l.bf16 %v16759_v61 }
 0x8d6   : > { %v7836_v4 = vsel %vm2521_vm5, %v7788_v52, %v11260_v22  ;;  %v7859_v52 = vsel %vm2570_vm6, %v7811_v5, %v11219_v16  ;;  %7526 = vrot.lane.b32.xlu2 %v16679_v33, %s11470_s18  ;;  %v8017_v16 = vadd.f32 %v16804_v9, %v16683_v6  ;;  %v11234_v61 = vunpack.i.l.bf16 %v16768_v58 }
 0x8d7   : > { %v8524_v40 = vsel %vm8521_vm13, %v8522_v24, %v8523_v59  ;;  %v16870_v20 = vpop.f32.mrf.mxu0  ;;  %v16880_v24 = vpop.permute.xlu1 %11272  ;;  %v11239_v6 = vunpack.i.l.bf16 %v16787_v36  ;;  %v17881_v36 = vld [vmem:[#allocation123_spill] sm:$0xff] }
 0x8d8   : > { %v8666_v45 = vadd.f32 %v8634_v41, %v8524_v40  ;;  %v8174_v11 = vpop.f32.mrf.mxu1  ;;  %v17876_v41 = vld [vmem:[#allocation80_spill] sm:$0xff] }
 0x8d9   : > { %v8175_v47 = vadd.f32 %v8174_v11, %v8014_v0  ;;  %v16892_v0 = vpop.permute.xlu2 %11277 }
 0x8da   : > { %8698 = vst.msk [vmem:[%s11622_s2] sm:$0xff] %vm2472_vm4, %v8666_v45  ;;  %8081 = vmatmul.f32.gmra.mxu0 %v17875_v27  ;;  %8296 = vmatmul.f32.gmra.mxu3 %v7883_v18  ;;  %v8635_v45 = vld [vmem:[%s11570_s28 + $0x8] sm:$0xff]  ;;  %v11270_v18 = vunpack.i.h.bf16 %v16865_v12  ;;  %v11275_v27 = vunpack.i.h.bf16 %v16880_v24  ;;  %v11280_v33 = vunpack.i.h.bf16 %v16892_v0 }
 0x8db   : > { %v8336_v23 = vadd.f32 %v17876_v41, %v8175_v47  ;;  %8221 = vmatmul.f32.gmra.mxu1 %v7858_v32  ;;  %v7884_v47 = vsel %vm2570_vm6, %v7836_v4, %v11265_v50  ;;  %v16904_v41 = vpop.permute.xlu0 %11282  ;;  %v7764_v50 = vsel %vm2472_vm4, %v6453_v55, %v11224_v31  ;;  %v8020_v55 = vadd.f32 %v16804_v9, %v16717_v48 }
 0x8dc   : > { %v11285_v31 = vunpack.i.h.bf16 %v16904_v41 }
 0x8dd   : > { %v8525_v40 = vrot.slane %v8336_v23, 1  ;;  %v16895_v11 = vpop.f32.mrf.mxu3  ;;  %v17878_v23 = vld [vmem:[#allocation112_spill] sm:$0xff] }
 0x8df   : > { %v8526_v32 = vsel %vm8521_vm13, %v8523_v59, %v8525_v40  ;;  %v16909_v60 = vpop.f32.mrf.mxu0  ;;  %v7789_v59 = vsel %vm2472_vm4, %v17877_v39, %v11270_v18  ;;  %v16920_v4 = vpop.permute.xlu1 %11287  ;;  %v11244_v39 = vunpack.i.l.bf16 %v16796_v57 }
 0x8e0   : > { %v8667_v37 = vadd.f32 %v8635_v45, %v8526_v32  ;;  %v8177_v22 = vpop.f32.mrf.mxu1  ;;  %v7837_v40 = vsel %vm2521_vm5, %v7789_v59, %v11275_v27  ;;  %v16924_v45 = vpop.f32.mrf.mxu2  ;;  %v7812_v32 = vsel %vm2521_vm5, %v7764_v50, %v11229_v1  ;;  %v17880_v1 = vld [vmem:[#allocation79_spill] sm:$0xff]  ;;  %v7790_v50 = vsel %vm2472_vm4, %v17881_v36, %v11285_v31 }
 0x8e1   : > { %17879 = vst [vmem:[#allocation109_spill] sm:$0xff] %v16924_v45  ;;  %v8178_v5 = vadd.f32 %v8177_v22, %v8017_v16  ;;  %v7885_v58 = vsel %vm2570_vm6, %v7837_v40, %v11280_v33  ;;  %v7860_v27 = vsel %vm2570_vm6, %v7812_v32, %v11234_v61  ;;  %v11290_v22 = vunpack.i.h.bf16 %v16920_v4  ;;  %v17882_v16 = vld [vmem:[#allocation84_spill] sm:$0xff]  ;;  %v17883_v61 = vld [vmem:[#allocation99_spill] sm:$0xff] }
 0x8e2   : > { %8699 = vst.msk [vmem:[%s11622_s2 + $0x8] sm:$0xff] %vm2472_vm4, %v8667_v37  ;;  %8084 = vmatmul.f32.gmra.mxu0 %v17878_v23  ;;  %8299 = vmatmul.f32.gmra.mxu3 %v7884_v47  ;;  %v16931_v47 = vpop.permute.xlu2 %11292  ;;  %v6454_v37 = vld [vmem:[#allocation2 + $0xc8] sm:$0xff]  ;;  %v17885_v45 = vld [vmem:[#allocation120_spill] sm:$0xff] }
 0x8e3   : > { %8224 = vmatmul.f32.gmra.mxu1 %v7859_v52  ;;  %v8339_v59 = vadd.f32 %v17880_v1, %v8178_v5  ;;  %v7765_v48 = vsel %vm2472_vm4, %v6454_v37, %v11239_v6  ;;  %v16944_v33 = vpop.permute.xlu0 %11297  ;;  %v11295_v57 = vunpack.i.h.bf16 %v16931_v47  ;;  %v11249_v5 = vunpack.i.l.bf16 %v16812_v43  ;;  %v8636_v1 = vld [vmem:[%s11570_s28 + $0x10] sm:$0xff] }
 0x8e4   : > { %v7813_v6 = vsel %vm2521_vm5, %v7765_v48, %v11244_v39  ;;  %v8023_v43 = vadd.f32 %v16804_v9, %v16741_v13 }
 0x8e5   : > { %v16926_v18 = vpop.f32.mrf.mxu3  ;;  %v7861_v39 = vsel %vm2570_vm6, %v7813_v6, %v11249_v5  ;;  %v11264_v6 = vunpack.i.l.bf16 %v16853_v15 }
 0x8e7   : > { %v16946_v40 = vpop.f32.mrf.mxu0  ;;  %v16957_v37 = vpop.permute.xlu1 %11302 }
 0x8e8   : > { %v8180_v52 = vpop.f32.mrf.mxu1  ;;  %v11305_v48 = vunpack.i.h.bf16 %v16957_v37 }
 0x8e9   : > { %v8181_v23 = vadd.f32 %v8180_v52, %v8020_v55  ;;  %v7838_v55 = vsel %vm2521_vm5, %v7790_v50, %v11290_v22  ;;  %v8527_v52 = vrot.slane %v8339_v59, 1  ;;  %v6455_v50 = vld [vmem:[#allocation2 + $0xd0] sm:$0xff] }
 0x8ea   : > { %8087 = vmatmul.f32.gmra.mxu0 %v17882_v16  ;;  %8302 = vmatmul.f32.gmra.mxu3 %v7885_v58  ;;  %v11300_v58 = vunpack.i.h.bf16 %v16944_v33  ;;  %v7886_v59 = vsel %vm2570_vm6, %v7838_v55, %v11295_v57  ;;  %v17887_v55 = vld [vmem:[#allocation78_spill] sm:$0xff] }
 0x8eb   : > { %v8342_v32 = vadd.f32 %v17883_v61, %v8181_v23  ;;  %8227 = vmatmul.f32.gmra.mxu1 %v7860_v27  ;;  %v11254_v27 = vunpack.i.l.bf16 %v16827_v14  ;;  %v16960_v23 = vpop.f32.mrf.mxu2  ;;  %v11259_v14 = vunpack.i.l.bf16 %v16839_v51 }
 0x8ec   : > { %17884 = vst [vmem:[#allocation110_spill] sm:$0xff] %v16960_v23  ;;  %v7791_v13 = vsel %vm2472_vm4, %v17885_v45, %v11300_v58  ;;  %v8637_v58 = vld [vmem:[%s11570_s28 + $0x18] sm:$0xff] }
 0x8ed   : > { %v8528_v31 = vrot.slane %v8342_v32, 1  ;;  %v16953_v36 = vpop.f32.mrf.mxu3  ;;  %v16968_v32 = vpop.permute.xlu2 %11307  ;;  %v7766_v57 = vsel %vm2472_vm4, %v6455_v50, %v11254_v27  ;;  %v7839_v51 = vsel %vm2521_vm5, %v7791_v13, %v11305_v48  ;;  %v11269_v27 = vunpack.i.l.bf16 %v16865_v12 }
 0x8ee   : > { %v11274_v13 = vunpack.i.l.bf16 %v16880_v24  ;;  %v11284_v24 = vunpack.i.l.bf16 %v16904_v41 }
 0x8ef   : > { %v8529_v22 = vsel %vm8521_vm13, %v8527_v52, %v8528_v31  ;;  %v17886_v52 = vld [vmem:[#allocation92_spill] sm:$0xff] }
 0x8f0   : > { %v8668_v16 = vadd.f32 %v8636_v1, %v8529_v22  ;;  %v8183_v61 = vpop.f32.mrf.mxu1  ;;  %v11310_v1 = vunpack.i.h.bf16 %v16968_v32 }
 0x8f1   : > { %v8184_v23 = vadd.f32 %v8183_v61, %v8023_v43  ;;  %v16981_v43 = vpop.f32.mrf.mxu0 }
 0x8f2   : > { %8700 = vst.msk [vmem:[%s11622_s2 + $0x10] sm:$0xff] %vm2472_vm4, %v8668_v16  ;;  %8090 = vmatmul.f32.gmra.mxu0 %v17886_v52  ;;  %8305 = vmatmul.f32.gmra.mxu3 %v7886_v59  ;;  %v7814_v59 = vsel %vm2521_vm5, %v7766_v57, %v11259_v14  ;;  %v7887_v50 = vsel %vm2570_vm6, %v7839_v51, %v11310_v1  ;;  %v6456_v16 = vld [vmem:[#allocation2 + $0xd8] sm:$0xff]  ;;  %v11279_v14 = vunpack.i.l.bf16 %v16892_v0  ;;  %v6457_v51 = vld [vmem:[#allocation2 + $0xe0] sm:$0xff]  ;;  %v17889_v0 = vld [vmem:[#allocation107_spill] sm:$0xff] }
 0x8f3   : > { %v8345_v5 = vadd.f32 %v17887_v55, %v8184_v23  ;;  %8230 = vmatmul.f32.gmra.mxu1 %v7861_v39  ;;  %v7862_v39 = vsel %vm2570_vm6, %v7814_v59, %v11264_v6  ;;  %v16991_v48 = vpop.f32.mrf.mxu2  ;;  %v17888_v52 = vld [vmem:[#allocation105_spill] sm:$0xff]  ;;  %v7767_v12 = vsel %vm2472_vm4, %v6456_v16, %v11269_v27  ;;  %v8029_v1 = vadd.f32 %v16804_v9, %v16806_v35  ;;  %v17891_v16 = vld [vmem:[#allocation106_spill] sm:$0xff] }
 0x8f4   : > { %v7768_v41 = vsel %vm2472_vm4, %v6457_v51, %v11284_v24  ;;  %v11304_v51 = vunpack.i.l.bf16 %v16957_v37 }
 0x8f5   : > { %v8530_v45 = vrot.slane %v8345_v5, 1  ;;  %v16984_v22 = vpop.f32.mrf.mxu3  ;;  %v7815_v5 = vsel %vm2521_vm5, %v7767_v12, %v11274_v13  ;;  %v8638_v13 = vld [vmem:[%s11570_s28 + $0x20] sm:$0xff] }
 0x8f7   : > { %v8531_v23 = vsel %vm8521_vm13, %v8528_v31, %v8530_v45  ;;  %v8026_v31 = vadd.f32 %v16804_v9, %v16770_v46  ;;  %v7863_v46 = vsel %vm2570_vm6, %v7815_v5, %v11279_v14  ;;  %v8032_v14 = vadd.f32 %v16804_v9, %v16836_v26  ;;  %v6458_v5 = vld [vmem:[#allocation2 + $0xe8] sm:$0xff] }
 0x8f8   : > { %v8669_v61 = vadd.f32 %v8637_v58, %v8531_v23  ;;  %v8186_v15 = vpop.f32.mrf.mxu1  ;;  %v11289_v58 = vunpack.i.l.bf16 %v16920_v4  ;;  %v17890_v23 = vld [vmem:[#allocation115_spill] sm:$0xff] }
 0x8f9   : > { %v8187_v57 = vadd.f32 %v8186_v15, %v8026_v31  ;;  %v17007_v6 = vpop.f32.mrf.mxu0  ;;  %v11294_v15 = vunpack.i.l.bf16 %v16931_v47  ;;  %v11299_v31 = vunpack.i.l.bf16 %v16944_v33  ;;  %v11417_v33 = vld [vmem:[#allocation2 + $0x179] sm:$0xff] }
 0x8fa   : > { %8701 = vst.msk [vmem:[%s11622_s2 + $0x18] sm:$0xff] %vm2472_vm4, %v8669_v61  ;;  %8093 = vmatmul.f32.gmra.mxu0 %v17888_v52  ;;  %8308 = vmatmul.f32.gmra.mxu3 %v7887_v50  ;;  %v11416_v50 = vld [vmem:[#allocation2 + $0x171] sm:$0xff]  ;;  %v7816_v12 = vsel %vm2521_vm5, %v7768_v41, %v11289_v58  ;;  %v8639_v41 = vld [vmem:[%s11570_s28 + $0x28] sm:$0xff] }
 0x8fb   : > { %8233 = vmatmul.f32.gmra.mxu1 %v7862_v39  ;;  %v8348_v59 = vadd.f32 %v17889_v0, %v8187_v57  ;;  %v17015_v35 = vpop.f32.mrf.mxu2  ;;  %v7864_v47 = vsel %vm2570_vm6, %v7816_v12, %v11294_v15  ;;  %v17892_v58 = vld [vmem:[#allocation116_spill] sm:$0xff]  ;;  %v7769_v26 = vsel %vm2472_vm4, %v6458_v5, %v11299_v31  ;;  %v17893_v0 = vld [vmem:[#allocation86_spill] sm:$0xff] }
 0x8fc   : > { %v6459_v12 = vld [vmem:[#allocation2 + $0xf0] sm:$0xff] }
 0x8fd   : > { %v17001_v55 = vpop.f32.mrf.mxu3  ;;  %v8532_v39 = vrot.slane %v8348_v59, 1 }
 0x900   : > { %v8189_v45 = vpop.f32.mrf.mxu1 }
 0x901   : > { %v8190_v27 = vadd.f32 %v8189_v45, %v8029_v1  ;;  %v17029_v45 = vpop.f32.mrf.mxu0 }
 0x902   : > { %8096 = vmatmul.f32.gmra.mxu0 %v17890_v23  ;;  %9035 = vmatmul.msk.f32.vlgmr.msra.gmra.mxu3 %vm2472_vm4, %v11416_v50  ;;  %v11309_v23 = vunpack.i.l.bf16 %v16968_v32  ;;  %v17894_v32 = vld [vmem:[#allocation118_spill] sm:$0xff] }
 0x903   : > { %v8351_v61 = vadd.f32 %v17891_v16, %v8190_v27  ;;  %8236 = vmatmul.f32.gmra.mxu1 %v7863_v46  ;;  %v11313_v27 = vpop.permute.xlu0 %11312  ;;  %v17038_v37 = vpop.f32.mrf.mxu2 }
 0x904   : > { %v11314_v15 = vunpack.i.l.bf16 %v11313_v27 }
 0x905   : > { %v8533_v4 = vrot.slane %v8351_v61, 1  ;;  %v17020_v52 = vpop.f32.mrf.mxu3  ;;  %v7817_v61 = vsel %vm2521_vm5, %v7769_v26, %v11304_v51  ;;  %v8035_v51 = vadd.f32 %v16804_v9, %v16870_v20  ;;  %v17896_v20 = vld [vmem:[#allocation93_spill] sm:$0xff] }
 0x907   : > { %v8534_v57 = vsel %vm8521_vm13, %v8532_v39, %v8533_v4  ;;  %v11318_v39 = vpop.permute.xlu1 %11317 }
 0x908   : > { %v8670_v24 = vadd.f32 %v8638_v13, %v8534_v57  ;;  %v8192_v1 = vpop.f32.mrf.mxu1  ;;  %v7865_v57 = vsel %vm2570_vm6, %v7817_v61, %v11309_v23  ;;  %v11319_v5 = vunpack.i.l.bf16 %v11318_v39  ;;  %v11315_v23 = vunpack.i.h.bf16 %v11313_v27 }
 0x909   : > { %v8193_v46 = vadd.f32 %v8192_v1, %v8032_v14  ;;  %v11418_v1 = vld [vmem:[#allocation2 + $0x181] sm:$0xff] }
 0x90a   : > { %8702 = vst.msk [vmem:[%s11622_s2 + $0x20] sm:$0xff] %vm2472_vm4, %v8670_v24  ;;  %8099 = vmatmul.f32.gmra.mxu0 %v17892_v58  ;;  %9036 = vmatmul.msk.f32.gmra.mxu3 %vm2472_vm4, %v11417_v33  ;;  %v11323_v24 = vpop.permute.xlu2 %11322 }
 0x90b   : > { %v8354_v59 = vadd.f32 %v17893_v0, %v8193_v46  ;;  %8239 = vmatmul.f32.gmra.mxu1 %v7864_v47  ;;  %v7770_v47 = vsel %vm2472_vm4, %v6459_v12, %v11314_v15  ;;  %v11324_v46 = vunpack.i.l.bf16 %v11323_v24  ;;  %v17058_v0 = vpop.f32.mrf.mxu2  ;;  %v17897_v12 = vld [vmem:[#allocation89_spill] sm:$0xff] }
 0x90c   : > { %v7818_v26 = vsel %vm2521_vm5, %v7770_v47, %v11319_v5  ;;  %17895 = vst [vmem:[#allocation121_spill] sm:$0xff] %v17058_v0 }
 0x90d   : > { %v8535_v50 = vrot.slane %v8354_v59, 1  ;;  %v17041_v16 = vpop.f32.mrf.mxu3  ;;  %v8038_v59 = vadd.f32 %v16804_v9, %v16909_v60 }
 0x90f   : > { %v8536_v13 = vsel %vm8521_vm13, %v8533_v4, %v8535_v50  ;;  %v17053_v4 = vpop.f32.mrf.mxu0 }
 0x910   : > { %v8671_v31 = vadd.f32 %v8639_v41, %v8536_v13  ;;  %v8195_v14 = vpop.f32.mrf.mxu1  ;;  %v7866_v41 = vsel %vm2570_vm6, %v7818_v26, %v11324_v46  ;;  %v6460_v13 = vld [vmem:[#allocation2 + $0xf8] sm:$0xff] }
 0x911   : > { %v8196_v58 = vadd.f32 %v8195_v14, %v8035_v51  ;;  %v11320_v14 = vunpack.i.h.bf16 %v11318_v39  ;;  %v7771_v60 = vsel %vm2472_vm4, %v6460_v13, %v11315_v23  ;;  %v8640_v51 = vld [vmem:[%s11570_s28 + $0x30] sm:$0xff]  ;;  %v8041_v39 = vadd.f32 %v16804_v9, %v16946_v40 }
 0x912   : > { %8703 = vst.msk [vmem:[%s11622_s2 + $0x28] sm:$0xff] %vm2472_vm4, %v8671_v31  ;;  %8102 = vmatmul.f32.gmra.mxu0 %v17894_v32  ;;  %9037 = vmatmul.msk.f32.gmra.mxu3 %vm2472_vm4, %v11418_v1  ;;  %v11419_v31 = vld [vmem:[#allocation2 + $0x189] sm:$0xff]  ;;  %v11328_v32 = vpop.permute.xlu0 %11327 }
 0x913   : > { %8242 = vmatmul.f32.gmra.mxu1 %v7865_v57  ;;  %v8357_v61 = vadd.f32 %v17896_v20, %v8196_v58  ;;  %v17898_v57 = vld [vmem:[#allocation82_spill] sm:$0xff]  ;;  %v11325_v58 = vunpack.i.h.bf16 %v11323_v24  ;;  %v11329_v26 = vunpack.i.l.bf16 %v11328_v32  ;;  %v17899_v24 = vld [vmem:[#allocation113_spill] sm:$0xff] }
 0x914   : > { %v6461_v20 = vld [vmem:[#allocation2 + $0x100] sm:$0xff] }
 0x915   : > { %v17055_v33 = vpop.f32.mrf.mxu3  ;;  %v8537_v1 = vrot.slane %v8357_v61, 1  ;;  %v8437_v61 = vpop.f32.mrf.mxu2 }
 0x917   : > { %v17068_v27 = vpop.f32.mrf.mxu0 }
 0x918   : > { %v8198_v50 = vpop.f32.mrf.mxu1 }
 0x919   : > { %v8199_v15 = vadd.f32 %v8198_v50, %v8038_v59  ;;  %v11333_v59 = vpop.permute.xlu1 %11332 }
 0x91a   : > { %8105 = vmatmul.f32.gmra.mxu0 %v17897_v12  ;;  %9038 = vmatmul.msk.f32.gmra.mxu3 %vm2472_vm4, %v11419_v31  ;;  %v11334_v12 = vunpack.i.l.bf16 %v11333_v59  ;;  %v11338_v31 = vpop.permute.xlu2 %11337 }
 0x91b   : > { %v8360_v5 = vadd.f32 %v17898_v57, %v8199_v15  ;;  %8245 = vmatmul.f32.gmra.mxu1 %v7866_v41  ;;  %v7819_v41 = vsel %vm2521_vm5, %v7771_v60, %v11320_v14  ;;  %v11420_v57 = vld [vmem:[#allocation2 + $0x191] sm:$0xff]  ;;  %v7772_v14 = vsel %vm2472_vm4, %v6461_v20, %v11329_v26 }
 0x91c   : > { %v7867_v40 = vsel %vm2570_vm6, %v7819_v41, %v11325_v58  ;;  %v11330_v41 = vunpack.i.h.bf16 %v11328_v32 }
 0x91d   : > { %v8538_v47 = vrot.slane %v8360_v5, 1  ;;  %v17071_v46 = vpop.f32.mrf.mxu3  ;;  %v17900_v5 = vld [vmem:[#allocation117_spill] sm:$0xff] }
 0x91e   : > { %v7773_v32 = vsel %vm2472_vm4, %v16636_v25, %v11330_v41  ;;  %v17902_v25 = vld [vmem:[#allocation95_spill] sm:$0xff] }
 0x91f   : > { %v8539_v50 = vsel %vm8521_vm13, %v8537_v1, %v8538_v47  ;;  %v11339_v1 = vunpack.i.l.bf16 %v11338_v31 }
 0x920   : > { %v8672_v23 = vadd.f32 %v8640_v51, %v8539_v50  ;;  %v8201_v15 = vpop.f32.mrf.mxu1 }
 0x921   : > { %v8202_v13 = vadd.f32 %v8201_v15, %v8041_v39  ;;  %v8641_v39 = vld [vmem:[%s11570_s28 + $0x38] sm:$0xff]  ;;  %v7820_v15 = vsel %vm2521_vm5, %v7772_v14, %v11334_v12  ;;  %v8440_v12 = vpop.f32.mrf.mxu2  ;;  %v11335_v14 = vunpack.i.h.bf16 %v11333_v59  ;;  %v6535_v59 = vld [vmem:[#allocation2 + $0x1a1] sm:$0xff] }
 0x922   : > { %8704 = vst.msk [vmem:[%s11622_s2 + $0x30] sm:$0xff] %vm2472_vm4, %v8672_v23  ;;  %8108 = vmatmul.f32.gmra.mxu0 %v17899_v24  ;;  %9039 = vmatmul.msk.f32.gmra.mxu3 %vm2472_vm4, %v11420_v57  ;;  %v17086_v23 = vpop.f32.mrf.mxu0  ;;  %v8116_v57 = vadd.f32 %v16804_v9, %v16792_v44  ;;  %v7868_v26 = vsel %vm2570_vm6, %v7820_v15, %v11339_v1  ;;  %v11343_v1 = vpop.permute.xlu0 %11342 }
 0x923   : > { %v8363_v60 = vadd.f32 %v17900_v5, %v8202_v13  ;;  %8248 = vmatmul.f32.gmra.mxu1 %v7867_v40  ;;  %v17901_v13 = vld [vmem:[#allocation114_spill] sm:$0xff]  ;;  %v8119_v44 = vadd.f32 %v16804_v9, %v16829_v53  ;;  %v11344_v15 = vunpack.i.l.bf16 %v11343_v1 }
 0x924   : > { %v11421_v40 = vld [vmem:[#allocation2 + $0x199] sm:$0xff] }
 0x925   : > { %v8540_v51 = vrot.slane %v8363_v60, 1  ;;  %v8276_v50 = vpop.f32.mrf.mxu3 }
 0x926   : > { %v8277_v20 = vadd.f32 %v8276_v50, %v8116_v57  ;;  %v7821_v57 = vsel %vm2521_vm5, %v7773_v32, %v11335_v14  ;;  %v8122_v14 = vadd.f32 %v16804_v9, %v16860_v7 }
 0x927   : > { %v8541_v24 = vsel %vm8521_vm13, %v8538_v47, %v8540_v51  ;;  %v8044_v47 = vadd.f32 %v16804_v9, %v16981_v43  ;;  %v11340_v51 = vunpack.i.h.bf16 %v11338_v31  ;;  %v8047_v43 = vadd.f32 %v16804_v9, %v17007_v6 }
 0x928   : > { %v8673_v58 = vadd.f32 %v8641_v39, %v8541_v24  ;;  %v8204_v0 = vpop.f32.mrf.mxu1  ;;  %v8438_v39 = vadd.f32 %v8437_v61, %v8277_v20  ;;  %v11348_v24 = vpop.permute.xlu1 %11347  ;;  %v8658_v20 = vld [vmem:[%s11570_s28 + $0xc0] sm:$0xff]  ;;  %v7774_v6 = vsel %vm2472_vm4, %v16638_v17, %v11344_v15  ;;  %v8050_v15 = vadd.f32 %v16804_v9, %v17029_v45 }
 0x929   : > { %v8205_v5 = vadd.f32 %v8204_v0, %v8044_v47  ;;  %v11349_v31 = vunpack.i.l.bf16 %v11348_v24  ;;  %v8443_v32 = vpop.f32.mrf.mxu2 }
 0x92a   : > { %8705 = vst.msk [vmem:[%s11622_s2 + $0x38] sm:$0xff] %vm2472_vm4, %v8673_v58  ;;  %8111 = vmatmul.f32.gmra.mxu0 %v17901_v13  ;;  %9040 = vmatmul.msk.f32.gmra.mxu3 %vm2472_vm4, %v11421_v40  ;;  %v8582_v13 = vrot.slane %v8438_v39, 1  ;;  %v7869_v40 = vsel %vm2570_vm6, %v7821_v57, %v11340_v51  ;;  %v7517_v51 = vpop.permute.xlu2 %7516  ;;  %v6536_v57 = vld [vmem:[#allocation2 + $0x1a9] sm:$0xff] }
 0x92b   : > { %8251 = vmatmul.f32.gmra.mxu1 %v7868_v26  ;;  %v17105_v26 = vpop.f32.mrf.mxu0  ;;  %v8366_v0 = vadd.f32 %v17902_v25, %v8205_v5 }
 0x92d   : > { %v8279_v60 = vpop.f32.mrf.mxu3  ;;  %v8542_v5 = vrot.slane %v8366_v0, 1 }
 0x92e   : > { %v8280_v50 = vadd.f32 %v8279_v60, %v8119_v44 }
 0x930   : > { %v8441_v58 = vadd.f32 %v8440_v12, %v8280_v50  ;;  %v8207_v53 = vpop.f32.mrf.mxu1  ;;  %v17903_v12 = vld [vmem:[#allocation91_spill] sm:$0xff]  ;;  %v8642_v50 = vld [vmem:[%s11570_s28 + $0x40] sm:$0xff] }
 0x931   : > { %v8208_v41 = vadd.f32 %v8207_v53, %v8047_v43  ;;  %v11345_v53 = vunpack.i.h.bf16 %v11343_v1  ;;  %v8125_v1 = vadd.f32 %v16804_v9, %v16895_v11 }
 0x932   : > { %v8583_v61 = vrot.slane %v8441_v58, 1  ;;  %9041 = vmatmul.msk.f32.gmra.mxu3 %vm2472_vm4, %v6535_v59  ;;  %v7822_v59 = vsel %vm2521_vm5, %v7774_v6, %v11349_v31  ;;  %v17904_v6 = vld [vmem:[#allocation90_spill] sm:$0xff] }
 0x933   : > { %v8369_v47 = vadd.f32 %v17903_v12, %v8208_v41  ;;  %8254 = vmatmul.f32.gmra.mxu1 %v7869_v40  ;;  %v7870_v41 = vsel %vm2570_vm6, %v7822_v59, %v7517_v51  ;;  %v17129_v45 = vpop.f32.mrf.mxu0  ;;  %v11350_v40 = vunpack.i.h.bf16 %v11348_v24 }
 0x934   : > { %v8584_v44 = vsel %vm8521_vm13, %v8582_v13, %v8583_v61 }
 0x935   : > { %v8690_v60 = vadd.f32 %v8658_v20, %v8584_v44  ;;  %v8543_v39 = vrot.slane %v8369_v47, 1  ;;  %v8282_v43 = vpop.f32.mrf.mxu3  ;;  %v8659_v20 = vld [vmem:[%s11570_s28 + $0xc8] sm:$0xff]  ;;  %v7775_v44 = vsel %vm2472_vm4, %v16701_v63, %v11345_v53 }
 0x936   : > { %v8283_v17 = vadd.f32 %v8282_v43, %v8122_v14  ;;  %v7519_v14 = vpop.permute.xlu0 %7518  ;;  %v11353_v43 = vpop.permute.xlu1 %11352  ;;  %v7823_v11 = vsel %vm2521_vm5, %v7775_v44, %v11350_v40  ;;  %v8131_v44 = vadd.f32 %v16804_v9, %v16953_v36 }
 0x937   : > { %8722 = vst.msk [vmem:[%s11622_s2 + $0xc0] sm:$0xff] %vm2472_vm4, %v8690_v60  ;;  %v8544_v7 = vsel %vm8521_vm13, %v8542_v5, %v8543_v39  ;;  %v8643_v60 = vld [vmem:[%s11570_s28 + $0x48] sm:$0xff]  ;;  %v11354_v24 = vunpack.i.l.bf16 %v11353_v43  ;;  %v7871_v63 = vsel %vm2570_vm6, %v7823_v11, %v7519_v14 }
 0x938   : > { %v8674_v58 = vadd.f32 %v8642_v50, %v8544_v7  ;;  %v8444_v25 = vadd.f32 %v8443_v32, %v8283_v17  ;;  %v8210_v0 = vpop.f32.mrf.mxu1  ;;  %v7329_v7 = vpop.permute.xlu2 %7328 }
 0x939   : > { %v8211_v13 = vadd.f32 %v8210_v0, %v8050_v15 }
 0x93a   : > { %8706 = vst.msk [vmem:[%s11622_s2 + $0x40] sm:$0xff] %vm2472_vm4, %v8674_v58  ;;  %v8585_v31 = vrot.slane %v8444_v25, 1  ;;  %9042 = vmatmul.msk.f32.gmra.mxu3 %vm2472_vm4, %v6536_v57  ;;  %v7776_v57 = vsel %vm2472_vm4, %v16703_v21, %v11354_v24  ;;  %v8053_v58 = vadd.f32 %v16804_v9, %v17053_v4  ;;  %v8056_v21 = vadd.f32 %v16804_v9, %v17068_v27 }
 0x93b   : > { %v8372_v12 = vadd.f32 %v17904_v6, %v8211_v13  ;;  %8257 = vmatmul.f32.gmra.mxu1 %v7870_v41  ;;  %v17154_v25 = vpop.f32.mrf.mxu0  ;;  %v7824_v41 = vsel %vm2521_vm5, %v7776_v57, %v7329_v7 }
 0x93c   : > { %v8586_v47 = vsel %vm8521_vm13, %v8583_v61, %v8585_v31  ;;  %v6537_v61 = vld [vmem:[#allocation2 + $0x1b1] sm:$0xff] }
 0x93d   : > { %v8691_v32 = vadd.f32 %v8659_v20, %v8586_v47  ;;  %v8545_v5 = vrot.slane %v8372_v12, 1  ;;  %v8285_v50 = vpop.f32.mrf.mxu3  ;;  %v11355_v20 = vunpack.i.h.bf16 %v11353_v43  ;;  %v17905_v12 = vld [vmem:[#allocation103_spill] sm:$0xff] }
 0x93e   : > { %v17138_v51 = vadd.f32 %v8285_v50, %v8125_v1  ;;  %v7521_v53 = vpop.permute.xlu0 %7520  ;;  %v7331_v40 = vpop.permute.xlu1 %7330 }
 0x93f   : > { %8723 = vst.msk [vmem:[%s11622_s2 + $0xc8] sm:$0xff] %vm2472_vm4, %v8691_v32  ;;  %v8546_v59 = vsel %vm8521_vm13, %v8543_v39, %v8545_v5  ;;  %v8128_v39 = vadd.f32 %v16804_v9, %v16926_v18  ;;  %v7872_v6 = vsel %vm2570_vm6, %v7824_v41, %v7521_v53  ;;  %v7777_v32 = vsel %vm2472_vm4, %v16773_v2, %v11355_v20 }
 0x940   : > { %v8675_v17 = vadd.f32 %v8643_v60, %v8546_v59  ;;  %v8213_v15 = vpop.f32.mrf.mxu1  ;;  %v7523_v14 = vpop.permute.xlu2 %7522  ;;  %v8644_v60 = vld [vmem:[%s11570_s28 + $0x50] sm:$0xff]  ;;  %v8059_v59 = vadd.f32 %v16804_v9, %v17086_v23  ;;  %v7825_v11 = vsel %vm2521_vm5, %v7777_v32, %v7331_v40 }
 0x941   : > { %v8214_v0 = vadd.f32 %v8213_v15, %v8053_v58 }
 0x942   : > { %8707 = vst.msk [vmem:[%s11622_s2 + $0x48] sm:$0xff] %vm2472_vm4, %v8675_v17  ;;  %9043 = vmatmul.msk.f32.gmra.mxu3 %vm2472_vm4, %v6537_v61  ;;  %v6467_v61 = vld [vmem:[#allocation2 + $0x130] sm:$0xff] }
 0x943   : > { %8260 = vmatmul.f32.gmra.mxu1 %v7871_v63  ;;  %v8375_v18 = vadd.f32 %v17905_v12, %v8214_v0  ;;  %v7873_v63 = vsel %vm2570_vm6, %v7825_v11, %v7523_v14  ;;  %v8645_v0 = vld [vmem:[%s11570_s28 + $0x58] sm:$0xff] }
 0x945   : > { %v8288_v13 = vpop.f32.mrf.mxu3  ;;  %v8547_v27 = vrot.slane %v8375_v18, 1 }
 0x946   : > { %v17157_v31 = vadd.f32 %v8288_v13, %v8128_v39  ;;  %v7186_v43 = vpop.permute.xlu0 %7185  ;;  %v7333_v15 = vpop.permute.xlu1 %7332  ;;  %v8134_v39 = vadd.f32 %v16804_v9, %v16984_v22 }
 0x947   : > { %v7778_v57 = vsel %vm2472_vm4, %v6467_v61, %v7186_v43 }
 0x948   : > { %v8216_v4 = vpop.f32.mrf.mxu1  ;;  %v7525_v58 = vpop.permute.xlu2 %7524  ;;  %v7826_v13 = vsel %vm2521_vm5, %v7778_v57, %v7333_v15  ;;  %v8068_v15 = vadd.f32 %v16804_v9, %v17154_v25  ;;  %v8143_v57 = vadd.f32 %v16804_v9, %v17041_v16 }
 0x949   : > { %v8217_v1 = vadd.f32 %v8216_v4, %v8056_v21  ;;  %v7874_v12 = vsel %vm2570_vm6, %v7826_v13, %v7525_v58  ;;  %v8647_v58 = vld [vmem:[%s11570_s28 + $0x68] sm:$0xff] }
 0x94b   : > { %v8378_v47 = vadd.f32 %v16489_v29, %v8217_v1  ;;  %8263 = vmatmul.f32.gmra.mxu1 %v7872_v6  ;;  %v17173_v29 = vpop.f32.mrf.mxu0  ;;  %v8062_v1 = vadd.f32 %v16804_v9, %v17105_v26 }
 0x94d   : > { %v8548_v5 = vrot.slane %v8378_v47, 1  ;;  %v8291_v50 = vpop.f32.mrf.mxu3  ;;  %v8137_v47 = vadd.f32 %v16804_v9, %v17001_v55 }
 0x94e   : > { %v17169_v24 = vadd.f32 %v8291_v50, %v8131_v44  ;;  %v7188_v40 = vpop.permute.xlu0 %7187  ;;  %v7335_v18 = vpop.permute.xlu1 %7334 }
 0x94f   : > { %v8549_v36 = vsel %vm8521_vm13, %v8547_v27, %v8548_v5  ;;  %v7779_v22 = vsel %vm2472_vm4, %v16745_v54, %v7188_v40 }
 0x950   : > { %v8676_v2 = vadd.f32 %v8644_v60, %v8549_v36  ;;  %v8219_v17 = vpop.f32.mrf.mxu1  ;;  %v7827_v32 = vsel %vm2521_vm5, %v7779_v22, %v7335_v18  ;;  %v7527_v27 = vpop.permute.xlu2 %7526  ;;  %v8065_v60 = vadd.f32 %v16804_v9, %v17129_v45 }
 0x951   : > { %v8220_v7 = vadd.f32 %v8219_v17, %v8059_v59  ;;  %v7875_v50 = vsel %vm2570_vm6, %v7827_v32, %v7527_v27  ;;  %v8140_v59 = vadd.f32 %v16804_v9, %v17020_v52 }
 0x952   : > { %8708 = vst.msk [vmem:[%s11622_s2 + $0x50] sm:$0xff] %vm2472_vm4, %v8676_v2  ;;  %v8646_v2 = vld [vmem:[%s11570_s28 + $0x60] sm:$0xff] }
 0x953   : > { %v8381_v23 = vadd.f32 %v16510_v34, %v8220_v7  ;;  %8266 = vmatmul.f32.gmra.mxu1 %v7873_v63  ;;  %v8073_v34 = vpop.f32.mrf.mxu0 }
 0x955   : > { %v8550_v53 = vrot.slane %v8381_v23, 1  ;;  %v8294_v41 = vpop.f32.mrf.mxu3 }
 0x956   : > { %v17186_v21 = vadd.f32 %v8294_v41, %v8134_v39 }
 0x957   : > { %v8551_v20 = vsel %vm8521_vm13, %v8548_v5, %v8550_v53 }
 0x958   : > { %v8677_v4 = vadd.f32 %v8645_v0, %v8551_v20  ;;  %v8222_v6 = vpop.f32.mrf.mxu1  ;;  %v8071_v20 = vadd.f32 %v16804_v9, %v17173_v29  ;;  %v8149_v29 = vadd.f32 %v16804_v9, %v17071_v46 }
 0x959   : > { %v8223_v14 = vadd.f32 %v8222_v6, %v8062_v1  ;;  %v8074_v6 = vadd.f32 %v16804_v9, %v8073_v34 }
 0x95a   : > { %8709 = vst.msk [vmem:[%s11622_s2 + $0x58] sm:$0xff] %vm2472_vm4, %v8677_v4 }
 0x95b   : > { %8269 = vmatmul.f32.gmra.mxu1 %v7874_v12  ;;  %v8384_v26 = vadd.f32 %v16530_v38, %v8223_v14  ;;  %v8076_v11 = vpop.f32.mrf.mxu0 }
 0x95c   : > { %v8077_v34 = vadd.f32 %v16804_v9, %v8076_v11 }
 0x95d   : > { %v8297_v44 = vpop.f32.mrf.mxu3  ;;  %v8552_v36 = vrot.slane %v8384_v26, 1 }
 0x95e   : > { %v17199_v5 = vadd.f32 %v8297_v44, %v8137_v47  ;;  %v8648_v44 = vld [vmem:[%s11570_s28 + $0x70] sm:$0xff] }
 0x960   : > { %v8225_v54 = vpop.f32.mrf.mxu1 }
 0x961   : > { %v8226_v43 = vadd.f32 %v8225_v54, %v8065_v60 }
 0x963   : > { %v8387_v55 = vadd.f32 %v16550_v3, %v8226_v43  ;;  %8272 = vmatmul.f32.gmra.mxu1 %v7875_v50  ;;  %v8079_v53 = vpop.f32.mrf.mxu0  ;;  %v8649_v43 = vld [vmem:[%s11570_s28 + $0x78] sm:$0xff] }
 0x965   : > { %v8553_v61 = vrot.slane %v8387_v55, 1  ;;  %v8300_v17 = vpop.f32.mrf.mxu3 }
 0x966   : > { %v17209_v45 = vadd.f32 %v8300_v17, %v8140_v59 }
 0x967   : > { %v8554_v38 = vsel %vm8521_vm13, %v8552_v36, %v8553_v61 }
 0x968   : > { %v8678_v7 = vadd.f32 %v8646_v2, %v8554_v38  ;;  %v8228_v3 = vpop.f32.mrf.mxu1 }
 0x969   : > { %v8229_v63 = vadd.f32 %v8228_v3, %v8068_v15 }
 0x96a   : > { %8710 = vst.msk [vmem:[%s11622_s2 + $0x60] sm:$0xff] %vm2472_vm4, %v8678_v7 }
 0x96b   : > { %v8390_v52 = vadd.f32 %v16575_v42, %v8229_v63  ;;  %v8146_v42 = vadd.f32 %v16804_v9, %v17055_v33  ;;  %v8082_v12 = vpop.f32.mrf.mxu0  ;;  %v17251_v9 = vld [vmem:[%s17367_s10] ss:$0 sm:$0xff] }
 0x96c   : > { %v8080_v11 = vadd.f32 %v17251_v9, %v8079_v53  ;;  %v8083_v7 = vadd.f32 %v17251_v9, %v8082_v12  ;;  %v8661_v12 = vld [vmem:[%s11570_s28 + $0xd8] sm:$0xff] }
 0x96d   : > { %v8555_v23 = vrot.slane %v8390_v52, 1  ;;  %v8303_v39 = vpop.f32.mrf.mxu3  ;;  %v8660_v52 = vld [vmem:[%s11570_s28 + $0xd0] sm:$0xff] }
 0x96e   : > { %v17220_v0 = vadd.f32 %v8303_v39, %v8143_v57 }
 0x96f   : > { %v8556_v25 = vsel %vm8521_vm13, %v8553_v61, %v8555_v23 }
 0x970   : > { %v8679_v41 = vadd.f32 %v8647_v58, %v8556_v25  ;;  %v8231_v13 = vpop.f32.mrf.mxu1 }
 0x971   : > { %v8232_v16 = vadd.f32 %v8231_v13, %v8071_v20 }
 0x972   : > { %8711 = vst.msk [vmem:[%s11622_s2 + $0x68] sm:$0xff] %vm2472_vm4, %v8679_v41  ;;  %v8650_v41 = vld [vmem:[%s11570_s28 + $0x80] sm:$0xff] }
 0x973   : > { %v8393_v18 = vadd.f32 %v16596_v56, %v8232_v16  ;;  %v8085_v26 = vpop.f32.mrf.mxu0 }
 0x975   : > { %v8306_v40 = vpop.f32.mrf.mxu3  ;;  %v8557_v14 = vrot.slane %v8393_v18, 1 }
 0x976   : > { %v17229_v4 = vadd.f32 %v8306_v40, %v8146_v42 }
 0x978   : > { %v8234_v22 = vpop.f32.mrf.mxu1 }
 0x979   : > { %v8235_v1 = vadd.f32 %v8234_v22, %v8074_v6 }
 0x97b   : > { %v8396_v47 = vadd.f32 %v16627_v62, %v8235_v1  ;;  %v8088_v2 = vpop.f32.mrf.mxu0 }
 0x97d   : > { %v8558_v33 = vrot.slane %v8396_v47, 1  ;;  %v8309_v32 = vpop.f32.mrf.mxu3 }
 0x97e   : > { %v17237_v27 = vadd.f32 %v8309_v32, %v8149_v29  ;;  %v8651_v29 = vld [vmem:[%s11570_s28 + $0x88] sm:$0xff] }
 0x97f   : > { %v8559_v60 = vsel %vm8521_vm13, %v8557_v14, %v8558_v33 }
 0x980   : > { %v8680_v54 = vadd.f32 %v8648_v44, %v8559_v60  ;;  %v8237_v56 = vpop.f32.mrf.mxu1  ;;  %v8089_v60 = vadd.f32 %v17251_v9, %v8088_v2 }
 0x981   : > { %v8238_v50 = vadd.f32 %v8237_v56, %v8077_v34 }
 0x982   : > { %8712 = vst.msk [vmem:[%s11622_s2 + $0x70] sm:$0xff] %vm2472_vm4, %v8680_v54 }
 0x983   : > { %v8399_v62 = vadd.f32 %v16664_v49, %v8238_v50  ;;  %v8091_v20 = vpop.f32.mrf.mxu0 }
 0x985   : > { %v8560_v46 = vrot.slane %v8399_v62, 1  ;;  %v8446_v55 = vpop.f32.mrf.mxu3 }
 0x986   : > { %v8447_v49 = vadd.f32 %v8446_v55, %v17138_v51 }
 0x987   : > { %v8561_v59 = vsel %vm8521_vm13, %v8558_v33, %v8560_v46 }
 0x988   : > { %v8681_v36 = vadd.f32 %v8649_v43, %v8561_v59  ;;  %v8240_v61 = vpop.f32.mrf.mxu1  ;;  %v8587_v3 = vrot.slane %v8447_v49, 1  ;;  %v8662_v43 = vld [vmem:[%s11570_s28 + $0xe0] sm:$0xff]  ;;  %v17906_v59 = vld [vmem:[#allocation104_spill] sm:$0xff] }
 0x989   : > { %v8241_v17 = vadd.f32 %v8240_v61, %v8080_v11 }
 0x98a   : > { %8713 = vst.msk [vmem:[%s11622_s2 + $0x78] sm:$0xff] %vm2472_vm4, %v8681_v36 }
 0x98b   : > { %v8402_v23 = vadd.f32 %v16694_v8, %v8241_v17  ;;  %v8086_v8 = vadd.f32 %v17251_v9, %v8085_v26  ;;  %v8094_v44 = vpop.f32.mrf.mxu0  ;;  %v8092_v26 = vadd.f32 %v17251_v9, %v8091_v20 }
 0x98d   : > { %v8449_v15 = vpop.f32.mrf.mxu3  ;;  %v8562_v25 = vrot.slane %v8402_v23, 1  ;;  %v8663_v23 = vld [vmem:[%s11570_s28 + $0xe8] sm:$0xff] }
 0x98e   : > { %v8450_v38 = vadd.f32 %v8449_v15, %v17157_v31  ;;  %v8652_v15 = vld [vmem:[%s11570_s28 + $0x90] sm:$0xff] }
 0x990   : > { %v8588_v63 = vrot.slane %v8450_v38, 1  ;;  %v8243_v57 = vpop.f32.mrf.mxu1 }
 0x991   : > { %v8244_v58 = vadd.f32 %v8243_v57, %v8083_v7 }
 0x992   : > { %v8589_v39 = vsel %vm8521_vm13, %v8587_v3, %v8588_v63  ;;  %v8095_v3 = vadd.f32 %v17251_v9, %v8094_v44  ;;  %v17908_v44 = vld [vmem:[#allocation110_spill] sm:$0xff] }
 0x993   : > { %v8692_v53 = vadd.f32 %v8660_v52, %v8589_v39  ;;  %v8405_v51 = vadd.f32 %v16731_v30, %v8244_v58  ;;  %v8097_v11 = vpop.f32.mrf.mxu0 }
 0x995   : > { %8724 = vst.msk [vmem:[%s11622_s2 + $0xd0] sm:$0xff] %vm2472_vm4, %v8692_v53  ;;  %v8563_v31 = vrot.slane %v8405_v51, 1  ;;  %v8452_v13 = vpop.f32.mrf.mxu3 }
 0x996   : > { %v8453_v42 = vadd.f32 %v8452_v13, %v17169_v24 }
 0x997   : > { %v8564_v16 = vsel %vm8521_vm13, %v8562_v25, %v8563_v31 }
 0x998   : > { %v8682_v40 = vadd.f32 %v8650_v41, %v8564_v16  ;;  %v8590_v6 = vrot.slane %v8453_v42, 1  ;;  %v8246_v30 = vpop.f32.mrf.mxu1 }
 0x999   : > { %v8247_v22 = vadd.f32 %v8246_v30, %v8086_v8  ;;  %v8098_v8 = vadd.f32 %v17251_v9, %v8097_v11 }
 0x99a   : > { %8714 = vst.msk [vmem:[%s11622_s2 + $0x80] sm:$0xff] %vm2472_vm4, %v8682_v40  ;;  %v8591_v18 = vsel %vm8521_vm13, %v8588_v63, %v8590_v6 }
 0x99b   : > { %v8693_v1 = vadd.f32 %v8661_v12, %v8591_v18  ;;  %v8408_v47 = vadd.f32 %v16763_v28, %v8247_v22  ;;  %v8100_v25 = vpop.f32.mrf.mxu0 }
 0x99c   : > { %v8101_v30 = vadd.f32 %v17251_v9, %v8100_v25 }
 0x99d   : > { %8725 = vst.msk [vmem:[%s11622_s2 + $0xd8] sm:$0xff] %vm2472_vm4, %v8693_v1  ;;  %v8565_v24 = vrot.slane %v8408_v47, 1  ;;  %v8455_v14 = vpop.f32.mrf.mxu3  ;;  %v8664_v1 = vld [vmem:[%s11570_s28 + $0xf0] sm:$0xff] }
 0x99e   : > { %v8456_v54 = vadd.f32 %v8455_v14, %v17186_v21 }
 0x99f   : > { %v8566_v33 = vsel %vm8521_vm13, %v8563_v31, %v8565_v24  ;;  %v8653_v31 = vld [vmem:[%s11570_s28 + $0x98] sm:$0xff] }
 0x9a0   : > { %v8683_v32 = vadd.f32 %v8651_v29, %v8566_v33  ;;  %v8249_v34 = vpop.f32.mrf.mxu1  ;;  %v8592_v62 = vrot.slane %v8456_v54, 1  ;;  %v17907_v24 = vld [vmem:[#allocation109_spill] sm:$0xff] }
 0x9a1   : > { %v8250_v56 = vadd.f32 %v8249_v34, %v8089_v60  ;;  %v8654_v60 = vld [vmem:[%s11570_s28 + $0xa0] sm:$0xff] }
 0x9a2   : > { %8715 = vst.msk [vmem:[%s11622_s2 + $0x88] sm:$0xff] %vm2472_vm4, %v8683_v32 }
 0x9a3   : > { %v8411_v36 = vadd.f32 %v17906_v59, %v8250_v56  ;;  %v8103_v6 = vpop.f32.mrf.mxu0 }
 0x9a5   : > { %v8458_v28 = vpop.f32.mrf.mxu3  ;;  %v8567_v17 = vrot.slane %v8411_v36, 1 }
 0x9a6   : > { %v8459_v50 = vadd.f32 %v8458_v28, %v17199_v5  ;;  %v8104_v28 = vadd.f32 %v17251_v9, %v8103_v6 }
 0x9a8   : > { %v8593_v46 = vrot.slane %v8459_v50, 1  ;;  %v8252_v55 = vpop.f32.mrf.mxu1 }
 0x9a9   : > { %v8253_v61 = vadd.f32 %v8252_v55, %v8092_v26 }
 0x9aa   : > { %v8594_v2 = vsel %vm8521_vm13, %v8592_v62, %v8593_v46 }
 0x9ab   : > { %v8694_v21 = vadd.f32 %v8662_v43, %v8594_v2  ;;  %v8414_v49 = vadd.f32 %v16843_v19, %v8253_v61  ;;  %v8106_v26 = vpop.f32.mrf.mxu0  ;;  %v8665_v43 = vld [vmem:[%s11570_s28 + $0xf8] sm:$0xff]  ;;  %v8655_v2 = vld [vmem:[%s11570_s28 + $0xa8] sm:$0xff] }
 0x9ad   : > { %8726 = vst.msk [vmem:[%s11622_s2 + $0xe0] sm:$0xff] %vm2472_vm4, %v8694_v21  ;;  %v8568_v5 = vrot.slane %v8414_v49, 1  ;;  %v8461_v38 = vpop.f32.mrf.mxu3 }
 0x9ae   : > { %v8462_v7 = vadd.f32 %v8461_v38, %v17209_v45 }
 0x9af   : > { %v8569_v63 = vsel %vm8521_vm13, %v8567_v17, %v8568_v5 }
 0x9b0   : > { %v8684_v52 = vadd.f32 %v8652_v15, %v8569_v63  ;;  %v8595_v57 = vrot.slane %v8462_v7, 1  ;;  %v8255_v58 = vpop.f32.mrf.mxu1  ;;  %v8107_v15 = vadd.f32 %v17251_v9, %v8106_v26 }
 0x9b1   : > { %v8256_v19 = vadd.f32 %v8255_v58, %v8095_v3 }
 0x9b2   : > { %8716 = vst.msk [vmem:[%s11622_s2 + $0x90] sm:$0xff] %vm2472_vm4, %v8684_v52  ;;  %v8596_v39 = vsel %vm8521_vm13, %v8593_v46, %v8595_v57 }
 0x9b3   : > { %v8695_v53 = vadd.f32 %v8663_v23, %v8596_v39  ;;  %v8417_v51 = vadd.f32 %v16886_v10, %v8256_v19  ;;  %v8656_v19 = vld [vmem:[%s11570_s28 + $0xb0] sm:$0xff] }
 0x9b5   : > { %8727 = vst.msk [vmem:[%s11622_s2 + $0xe8] sm:$0xff] %vm2472_vm4, %v8695_v53  ;;  %v8570_v45 = vrot.slane %v8417_v51, 1  ;;  %v8464_v41 = vpop.f32.mrf.mxu3 }
 0x9b6   : > { %v8465_v16 = vadd.f32 %v8464_v41, %v17220_v0 }
 0x9b7   : > { %v8571_v13 = vsel %vm8521_vm13, %v8568_v5, %v8570_v45  ;;  %v8109_v5 = vpop.f32.mrf.mxu0 }
 0x9b8   : > { %v8685_v20 = vadd.f32 %v8653_v31, %v8571_v13  ;;  %v8258_v42 = vpop.f32.mrf.mxu1  ;;  %v8597_v22 = vrot.slane %v8465_v16, 1  ;;  %v8110_v7 = vadd.f32 %v17251_v9, %v8109_v5  ;;  %v17909_v31 = vld [vmem:[#allocation121_spill] sm:$0xff] }
 0x9b9   : > { %v8259_v40 = vadd.f32 %v8258_v42, %v8098_v8  ;;  %v8657_v13 = vld [vmem:[%s11570_s28 + $0xb8] sm:$0xff] }
 0x9ba   : > { %8717 = vst.msk [vmem:[%s11622_s2 + $0x98] sm:$0xff] %vm2472_vm4, %v8685_v20 }
 0x9bb   : > { %v8420_v29 = vadd.f32 %v17907_v24, %v8259_v40 }
 0x9bd   : > { %v8467_v10 = vpop.f32.mrf.mxu3  ;;  %v8572_v34 = vrot.slane %v8420_v29, 1 }
 0x9be   : > { %v8468_v12 = vadd.f32 %v8467_v10, %v17229_v4 }
 0x9bf   : > { %v8112_v57 = vpop.f32.mrf.mxu0 }
 0x9c0   : > { %v8598_v18 = vrot.slane %v8468_v12, 1  ;;  %v8261_v47 = vpop.f32.mrf.mxu1  ;;  %v8113_v39 = vadd.f32 %v17251_v9, %v8112_v57 }
 0x9c1   : > { %v8262_v14 = vadd.f32 %v8261_v47, %v8101_v30 }
 0x9c2   : > { %v8599_v33 = vsel %vm8521_vm13, %v8597_v22, %v8598_v18 }
 0x9c3   : > { %v8696_v0 = vadd.f32 %v8664_v1, %v8599_v33  ;;  %v8423_v32 = vadd.f32 %v17908_v44, %v8262_v14 }
 0x9c5   : > { %8728 = vst.msk [vmem:[%s11622_s2 + $0xf0] sm:$0xff] %vm2472_vm4, %v8696_v0  ;;  %v8573_v4 = vrot.slane %v8423_v32, 1  ;;  %v8470_v54 = vpop.f32.mrf.mxu3 }
 0x9c6   : > { %v8471_v56 = vadd.f32 %v8470_v54, %v17237_v27 }
 0x9c7   : > { %v8574_v50 = vsel %vm8521_vm13, %v8572_v34, %v8573_v4 }
 0x9c8   : > { %v8686_v62 = vadd.f32 %v8654_v60, %v8574_v50  ;;  %v8600_v46 = vrot.slane %v8471_v56, 1  ;;  %v8264_v55 = vpop.f32.mrf.mxu1 }
 0x9c9   : > { %v8265_v59 = vadd.f32 %v8264_v55, %v8104_v28 }
 0x9ca   : > { %8718 = vst.msk [vmem:[%s11622_s2 + $0xa0] sm:$0xff] %vm2472_vm4, %v8686_v62  ;;  %v8601_v36 = vsel %vm8521_vm13, %v8598_v18, %v8600_v46 }
 0x9cb   : > { %v8697_v61 = vadd.f32 %v8665_v43, %v8601_v36  ;;  %v8426_v11 = vadd.f32 %v16991_v48, %v8265_v59 }
 0x9cd   : > { %8729 = vst.msk [vmem:[%s11622_s2 + $0xf8] sm:$0xff] %vm2472_vm4, %v8697_v61  ;;  %v8575_v27 = vrot.slane %v8426_v11, 1 }
 0x9cf   : > { %v8576_v21 = vsel %vm8521_vm13, %v8573_v4, %v8575_v27 }
 0x9d0   : > { %v8687_v49 = vadd.f32 %v8655_v2, %v8576_v21  ;;  %v8267_v17 = vpop.f32.mrf.mxu1 }
 0x9d1   : > { %v8268_v38 = vadd.f32 %v8267_v17, %v8107_v15 }
 0x9d2   : > { %8719 = vst.msk [vmem:[%s11622_s2 + $0xa8] sm:$0xff] %vm2472_vm4, %v8687_v49 }
 0x9d3   : > { %v8429_v48 = vadd.f32 %v17015_v35, %v8268_v38 }
 0x9d5   : > { %v8577_v23 = vrot.slane %v8429_v48, 1 }
 0x9d8   : > { %v8270_v3 = vpop.f32.mrf.mxu1 }
 0x9d9   : > { %v8271_v63 = vadd.f32 %v8270_v3, %v8110_v7 }
 0x9db   : > { %v8432_v52 = vadd.f32 %v17038_v37, %v8271_v63 }
 0x9dd   : > { %v8578_v58 = vrot.slane %v8432_v52, 1 }
 0x9df   : > { %v8579_v53 = vsel %vm8521_vm13, %v8577_v23, %v8578_v58 }
 0x9e0   : > { %v8688_v51 = vadd.f32 %v8656_v19, %v8579_v53  ;;  %v8273_v25 = vpop.f32.mrf.mxu1 }
 0x9e1   : > { %v8274_v45 = vadd.f32 %v8273_v25, %v8113_v39 }
 0x9e2   : > { %8720 = vst.msk [vmem:[%s11622_s2 + $0xb0] sm:$0xff] %vm2472_vm4, %v8688_v51 }
 0x9e3   : > { %v8435_v41 = vadd.f32 %v17909_v31, %v8274_v45 }
 0x9e5   : > { %v8580_v35 = vrot.slane %v8435_v41, 1 }
 0x9e7   : > { %v8581_v37 = vsel %vm8521_vm13, %v8578_v58, %v8580_v35 }
 0x9e8   : > { %v8689_v20 = vadd.f32 %v8657_v13, %v8581_v37 }
 0x9ea   : > { %8721 = vst.msk [vmem:[%s11622_s2 + $0xb8] sm:$0xff] %vm2472_vm4, %v8689_v20 }
 0x9eb PF: > { %s17910_s18 = sld [smem:[#allocation7_spill]] }
 0x9ec   : > { %s17911_s17 = sld [smem:[#allocation5_spill]] }
 0x9ed   : > { %s17913_s19 = sld [smem:[#allocation8_spill]] }
 0x9ee   : > { %s17914_s20 = sld [smem:[#allocation9_spill]] }
 0x9f1   : > { %s21_s21 = sadd.s32 1, %s17910_s18   ;;  %s17912_s18 = sld [smem:[#allocation6_spill]] }
 0x9f2   : > { %p18_p9 = scmp.ge.s32.totalorder %s21_s21, 6  }
 0x9f4   :  { %20 = sbr.rel (!%p18_p9) target bundleno = 6 (0x6), region = 133 }

</bundles_post_ra>
